<compile_context>
chip_gen: v7x
topology: tpu7x:2x2x1
jax: 0.10.0
libtpu: 0.0.40
codegen_flags: <defaults>
</compile_context>

<pallas_src>
import functools

import jax
import jax.numpy as jnp
from jax.experimental import pallas as pl
from jax.experimental.pallas import tpu as pltpu


def _dense_block_kernel(x_ref, *rest, h, w, kh, kw, apply_relu):
    """Fused DenseBlock for one batch element (channel-major, lane-dense).

    x_ref : (1, cin, h*w)   channel-major input tile (VMEM), f32
    rest  : w1,b1, w2,b2, w3,b3, o_ref
            w_l : (kh*kw, cout, c_l)  bf16   (tap-major, output-channel, input-channel)
            b_l : (cout, 1)           f32
            o   : (1, c_total, h*w)   channel-major output tile
    """
    o_ref = rest[-1]
    wb_refs = rest[:-1]
    n_layers = len(wb_refs) // 2
    ph, pw = kh // 2, kw // 2
    hw = h * w
    f32 = jnp.float32
    bf16 = jnp.bfloat16

    def transpose2d(a):
        # Exact 2-D transpose routed through the MXU (A^T = A^T @ I).  Avoids a
        # standalone XLU transpose lowering for non-(8,128)-aligned shapes; exact
        # in f32 (multiplies by 1.0, adds 0.0).
        eye = jnp.eye(a.shape[0], dtype=a.dtype)
        return jax.lax.dot_general(a, eye, (((0,), (0,)), ((), ())),
                                   preferred_element_type=a.dtype)

    def reflect_pad(t):
        # t: (h, w, c) -> (h + 2*ph, w + 2*pw, c), torch ReflectionPad2d semantics.
        if ph:
            top = [t[i:i + 1] for i in range(ph, 0, -1)]
            bot = [t[h - 2 - j:h - 1 - j] for j in range(ph)]
            t = jnp.concatenate(top + [t] + bot, axis=0)
        if pw:
            left = [t[:, i:i + 1] for i in range(pw, 0, -1)]
            right = [t[:, w - 2 - j:w - 1 - j] for j in range(pw)]
            t = jnp.concatenate(left + [t] + right, axis=1)
        return t

    x_cm = x_ref[0]                                   # (cin, hw) channel-major f32
    cin = x_cm.shape[0]
    x_pm = transpose2d(x_cm)                          # (hw, cin) pixel-major

    # Reflection-padded pieces stay resident across layers (pad-reuse); each
    # layer pads only the 16 channels it just produced.
    pieces = [reflect_pad(x_pm.reshape(h, w, cin))]   # [(h+2ph, w+2pw, c_piece)]
    offs = [0]                                        # channel offset of each piece
    outs_cm = [x_cm]                                  # channel-major store pieces

    for l in range(n_layers):
        w_ref, b_ref = wb_refs[2 * l], wb_refs[2 * l + 1]
        cout = b_ref.shape[0]
        acc = jnp.zeros((cout, hw), f32)              # lane-dense accumulator
        for t in range(kh * kw):
            dy, dx = t // kw, t % kw
            for xp, off in zip(pieces, offs):
                pc = xp.shape[-1]
                # (h, w, pc) -> (hw, pc): leading/sublane merge only (lane dim kept).
                slab = xp[dy:dy + h, dx:dx + w, :].reshape(hw, pc)
                wt = w_ref[t, :, off:off + pc]        # (cout, pc) bf16
                # acc(cout, hw) += wt . slab^T   (q.k^T pattern, bf16 ops, f32 acc)
                acc = acc + jax.lax.dot_general(
                    wt, slab.astype(bf16),
                    (((1,), (1,)), ((), ())),
                    preferred_element_type=f32)
        out_cm = acc + b_ref[...]                     # (cout, hw) + (cout, 1)
        if apply_relu:
            out_cm = jnp.maximum(out_cm, 0.0)
        outs_cm.append(out_cm)
        if l + 1 < n_layers:
            offs.append(offs[-1] + pieces[-1].shape[-1])
            out_pm = transpose2d(out_cm)              # (hw, cout), exact
            pieces.append(reflect_pad(out_pm.reshape(h, w, cout)))

    # torch.cat([x, out1, out2, out3], dim=1): channel concat, then one
    # lane-dense (c_total, 256) store.
    o_ref[0] = jnp.concatenate(outs_cm, axis=0).astype(o_ref.dtype)


def dense_block_pallas(x_nchw, params, *, stride, padding):
    """DenseBlock forward. x_nchw: (N, Cin, H, W); params: [(w_hwio, b)] * 3."""
    # ConLayer applies ReLU iff `is_last is False`; `is_last` receives `padding`.
    assert isinstance(padding, bool), (
        "`padding` is forwarded to ConLayer.is_last and compared with `is False`; "
        "pass a real bool to preserve the PyTorch semantics")
    apply_relu = padding is False
    assert stride == 1, "DenseBlock channel concat requires stride == 1"

    n, cin, h, w = x_nchw.shape
    hw = h * w
    kh, kw = params[0][0].shape[0], params[0][0].shape[1]
    cout = params[0][1].shape[0]
    assert kh // 2 < h and kw // 2 < w, "reflection pad needs pad < spatial dim"
    c_total = cin + len(params) * cout

    # Channel-major (N, Cin, H*W): a free reshape of NCHW (no HBM transpose).
    x_cm = x_nchw.reshape(n, cin, hw)

    # Weights: HWIO -> (kh*kw, cout, cin_l) bf16 (tap-major, cout rows, cin lanes);
    # biases -> (cout, 1) f32 so they broadcast over the lane (pixel) axis.
    wb = []
    for wgt, b in params:
        k_h, k_w, ci, co = wgt.shape
        w_t = jnp.transpose(wgt, (0, 1, 3, 2)).reshape(k_h * k_w, co, ci)
        wb.append((w_t.astype(jnp.bfloat16), b.reshape(co, 1).astype(jnp.float32)))

    kern = functools.partial(_dense_block_kernel,
                             h=h, w=w, kh=kh, kw=kw, apply_relu=apply_relu)

    in_specs = [pl.BlockSpec((1, cin, hw), lambda i: (i, 0, 0))]
    args = [x_cm]
    for w_t, b_t in wb:
        in_specs.append(pl.BlockSpec(w_t.shape, lambda i: (0, 0, 0)))
        in_specs.append(pl.BlockSpec(b_t.shape, lambda i: (0, 0)))
        args.append(w_t)
        args.append(b_t)

    flops = int(sum(2 * n * hw * (kh * kw * wt.shape[2]) * wt.shape[1]
                    for wt, _ in wb))
    bytes_accessed = int(x_cm.size * 4
                         + sum(wt.size * 2 + bt.size * 4 for wt, bt in wb)
                         + n * c_total * hw * 4)

    out = pl.pallas_call(
        kern,
        out_shape=jax.ShapeDtypeStruct((n, c_total, hw), x_nchw.dtype),
        grid=(n,),
        in_specs=in_specs,
        out_specs=pl.BlockSpec((1, c_total, hw), lambda i: (i, 0, 0)),
        compiler_params=pltpu.CompilerParams(dimension_semantics=("parallel",)),
        cost_estimate=pl.CostEstimate(flops=flops, transcendentals=0,
                                      bytes_accessed=bytes_accessed),
    )(*args)

    # (N, C_total, H*W) -> (N, C_total, H, W): free reshape (already channel-major).
    return out.reshape(n, c_total, h, w)


def init_dense_block_params(key, in_channels, kernel_size, out_channels_def=16):
    """Deterministic Conv2d-style (kaiming-uniform-ish) init for the 3 layers."""
    params = []
    cin = in_channels
    for _ in range(3):
        key, wk, bk = jax.random.split(key, 3)
        fan_in = cin * kernel_size * kernel_size
        bound = 1.0 / (fan_in ** 0.5)
        w = jax.random.uniform(wk, (kernel_size, kernel_size, cin, out_channels_def),
                               jnp.float32, -bound, bound)
        b = jax.random.uniform(bk, (out_channels_def,), jnp.float32, -bound, bound)
        params.append((w, b))
        cin = cin + out_channels_def
    return params


def dense_block_reference(x_nchw, params, *, stride, padding):
    """Pure-JAX reference (lax conv, f32) for correctness checking."""
    apply_relu = padding is False
    x = jnp.transpose(x_nchw, (0, 2, 3, 1))
    for w, b in params:
        p = w.shape[0] // 2
        xp = jnp.pad(x, ((0, 0), (p, p), (p, p), (0, 0)), mode="reflect")
        out = jax.lax.conv_general_dilated(
            xp, w, window_strides=(stride, stride), padding="VALID",
            dimension_numbers=("NHWC", "HWIO", "NHWC"))
        out = out + b
        if apply_relu:
            out = jnp.maximum(out, 0.0)
        x = jnp.concatenate([x, out], axis=-1)
    return jnp.transpose(x, (0, 3, 1, 2))


if __name__ == "__main__":
    key = jax.random.PRNGKey(0)
    key, xk, pk = jax.random.split(key, 3)

    # DenseBlock(in_channels=4, kernel_size=3, stride=1, padding=False)
    in_channels, kernel_size, stride, padding = 4, 3, 1, False
    x = jax.random.normal(xk, (2, in_channels, 16, 16), jnp.float32)  # NCHW

    params = init_dense_block_params(pk, in_channels, kernel_size)

    out = dense_block_pallas(x, params, stride=stride, padding=padding)
    out = jax.block_until_ready(out)

    assert out.shape == (2, in_channels + 3 * 16, 16, 16), out.shape

    ref = jax.block_until_ready(
        dense_block_reference(x, params, stride=stride, padding=padding))
    # bf16 matmul operands (f32 accumulation) -> relaxed tolerance vs f32 reference.
    err = float(jnp.max(jnp.abs(out - ref)))
    assert jnp.allclose(out, ref, atol=3e-2, rtol=3e-2), err

    print("KERNEL_OK")
</pallas_src>

<mosaic_0001>
module attributes {stable_mosaic.version = 11 : i64} {
  func.func @_dense_block_kernel(%arg0: i32, %arg1: memref<1x4x256xf32, #tpu.memory_space<vmem>>, %arg2: memref<9x16x4xbf16, #tpu.memory_space<vmem>>, %arg3: memref<16x1xf32, #tpu.memory_space<vmem>>, %arg4: memref<9x16x20xbf16, #tpu.memory_space<vmem>>, %arg5: memref<16x1xf32, #tpu.memory_space<vmem>>, %arg6: memref<9x16x36xbf16, #tpu.memory_space<vmem>>, %arg7: memref<16x1xf32, #tpu.memory_space<vmem>>, %arg8: memref<1x52x256xf32, #tpu.memory_space<vmem>>) attributes {dimension_semantics = [#tpu.dimension_semantics<parallel>], iteration_bounds = array<i64: 2>, scalar_prefetch = 0 : i64, scratch_operands = 0 : i64, tpu.core_type = #tpu.core_type<tc>, window_params = [{transform_indices = @transform_0, window_bounds = array<i64: 1, 4, 256>}, {pipeline_mode = #tpu.pipeline_mode<synchronous>, transform_indices = @transform_1, window_bounds = array<i64: 9, 16, 4>}, {pipeline_mode = #tpu.pipeline_mode<synchronous>, transform_indices = @transform_2, window_bounds = array<i64: 16, 1>}, {pipeline_mode = #tpu.pipeline_mode<synchronous>, transform_indices = @transform_3, window_bounds = array<i64: 9, 16, 20>}, {pipeline_mode = #tpu.pipeline_mode<synchronous>, transform_indices = @transform_4, window_bounds = array<i64: 16, 1>}, {pipeline_mode = #tpu.pipeline_mode<synchronous>, transform_indices = @transform_5, window_bounds = array<i64: 9, 16, 36>}, {pipeline_mode = #tpu.pipeline_mode<synchronous>, transform_indices = @transform_6, window_bounds = array<i64: 16, 1>}, {transform_indices = @transform_7, window_bounds = array<i64: 1, 52, 256>}]} {
    %c0 = arith.constant 0 : index
    %c0_0 = arith.constant 0 : index
    %c0_1 = arith.constant 0 : index
    %0 = vector.load %arg1[%c0, %c0_0, %c0_1] : memref<1x4x256xf32, #tpu.memory_space<vmem>>, vector<1x4x256xf32>
    %1 = vector.shape_cast %0 : vector<1x4x256xf32> to vector<4x256xf32>
    %2 = tpu.iota {dimensions = array<i32: 0>} : vector<4x4xi32>
    %3 = tpu.iota {dimensions = array<i32: 1>} : vector<4x4xi32>
    %c0_i32 = arith.constant 0 : i32
    %4 = vector.broadcast %c0_i32 : i32 to vector<4x4xi32>
    %5 = arith.addi %2, %4 : vector<4x4xi32>
    %6 = arith.cmpi eq, %5, %3 : vector<4x4xi32>
    %7 = arith.extui %6 : vector<4x4xi1> to vector<4x4xi32>
    %8 = arith.sitofp %7 : vector<4x4xi32> to vector<4x4xf32>
    %cst = arith.constant dense<0.000000e+00> : vector<256x4xf32>
    %9 = tpu.matmul %1, %8, %cst {dimension_numbers = #tpu.dot_dimension_numbers<[0], [0], [1], [1], [0, 1, 1, 1], [], []>} : vector<4x256xf32>, vector<4x4xf32>, vector<256x4xf32> -> vector<256x4xf32>
    %10 = vector.shape_cast %9 : vector<256x4xf32> to vector<16x16x4xf32>
    %11 = vector.extract_strided_slice %10 {offsets = [1, 0, 0], sizes = [1, 16, 4], strides = [1, 1, 1]} : vector<16x16x4xf32> to vector<1x16x4xf32>
    %12 = vector.extract_strided_slice %10 {offsets = [14, 0, 0], sizes = [1, 16, 4], strides = [1, 1, 1]} : vector<16x16x4xf32> to vector<1x16x4xf32>
    %13 = tpu.concatenate %11, %10, %12 in 0 : vector<1x16x4xf32>, vector<16x16x4xf32>, vector<1x16x4xf32> -> vector<18x16x4xf32>
    %14 = vector.extract_strided_slice %13 {offsets = [0, 1, 0], sizes = [18, 1, 4], strides = [1, 1, 1]} : vector<18x16x4xf32> to vector<18x1x4xf32>
    %15 = vector.extract_strided_slice %13 {offsets = [0, 14, 0], sizes = [18, 1, 4], strides = [1, 1, 1]} : vector<18x16x4xf32> to vector<18x1x4xf32>
    %16 = tpu.concatenate %14, %13, %15 in 1 : vector<18x1x4xf32>, vector<18x16x4xf32>, vector<18x1x4xf32> -> vector<18x18x4xf32>
    %cst_2 = arith.constant 0.000000e+00 : f32
    %17 = vector.broadcast %cst_2 : f32 to vector<16x256xf32>
    %18 = vector.extract_strided_slice %16 {offsets = [0, 0, 0], sizes = [16, 16, 4], strides = [1, 1, 1]} : vector<18x18x4xf32> to vector<16x16x4xf32>
    %19 = vector.shape_cast %18 : vector<16x16x4xf32> to vector<256x4xf32>
    %c0_3 = arith.constant 0 : index
    %c0_4 = arith.constant 0 : index
    %c0_5 = arith.constant 0 : index
    %20 = vector.load %arg2[%c0_3, %c0_4, %c0_5] : memref<9x16x4xbf16, #tpu.memory_space<vmem>>, vector<1x16x4xbf16>
    %21 = vector.shape_cast %20 : vector<1x16x4xbf16> to vector<16x4xbf16>
    %22 = arith.truncf %19 : vector<256x4xf32> to vector<256x4xbf16>
    %cst_6 = arith.constant dense<0.000000e+00> : vector<16x256xf32>
    %23 = tpu.matmul %21, %22, %cst_6 {dimension_numbers = #tpu.dot_dimension_numbers<[1], [1], [0], [0], [0, 0, 1, 0], [], []>} : vector<16x4xbf16>, vector<256x4xbf16>, vector<16x256xf32> -> vector<16x256xf32>
    %24 = arith.addf %17, %23 : vector<16x256xf32>
    %25 = vector.extract_strided_slice %16 {offsets = [0, 1, 0], sizes = [16, 16, 4], strides = [1, 1, 1]} : vector<18x18x4xf32> to vector<16x16x4xf32>
    %26 = vector.shape_cast %25 : vector<16x16x4xf32> to vector<256x4xf32>
    %c1 = arith.constant 1 : index
    %c0_7 = arith.constant 0 : index
    %c0_8 = arith.constant 0 : index
    %27 = vector.load %arg2[%c1, %c0_7, %c0_8] : memref<9x16x4xbf16, #tpu.memory_space<vmem>>, vector<1x16x4xbf16>
    %28 = vector.shape_cast %27 : vector<1x16x4xbf16> to vector<16x4xbf16>
    %29 = arith.truncf %26 : vector<256x4xf32> to vector<256x4xbf16>
    %cst_9 = arith.constant dense<0.000000e+00> : vector<16x256xf32>
    %30 = tpu.matmul %28, %29, %cst_9 {dimension_numbers = #tpu.dot_dimension_numbers<[1], [1], [0], [0], [0, 0, 1, 0], [], []>} : vector<16x4xbf16>, vector<256x4xbf16>, vector<16x256xf32> -> vector<16x256xf32>
    %31 = arith.addf %24, %30 : vector<16x256xf32>
    %32 = vector.extract_strided_slice %16 {offsets = [0, 2, 0], sizes = [16, 16, 4], strides = [1, 1, 1]} : vector<18x18x4xf32> to vector<16x16x4xf32>
    %33 = vector.shape_cast %32 : vector<16x16x4xf32> to vector<256x4xf32>
    %c2 = arith.constant 2 : index
    %c0_10 = arith.constant 0 : index
    %c0_11 = arith.constant 0 : index
    %34 = vector.load %arg2[%c2, %c0_10, %c0_11] : memref<9x16x4xbf16, #tpu.memory_space<vmem>>, vector<1x16x4xbf16>
    %35 = vector.shape_cast %34 : vector<1x16x4xbf16> to vector<16x4xbf16>
    %36 = arith.truncf %33 : vector<256x4xf32> to vector<256x4xbf16>
    %cst_12 = arith.constant dense<0.000000e+00> : vector<16x256xf32>
    %37 = tpu.matmul %35, %36, %cst_12 {dimension_numbers = #tpu.dot_dimension_numbers<[1], [1], [0], [0], [0, 0, 1, 0], [], []>} : vector<16x4xbf16>, vector<256x4xbf16>, vector<16x256xf32> -> vector<16x256xf32>
    %38 = arith.addf %31, %37 : vector<16x256xf32>
    %39 = vector.extract_strided_slice %16 {offsets = [1, 0, 0], sizes = [16, 16, 4], strides = [1, 1, 1]} : vector<18x18x4xf32> to vector<16x16x4xf32>
    %40 = vector.shape_cast %39 : vector<16x16x4xf32> to vector<256x4xf32>
    %c3 = arith.constant 3 : index
    %c0_13 = arith.constant 0 : index
    %c0_14 = arith.constant 0 : index
    %41 = vector.load %arg2[%c3, %c0_13, %c0_14] : memref<9x16x4xbf16, #tpu.memory_space<vmem>>, vector<1x16x4xbf16>
    %42 = vector.shape_cast %41 : vector<1x16x4xbf16> to vector<16x4xbf16>
    %43 = arith.truncf %40 : vector<256x4xf32> to vector<256x4xbf16>
    %cst_15 = arith.constant dense<0.000000e+00> : vector<16x256xf32>
    %44 = tpu.matmul %42, %43, %cst_15 {dimension_numbers = #tpu.dot_dimension_numbers<[1], [1], [0], [0], [0, 0, 1, 0], [], []>} : vector<16x4xbf16>, vector<256x4xbf16>, vector<16x256xf32> -> vector<16x256xf32>
    %45 = arith.addf %38, %44 : vector<16x256xf32>
    %46 = vector.extract_strided_slice %16 {offsets = [1, 1, 0], sizes = [16, 16, 4], strides = [1, 1, 1]} : vector<18x18x4xf32> to vector<16x16x4xf32>
    %47 = vector.shape_cast %46 : vector<16x16x4xf32> to vector<256x4xf32>
    %c4 = arith.constant 4 : index
    %c0_16 = arith.constant 0 : index
    %c0_17 = arith.constant 0 : index
    %48 = vector.load %arg2[%c4, %c0_16, %c0_17] : memref<9x16x4xbf16, #tpu.memory_space<vmem>>, vector<1x16x4xbf16>
    %49 = vector.shape_cast %48 : vector<1x16x4xbf16> to vector<16x4xbf16>
    %50 = arith.truncf %47 : vector<256x4xf32> to vector<256x4xbf16>
    %cst_18 = arith.constant dense<0.000000e+00> : vector<16x256xf32>
    %51 = tpu.matmul %49, %50, %cst_18 {dimension_numbers = #tpu.dot_dimension_numbers<[1], [1], [0], [0], [0, 0, 1, 0], [], []>} : vector<16x4xbf16>, vector<256x4xbf16>, vector<16x256xf32> -> vector<16x256xf32>
    %52 = arith.addf %45, %51 : vector<16x256xf32>
    %53 = vector.extract_strided_slice %16 {offsets = [1, 2, 0], sizes = [16, 16, 4], strides = [1, 1, 1]} : vector<18x18x4xf32> to vector<16x16x4xf32>
    %54 = vector.shape_cast %53 : vector<16x16x4xf32> to vector<256x4xf32>
    %c5 = arith.constant 5 : index
    %c0_19 = arith.constant 0 : index
    %c0_20 = arith.constant 0 : index
    %55 = vector.load %arg2[%c5, %c0_19, %c0_20] : memref<9x16x4xbf16, #tpu.memory_space<vmem>>, vector<1x16x4xbf16>
    %56 = vector.shape_cast %55 : vector<1x16x4xbf16> to vector<16x4xbf16>
    %57 = arith.truncf %54 : vector<256x4xf32> to vector<256x4xbf16>
    %cst_21 = arith.constant dense<0.000000e+00> : vector<16x256xf32>
    %58 = tpu.matmul %56, %57, %cst_21 {dimension_numbers = #tpu.dot_dimension_numbers<[1], [1], [0], [0], [0, 0, 1, 0], [], []>} : vector<16x4xbf16>, vector<256x4xbf16>, vector<16x256xf32> -> vector<16x256xf32>
    %59 = arith.addf %52, %58 : vector<16x256xf32>
    %60 = vector.extract_strided_slice %16 {offsets = [2, 0, 0], sizes = [16, 16, 4], strides = [1, 1, 1]} : vector<18x18x4xf32> to vector<16x16x4xf32>
    %61 = vector.shape_cast %60 : vector<16x16x4xf32> to vector<256x4xf32>
    %c6 = arith.constant 6 : index
    %c0_22 = arith.constant 0 : index
    %c0_23 = arith.constant 0 : index
    %62 = vector.load %arg2[%c6, %c0_22, %c0_23] : memref<9x16x4xbf16, #tpu.memory_space<vmem>>, vector<1x16x4xbf16>
    %63 = vector.shape_cast %62 : vector<1x16x4xbf16> to vector<16x4xbf16>
    %64 = arith.truncf %61 : vector<256x4xf32> to vector<256x4xbf16>
    %cst_24 = arith.constant dense<0.000000e+00> : vector<16x256xf32>
    %65 = tpu.matmul %63, %64, %cst_24 {dimension_numbers = #tpu.dot_dimension_numbers<[1], [1], [0], [0], [0, 0, 1, 0], [], []>} : vector<16x4xbf16>, vector<256x4xbf16>, vector<16x256xf32> -> vector<16x256xf32>
    %66 = arith.addf %59, %65 : vector<16x256xf32>
    %67 = vector.extract_strided_slice %16 {offsets = [2, 1, 0], sizes = [16, 16, 4], strides = [1, 1, 1]} : vector<18x18x4xf32> to vector<16x16x4xf32>
    %68 = vector.shape_cast %67 : vector<16x16x4xf32> to vector<256x4xf32>
    %c7 = arith.constant 7 : index
    %c0_25 = arith.constant 0 : index
    %c0_26 = arith.constant 0 : index
    %69 = vector.load %arg2[%c7, %c0_25, %c0_26] : memref<9x16x4xbf16, #tpu.memory_space<vmem>>, vector<1x16x4xbf16>
    %70 = vector.shape_cast %69 : vector<1x16x4xbf16> to vector<16x4xbf16>
    %71 = arith.truncf %68 : vector<256x4xf32> to vector<256x4xbf16>
    %cst_27 = arith.constant dense<0.000000e+00> : vector<16x256xf32>
    %72 = tpu.matmul %70, %71, %cst_27 {dimension_numbers = #tpu.dot_dimension_numbers<[1], [1], [0], [0], [0, 0, 1, 0], [], []>} : vector<16x4xbf16>, vector<256x4xbf16>, vector<16x256xf32> -> vector<16x256xf32>
    %73 = arith.addf %66, %72 : vector<16x256xf32>
    %74 = vector.extract_strided_slice %16 {offsets = [2, 2, 0], sizes = [16, 16, 4], strides = [1, 1, 1]} : vector<18x18x4xf32> to vector<16x16x4xf32>
    %75 = vector.shape_cast %74 : vector<16x16x4xf32> to vector<256x4xf32>
    %c8 = arith.constant 8 : index
    %c0_28 = arith.constant 0 : index
    %c0_29 = arith.constant 0 : index
    %76 = vector.load %arg2[%c8, %c0_28, %c0_29] : memref<9x16x4xbf16, #tpu.memory_space<vmem>>, vector<1x16x4xbf16>
    %77 = vector.shape_cast %76 : vector<1x16x4xbf16> to vector<16x4xbf16>
    %78 = arith.truncf %75 : vector<256x4xf32> to vector<256x4xbf16>
    %cst_30 = arith.constant dense<0.000000e+00> : vector<16x256xf32>
    %79 = tpu.matmul %77, %78, %cst_30 {dimension_numbers = #tpu.dot_dimension_numbers<[1], [1], [0], [0], [0, 0, 1, 0], [], []>} : vector<16x4xbf16>, vector<256x4xbf16>, vector<16x256xf32> -> vector<16x256xf32>
    %80 = arith.addf %73, %79 : vector<16x256xf32>
    %c0_31 = arith.constant 0 : index
    %c0_32 = arith.constant 0 : index
    %81 = vector.load %arg3[%c0_31, %c0_32] : memref<16x1xf32, #tpu.memory_space<vmem>>, vector<16x1xf32>
    %82 = vector.broadcast %81 : vector<16x1xf32> to vector<16x256xf32>
    %83 = arith.addf %80, %82 : vector<16x256xf32>
    %cst_33 = arith.constant 0.000000e+00 : f32
    %84 = vector.broadcast %cst_33 : f32 to vector<16x256xf32>
    %85 = arith.maximumf %83, %84 : vector<16x256xf32>
    %86 = tpu.iota {dimensions = array<i32: 0>} : vector<16x16xi32>
    %87 = tpu.iota {dimensions = array<i32: 1>} : vector<16x16xi32>
    %c0_i32_34 = arith.constant 0 : i32
    %88 = vector.broadcast %c0_i32_34 : i32 to vector<16x16xi32>
    %89 = arith.addi %86, %88 : vector<16x16xi32>
    %90 = arith.cmpi eq, %89, %87 : vector<16x16xi32>
    %91 = arith.extui %90 : vector<16x16xi1> to vector<16x16xi32>
    %92 = arith.sitofp %91 : vector<16x16xi32> to vector<16x16xf32>
    %cst_35 = arith.constant dense<0.000000e+00> : vector<256x16xf32>
    %93 = tpu.matmul %85, %92, %cst_35 {dimension_numbers = #tpu.dot_dimension_numbers<[0], [0], [1], [1], [0, 1, 1, 1], [], []>} : vector<16x256xf32>, vector<16x16xf32>, vector<256x16xf32> -> vector<256x16xf32>
    %94 = vector.shape_cast %93 : vector<256x16xf32> to vector<16x16x16xf32>
    %95 = vector.extract_strided_slice %94 {offsets = [1, 0, 0], sizes = [1, 16, 16], strides = [1, 1, 1]} : vector<16x16x16xf32> to vector<1x16x16xf32>
    %96 = vector.extract_strided_slice %94 {offsets = [14, 0, 0], sizes = [1, 16, 16], strides = [1, 1, 1]} : vector<16x16x16xf32> to vector<1x16x16xf32>
    %97 = tpu.concatenate %95, %94, %96 in 0 : vector<1x16x16xf32>, vector<16x16x16xf32>, vector<1x16x16xf32> -> vector<18x16x16xf32>
    %98 = vector.extract_strided_slice %97 {offsets = [0, 1, 0], sizes = [18, 1, 16], strides = [1, 1, 1]} : vector<18x16x16xf32> to vector<18x1x16xf32>
    %99 = vector.extract_strided_slice %97 {offsets = [0, 14, 0], sizes = [18, 1, 16], strides = [1, 1, 1]} : vector<18x16x16xf32> to vector<18x1x16xf32>
    %100 = tpu.concatenate %98, %97, %99 in 1 : vector<18x1x16xf32>, vector<18x16x16xf32>, vector<18x1x16xf32> -> vector<18x18x16xf32>
    %cst_36 = arith.constant 0.000000e+00 : f32
    %101 = vector.broadcast %cst_36 : f32 to vector<16x256xf32>
    %102 = vector.extract_strided_slice %16 {offsets = [0, 0, 0], sizes = [16, 16, 4], strides = [1, 1, 1]} : vector<18x18x4xf32> to vector<16x16x4xf32>
    %103 = vector.shape_cast %102 : vector<16x16x4xf32> to vector<256x4xf32>
    %c0_37 = arith.constant 0 : index
    %c0_38 = arith.constant 0 : index
    %c0_39 = arith.constant 0 : index
    %104 = vector.load %arg4[%c0_37, %c0_38, %c0_39] : memref<9x16x20xbf16, #tpu.memory_space<vmem>>, vector<1x16x4xbf16>
    %105 = vector.shape_cast %104 : vector<1x16x4xbf16> to vector<16x4xbf16>
    %106 = arith.truncf %103 : vector<256x4xf32> to vector<256x4xbf16>
    %cst_40 = arith.constant dense<0.000000e+00> : vector<16x256xf32>
    %107 = tpu.matmul %105, %106, %cst_40 {dimension_numbers = #tpu.dot_dimension_numbers<[1], [1], [0], [0], [0, 0, 1, 0], [], []>} : vector<16x4xbf16>, vector<256x4xbf16>, vector<16x256xf32> -> vector<16x256xf32>
    %108 = arith.addf %101, %107 : vector<16x256xf32>
    %109 = vector.extract_strided_slice %100 {offsets = [0, 0, 0], sizes = [16, 16, 16], strides = [1, 1, 1]} : vector<18x18x16xf32> to vector<16x16x16xf32>
    %110 = vector.shape_cast %109 : vector<16x16x16xf32> to vector<256x16xf32>
    %c0_41 = arith.constant 0 : index
    %c0_42 = arith.constant 0 : index
    %c4_43 = arith.constant 4 : index
    %111 = vector.load %arg4[%c0_41, %c0_42, %c4_43] : memref<9x16x20xbf16, #tpu.memory_space<vmem>>, vector<1x16x16xbf16>
    %112 = vector.shape_cast %111 : vector<1x16x16xbf16> to vector<16x16xbf16>
    %113 = arith.truncf %110 : vector<256x16xf32> to vector<256x16xbf16>
    %cst_44 = arith.constant dense<0.000000e+00> : vector<16x256xf32>
    %114 = tpu.matmul %112, %113, %cst_44 {dimension_numbers = #tpu.dot_dimension_numbers<[1], [1], [0], [0], [0, 0, 1, 0], [], []>} : vector<16x16xbf16>, vector<256x16xbf16>, vector<16x256xf32> -> vector<16x256xf32>
    %115 = arith.addf %108, %114 : vector<16x256xf32>
    %116 = vector.extract_strided_slice %16 {offsets = [0, 1, 0], sizes = [16, 16, 4], strides = [1, 1, 1]} : vector<18x18x4xf32> to vector<16x16x4xf32>
    %117 = vector.shape_cast %116 : vector<16x16x4xf32> to vector<256x4xf32>
    %c1_45 = arith.constant 1 : index
    %c0_46 = arith.constant 0 : index
    %c0_47 = arith.constant 0 : index
    %118 = vector.load %arg4[%c1_45, %c0_46, %c0_47] : memref<9x16x20xbf16, #tpu.memory_space<vmem>>, vector<1x16x4xbf16>
    %119 = vector.shape_cast %118 : vector<1x16x4xbf16> to vector<16x4xbf16>
    %120 = arith.truncf %117 : vector<256x4xf32> to vector<256x4xbf16>
    %cst_48 = arith.constant dense<0.000000e+00> : vector<16x256xf32>
    %121 = tpu.matmul %119, %120, %cst_48 {dimension_numbers = #tpu.dot_dimension_numbers<[1], [1], [0], [0], [0, 0, 1, 0], [], []>} : vector<16x4xbf16>, vector<256x4xbf16>, vector<16x256xf32> -> vector<16x256xf32>
    %122 = arith.addf %115, %121 : vector<16x256xf32>
    %123 = vector.extract_strided_slice %100 {offsets = [0, 1, 0], sizes = [16, 16, 16], strides = [1, 1, 1]} : vector<18x18x16xf32> to vector<16x16x16xf32>
    %124 = vector.shape_cast %123 : vector<16x16x16xf32> to vector<256x16xf32>
    %c1_49 = arith.constant 1 : index
    %c0_50 = arith.constant 0 : index
    %c4_51 = arith.constant 4 : index
    %125 = vector.load %arg4[%c1_49, %c0_50, %c4_51] : memref<9x16x20xbf16, #tpu.memory_space<vmem>>, vector<1x16x16xbf16>
    %126 = vector.shape_cast %125 : vector<1x16x16xbf16> to vector<16x16xbf16>
    %127 = arith.truncf %124 : vector<256x16xf32> to vector<256x16xbf16>
    %cst_52 = arith.constant dense<0.000000e+00> : vector<16x256xf32>
    %128 = tpu.matmul %126, %127, %cst_52 {dimension_numbers = #tpu.dot_dimension_numbers<[1], [1], [0], [0], [0, 0, 1, 0], [], []>} : vector<16x16xbf16>, vector<256x16xbf16>, vector<16x256xf32> -> vector<16x256xf32>
    %129 = arith.addf %122, %128 : vector<16x256xf32>
    %130 = vector.extract_strided_slice %16 {offsets = [0, 2, 0], sizes = [16, 16, 4], strides = [1, 1, 1]} : vector<18x18x4xf32> to vector<16x16x4xf32>
    %131 = vector.shape_cast %130 : vector<16x16x4xf32> to vector<256x4xf32>
    %c2_53 = arith.constant 2 : index
    %c0_54 = arith.constant 0 : index
    %c0_55 = arith.constant 0 : index
    %132 = vector.load %arg4[%c2_53, %c0_54, %c0_55] : memref<9x16x20xbf16, #tpu.memory_space<vmem>>, vector<1x16x4xbf16>
    %133 = vector.shape_cast %132 : vector<1x16x4xbf16> to vector<16x4xbf16>
    %134 = arith.truncf %131 : vector<256x4xf32> to vector<256x4xbf16>
    %cst_56 = arith.constant dense<0.000000e+00> : vector<16x256xf32>
    %135 = tpu.matmul %133, %134, %cst_56 {dimension_numbers = #tpu.dot_dimension_numbers<[1], [1], [0], [0], [0, 0, 1, 0], [], []>} : vector<16x4xbf16>, vector<256x4xbf16>, vector<16x256xf32> -> vector<16x256xf32>
    %136 = arith.addf %129, %135 : vector<16x256xf32>
    %137 = vector.extract_strided_slice %100 {offsets = [0, 2, 0], sizes = [16, 16, 16], strides = [1, 1, 1]} : vector<18x18x16xf32> to vector<16x16x16xf32>
    %138 = vector.shape_cast %137 : vector<16x16x16xf32> to vector<256x16xf32>
    %c2_57 = arith.constant 2 : index
    %c0_58 = arith.constant 0 : index
    %c4_59 = arith.constant 4 : index
    %139 = vector.load %arg4[%c2_57, %c0_58, %c4_59] : memref<9x16x20xbf16, #tpu.memory_space<vmem>>, vector<1x16x16xbf16>
    %140 = vector.shape_cast %139 : vector<1x16x16xbf16> to vector<16x16xbf16>
    %141 = arith.truncf %138 : vector<256x16xf32> to vector<256x16xbf16>
    %cst_60 = arith.constant dense<0.000000e+00> : vector<16x256xf32>
    %142 = tpu.matmul %140, %141, %cst_60 {dimension_numbers = #tpu.dot_dimension_numbers<[1], [1], [0], [0], [0, 0, 1, 0], [], []>} : vector<16x16xbf16>, vector<256x16xbf16>, vector<16x256xf32> -> vector<16x256xf32>
    %143 = arith.addf %136, %142 : vector<16x256xf32>
    %144 = vector.extract_strided_slice %16 {offsets = [1, 0, 0], sizes = [16, 16, 4], strides = [1, 1, 1]} : vector<18x18x4xf32> to vector<16x16x4xf32>
    %145 = vector.shape_cast %144 : vector<16x16x4xf32> to vector<256x4xf32>
    %c3_61 = arith.constant 3 : index
    %c0_62 = arith.constant 0 : index
    %c0_63 = arith.constant 0 : index
    %146 = vector.load %arg4[%c3_61, %c0_62, %c0_63] : memref<9x16x20xbf16, #tpu.memory_space<vmem>>, vector<1x16x4xbf16>
    %147 = vector.shape_cast %146 : vector<1x16x4xbf16> to vector<16x4xbf16>
    %148 = arith.truncf %145 : vector<256x4xf32> to vector<256x4xbf16>
    %cst_64 = arith.constant dense<0.000000e+00> : vector<16x256xf32>
    %149 = tpu.matmul %147, %148, %cst_64 {dimension_numbers = #tpu.dot_dimension_numbers<[1], [1], [0], [0], [0, 0, 1, 0], [], []>} : vector<16x4xbf16>, vector<256x4xbf16>, vector<16x256xf32> -> vector<16x256xf32>
    %150 = arith.addf %143, %149 : vector<16x256xf32>
    %151 = vector.extract_strided_slice %100 {offsets = [1, 0, 0], sizes = [16, 16, 16], strides = [1, 1, 1]} : vector<18x18x16xf32> to vector<16x16x16xf32>
    %152 = vector.shape_cast %151 : vector<16x16x16xf32> to vector<256x16xf32>
    %c3_65 = arith.constant 3 : index
    %c0_66 = arith.constant 0 : index
    %c4_67 = arith.constant 4 : index
    %153 = vector.load %arg4[%c3_65, %c0_66, %c4_67] : memref<9x16x20xbf16, #tpu.memory_space<vmem>>, vector<1x16x16xbf16>
    %154 = vector.shape_cast %153 : vector<1x16x16xbf16> to vector<16x16xbf16>
    %155 = arith.truncf %152 : vector<256x16xf32> to vector<256x16xbf16>
    %cst_68 = arith.constant dense<0.000000e+00> : vector<16x256xf32>
    %156 = tpu.matmul %154, %155, %cst_68 {dimension_numbers = #tpu.dot_dimension_numbers<[1], [1], [0], [0], [0, 0, 1, 0], [], []>} : vector<16x16xbf16>, vector<256x16xbf16>, vector<16x256xf32> -> vector<16x256xf32>
    %157 = arith.addf %150, %156 : vector<16x256xf32>
    %158 = vector.extract_strided_slice %16 {offsets = [1, 1, 0], sizes = [16, 16, 4], strides = [1, 1, 1]} : vector<18x18x4xf32> to vector<16x16x4xf32>
    %159 = vector.shape_cast %158 : vector<16x16x4xf32> to vector<256x4xf32>
    %c4_69 = arith.constant 4 : index
    %c0_70 = arith.constant 0 : index
    %c0_71 = arith.constant 0 : index
    %160 = vector.load %arg4[%c4_69, %c0_70, %c0_71] : memref<9x16x20xbf16, #tpu.memory_space<vmem>>, vector<1x16x4xbf16>
    %161 = vector.shape_cast %160 : vector<1x16x4xbf16> to vector<16x4xbf16>
    %162 = arith.truncf %159 : vector<256x4xf32> to vector<256x4xbf16>
    %cst_72 = arith.constant dense<0.000000e+00> : vector<16x256xf32>
    %163 = tpu.matmul %161, %162, %cst_72 {dimension_numbers = #tpu.dot_dimension_numbers<[1], [1], [0], [0], [0, 0, 1, 0], [], []>} : vector<16x4xbf16>, vector<256x4xbf16>, vector<16x256xf32> -> vector<16x256xf32>
    %164 = arith.addf %157, %163 : vector<16x256xf32>
    %165 = vector.extract_strided_slice %100 {offsets = [1, 1, 0], sizes = [16, 16, 16], strides = [1, 1, 1]} : vector<18x18x16xf32> to vector<16x16x16xf32>
    %166 = vector.shape_cast %165 : vector<16x16x16xf32> to vector<256x16xf32>
    %c4_73 = arith.constant 4 : index
    %c0_74 = arith.constant 0 : index
    %c4_75 = arith.constant 4 : index
    %167 = vector.load %arg4[%c4_73, %c0_74, %c4_75] : memref<9x16x20xbf16, #tpu.memory_space<vmem>>, vector<1x16x16xbf16>
    %168 = vector.shape_cast %167 : vector<1x16x16xbf16> to vector<16x16xbf16>
    %169 = arith.truncf %166 : vector<256x16xf32> to vector<256x16xbf16>
    %cst_76 = arith.constant dense<0.000000e+00> : vector<16x256xf32>
    %170 = tpu.matmul %168, %169, %cst_76 {dimension_numbers = #tpu.dot_dimension_numbers<[1], [1], [0], [0], [0, 0, 1, 0], [], []>} : vector<16x16xbf16>, vector<256x16xbf16>, vector<16x256xf32> -> vector<16x256xf32>
    %171 = arith.addf %164, %170 : vector<16x256xf32>
    %172 = vector.extract_strided_slice %16 {offsets = [1, 2, 0], sizes = [16, 16, 4], strides = [1, 1, 1]} : vector<18x18x4xf32> to vector<16x16x4xf32>
    %173 = vector.shape_cast %172 : vector<16x16x4xf32> to vector<256x4xf32>
    %c5_77 = arith.constant 5 : index
    %c0_78 = arith.constant 0 : index
    %c0_79 = arith.constant 0 : index
    %174 = vector.load %arg4[%c5_77, %c0_78, %c0_79] : memref<9x16x20xbf16, #tpu.memory_space<vmem>>, vector<1x16x4xbf16>
    %175 = vector.shape_cast %174 : vector<1x16x4xbf16> to vector<16x4xbf16>
    %176 = arith.truncf %173 : vector<256x4xf32> to vector<256x4xbf16>
    %cst_80 = arith.constant dense<0.000000e+00> : vector<16x256xf32>
    %177 = tpu.matmul %175, %176, %cst_80 {dimension_numbers = #tpu.dot_dimension_numbers<[1], [1], [0], [0], [0, 0, 1, 0], [], []>} : vector<16x4xbf16>, vector<256x4xbf16>, vector<16x256xf32> -> vector<16x256xf32>
    %178 = arith.addf %171, %177 : vector<16x256xf32>
    %179 = vector.extract_strided_slice %100 {offsets = [1, 2, 0], sizes = [16, 16, 16], strides = [1, 1, 1]} : vector<18x18x16xf32> to vector<16x16x16xf32>
    %180 = vector.shape_cast %179 : vector<16x16x16xf32> to vector<256x16xf32>
    %c5_81 = arith.constant 5 : index
    %c0_82 = arith.constant 0 : index
    %c4_83 = arith.constant 4 : index
    %181 = vector.load %arg4[%c5_81, %c0_82, %c4_83] : memref<9x16x20xbf16, #tpu.memory_space<vmem>>, vector<1x16x16xbf16>
    %182 = vector.shape_cast %181 : vector<1x16x16xbf16> to vector<16x16xbf16>
    %183 = arith.truncf %180 : vector<256x16xf32> to vector<256x16xbf16>
    %cst_84 = arith.constant dense<0.000000e+00> : vector<16x256xf32>
    %184 = tpu.matmul %182, %183, %cst_84 {dimension_numbers = #tpu.dot_dimension_numbers<[1], [1], [0], [0], [0, 0, 1, 0], [], []>} : vector<16x16xbf16>, vector<256x16xbf16>, vector<16x256xf32> -> vector<16x256xf32>
    %185 = arith.addf %178, %184 : vector<16x256xf32>
    %186 = vector.extract_strided_slice %16 {offsets = [2, 0, 0], sizes = [16, 16, 4], strides = [1, 1, 1]} : vector<18x18x4xf32> to vector<16x16x4xf32>
    %187 = vector.shape_cast %186 : vector<16x16x4xf32> to vector<256x4xf32>
    %c6_85 = arith.constant 6 : index
    %c0_86 = arith.constant 0 : index
    %c0_87 = arith.constant 0 : index
    %188 = vector.load %arg4[%c6_85, %c0_86, %c0_87] : memref<9x16x20xbf16, #tpu.memory_space<vmem>>, vector<1x16x4xbf16>
    %189 = vector.shape_cast %188 : vector<1x16x4xbf16> to vector<16x4xbf16>
    %190 = arith.truncf %187 : vector<256x4xf32> to vector<256x4xbf16>
    %cst_88 = arith.constant dense<0.000000e+00> : vector<16x256xf32>
    %191 = tpu.matmul %189, %190, %cst_88 {dimension_numbers = #tpu.dot_dimension_numbers<[1], [1], [0], [0], [0, 0, 1, 0], [], []>} : vector<16x4xbf16>, vector<256x4xbf16>, vector<16x256xf32> -> vector<16x256xf32>
    %192 = arith.addf %185, %191 : vector<16x256xf32>
    %193 = vector.extract_strided_slice %100 {offsets = [2, 0, 0], sizes = [16, 16, 16], strides = [1, 1, 1]} : vector<18x18x16xf32> to vector<16x16x16xf32>
    %194 = vector.shape_cast %193 : vector<16x16x16xf32> to vector<256x16xf32>
    %c6_89 = arith.constant 6 : index
    %c0_90 = arith.constant 0 : index
    %c4_91 = arith.constant 4 : index
    %195 = vector.load %arg4[%c6_89, %c0_90, %c4_91] : memref<9x16x20xbf16, #tpu.memory_space<vmem>>, vector<1x16x16xbf16>
    %196 = vector.shape_cast %195 : vector<1x16x16xbf16> to vector<16x16xbf16>
    %197 = arith.truncf %194 : vector<256x16xf32> to vector<256x16xbf16>
    %cst_92 = arith.constant dense<0.000000e+00> : vector<16x256xf32>
    %198 = tpu.matmul %196, %197, %cst_92 {dimension_numbers = #tpu.dot_dimension_numbers<[1], [1], [0], [0], [0, 0, 1, 0], [], []>} : vector<16x16xbf16>, vector<256x16xbf16>, vector<16x256xf32> -> vector<16x256xf32>
    %199 = arith.addf %192, %198 : vector<16x256xf32>
    %200 = vector.extract_strided_slice %16 {offsets = [2, 1, 0], sizes = [16, 16, 4], strides = [1, 1, 1]} : vector<18x18x4xf32> to vector<16x16x4xf32>
    %201 = vector.shape_cast %200 : vector<16x16x4xf32> to vector<256x4xf32>
    %c7_93 = arith.constant 7 : index
    %c0_94 = arith.constant 0 : index
    %c0_95 = arith.constant 0 : index
    %202 = vector.load %arg4[%c7_93, %c0_94, %c0_95] : memref<9x16x20xbf16, #tpu.memory_space<vmem>>, vector<1x16x4xbf16>
    %203 = vector.shape_cast %202 : vector<1x16x4xbf16> to vector<16x4xbf16>
    %204 = arith.truncf %201 : vector<256x4xf32> to vector<256x4xbf16>
    %cst_96 = arith.constant dense<0.000000e+00> : vector<16x256xf32>
    %205 = tpu.matmul %203, %204, %cst_96 {dimension_numbers = #tpu.dot_dimension_numbers<[1], [1], [0], [0], [0, 0, 1, 0], [], []>} : vector<16x4xbf16>, vector<256x4xbf16>, vector<16x256xf32> -> vector<16x256xf32>
    %206 = arith.addf %199, %205 : vector<16x256xf32>
    %207 = vector.extract_strided_slice %100 {offsets = [2, 1, 0], sizes = [16, 16, 16], strides = [1, 1, 1]} : vector<18x18x16xf32> to vector<16x16x16xf32>
    %208 = vector.shape_cast %207 : vector<16x16x16xf32> to vector<256x16xf32>
    %c7_97 = arith.constant 7 : index
    %c0_98 = arith.constant 0 : index
    %c4_99 = arith.constant 4 : index
    %209 = vector.load %arg4[%c7_97, %c0_98, %c4_99] : memref<9x16x20xbf16, #tpu.memory_space<vmem>>, vector<1x16x16xbf16>
    %210 = vector.shape_cast %209 : vector<1x16x16xbf16> to vector<16x16xbf16>
    %211 = arith.truncf %208 : vector<256x16xf32> to vector<256x16xbf16>
    %cst_100 = arith.constant dense<0.000000e+00> : vector<16x256xf32>
    %212 = tpu.matmul %210, %211, %cst_100 {dimension_numbers = #tpu.dot_dimension_numbers<[1], [1], [0], [0], [0, 0, 1, 0], [], []>} : vector<16x16xbf16>, vector<256x16xbf16>, vector<16x256xf32> -> vector<16x256xf32>
    %213 = arith.addf %206, %212 : vector<16x256xf32>
    %214 = vector.extract_strided_slice %16 {offsets = [2, 2, 0], sizes = [16, 16, 4], strides = [1, 1, 1]} : vector<18x18x4xf32> to vector<16x16x4xf32>
    %215 = vector.shape_cast %214 : vector<16x16x4xf32> to vector<256x4xf32>
    %c8_101 = arith.constant 8 : index
    %c0_102 = arith.constant 0 : index
    %c0_103 = arith.constant 0 : index
    %216 = vector.load %arg4[%c8_101, %c0_102, %c0_103] : memref<9x16x20xbf16, #tpu.memory_space<vmem>>, vector<1x16x4xbf16>
    %217 = vector.shape_cast %216 : vector<1x16x4xbf16> to vector<16x4xbf16>
    %218 = arith.truncf %215 : vector<256x4xf32> to vector<256x4xbf16>
    %cst_104 = arith.constant dense<0.000000e+00> : vector<16x256xf32>
    %219 = tpu.matmul %217, %218, %cst_104 {dimension_numbers = #tpu.dot_dimension_numbers<[1], [1], [0], [0], [0, 0, 1, 0], [], []>} : vector<16x4xbf16>, vector<256x4xbf16>, vector<16x256xf32> -> vector<16x256xf32>
    %220 = arith.addf %213, %219 : vector<16x256xf32>
    %221 = vector.extract_strided_slice %100 {offsets = [2, 2, 0], sizes = [16, 16, 16], strides = [1, 1, 1]} : vector<18x18x16xf32> to vector<16x16x16xf32>
    %222 = vector.shape_cast %221 : vector<16x16x16xf32> to vector<256x16xf32>
    %c8_105 = arith.constant 8 : index
    %c0_106 = arith.constant 0 : index
    %c4_107 = arith.constant 4 : index
    %223 = vector.load %arg4[%c8_105, %c0_106, %c4_107] : memref<9x16x20xbf16, #tpu.memory_space<vmem>>, vector<1x16x16xbf16>
    %224 = vector.shape_cast %223 : vector<1x16x16xbf16> to vector<16x16xbf16>
    %225 = arith.truncf %222 : vector<256x16xf32> to vector<256x16xbf16>
    %cst_108 = arith.constant dense<0.000000e+00> : vector<16x256xf32>
    %226 = tpu.matmul %224, %225, %cst_108 {dimension_numbers = #tpu.dot_dimension_numbers<[1], [1], [0], [0], [0, 0, 1, 0], [], []>} : vector<16x16xbf16>, vector<256x16xbf16>, vector<16x256xf32> -> vector<16x256xf32>
    %227 = arith.addf %220, %226 : vector<16x256xf32>
    %c0_109 = arith.constant 0 : index
    %c0_110 = arith.constant 0 : index
    %228 = vector.load %arg5[%c0_109, %c0_110] : memref<16x1xf32, #tpu.memory_space<vmem>>, vector<16x1xf32>
    %229 = vector.broadcast %228 : vector<16x1xf32> to vector<16x256xf32>
    %230 = arith.addf %227, %229 : vector<16x256xf32>
    %cst_111 = arith.constant 0.000000e+00 : f32
    %231 = vector.broadcast %cst_111 : f32 to vector<16x256xf32>
    %232 = arith.maximumf %230, %231 : vector<16x256xf32>
    %233 = tpu.iota {dimensions = array<i32: 0>} : vector<16x16xi32>
    %234 = tpu.iota {dimensions = array<i32: 1>} : vector<16x16xi32>
    %c0_i32_112 = arith.constant 0 : i32
    %235 = vector.broadcast %c0_i32_112 : i32 to vector<16x16xi32>
    %236 = arith.addi %233, %235 : vector<16x16xi32>
    %237 = arith.cmpi eq, %236, %234 : vector<16x16xi32>
    %238 = arith.extui %237 : vector<16x16xi1> to vector<16x16xi32>
    %239 = arith.sitofp %238 : vector<16x16xi32> to vector<16x16xf32>
    %cst_113 = arith.constant dense<0.000000e+00> : vector<256x16xf32>
    %240 = tpu.matmul %232, %239, %cst_113 {dimension_numbers = #tpu.dot_dimension_numbers<[0], [0], [1], [1], [0, 1, 1, 1], [], []>} : vector<16x256xf32>, vector<16x16xf32>, vector<256x16xf32> -> vector<256x16xf32>
    %241 = vector.shape_cast %240 : vector<256x16xf32> to vector<16x16x16xf32>
    %242 = vector.extract_strided_slice %241 {offsets = [1, 0, 0], sizes = [1, 16, 16], strides = [1, 1, 1]} : vector<16x16x16xf32> to vector<1x16x16xf32>
    %243 = vector.extract_strided_slice %241 {offsets = [14, 0, 0], sizes = [1, 16, 16], strides = [1, 1, 1]} : vector<16x16x16xf32> to vector<1x16x16xf32>
    %244 = tpu.concatenate %242, %241, %243 in 0 : vector<1x16x16xf32>, vector<16x16x16xf32>, vector<1x16x16xf32> -> vector<18x16x16xf32>
    %245 = vector.extract_strided_slice %244 {offsets = [0, 1, 0], sizes = [18, 1, 16], strides = [1, 1, 1]} : vector<18x16x16xf32> to vector<18x1x16xf32>
    %246 = vector.extract_strided_slice %244 {offsets = [0, 14, 0], sizes = [18, 1, 16], strides = [1, 1, 1]} : vector<18x16x16xf32> to vector<18x1x16xf32>
    %247 = tpu.concatenate %245, %244, %246 in 1 : vector<18x1x16xf32>, vector<18x16x16xf32>, vector<18x1x16xf32> -> vector<18x18x16xf32>
    %cst_114 = arith.constant 0.000000e+00 : f32
    %248 = vector.broadcast %cst_114 : f32 to vector<16x256xf32>
    %249 = vector.extract_strided_slice %16 {offsets = [0, 0, 0], sizes = [16, 16, 4], strides = [1, 1, 1]} : vector<18x18x4xf32> to vector<16x16x4xf32>
    %250 = vector.shape_cast %249 : vector<16x16x4xf32> to vector<256x4xf32>
    %c0_115 = arith.constant 0 : index
    %c0_116 = arith.constant 0 : index
    %c0_117 = arith.constant 0 : index
    %251 = vector.load %arg6[%c0_115, %c0_116, %c0_117] : memref<9x16x36xbf16, #tpu.memory_space<vmem>>, vector<1x16x4xbf16>
    %252 = vector.shape_cast %251 : vector<1x16x4xbf16> to vector<16x4xbf16>
    %253 = arith.truncf %250 : vector<256x4xf32> to vector<256x4xbf16>
    %cst_118 = arith.constant dense<0.000000e+00> : vector<16x256xf32>
    %254 = tpu.matmul %252, %253, %cst_118 {dimension_numbers = #tpu.dot_dimension_numbers<[1], [1], [0], [0], [0, 0, 1, 0], [], []>} : vector<16x4xbf16>, vector<256x4xbf16>, vector<16x256xf32> -> vector<16x256xf32>
    %255 = arith.addf %248, %254 : vector<16x256xf32>
    %256 = vector.extract_strided_slice %100 {offsets = [0, 0, 0], sizes = [16, 16, 16], strides = [1, 1, 1]} : vector<18x18x16xf32> to vector<16x16x16xf32>
    %257 = vector.shape_cast %256 : vector<16x16x16xf32> to vector<256x16xf32>
    %c0_119 = arith.constant 0 : index
    %c0_120 = arith.constant 0 : index
    %c4_121 = arith.constant 4 : index
    %258 = vector.load %arg6[%c0_119, %c0_120, %c4_121] : memref<9x16x36xbf16, #tpu.memory_space<vmem>>, vector<1x16x16xbf16>
    %259 = vector.shape_cast %258 : vector<1x16x16xbf16> to vector<16x16xbf16>
    %260 = arith.truncf %257 : vector<256x16xf32> to vector<256x16xbf16>
    %cst_122 = arith.constant dense<0.000000e+00> : vector<16x256xf32>
    %261 = tpu.matmul %259, %260, %cst_122 {dimension_numbers = #tpu.dot_dimension_numbers<[1], [1], [0], [0], [0, 0, 1, 0], [], []>} : vector<16x16xbf16>, vector<256x16xbf16>, vector<16x256xf32> -> vector<16x256xf32>
    %262 = arith.addf %255, %261 : vector<16x256xf32>
    %263 = vector.extract_strided_slice %247 {offsets = [0, 0, 0], sizes = [16, 16, 16], strides = [1, 1, 1]} : vector<18x18x16xf32> to vector<16x16x16xf32>
    %264 = vector.shape_cast %263 : vector<16x16x16xf32> to vector<256x16xf32>
    %c0_123 = arith.constant 0 : index
    %c0_124 = arith.constant 0 : index
    %c20 = arith.constant 20 : index
    %265 = vector.load %arg6[%c0_123, %c0_124, %c20] : memref<9x16x36xbf16, #tpu.memory_space<vmem>>, vector<1x16x16xbf16>
    %266 = vector.shape_cast %265 : vector<1x16x16xbf16> to vector<16x16xbf16>
    %267 = arith.truncf %264 : vector<256x16xf32> to vector<256x16xbf16>
    %cst_125 = arith.constant dense<0.000000e+00> : vector<16x256xf32>
    %268 = tpu.matmul %266, %267, %cst_125 {dimension_numbers = #tpu.dot_dimension_numbers<[1], [1], [0], [0], [0, 0, 1, 0], [], []>} : vector<16x16xbf16>, vector<256x16xbf16>, vector<16x256xf32> -> vector<16x256xf32>
    %269 = arith.addf %262, %268 : vector<16x256xf32>
    %270 = vector.extract_strided_slice %16 {offsets = [0, 1, 0], sizes = [16, 16, 4], strides = [1, 1, 1]} : vector<18x18x4xf32> to vector<16x16x4xf32>
    %271 = vector.shape_cast %270 : vector<16x16x4xf32> to vector<256x4xf32>
    %c1_126 = arith.constant 1 : index
    %c0_127 = arith.constant 0 : index
    %c0_128 = arith.constant 0 : index
    %272 = vector.load %arg6[%c1_126, %c0_127, %c0_128] : memref<9x16x36xbf16, #tpu.memory_space<vmem>>, vector<1x16x4xbf16>
    %273 = vector.shape_cast %272 : vector<1x16x4xbf16> to vector<16x4xbf16>
    %274 = arith.truncf %271 : vector<256x4xf32> to vector<256x4xbf16>
    %cst_129 = arith.constant dense<0.000000e+00> : vector<16x256xf32>
    %275 = tpu.matmul %273, %274, %cst_129 {dimension_numbers = #tpu.dot_dimension_numbers<[1], [1], [0], [0], [0, 0, 1, 0], [], []>} : vector<16x4xbf16>, vector<256x4xbf16>, vector<16x256xf32> -> vector<16x256xf32>
    %276 = arith.addf %269, %275 : vector<16x256xf32>
    %277 = vector.extract_strided_slice %100 {offsets = [0, 1, 0], sizes = [16, 16, 16], strides = [1, 1, 1]} : vector<18x18x16xf32> to vector<16x16x16xf32>
    %278 = vector.shape_cast %277 : vector<16x16x16xf32> to vector<256x16xf32>
    %c1_130 = arith.constant 1 : index
    %c0_131 = arith.constant 0 : index
    %c4_132 = arith.constant 4 : index
    %279 = vector.load %arg6[%c1_130, %c0_131, %c4_132] : memref<9x16x36xbf16, #tpu.memory_space<vmem>>, vector<1x16x16xbf16>
    %280 = vector.shape_cast %279 : vector<1x16x16xbf16> to vector<16x16xbf16>
    %281 = arith.truncf %278 : vector<256x16xf32> to vector<256x16xbf16>
    %cst_133 = arith.constant dense<0.000000e+00> : vector<16x256xf32>
    %282 = tpu.matmul %280, %281, %cst_133 {dimension_numbers = #tpu.dot_dimension_numbers<[1], [1], [0], [0], [0, 0, 1, 0], [], []>} : vector<16x16xbf16>, vector<256x16xbf16>, vector<16x256xf32> -> vector<16x256xf32>
    %283 = arith.addf %276, %282 : vector<16x256xf32>
    %284 = vector.extract_strided_slice %247 {offsets = [0, 1, 0], sizes = [16, 16, 16], strides = [1, 1, 1]} : vector<18x18x16xf32> to vector<16x16x16xf32>
    %285 = vector.shape_cast %284 : vector<16x16x16xf32> to vector<256x16xf32>
    %c1_134 = arith.constant 1 : index
    %c0_135 = arith.constant 0 : index
    %c20_136 = arith.constant 20 : index
    %286 = vector.load %arg6[%c1_134, %c0_135, %c20_136] : memref<9x16x36xbf16, #tpu.memory_space<vmem>>, vector<1x16x16xbf16>
    %287 = vector.shape_cast %286 : vector<1x16x16xbf16> to vector<16x16xbf16>
    %288 = arith.truncf %285 : vector<256x16xf32> to vector<256x16xbf16>
    %cst_137 = arith.constant dense<0.000000e+00> : vector<16x256xf32>
    %289 = tpu.matmul %287, %288, %cst_137 {dimension_numbers = #tpu.dot_dimension_numbers<[1], [1], [0], [0], [0, 0, 1, 0], [], []>} : vector<16x16xbf16>, vector<256x16xbf16>, vector<16x256xf32> -> vector<16x256xf32>
    %290 = arith.addf %283, %289 : vector<16x256xf32>
    %291 = vector.extract_strided_slice %16 {offsets = [0, 2, 0], sizes = [16, 16, 4], strides = [1, 1, 1]} : vector<18x18x4xf32> to vector<16x16x4xf32>
    %292 = vector.shape_cast %291 : vector<16x16x4xf32> to vector<256x4xf32>
    %c2_138 = arith.constant 2 : index
    %c0_139 = arith.constant 0 : index
    %c0_140 = arith.constant 0 : index
    %293 = vector.load %arg6[%c2_138, %c0_139, %c0_140] : memref<9x16x36xbf16, #tpu.memory_space<vmem>>, vector<1x16x4xbf16>
    %294 = vector.shape_cast %293 : vector<1x16x4xbf16> to vector<16x4xbf16>
    %295 = arith.truncf %292 : vector<256x4xf32> to vector<256x4xbf16>
    %cst_141 = arith.constant dense<0.000000e+00> : vector<16x256xf32>
    %296 = tpu.matmul %294, %295, %cst_141 {dimension_numbers = #tpu.dot_dimension_numbers<[1], [1], [0], [0], [0, 0, 1, 0], [], []>} : vector<16x4xbf16>, vector<256x4xbf16>, vector<16x256xf32> -> vector<16x256xf32>
    %297 = arith.addf %290, %296 : vector<16x256xf32>
    %298 = vector.extract_strided_slice %100 {offsets = [0, 2, 0], sizes = [16, 16, 16], strides = [1, 1, 1]} : vector<18x18x16xf32> to vector<16x16x16xf32>
    %299 = vector.shape_cast %298 : vector<16x16x16xf32> to vector<256x16xf32>
    %c2_142 = arith.constant 2 : index
    %c0_143 = arith.constant 0 : index
    %c4_144 = arith.constant 4 : index
    %300 = vector.load %arg6[%c2_142, %c0_143, %c4_144] : memref<9x16x36xbf16, #tpu.memory_space<vmem>>, vector<1x16x16xbf16>
    %301 = vector.shape_cast %300 : vector<1x16x16xbf16> to vector<16x16xbf16>
    %302 = arith.truncf %299 : vector<256x16xf32> to vector<256x16xbf16>
    %cst_145 = arith.constant dense<0.000000e+00> : vector<16x256xf32>
    %303 = tpu.matmul %301, %302, %cst_145 {dimension_numbers = #tpu.dot_dimension_numbers<[1], [1], [0], [0], [0, 0, 1, 0], [], []>} : vector<16x16xbf16>, vector<256x16xbf16>, vector<16x256xf32> -> vector<16x256xf32>
    %304 = arith.addf %297, %303 : vector<16x256xf32>
    %305 = vector.extract_strided_slice %247 {offsets = [0, 2, 0], sizes = [16, 16, 16], strides = [1, 1, 1]} : vector<18x18x16xf32> to vector<16x16x16xf32>
    %306 = vector.shape_cast %305 : vector<16x16x16xf32> to vector<256x16xf32>
    %c2_146 = arith.constant 2 : index
    %c0_147 = arith.constant 0 : index
    %c20_148 = arith.constant 20 : index
    %307 = vector.load %arg6[%c2_146, %c0_147, %c20_148] : memref<9x16x36xbf16, #tpu.memory_space<vmem>>, vector<1x16x16xbf16>
    %308 = vector.shape_cast %307 : vector<1x16x16xbf16> to vector<16x16xbf16>
    %309 = arith.truncf %306 : vector<256x16xf32> to vector<256x16xbf16>
    %cst_149 = arith.constant dense<0.000000e+00> : vector<16x256xf32>
    %310 = tpu.matmul %308, %309, %cst_149 {dimension_numbers = #tpu.dot_dimension_numbers<[1], [1], [0], [0], [0, 0, 1, 0], [], []>} : vector<16x16xbf16>, vector<256x16xbf16>, vector<16x256xf32> -> vector<16x256xf32>
    %311 = arith.addf %304, %310 : vector<16x256xf32>
    %312 = vector.extract_strided_slice %16 {offsets = [1, 0, 0], sizes = [16, 16, 4], strides = [1, 1, 1]} : vector<18x18x4xf32> to vector<16x16x4xf32>
    %313 = vector.shape_cast %312 : vector<16x16x4xf32> to vector<256x4xf32>
    %c3_150 = arith.constant 3 : index
    %c0_151 = arith.constant 0 : index
    %c0_152 = arith.constant 0 : index
    %314 = vector.load %arg6[%c3_150, %c0_151, %c0_152] : memref<9x16x36xbf16, #tpu.memory_space<vmem>>, vector<1x16x4xbf16>
    %315 = vector.shape_cast %314 : vector<1x16x4xbf16> to vector<16x4xbf16>
    %316 = arith.truncf %313 : vector<256x4xf32> to vector<256x4xbf16>
    %cst_153 = arith.constant dense<0.000000e+00> : vector<16x256xf32>
    %317 = tpu.matmul %315, %316, %cst_153 {dimension_numbers = #tpu.dot_dimension_numbers<[1], [1], [0], [0], [0, 0, 1, 0], [], []>} : vector<16x4xbf16>, vector<256x4xbf16>, vector<16x256xf32> -> vector<16x256xf32>
    %318 = arith.addf %311, %317 : vector<16x256xf32>
    %319 = vector.extract_strided_slice %100 {offsets = [1, 0, 0], sizes = [16, 16, 16], strides = [1, 1, 1]} : vector<18x18x16xf32> to vector<16x16x16xf32>
    %320 = vector.shape_cast %319 : vector<16x16x16xf32> to vector<256x16xf32>
    %c3_154 = arith.constant 3 : index
    %c0_155 = arith.constant 0 : index
    %c4_156 = arith.constant 4 : index
    %321 = vector.load %arg6[%c3_154, %c0_155, %c4_156] : memref<9x16x36xbf16, #tpu.memory_space<vmem>>, vector<1x16x16xbf16>
    %322 = vector.shape_cast %321 : vector<1x16x16xbf16> to vector<16x16xbf16>
    %323 = arith.truncf %320 : vector<256x16xf32> to vector<256x16xbf16>
    %cst_157 = arith.constant dense<0.000000e+00> : vector<16x256xf32>
    %324 = tpu.matmul %322, %323, %cst_157 {dimension_numbers = #tpu.dot_dimension_numbers<[1], [1], [0], [0], [0, 0, 1, 0], [], []>} : vector<16x16xbf16>, vector<256x16xbf16>, vector<16x256xf32> -> vector<16x256xf32>
    %325 = arith.addf %318, %324 : vector<16x256xf32>
    %326 = vector.extract_strided_slice %247 {offsets = [1, 0, 0], sizes = [16, 16, 16], strides = [1, 1, 1]} : vector<18x18x16xf32> to vector<16x16x16xf32>
    %327 = vector.shape_cast %326 : vector<16x16x16xf32> to vector<256x16xf32>
    %c3_158 = arith.constant 3 : index
    %c0_159 = arith.constant 0 : index
    %c20_160 = arith.constant 20 : index
    %328 = vector.load %arg6[%c3_158, %c0_159, %c20_160] : memref<9x16x36xbf16, #tpu.memory_space<vmem>>, vector<1x16x16xbf16>
    %329 = vector.shape_cast %328 : vector<1x16x16xbf16> to vector<16x16xbf16>
    %330 = arith.truncf %327 : vector<256x16xf32> to vector<256x16xbf16>
    %cst_161 = arith.constant dense<0.000000e+00> : vector<16x256xf32>
    %331 = tpu.matmul %329, %330, %cst_161 {dimension_numbers = #tpu.dot_dimension_numbers<[1], [1], [0], [0], [0, 0, 1, 0], [], []>} : vector<16x16xbf16>, vector<256x16xbf16>, vector<16x256xf32> -> vector<16x256xf32>
    %332 = arith.addf %325, %331 : vector<16x256xf32>
    %333 = vector.extract_strided_slice %16 {offsets = [1, 1, 0], sizes = [16, 16, 4], strides = [1, 1, 1]} : vector<18x18x4xf32> to vector<16x16x4xf32>
    %334 = vector.shape_cast %333 : vector<16x16x4xf32> to vector<256x4xf32>
    %c4_162 = arith.constant 4 : index
    %c0_163 = arith.constant 0 : index
    %c0_164 = arith.constant 0 : index
    %335 = vector.load %arg6[%c4_162, %c0_163, %c0_164] : memref<9x16x36xbf16, #tpu.memory_space<vmem>>, vector<1x16x4xbf16>
    %336 = vector.shape_cast %335 : vector<1x16x4xbf16> to vector<16x4xbf16>
    %337 = arith.truncf %334 : vector<256x4xf32> to vector<256x4xbf16>
    %cst_165 = arith.constant dense<0.000000e+00> : vector<16x256xf32>
    %338 = tpu.matmul %336, %337, %cst_165 {dimension_numbers = #tpu.dot_dimension_numbers<[1], [1], [0], [0], [0, 0, 1, 0], [], []>} : vector<16x4xbf16>, vector<256x4xbf16>, vector<16x256xf32> -> vector<16x256xf32>
    %339 = arith.addf %332, %338 : vector<16x256xf32>
    %340 = vector.extract_strided_slice %100 {offsets = [1, 1, 0], sizes = [16, 16, 16], strides = [1, 1, 1]} : vector<18x18x16xf32> to vector<16x16x16xf32>
    %341 = vector.shape_cast %340 : vector<16x16x16xf32> to vector<256x16xf32>
    %c4_166 = arith.constant 4 : index
    %c0_167 = arith.constant 0 : index
    %c4_168 = arith.constant 4 : index
    %342 = vector.load %arg6[%c4_166, %c0_167, %c4_168] : memref<9x16x36xbf16, #tpu.memory_space<vmem>>, vector<1x16x16xbf16>
    %343 = vector.shape_cast %342 : vector<1x16x16xbf16> to vector<16x16xbf16>
    %344 = arith.truncf %341 : vector<256x16xf32> to vector<256x16xbf16>
    %cst_169 = arith.constant dense<0.000000e+00> : vector<16x256xf32>
    %345 = tpu.matmul %343, %344, %cst_169 {dimension_numbers = #tpu.dot_dimension_numbers<[1], [1], [0], [0], [0, 0, 1, 0], [], []>} : vector<16x16xbf16>, vector<256x16xbf16>, vector<16x256xf32> -> vector<16x256xf32>
    %346 = arith.addf %339, %345 : vector<16x256xf32>
    %347 = vector.extract_strided_slice %247 {offsets = [1, 1, 0], sizes = [16, 16, 16], strides = [1, 1, 1]} : vector<18x18x16xf32> to vector<16x16x16xf32>
    %348 = vector.shape_cast %347 : vector<16x16x16xf32> to vector<256x16xf32>
    %c4_170 = arith.constant 4 : index
    %c0_171 = arith.constant 0 : index
    %c20_172 = arith.constant 20 : index
    %349 = vector.load %arg6[%c4_170, %c0_171, %c20_172] : memref<9x16x36xbf16, #tpu.memory_space<vmem>>, vector<1x16x16xbf16>
    %350 = vector.shape_cast %349 : vector<1x16x16xbf16> to vector<16x16xbf16>
    %351 = arith.truncf %348 : vector<256x16xf32> to vector<256x16xbf16>
    %cst_173 = arith.constant dense<0.000000e+00> : vector<16x256xf32>
    %352 = tpu.matmul %350, %351, %cst_173 {dimension_numbers = #tpu.dot_dimension_numbers<[1], [1], [0], [0], [0, 0, 1, 0], [], []>} : vector<16x16xbf16>, vector<256x16xbf16>, vector<16x256xf32> -> vector<16x256xf32>
    %353 = arith.addf %346, %352 : vector<16x256xf32>
    %354 = vector.extract_strided_slice %16 {offsets = [1, 2, 0], sizes = [16, 16, 4], strides = [1, 1, 1]} : vector<18x18x4xf32> to vector<16x16x4xf32>
    %355 = vector.shape_cast %354 : vector<16x16x4xf32> to vector<256x4xf32>
    %c5_174 = arith.constant 5 : index
    %c0_175 = arith.constant 0 : index
    %c0_176 = arith.constant 0 : index
    %356 = vector.load %arg6[%c5_174, %c0_175, %c0_176] : memref<9x16x36xbf16, #tpu.memory_space<vmem>>, vector<1x16x4xbf16>
    %357 = vector.shape_cast %356 : vector<1x16x4xbf16> to vector<16x4xbf16>
    %358 = arith.truncf %355 : vector<256x4xf32> to vector<256x4xbf16>
    %cst_177 = arith.constant dense<0.000000e+00> : vector<16x256xf32>
    %359 = tpu.matmul %357, %358, %cst_177 {dimension_numbers = #tpu.dot_dimension_numbers<[1], [1], [0], [0], [0, 0, 1, 0], [], []>} : vector<16x4xbf16>, vector<256x4xbf16>, vector<16x256xf32> -> vector<16x256xf32>
    %360 = arith.addf %353, %359 : vector<16x256xf32>
    %361 = vector.extract_strided_slice %100 {offsets = [1, 2, 0], sizes = [16, 16, 16], strides = [1, 1, 1]} : vector<18x18x16xf32> to vector<16x16x16xf32>
    %362 = vector.shape_cast %361 : vector<16x16x16xf32> to vector<256x16xf32>
    %c5_178 = arith.constant 5 : index
    %c0_179 = arith.constant 0 : index
    %c4_180 = arith.constant 4 : index
    %363 = vector.load %arg6[%c5_178, %c0_179, %c4_180] : memref<9x16x36xbf16, #tpu.memory_space<vmem>>, vector<1x16x16xbf16>
    %364 = vector.shape_cast %363 : vector<1x16x16xbf16> to vector<16x16xbf16>
    %365 = arith.truncf %362 : vector<256x16xf32> to vector<256x16xbf16>
    %cst_181 = arith.constant dense<0.000000e+00> : vector<16x256xf32>
    %366 = tpu.matmul %364, %365, %cst_181 {dimension_numbers = #tpu.dot_dimension_numbers<[1], [1], [0], [0], [0, 0, 1, 0], [], []>} : vector<16x16xbf16>, vector<256x16xbf16>, vector<16x256xf32> -> vector<16x256xf32>
    %367 = arith.addf %360, %366 : vector<16x256xf32>
    %368 = vector.extract_strided_slice %247 {offsets = [1, 2, 0], sizes = [16, 16, 16], strides = [1, 1, 1]} : vector<18x18x16xf32> to vector<16x16x16xf32>
    %369 = vector.shape_cast %368 : vector<16x16x16xf32> to vector<256x16xf32>
    %c5_182 = arith.constant 5 : index
    %c0_183 = arith.constant 0 : index
    %c20_184 = arith.constant 20 : index
    %370 = vector.load %arg6[%c5_182, %c0_183, %c20_184] : memref<9x16x36xbf16, #tpu.memory_space<vmem>>, vector<1x16x16xbf16>
    %371 = vector.shape_cast %370 : vector<1x16x16xbf16> to vector<16x16xbf16>
    %372 = arith.truncf %369 : vector<256x16xf32> to vector<256x16xbf16>
    %cst_185 = arith.constant dense<0.000000e+00> : vector<16x256xf32>
    %373 = tpu.matmul %371, %372, %cst_185 {dimension_numbers = #tpu.dot_dimension_numbers<[1], [1], [0], [0], [0, 0, 1, 0], [], []>} : vector<16x16xbf16>, vector<256x16xbf16>, vector<16x256xf32> -> vector<16x256xf32>
    %374 = arith.addf %367, %373 : vector<16x256xf32>
    %375 = vector.extract_strided_slice %16 {offsets = [2, 0, 0], sizes = [16, 16, 4], strides = [1, 1, 1]} : vector<18x18x4xf32> to vector<16x16x4xf32>
    %376 = vector.shape_cast %375 : vector<16x16x4xf32> to vector<256x4xf32>
    %c6_186 = arith.constant 6 : index
    %c0_187 = arith.constant 0 : index
    %c0_188 = arith.constant 0 : index
    %377 = vector.load %arg6[%c6_186, %c0_187, %c0_188] : memref<9x16x36xbf16, #tpu.memory_space<vmem>>, vector<1x16x4xbf16>
    %378 = vector.shape_cast %377 : vector<1x16x4xbf16> to vector<16x4xbf16>
    %379 = arith.truncf %376 : vector<256x4xf32> to vector<256x4xbf16>
    %cst_189 = arith.constant dense<0.000000e+00> : vector<16x256xf32>
    %380 = tpu.matmul %378, %379, %cst_189 {dimension_numbers = #tpu.dot_dimension_numbers<[1], [1], [0], [0], [0, 0, 1, 0], [], []>} : vector<16x4xbf16>, vector<256x4xbf16>, vector<16x256xf32> -> vector<16x256xf32>
    %381 = arith.addf %374, %380 : vector<16x256xf32>
    %382 = vector.extract_strided_slice %100 {offsets = [2, 0, 0], sizes = [16, 16, 16], strides = [1, 1, 1]} : vector<18x18x16xf32> to vector<16x16x16xf32>
    %383 = vector.shape_cast %382 : vector<16x16x16xf32> to vector<256x16xf32>
    %c6_190 = arith.constant 6 : index
    %c0_191 = arith.constant 0 : index
    %c4_192 = arith.constant 4 : index
    %384 = vector.load %arg6[%c6_190, %c0_191, %c4_192] : memref<9x16x36xbf16, #tpu.memory_space<vmem>>, vector<1x16x16xbf16>
    %385 = vector.shape_cast %384 : vector<1x16x16xbf16> to vector<16x16xbf16>
    %386 = arith.truncf %383 : vector<256x16xf32> to vector<256x16xbf16>
    %cst_193 = arith.constant dense<0.000000e+00> : vector<16x256xf32>
    %387 = tpu.matmul %385, %386, %cst_193 {dimension_numbers = #tpu.dot_dimension_numbers<[1], [1], [0], [0], [0, 0, 1, 0], [], []>} : vector<16x16xbf16>, vector<256x16xbf16>, vector<16x256xf32> -> vector<16x256xf32>
    %388 = arith.addf %381, %387 : vector<16x256xf32>
    %389 = vector.extract_strided_slice %247 {offsets = [2, 0, 0], sizes = [16, 16, 16], strides = [1, 1, 1]} : vector<18x18x16xf32> to vector<16x16x16xf32>
    %390 = vector.shape_cast %389 : vector<16x16x16xf32> to vector<256x16xf32>
    %c6_194 = arith.constant 6 : index
    %c0_195 = arith.constant 0 : index
    %c20_196 = arith.constant 20 : index
    %391 = vector.load %arg6[%c6_194, %c0_195, %c20_196] : memref<9x16x36xbf16, #tpu.memory_space<vmem>>, vector<1x16x16xbf16>
    %392 = vector.shape_cast %391 : vector<1x16x16xbf16> to vector<16x16xbf16>
    %393 = arith.truncf %390 : vector<256x16xf32> to vector<256x16xbf16>
    %cst_197 = arith.constant dense<0.000000e+00> : vector<16x256xf32>
    %394 = tpu.matmul %392, %393, %cst_197 {dimension_numbers = #tpu.dot_dimension_numbers<[1], [1], [0], [0], [0, 0, 1, 0], [], []>} : vector<16x16xbf16>, vector<256x16xbf16>, vector<16x256xf32> -> vector<16x256xf32>
    %395 = arith.addf %388, %394 : vector<16x256xf32>
    %396 = vector.extract_strided_slice %16 {offsets = [2, 1, 0], sizes = [16, 16, 4], strides = [1, 1, 1]} : vector<18x18x4xf32> to vector<16x16x4xf32>
    %397 = vector.shape_cast %396 : vector<16x16x4xf32> to vector<256x4xf32>
    %c7_198 = arith.constant 7 : index
    %c0_199 = arith.constant 0 : index
    %c0_200 = arith.constant 0 : index
    %398 = vector.load %arg6[%c7_198, %c0_199, %c0_200] : memref<9x16x36xbf16, #tpu.memory_space<vmem>>, vector<1x16x4xbf16>
    %399 = vector.shape_cast %398 : vector<1x16x4xbf16> to vector<16x4xbf16>
    %400 = arith.truncf %397 : vector<256x4xf32> to vector<256x4xbf16>
    %cst_201 = arith.constant dense<0.000000e+00> : vector<16x256xf32>
    %401 = tpu.matmul %399, %400, %cst_201 {dimension_numbers = #tpu.dot_dimension_numbers<[1], [1], [0], [0], [0, 0, 1, 0], [], []>} : vector<16x4xbf16>, vector<256x4xbf16>, vector<16x256xf32> -> vector<16x256xf32>
    %402 = arith.addf %395, %401 : vector<16x256xf32>
    %403 = vector.extract_strided_slice %100 {offsets = [2, 1, 0], sizes = [16, 16, 16], strides = [1, 1, 1]} : vector<18x18x16xf32> to vector<16x16x16xf32>
    %404 = vector.shape_cast %403 : vector<16x16x16xf32> to vector<256x16xf32>
    %c7_202 = arith.constant 7 : index
    %c0_203 = arith.constant 0 : index
    %c4_204 = arith.constant 4 : index
    %405 = vector.load %arg6[%c7_202, %c0_203, %c4_204] : memref<9x16x36xbf16, #tpu.memory_space<vmem>>, vector<1x16x16xbf16>
    %406 = vector.shape_cast %405 : vector<1x16x16xbf16> to vector<16x16xbf16>
    %407 = arith.truncf %404 : vector<256x16xf32> to vector<256x16xbf16>
    %cst_205 = arith.constant dense<0.000000e+00> : vector<16x256xf32>
    %408 = tpu.matmul %406, %407, %cst_205 {dimension_numbers = #tpu.dot_dimension_numbers<[1], [1], [0], [0], [0, 0, 1, 0], [], []>} : vector<16x16xbf16>, vector<256x16xbf16>, vector<16x256xf32> -> vector<16x256xf32>
    %409 = arith.addf %402, %408 : vector<16x256xf32>
    %410 = vector.extract_strided_slice %247 {offsets = [2, 1, 0], sizes = [16, 16, 16], strides = [1, 1, 1]} : vector<18x18x16xf32> to vector<16x16x16xf32>
    %411 = vector.shape_cast %410 : vector<16x16x16xf32> to vector<256x16xf32>
    %c7_206 = arith.constant 7 : index
    %c0_207 = arith.constant 0 : index
    %c20_208 = arith.constant 20 : index
    %412 = vector.load %arg6[%c7_206, %c0_207, %c20_208] : memref<9x16x36xbf16, #tpu.memory_space<vmem>>, vector<1x16x16xbf16>
    %413 = vector.shape_cast %412 : vector<1x16x16xbf16> to vector<16x16xbf16>
    %414 = arith.truncf %411 : vector<256x16xf32> to vector<256x16xbf16>
    %cst_209 = arith.constant dense<0.000000e+00> : vector<16x256xf32>
    %415 = tpu.matmul %413, %414, %cst_209 {dimension_numbers = #tpu.dot_dimension_numbers<[1], [1], [0], [0], [0, 0, 1, 0], [], []>} : vector<16x16xbf16>, vector<256x16xbf16>, vector<16x256xf32> -> vector<16x256xf32>
    %416 = arith.addf %409, %415 : vector<16x256xf32>
    %417 = vector.extract_strided_slice %16 {offsets = [2, 2, 0], sizes = [16, 16, 4], strides = [1, 1, 1]} : vector<18x18x4xf32> to vector<16x16x4xf32>
    %418 = vector.shape_cast %417 : vector<16x16x4xf32> to vector<256x4xf32>
    %c8_210 = arith.constant 8 : index
    %c0_211 = arith.constant 0 : index
    %c0_212 = arith.constant 0 : index
    %419 = vector.load %arg6[%c8_210, %c0_211, %c0_212] : memref<9x16x36xbf16, #tpu.memory_space<vmem>>, vector<1x16x4xbf16>
    %420 = vector.shape_cast %419 : vector<1x16x4xbf16> to vector<16x4xbf16>
    %421 = arith.truncf %418 : vector<256x4xf32> to vector<256x4xbf16>
    %cst_213 = arith.constant dense<0.000000e+00> : vector<16x256xf32>
    %422 = tpu.matmul %420, %421, %cst_213 {dimension_numbers = #tpu.dot_dimension_numbers<[1], [1], [0], [0], [0, 0, 1, 0], [], []>} : vector<16x4xbf16>, vector<256x4xbf16>, vector<16x256xf32> -> vector<16x256xf32>
    %423 = arith.addf %416, %422 : vector<16x256xf32>
    %424 = vector.extract_strided_slice %100 {offsets = [2, 2, 0], sizes = [16, 16, 16], strides = [1, 1, 1]} : vector<18x18x16xf32> to vector<16x16x16xf32>
    %425 = vector.shape_cast %424 : vector<16x16x16xf32> to vector<256x16xf32>
    %c8_214 = arith.constant 8 : index
    %c0_215 = arith.constant 0 : index
    %c4_216 = arith.constant 4 : index
    %426 = vector.load %arg6[%c8_214, %c0_215, %c4_216] : memref<9x16x36xbf16, #tpu.memory_space<vmem>>, vector<1x16x16xbf16>
    %427 = vector.shape_cast %426 : vector<1x16x16xbf16> to vector<16x16xbf16>
    %428 = arith.truncf %425 : vector<256x16xf32> to vector<256x16xbf16>
    %cst_217 = arith.constant dense<0.000000e+00> : vector<16x256xf32>
    %429 = tpu.matmul %427, %428, %cst_217 {dimension_numbers = #tpu.dot_dimension_numbers<[1], [1], [0], [0], [0, 0, 1, 0], [], []>} : vector<16x16xbf16>, vector<256x16xbf16>, vector<16x256xf32> -> vector<16x256xf32>
    %430 = arith.addf %423, %429 : vector<16x256xf32>
    %431 = vector.extract_strided_slice %247 {offsets = [2, 2, 0], sizes = [16, 16, 16], strides = [1, 1, 1]} : vector<18x18x16xf32> to vector<16x16x16xf32>
    %432 = vector.shape_cast %431 : vector<16x16x16xf32> to vector<256x16xf32>
    %c8_218 = arith.constant 8 : index
    %c0_219 = arith.constant 0 : index
    %c20_220 = arith.constant 20 : index
    %433 = vector.load %arg6[%c8_218, %c0_219, %c20_220] : memref<9x16x36xbf16, #tpu.memory_space<vmem>>, vector<1x16x16xbf16>
    %434 = vector.shape_cast %433 : vector<1x16x16xbf16> to vector<16x16xbf16>
    %435 = arith.truncf %432 : vector<256x16xf32> to vector<256x16xbf16>
    %cst_221 = arith.constant dense<0.000000e+00> : vector<16x256xf32>
    %436 = tpu.matmul %434, %435, %cst_221 {dimension_numbers = #tpu.dot_dimension_numbers<[1], [1], [0], [0], [0, 0, 1, 0], [], []>} : vector<16x16xbf16>, vector<256x16xbf16>, vector<16x256xf32> -> vector<16x256xf32>
    %437 = arith.addf %430, %436 : vector<16x256xf32>
    %c0_222 = arith.constant 0 : index
    %c0_223 = arith.constant 0 : index
    %438 = vector.load %arg7[%c0_222, %c0_223] : memref<16x1xf32, #tpu.memory_space<vmem>>, vector<16x1xf32>
    %439 = vector.broadcast %438 : vector<16x1xf32> to vector<16x256xf32>
    %440 = arith.addf %437, %439 : vector<16x256xf32>
    %cst_224 = arith.constant 0.000000e+00 : f32
    %441 = vector.broadcast %cst_224 : f32 to vector<16x256xf32>
    %442 = arith.maximumf %440, %441 : vector<16x256xf32>
    %443 = tpu.concatenate %1, %85, %232, %442 in 0 : vector<4x256xf32>, vector<16x256xf32>, vector<16x256xf32>, vector<16x256xf32> -> vector<52x256xf32>
    %c0_225 = arith.constant 0 : index
    %c0_226 = arith.constant 0 : index
    %c0_227 = arith.constant 0 : index
    %444 = vector.load %arg8[%c0_225, %c0_226, %c0_227] : memref<1x52x256xf32, #tpu.memory_space<vmem>>, vector<1x52x256xf32>
    %445 = vector.shape_cast %444 : vector<1x52x256xf32> to vector<52x256xf32>
    %446 = vector.shape_cast %443 : vector<52x256xf32> to vector<1x52x256xf32>
    tpu.vector_store %arg8[%c0_225, %c0_226, %c0_227], %446 {strides = array<i32>} : memref<1x52x256xf32, #tpu.memory_space<vmem>>, vector<1x52x256xf32>,
    return
  }
  func.func @transform_0(%arg0: i32) -> (i32, i32, i32) {
    %c0_i32 = arith.constant 0 : i32
    %c0_i32_0 = arith.constant 0 : i32
    %c0_i32_1 = arith.constant 0 : i32
    return %arg0, %c0_i32, %c0_i32_0 : i32, i32, i32
  }
  func.func @transform_1(%arg0: i32) -> (i32, i32, i32) {
    %c0_i32 = arith.constant 0 : i32
    %c0_i32_0 = arith.constant 0 : i32
    %c0_i32_1 = arith.constant 0 : i32
    %c0_i32_2 = arith.constant 0 : i32
    return %c0_i32, %c0_i32_0, %c0_i32_1 : i32, i32, i32
  }
  func.func @transform_2(%arg0: i32) -> (i32, i32) {
    %c0_i32 = arith.constant 0 : i32
    %c0_i32_0 = arith.constant 0 : i32
    %c0_i32_1 = arith.constant 0 : i32
    return %c0_i32, %c0_i32_0 : i32, i32
  }
  func.func @transform_3(%arg0: i32) -> (i32, i32, i32) {
    %c0_i32 = arith.constant 0 : i32
    %c0_i32_0 = arith.constant 0 : i32
    %c0_i32_1 = arith.constant 0 : i32
    %c0_i32_2 = arith.constant 0 : i32
    return %c0_i32, %c0_i32_0, %c0_i32_1 : i32, i32, i32
  }
  func.func @transform_4(%arg0: i32) -> (i32, i32) {
    %c0_i32 = arith.constant 0 : i32
    %c0_i32_0 = arith.constant 0 : i32
    %c0_i32_1 = arith.constant 0 : i32
    return %c0_i32, %c0_i32_0 : i32, i32
  }
  func.func @transform_5(%arg0: i32) -> (i32, i32, i32) {
    %c0_i32 = arith.constant 0 : i32
    %c0_i32_0 = arith.constant 0 : i32
    %c0_i32_1 = arith.constant 0 : i32
    %c0_i32_2 = arith.constant 0 : i32
    return %c0_i32, %c0_i32_0, %c0_i32_1 : i32, i32, i32
  }
  func.func @transform_6(%arg0: i32) -> (i32, i32) {
    %c0_i32 = arith.constant 0 : i32
    %c0_i32_0 = arith.constant 0 : i32
    %c0_i32_1 = arith.constant 0 : i32
    return %c0_i32, %c0_i32_0 : i32, i32
  }
  func.func @transform_7(%arg0: i32) -> (i32, i32, i32) {
    %c0_i32 = arith.constant 0 : i32
    %c0_i32_0 = arith.constant 0 : i32
    %c0_i32_1 = arith.constant 0 : i32
    return %arg0, %c0_i32, %c0_i32_0 : i32, i32, i32
  }
}

</mosaic_0001>

<bundles_post_ra>
// kernel: tpu_custom_call.1
= control target key start
LH: loop header
LB: loop body
LE: loop exit
PB: predicated region body
PF: predicated region fallthrough
CT: control target
= control target key end

     0   :  { %12 = vsyncpa [#allocation3], 0  ;;  %s12317_s0 = inlined_call_operand.hbm [shape: f32[2,4,256], index: 0, kind: input, shape index: {}]   ;;  %s12318_s1 = inlined_call_operand.vmem [shape: bf16[9,16,4], index: 1, kind: input, shape index: {}]   ;;  %s12319_s2 = inlined_call_operand.vmem [shape: f32[16,1], index: 2, kind: input, shape index: {}]   ;;  %s12320_s3 = inlined_call_operand.vmem [shape: bf16[9,16,20], index: 3, kind: input, shape index: {}]   ;;  %s12321_s4 = inlined_call_operand.vmem [shape: f32[16,1], index: 4, kind: input, shape index: {}]   ;;  %s12322_s5 = inlined_call_operand.vmem [shape: bf16[9,16,36], index: 5, kind: input, shape index: {}]   ;;  %s12323_s6 = inlined_call_operand.vmem [shape: f32[16,1], index: 6, kind: input, shape index: {}]   ;;  %s12324_s7 = inlined_call_operand.vmem [shape: f32[2,52,256], index: 7, kind: output, shape index: {}]  }
   0x1   :  { %14 = vsyncpa [#allocation3 + $0x1], 0  ;;  %s8942_s24 = smov 0   ;;  %s8944_s25 = smov 0  }
   0x2   :  { %s8946_s26 = smov 0   ;;  %s8948_s27 = smov 0  }
   0x3 LB: > { %s8961_s28 = sadd.s32 4294967295, %s8894_s27   ;;  %s8964_s29 = sadd.s32 1, %s8894_s27   ;;  %s8894_s27 = sphi %s8948_s27, %s13385_s27   ;;  %s8890_s26 = sphi %s8946_s26, %s13384_s26   ;;  %s8886_s25 = sphi %s8944_s25, %s13383_s25   ;;  %s8882_s24 = sphi %s8942_s24, %s13382_s24  }
   0x4   : > { %s24_s30 = ssub.s32 %s8894_s27, %s8964_s29  ;;  %s27_s8 = sadd.s32 1, %s8890_s26 }
   0x5   : > { %p25_p0 = scmp.eq.s32.totalorder %s24_s30, 0  ;;  %p34_p1 = scmp.ne.s32.totalorder %s8890_s26, %s8886_s25 }
   0x6   : > { %p35_p2 = scmp.eq.s32.totalorder %s8894_s27, 0  ;;  %p40_p3 = scmp.ne.s32.totalorder %s8886_s25, %s8882_s24 }
   0x7   : > { %s8974_s9 = scalar_select %p25_p0, %s8890_s26, %s27_s8  }
   0x8   : > { %p36_p4 = por %p35_p2, %p34_p1  ;;  %p41_p5 = scmp.eq.s32.totalorder %s8961_s28, 0 }
   0x9   : > { %p8753_p6 = scmp.lt.s32.totalorder %s8894_s27, 2  ;;  %s234_s11 = sand.u32 1, %s8890_s26  }
   0xa   : > { %p8978_p7 = por %p41_p5, %p40_p3  ;;  %s6634_s12 = sshll.u32 %s234_s11, 3 }
   0xb   : > { %s6874_s13 = sshll.u32 %s8894_s27, 7  ;;  %s238_s17 = scalar_lea.vmem [#allocation2], %s6634_s12 }
   0xc   : > { %s8987_s16 = scalar_lea.hbm %s12317_s0, %s6874_s13  ;;  %s246_s18 = sshll.u32 %s238_s17, 4  ;;  %s8989_s18 = int_to_ptr.vmem [resolvable:$true] %s246_s18 }
   0xd   : > { %p8991_p8 = pnand %p8753_p6, %p36_p4  ;;  %s235_s20 = scalar_lea.sflag [#allocation3], %s234_s11 }
   0xe   : > { %s8830_s21 = scalar_lea.hbm %s8987_s16, 128  ;;  %s8835_s24 = scalar_lea.hbm %s12317_s0, 256 }
   0xf   : > { %p8831_p11 = scmp.ne.s32.totalorder %s8987_s16, %s8830_s21  ;;  %p8832_p12 = pneg %p8991_p8 }
  0x10   : > { %p8836_p1 = scmp.lt.u32.totalorder %s8987_s16, %s12317_s0  ;;  %p8837_p2 = scmp.lt.u32.totalorder %s8835_s24, %s8830_s21 }
  0x11   : > { %p8833_p13 = pnand %p8832_p12, %p8831_p11  ;;  %p8839_p4 = scmp.lt.u32.totalorder %s8830_s21, %s8987_s16 }
  0x12   : > { %p8838_p3 = por %p8837_p2, %p8836_p1 }
  0x13   : > { %p8834_p0 = pneg %p8833_p13 }
  0x14   : > { %p8840_p5 = por %p8839_p4, %p8838_p3 }
  0x16   : > { %p8841_p6 = pnand %p8840_p5, %p8834_p0 }
  0x18   : > { %8844 = shalt.err (!%p8841_p6)
}
  0x19   : > { %s8845_s11 = scalar_lea.vmem %s8989_s18, 128  ;;  %s8896_s12 = smov [#allocation2]  }
  0x1a   : > { %p8846_p11 = scmp.ne.s32.totalorder %s8989_s18, %s8845_s11  ;;  %s8850_s13 = sshll.u32 %s8896_s12, 4  ;;  %s8851_s13 = int_to_ptr.vmem [resolvable:$false] %s8850_s13 }
  0x1b   : > { %s8852_s14 = scalar_lea.vmem %s8851_s13, 256  ;;  %p8853_p10 = scmp.lt.s32.totalorder %s8989_s18, %s8851_s13 }
  0x1c   : > { %p8848_p13 = pnand %p8846_p11, %p8832_p12  ;;  %p8854_p1 = scmp.lt.s32.totalorder %s8852_s14, %s8845_s11 }
  0x1e   : > { %p8849_p9 = pneg %p8848_p13  ;;  %p8855_p2 = por %p8854_p1, %p8853_p10 }
  0x20   : > { %p8856_p3 = pnand %p8855_p2, %p8849_p9 }
  0x22   : > { %8859 = shalt.err (!%p8856_p3)
}
  0x23   : > { %8752 = dma.hbm_to_vmem [thread:$0]  (!%p8991_p8), %s8987_s16, 128, %s8989_s18, %s235_s20  }
  0x24   : > { %p12692_p0 = scmp.lt.s32.totalorder %s8894_s27, 3  ;;  %p12693_p4 = scmp.ge.s32.totalorder %s8894_s27, 1 }
  0x26   : > { %p252_p12 = pnand %p12693_p4, %p12692_p0 }
  0x28   : > { %255 = sbr.rel (%p252_p12) target bundleno = 5263 (0x148f), region = 48 }
  0x2f   : > { %s257_s15 = sand.u32 1, %s8886_s25  }
  0x30   : > { %s9027_s17 = sshll.u32 %s257_s15, 3  ;;  %s258_s21 = scalar_lea.sflag [#allocation3], %s257_s15 }
  0x31   : > { %s261_s22 = scalar_lea.vmem [#allocation2], %s9027_s17 }
  0x32   : > { %8877 = dma.done.wait (%p8978_p7), %s258_s21, 128  }
  0x33   : > { %8879 = vsyncadd (%p8978_p7), %s258_s21, 4294967168  ;;  %v299_v0 = vlaneseq  ;;  %v298_v1 = vld [vmem:[%s261_s22] sm:$0xff]  ;;  %vm470_vm1 = vcmask 1043456   ;;  %v8897_v5 = vmov 0.0   ;;  %v12694_v7 = vmov 0  ;;  %p292_p7 = scmp.lt.s32.totalorder %s8961_s28, 1 }
  0x34   : > { %309 = vxpose.xlu0.b32.start.end [1/1] (short) %v298_v1, 128  ;;  %v9042_v8 = vcombine.high %v298_v1, %v298_v1  ;;  %vm373_vm4 = vcmask 31744   ;;  %v9080_v41 = vld [vmem:[%s12318_s1 + $0x8] sm:$0xff]   ;;  %vm763_vm5 = vcmask 1040384   ;;  %vm971_vm6 = vcmask 1046528   ;;  %s8901_s21 = smov 108  }
  0x35   : > { %v300_v2 = vshrl.u32 %v299_v0, 7  ;;  %v302_v3 = vand.u32 127, %v299_v0  ;;  %vm1287_vm7 = vcmask 1045504   ;;  %s13387_s28 = smov (!%p292_p7, %s8961_s28), 1  ;;  %vm1975_vm8 = vcmask 130048  }
  0x36   : > { %12697 = vst [vmem:[#allocation6_spill] sm:$0xff] %v9042_v8  ;;  %s8746_s23 = smul.u32 112, %s13387_s28 }
  0x37   : > { %vm303_vm0 = vcmp.eq.s32.totalorder %v300_v2, %v302_v3  ;;  %v1907_v4 = vadd.s32 8, %v300_v2 }
  0x38   : > { %v6640_v6 = vsel %vm303_vm0, 1.0, %v8897_v5  ;;  %s9823_s8 = scalar_lea.vmem %s12324_s7, %s8746_s23 }
  0x39   : > { %7948 = vmatprep.subr.msk.mxu0 %vm470_vm1, %v6640_v6  ;;  %vm1908_vm2 = vcmp.eq.s32.totalorder %v1907_v4, %v302_v3 }
  0x3a   : > { %vm9037_vm3 = vmpackc.low %vm1908_vm2, %vm303_vm0  ;;  %7949 = vmatpush3.msk.msra.mxu0 %vm470_vm1, %v6640_v6 }
  0x3b   : > { %v12695_v7 = vsel %vm9037_vm3, 4294967295, %v12694_v7 }
  0x3c   : > { %12696 = vst [vmem:[#allocation5_spill] sm:$0xff] %v12695_v7 }
  0x71   : > { %341 = vxpose.xlu0.b32.start.end [1/1] (short) %v9042_v8, 128 }
  0xb4   : > { %v325_v9 = vpop.trf.xlu0 }
  0xb5   : > { %7950 = vmatprep.mubr.msk.f32.mxu0 %vm373_vm4, %v325_v9 }
  0xb8   : > { %v326_v10 = vpop.trf.xlu0 }
  0xb9   : > { %7951 = vmatmul.mubr.msk.f32.vlgmr.msra.gmra.mrb[0].mxu0 %vm373_vm4, %v326_v10 }
  0xbc   : > { %v327_v11 = vpop.trf.xlu0 }
  0xbd   : > { %7953 = vmatprep.mubr.msk.f32.mxu0 %vm373_vm4, %v327_v11 }
  0xc0   : > { %v328_v12 = vpop.trf.xlu0 }
  0xc1   : > { %7954 = vmatmul.mubr.msk.f32.gmra.mrb[2].mxu0 %vm373_vm4, %v328_v12 }
  0xc4   : > { %v329_v13 = vpop.trf.xlu0 }
  0xc5   : > { %7956 = vmatprep.mubr.msk.f32.mxu0 %vm373_vm4, %v329_v13 }
  0xc8   : > { %v330_v14 = vpop.trf.xlu0 }
  0xc9   : > { %7957 = vmatmul.mubr.msk.f32.gmra.mrb[4].mxu0 %vm373_vm4, %v330_v14 }
  0xcc   : > { %v331_v15 = vpop.trf.xlu0 }
  0xcd   : > { %7959 = vmatprep.mubr.msk.f32.mxu0 %vm373_vm4, %v331_v15 }
  0xd0   : > { %v332_v16 = vpop.trf.xlu0 }
  0xd1   : > { %7960 = vmatmul.mubr.msk.f32.gmra.mrb[6].mxu0 %vm373_vm4, %v332_v16 }
  0xd4   : > { %v333_v17 = vpop.trf.xlu0 }
  0xd5   : > { %7962 = vmatprep.mubr.msk.f32.mxu0 %vm373_vm4, %v333_v17 }
  0xd8   : > { %v334_v18 = vpop.trf.xlu0 }
  0xd9   : > { %7963 = vmatmul.mubr.msk.f32.gmra.mrb[8].mxu0 %vm373_vm4, %v334_v18 }
  0xdc   : > { %v335_v19 = vpop.trf.xlu0 }
  0xdd   : > { %7965 = vmatprep.mubr.msk.f32.mxu0 %vm373_vm4, %v335_v19 }
  0xe0   : > { %v336_v20 = vpop.trf.xlu0 }
  0xe1   : > { %7966 = vmatmul.mubr.msk.f32.gmra.mrb[10].mxu0 %vm373_vm4, %v336_v20 }
  0xe4   : > { %v337_v21 = vpop.trf.xlu0 }
  0xe5   : > { %7968 = vmatprep.mubr.msk.f32.mxu0 %vm373_vm4, %v337_v21 }
  0xe8   : > { %v338_v22 = vpop.trf.xlu0 }
  0xe9   : > { %7969 = vmatmul.mubr.msk.f32.gmra.mrb[12].mxu0 %vm373_vm4, %v338_v22 }
  0xec   : > { %v339_v23 = vpop.trf.xlu0 }
  0xed   : > { %7971 = vmatprep.mubr.msk.f32.mxu0 %vm373_vm4, %v339_v23 }
  0xf0   : > { %v340_v24 = vpop.trf.xlu0 }
  0xf1   : > { %7972 = vmatmul.mubr.msk.f32.gmra.mrb[14].mxu0 %vm373_vm4, %v340_v24 }
  0xf4   : > { %v357_v25 = vpop.trf.xlu0 }
  0xf5   : > { %7974 = vmatprep.mubr.msk.f32.mxu0 %vm373_vm4, %v357_v25 }
  0xf8   : > { %v358_v26 = vpop.trf.xlu0 }
  0xf9   : > { %7975 = vmatmul.mubr.msk.f32.gmra.mrb[16].mxu0 %vm373_vm4, %v358_v26 }
  0xfc   : > { %v359_v27 = vpop.trf.xlu0 }
  0xfd   : > { %7977 = vmatprep.mubr.msk.f32.mxu0 %vm373_vm4, %v359_v27 }
 0x100   : > { %v360_v28 = vpop.trf.xlu0 }
 0x101   : > { %7978 = vmatmul.mubr.msk.f32.gmra.mrb[18].mxu0 %vm373_vm4, %v360_v28 }
 0x104   : > { %v361_v29 = vpop.trf.xlu0 }
 0x105   : > { %7980 = vmatprep.mubr.msk.f32.mxu0 %vm373_vm4, %v361_v29 }
 0x108   : > { %v362_v30 = vpop.trf.xlu0 }
 0x109   : > { %7981 = vmatmul.mubr.msk.f32.gmra.mrb[20].mxu0 %vm373_vm4, %v362_v30 }
 0x10c   : > { %v363_v31 = vpop.trf.xlu0 }
 0x10d   : > { %7983 = vmatprep.mubr.msk.f32.mxu0 %vm373_vm4, %v363_v31 }
 0x110   : > { %v364_v32 = vpop.trf.xlu0 }
 0x111   : > { %7984 = vmatmul.mubr.msk.f32.gmra.mrb[22].mxu0 %vm373_vm4, %v364_v32 }
 0x114   : > { %v365_v33 = vpop.trf.xlu0 }
 0x115   : > { %7986 = vmatprep.mubr.msk.f32.mxu0 %vm373_vm4, %v365_v33 }
 0x118   : > { %v366_v34 = vpop.trf.xlu0 }
 0x119   : > { %7987 = vmatmul.mubr.msk.f32.gmra.mrb[24].mxu0 %vm373_vm4, %v366_v34 }
 0x11c   : > { %v367_v35 = vpop.trf.xlu0 }
 0x11d   : > { %7989 = vmatprep.mubr.msk.f32.mxu0 %vm373_vm4, %v367_v35 }
 0x120   : > { %v368_v36 = vpop.trf.xlu0 }
 0x121   : > { %7990 = vmatmul.mubr.msk.f32.gmra.mrb[26].mxu0 %vm373_vm4, %v368_v36 }
 0x124   : > { %v369_v37 = vpop.trf.xlu0 }
 0x125   : > { %7992 = vmatprep.mubr.msk.f32.mxu0 %vm373_vm4, %v369_v37 }
 0x128   : > { %v370_v38 = vpop.trf.xlu0 }
 0x129   : > { %7993 = vmatmul.mubr.msk.f32.gmra.mrb[28].mxu0 %vm373_vm4, %v370_v38 }
 0x12c   : > { %v371_v39 = vpop.trf.xlu0 }
 0x12d   : > { %7995 = vmatprep.mubr.msk.f32.mxu0 %vm373_vm4, %v371_v39 }
 0x130   : > { %v372_v40 = vpop.trf.xlu0 }
 0x131   : > { %7996 = vmatmul.mubr.msk.f32.gmra.mrb[30].mxu0 %vm373_vm4, %v372_v40 }
 0x132   : > { %6924 = vmatprep.mubr.msk.bf16.mxu0 %vm373_vm4, %v9080_v41 }
 0x18c   : > { %v7952_v42 = vpop.f32.mrb[0].mxu0 }
 0x18d   : > { %v768_v43 = vrot.slane %v7952_v42, 7  ;;  %v861_v44 = vrot.slane %v7952_v42, 5  ;;  %v540_v45 = vpop.f32.mrb[1].mxu0 }
 0x18e   : > { %v716_v46 = vrot.slane %v540_v45, 1  ;;  %v767_v47 = vrot.slane %v540_v45, 7 }
 0x18f   : > { %v909_v48 = vsel %vm763_vm5, %v768_v43, %v861_v44 }
 0x190   : > { %v980_v49 = vrot.slane %v909_v48, 1  ;;  %v1296_v50 = vrot.slane %v909_v48, 2  ;;  %v9086_v51 = vsel %vm763_vm5, %v767_v47, %v768_v43  ;;  %v9089_v52 = vsel %vm763_vm5, %v716_v46, %v767_v47 }
 0x191   : > { %v977_v54 = vrot.slane %v9089_v52, 1  ;;  %v978_v55 = vrot.slane %v9086_v51, 1  ;;  %v1293_v56 = vrot.slane %v9089_v52, 2  ;;  %v1294_v57 = vrot.slane %v9086_v51, 2 }
 0x193   : > { %v9098_v58 = vsel %vm971_vm6, %v977_v54, %v978_v55  ;;  %v9101_v59 = vsel %vm971_vm6, %v978_v55, %v980_v49  ;;  %v9106_v62 = vsel %vm1287_vm7, %v1293_v56, %v1294_v57  ;;  %v9109_v63 = vsel %vm1287_vm7, %v1294_v57, %v1296_v50 }
 0x194   : > { %v7955_v60 = vpop.f32.mrb[2].mxu0 }
 0x195   : > { %v765_v0 = vrot.slane %v7955_v60, 7  ;;  %v860_v1 = vrot.slane %v7955_v60, 5  ;;  %v550_v2 = vpop.f32.mrb[3].mxu0 }
 0x196   : > { %v715_v4 = vrot.slane %v550_v2, 1  ;;  %v764_v5 = vrot.slane %v550_v2, 7 }
 0x197   : > { %v908_v6 = vsel %vm763_vm5, %v765_v0, %v860_v1 }
 0x198   : > { %v975_v9 = vrot.slane %v908_v6, 1  ;;  %v1291_v10 = vrot.slane %v908_v6, 2  ;;  %v9115_v11 = vsel %vm763_vm5, %v764_v5, %v765_v0  ;;  %v9118_v12 = vsel %vm763_vm5, %v715_v4, %v764_v5 }
 0x199   : > { %v972_v14 = vrot.slane %v9118_v12, 1  ;;  %v973_v15 = vrot.slane %v9115_v11, 1  ;;  %v1288_v16 = vrot.slane %v9118_v12, 2  ;;  %v1289_v17 = vrot.slane %v9115_v11, 2 }
 0x19b   : > { %v9127_v18 = vsel %vm971_vm6, %v972_v14, %v973_v15  ;;  %v9130_v19 = vsel %vm971_vm6, %v973_v15, %v975_v9  ;;  %v9135_v21 = vsel %vm1287_vm7, %v1288_v16, %v1289_v17  ;;  %v9138_v22 = vsel %vm1287_vm7, %v1289_v17, %v1291_v10 }
 0x19c   : > { %v7958_v23 = vpop.f32.mrb[4].mxu0 }
 0x19d   : > { %v771_v25 = vrot.slane %v7958_v23, 7  ;;  %v862_v26 = vrot.slane %v7958_v23, 5  ;;  %v560_v27 = vpop.f32.mrb[5].mxu0 }
 0x19e   : > { %v717_v28 = vrot.slane %v560_v27, 1  ;;  %v770_v29 = vrot.slane %v560_v27, 7 }
 0x19f   : > { %v910_v30 = vsel %vm763_vm5, %v771_v25, %v862_v26 }
 0x1a0   : > { %v985_v31 = vrot.slane %v910_v30, 1  ;;  %v1301_v32 = vrot.slane %v910_v30, 2  ;;  %v9144_v33 = vsel %vm763_vm5, %v770_v29, %v771_v25  ;;  %v9147_v34 = vsel %vm763_vm5, %v717_v28, %v770_v29 }
 0x1a1   : > { %v982_v36 = vrot.slane %v9147_v34, 1  ;;  %v983_v37 = vrot.slane %v9144_v33, 1  ;;  %v1298_v38 = vrot.slane %v9147_v34, 2  ;;  %v1299_v39 = vrot.slane %v9144_v33, 2 }
 0x1a3   : > { %v9156_v40 = vsel %vm971_vm6, %v982_v36, %v983_v37  ;;  %v9159_v42 = vsel %vm971_vm6, %v983_v37, %v985_v31  ;;  %v9164_v44 = vsel %vm1287_vm7, %v1298_v38, %v1299_v39  ;;  %v9167_v45 = vsel %vm1287_vm7, %v1299_v39, %v1301_v32 }
 0x1a4   : > { %v7961_v46 = vpop.f32.mrb[6].mxu0 }
 0x1a5   : > { %v774_v48 = vrot.slane %v7961_v46, 7  ;;  %v863_v49 = vrot.slane %v7961_v46, 5  ;;  %v570_v50 = vpop.f32.mrb[7].mxu0 }
 0x1a6   : > { %v718_v54 = vrot.slane %v570_v50, 1  ;;  %v773_v55 = vrot.slane %v570_v50, 7 }
 0x1a7   : > { %v911_v56 = vsel %vm763_vm5, %v774_v48, %v863_v49 }
 0x1a8   : > { %v990_v57 = vrot.slane %v911_v56, 1  ;;  %v1306_v60 = vrot.slane %v911_v56, 2  ;;  %v9173_v0 = vsel %vm763_vm5, %v773_v55, %v774_v48  ;;  %v9176_v1 = vsel %vm763_vm5, %v718_v54, %v773_v55 }
 0x1a9   : > { %v987_v4 = vrot.slane %v9176_v1, 1  ;;  %v988_v5 = vrot.slane %v9173_v0, 1  ;;  %v1303_v6 = vrot.slane %v9176_v1, 2  ;;  %v1304_v9 = vrot.slane %v9173_v0, 2 }
 0x1ab   : > { %v9185_v10 = vsel %vm971_vm6, %v987_v4, %v988_v5  ;;  %v9188_v14 = vsel %vm971_vm6, %v988_v5, %v990_v57  ;;  %v9193_v16 = vsel %vm1287_vm7, %v1303_v6, %v1304_v9  ;;  %v9196_v17 = vsel %vm1287_vm7, %v1304_v9, %v1306_v60 }
 0x1ac   : > { %v7964_v23 = vpop.f32.mrb[8].mxu0 }
 0x1ad   : > { %v777_v26 = vrot.slane %v7964_v23, 7  ;;  %v864_v27 = vrot.slane %v7964_v23, 5  ;;  %v580_v28 = vpop.f32.mrb[9].mxu0 }
 0x1ae   : > { %v719_v29 = vrot.slane %v580_v28, 1  ;;  %v776_v30 = vrot.slane %v580_v28, 7 }
 0x1af   : > { %v912_v31 = vsel %vm763_vm5, %v777_v26, %v864_v27 }
 0x1b0   : > { %v995_v32 = vrot.slane %v912_v31, 1  ;;  %v1311_v36 = vrot.slane %v912_v31, 2  ;;  %v9202_v37 = vsel %vm763_vm5, %v776_v30, %v777_v26  ;;  %v9205_v38 = vsel %vm763_vm5, %v719_v29, %v776_v30 }
 0x1b1   : > { %v992_v46 = vrot.slane %v9205_v38, 1  ;;  %v993_v48 = vrot.slane %v9202_v37, 1  ;;  %v1308_v49 = vrot.slane %v9205_v38, 2  ;;  %v1309_v50 = vrot.slane %v9202_v37, 2 }
 0x1b3   : > { %v9214_v54 = vsel %vm971_vm6, %v992_v46, %v993_v48  ;;  %v9217_v55 = vsel %vm971_vm6, %v993_v48, %v995_v32  ;;  %v9222_v57 = vsel %vm1287_vm7, %v1308_v49, %v1309_v50  ;;  %v9225_v60 = vsel %vm1287_vm7, %v1309_v50, %v1311_v36 }
 0x1b4   : > { %v7967_v4 = vpop.f32.mrb[10].mxu0 }
 0x1b5   : > { %v780_v6 = vrot.slane %v7967_v4, 7  ;;  %v865_v9 = vrot.slane %v7967_v4, 5  ;;  %v590_v23 = vpop.f32.mrb[11].mxu0 }
 0x1b6   : > { %v720_v26 = vrot.slane %v590_v23, 1  ;;  %v779_v27 = vrot.slane %v590_v23, 7 }
 0x1b7   : > { %v913_v28 = vsel %vm763_vm5, %v780_v6, %v865_v9 }
 0x1b8   : > { %v1000_v29 = vrot.slane %v913_v28, 1  ;;  %v1316_v30 = vrot.slane %v913_v28, 2  ;;  %v9231_v31 = vsel %vm763_vm5, %v779_v27, %v780_v6  ;;  %v9234_v32 = vsel %vm763_vm5, %v720_v26, %v779_v27 }
 0x1b9   : > { %v997_v46 = vrot.slane %v9234_v32, 1  ;;  %v998_v48 = vrot.slane %v9231_v31, 1  ;;  %v1313_v49 = vrot.slane %v9234_v32, 2  ;;  %v1314_v50 = vrot.slane %v9231_v31, 2 }
 0x1bb   : > { %v9243_v4 = vsel %vm971_vm6, %v997_v46, %v998_v48  ;;  %v9246_v6 = vsel %vm971_vm6, %v998_v48, %v1000_v29  ;;  %v9251_v23 = vsel %vm1287_vm7, %v1313_v49, %v1314_v50  ;;  %v9254_v26 = vsel %vm1287_vm7, %v1314_v50, %v1316_v30 }
 0x1bc   : > { %v7970_v27 = vpop.f32.mrb[12].mxu0 }
 0x1bd   : > { %v783_v5 = vrot.slane %v7970_v27, 7  ;;  %v866_v25 = vrot.slane %v7970_v27, 5  ;;  %v600_v46 = vpop.f32.mrb[13].mxu0 }
 0x1be   : > { %v721_v47 = vrot.slane %v600_v46, 1  ;;  %v782_v3 = vrot.slane %v600_v46, 7 }
 0x1bf   : > { %v914_v29 = vsel %vm763_vm5, %v783_v5, %v866_v25 }
 0x1c0   : > { %v1005_v48 = vrot.slane %v914_v29, 1  ;;  %v1321_v24 = vrot.slane %v914_v29, 2  ;;  %v9260_v36 = vsel %vm763_vm5, %v782_v3, %v783_v5  ;;  %v9263_v49 = vsel %vm763_vm5, %v721_v47, %v782_v3 }
 0x1c1   : > { %v1002_v50 = vrot.slane %v9263_v49, 1  ;;  %v1003_v27 = vrot.slane %v9260_v36, 1  ;;  %v1318_v28 = vrot.slane %v9263_v49, 2  ;;  %v1319_v46 = vrot.slane %v9260_v36, 2 }
 0x1c3   : > { %v9272_v25 = vsel %vm971_vm6, %v1002_v50, %v1003_v27  ;;  %v9275_v5 = vsel %vm971_vm6, %v1003_v27, %v1005_v48  ;;  %v9280_v47 = vsel %vm1287_vm7, %v1318_v28, %v1319_v46  ;;  %v9283_v29 = vsel %vm1287_vm7, %v1319_v46, %v1321_v24 }
 0x1c4   : > { %12698 = vst [vmem:[#allocation7_spill] sm:$0xff] %v9280_v47  ;;  %v7973_v30 = vpop.f32.mrb[14].mxu0 }
 0x1c5   : > { %v786_v2 = vrot.slane %v7973_v30, 7  ;;  %v867_v35 = vrot.slane %v7973_v30, 5  ;;  %v610_v50 = vpop.f32.mrb[15].mxu0 }
 0x1c6   : > { %v722_v53 = vrot.slane %v610_v50, 1  ;;  %v785_v13 = vrot.slane %v610_v50, 7 }
 0x1c7   : > { %v915_v48 = vsel %vm763_vm5, %v786_v2, %v867_v35 }
 0x1c8   : > { %v1010_v27 = vrot.slane %v915_v48, 1  ;;  %v1326_v9 = vrot.slane %v915_v48, 2  ;;  %v787_v3 = vsel %vm763_vm5, %v785_v13, %v786_v2  ;;  %v899_v28 = vsel %vm763_vm5, %v722_v53, %v785_v13 }
 0x1c9   : > { %v1007_v56 = vrot.slane %v899_v28, 1  ;;  %v1008_v24 = vrot.slane %v787_v3, 1  ;;  %v1323_v46 = vrot.slane %v899_v28, 2  ;;  %v1324_v15 = vrot.slane %v787_v3, 2 }
 0x1ca   : > { %v9290_v43 = vpack.c.bf16 %v787_v3, %v899_v28  ;;  %v12702_v3 = vpack.c.bf16 %v9130_v19, %v9127_v18 }
 0x1cb   : > { %v1009_v39 = vsel %vm971_vm6, %v1007_v56, %v1008_v24  ;;  %v1011_v30 = vsel %vm971_vm6, %v1008_v24, %v1010_v27  ;;  %v1325_v50 = vsel %vm1287_vm7, %v1323_v46, %v1324_v15  ;;  %v1327_v35 = vsel %vm1287_vm7, %v1324_v15, %v1326_v9 }
 0x1cc   : > { %12699 = vst [vmem:[#allocation8_spill] sm:$0xff] %v9290_v43  ;;  %v7976_v61 = vpop.f32.mrb[16].mxu0  ;;  %v9296_v48 = vpack.c.bf16 %v1011_v30, %v1009_v39  ;;  %v9298_v2 = vpack.c.bf16 %v1327_v35, %v1325_v50  ;;  %v9304_v28 = vsel %vm373_vm4, %v12702_v3, 0 }
 0x1cd   : > { %v789_v53 = vrot.slane %v7976_v61, 7  ;;  %v868_v13 = vrot.slane %v7976_v61, 5  ;;  %v620_v20 = vpop.f32.mrb[17].mxu0  ;;  %12703 = vst [vmem:[#allocation11_spill] sm:$0xff] %v9304_v28 }
 0x1ce   : > { %12700 = vst [vmem:[#allocation9_spill] sm:$0xff] %v9296_v48  ;;  %12701 = vst [vmem:[#allocation10_spill] sm:$0xff] %v9298_v2  ;;  %v723_v56 = vrot.slane %v620_v20, 1  ;;  %v788_v27 = vrot.slane %v620_v20, 7  ;;  %8314 = vmatprep.subr.msk.bf16.mxu0 %vm373_vm4, %v9296_v48 }
 0x1cf   : > { %v916_v15 = vsel %vm763_vm5, %v789_v53, %v868_v13  ;;  %6909 = vmatpush3.bf16.xpose.msra.mxu0 %v9304_v28 }
 0x1d0   : > { %v1015_v39 = vrot.slane %v916_v15, 1  ;;  %v1331_v9 = vrot.slane %v916_v15, 2  ;;  %v790_v61 = vsel %vm763_vm5, %v788_v27, %v789_v53  ;;  %v900_v24 = vsel %vm763_vm5, %v723_v56, %v788_v27 }
 0x1d1   : > { %v9312_v46 = vpack.c.bf16 %v790_v61, %v900_v24  ;;  %v1012_v18 = vrot.slane %v900_v24, 1  ;;  %v1013_v19 = vrot.slane %v790_v61, 1  ;;  %v1328_v30 = vrot.slane %v900_v24, 2 }
 0x1d2   : > { %v1329_v50 = vrot.slane %v790_v61, 2 }
 0x1d3   : > { %12704 = vst [vmem:[#allocation12_spill] sm:$0xff] %v9312_v46  ;;  %v1014_v20 = vsel %vm971_vm6, %v1012_v18, %v1013_v19  ;;  %v1016_v35 = vsel %vm971_vm6, %v1013_v19, %v1015_v39  ;;  %v12707_v39 = vpack.c.bf16 %v9101_v59, %v9098_v58 }
 0x1d4   : > { %v9316_v3 = vpack.c.bf16 %v1016_v35, %v1014_v20  ;;  %v1330_v13 = vsel %vm1287_vm7, %v1328_v30, %v1329_v50  ;;  %v1332_v15 = vsel %vm1287_vm7, %v1329_v50, %v1331_v9  ;;  %v7979_v8 = vpop.f32.mrb[18].mxu0 }
 0x1d5   : > { %v9320_v53 = vpack.c.bf16 %v1332_v15, %v1330_v13  ;;  %v792_v56 = vrot.slane %v7979_v8, 7  ;;  %v869_v27 = vrot.slane %v7979_v8, 5  ;;  %v630_v7 = vpop.f32.mrb[19].mxu0  ;;  %v9328_v61 = vsel %vm373_vm4, %v12707_v39, 0 }
 0x1d6   : > { %12705 = vst [vmem:[#allocation13_spill] sm:$0xff] %v9316_v3  ;;  %v724_v48 = vrot.slane %v630_v7, 1  ;;  %v791_v47 = vrot.slane %v630_v7, 7  ;;  %8315 = vmatprep.subr.msk.bf16.mxu0 %vm373_vm4, %v9316_v3  ;;  %12708 = vst [vmem:[#allocation15_spill] sm:$0xff] %v9328_v61 }
 0x1d7   : > { %12706 = vst [vmem:[#allocation14_spill] sm:$0xff] %v9320_v53  ;;  %v917_v24 = vsel %vm763_vm5, %v792_v56, %v869_v27  ;;  %6911 = vmatpush3.bf16.xpose.msra.mxu0 %v9328_v61 }
 0x1d8   : > { %v1020_v9 = vrot.slane %v917_v24, 1  ;;  %v1336_v18 = vrot.slane %v917_v24, 2  ;;  %v793_v8 = vsel %vm763_vm5, %v791_v47, %v792_v56  ;;  %v901_v19 = vsel %vm763_vm5, %v724_v48, %v791_v47 }
 0x1d9   : > { %v9334_v7 = vpack.c.bf16 %v793_v8, %v901_v19  ;;  %v1017_v30 = vrot.slane %v901_v19, 1  ;;  %v1018_v50 = vrot.slane %v793_v8, 1  ;;  %v1333_v20 = vrot.slane %v901_v19, 2 }
 0x1da   : > { %v1334_v35 = vrot.slane %v793_v8, 2 }
 0x1db   : > { %12709 = vst [vmem:[#allocation16_spill] sm:$0xff] %v9334_v7  ;;  %v1019_v58 = vsel %vm971_vm6, %v1017_v30, %v1018_v50  ;;  %v1021_v59 = vsel %vm971_vm6, %v1018_v50, %v1020_v9 }
 0x1dc   : > { %v9338_v13 = vpack.c.bf16 %v1021_v59, %v1019_v58  ;;  %v1335_v15 = vsel %vm1287_vm7, %v1333_v20, %v1334_v35  ;;  %v1337_v27 = vsel %vm1287_vm7, %v1334_v35, %v1336_v18  ;;  %v7982_v39 = vpop.f32.mrb[20].mxu0 }
 0x1dd   : > { %v9342_v56 = vpack.c.bf16 %v1337_v27, %v1335_v15  ;;  %v795_v47 = vrot.slane %v7982_v39, 7  ;;  %v870_v48 = vrot.slane %v7982_v39, 5  ;;  %v640_v24 = vpop.f32.mrb[21].mxu0 }
 0x1de   : > { %v725_v61 = vrot.slane %v640_v24, 1  ;;  %v794_v3 = vrot.slane %v640_v24, 7  ;;  %8316 = vmatprep.subr.msk.bf16.mxu0 %vm373_vm4, %v9338_v13 }
 0x1df   : > { %12710 = vst [vmem:[#allocation17_spill] sm:$0xff] %v9342_v56  ;;  %v918_v8 = vsel %vm763_vm5, %v795_v47, %v870_v48  ;;  %6913 = vmatpush3.bf16.xpose.msra.mxu0 %v9304_v28 }
 0x1e0   : > { %v1025_v9 = vrot.slane %v918_v8, 1  ;;  %v1341_v19 = vrot.slane %v918_v8, 2  ;;  %v796_v30 = vsel %vm763_vm5, %v794_v3, %v795_v47  ;;  %v902_v18 = vsel %vm763_vm5, %v725_v61, %v794_v3 }
 0x1e1   : > { %v9350_v50 = vpack.c.bf16 %v796_v30, %v902_v18  ;;  %v1022_v20 = vrot.slane %v902_v18, 1  ;;  %v1023_v35 = vrot.slane %v796_v30, 1  ;;  %v1338_v58 = vrot.slane %v902_v18, 2 }
 0x1e2   : > { %v1339_v59 = vrot.slane %v796_v30, 2  ;;  %v12714_v18 = vpack.c.bf16 %v9159_v42, %v9156_v40 }
 0x1e3   : > { %12711 = vst [vmem:[#allocation18_spill] sm:$0xff] %v9350_v50  ;;  %v1024_v15 = vsel %vm971_vm6, %v1022_v20, %v1023_v35  ;;  %v1026_v27 = vsel %vm971_vm6, %v1023_v35, %v1025_v9 }
 0x1e4   : > { %v9354_v39 = vpack.c.bf16 %v1026_v27, %v1024_v15  ;;  %v1340_v48 = vsel %vm1287_vm7, %v1338_v58, %v1339_v59  ;;  %v1342_v24 = vsel %vm1287_vm7, %v1339_v59, %v1341_v19  ;;  %v7985_v8 = vpop.f32.mrb[22].mxu0  ;;  %v9364_v30 = vsel %vm373_vm4, %v12714_v18, 0 }
 0x1e5   : > { %v9358_v47 = vpack.c.bf16 %v1342_v24, %v1340_v48  ;;  %v798_v3 = vrot.slane %v7985_v8, 7  ;;  %v871_v61 = vrot.slane %v7985_v8, 5  ;;  %v650_v28 = vpop.f32.mrb[23].mxu0  ;;  %12715 = vst [vmem:[#allocation21_spill] sm:$0xff] %v9364_v30 }
 0x1e6   : > { %12712 = vst [vmem:[#allocation19_spill] sm:$0xff] %v9354_v39  ;;  %v726_v20 = vrot.slane %v650_v28, 1  ;;  %v797_v9 = vrot.slane %v650_v28, 7  ;;  %8317 = vmatprep.subr.msk.bf16.mxu0 %vm373_vm4, %v9354_v39 }
 0x1e7   : > { %12713 = vst [vmem:[#allocation20_spill] sm:$0xff] %v9358_v47  ;;  %v919_v35 = vsel %vm763_vm5, %v798_v3, %v871_v61  ;;  %6915 = vmatpush3.bf16.xpose.msra.mxu0 %v9364_v30 }
 0x1e8   : > { %v1030_v19 = vrot.slane %v919_v35, 1  ;;  %v1346_v58 = vrot.slane %v919_v35, 2  ;;  %v799_v59 = vsel %vm763_vm5, %v797_v9, %v798_v3  ;;  %v903_v15 = vsel %vm763_vm5, %v726_v20, %v797_v9 }
 0x1e9   : > { %v9372_v27 = vpack.c.bf16 %v799_v59, %v903_v15  ;;  %v1027_v40 = vrot.slane %v903_v15, 1  ;;  %v1028_v42 = vrot.slane %v799_v59, 1  ;;  %v1343_v48 = vrot.slane %v903_v15, 2 }
 0x1ea   : > { %v1344_v24 = vrot.slane %v799_v59, 2  ;;  %v12719_v15 = vpack.c.bf16 %v9188_v14, %v9185_v10 }
 0x1eb   : > { %12716 = vst [vmem:[#allocation22_spill] sm:$0xff] %v9372_v27  ;;  %v1029_v28 = vsel %vm971_vm6, %v1027_v40, %v1028_v42  ;;  %v1031_v8 = vsel %vm971_vm6, %v1028_v42, %v1030_v19 }
 0x1ec   : > { %v9376_v18 = vpack.c.bf16 %v1031_v8, %v1029_v28  ;;  %v1345_v61 = vsel %vm1287_vm7, %v1343_v48, %v1344_v24  ;;  %v1347_v35 = vsel %vm1287_vm7, %v1344_v24, %v1346_v58  ;;  %v7988_v30 = vpop.f32.mrb[24].mxu0  ;;  %v9386_v59 = vsel %vm373_vm4, %v12719_v15, 0 }
 0x1ed   : > { %v9380_v3 = vpack.c.bf16 %v1347_v35, %v1345_v61  ;;  %v801_v20 = vrot.slane %v7988_v30, 7  ;;  %v872_v9 = vrot.slane %v7988_v30, 5  ;;  %v660_v39 = vpop.f32.mrb[25].mxu0  ;;  %12720 = vst [vmem:[#allocation25_spill] sm:$0xff] %v9386_v59 }
 0x1ee   : > { %12717 = vst [vmem:[#allocation23_spill] sm:$0xff] %v9376_v18  ;;  %v727_v40 = vrot.slane %v660_v39, 1  ;;  %v800_v19 = vrot.slane %v660_v39, 7  ;;  %8318 = vmatprep.subr.msk.bf16.mxu0 %vm373_vm4, %v9376_v18 }
 0x1ef   : > { %12718 = vst [vmem:[#allocation24_spill] sm:$0xff] %v9380_v3  ;;  %v920_v42 = vsel %vm763_vm5, %v801_v20, %v872_v9  ;;  %6917 = vmatpush3.bf16.xpose.msra.mxu0 %v9386_v59 }
 0x1f0   : > { %v1035_v58 = vrot.slane %v920_v42, 1  ;;  %v1351_v48 = vrot.slane %v920_v42, 2  ;;  %v802_v30 = vsel %vm763_vm5, %v800_v19, %v801_v20  ;;  %v904_v24 = vsel %vm763_vm5, %v727_v40, %v800_v19 }
 0x1f1   : > { %v9394_v28 = vpack.c.bf16 %v802_v30, %v904_v24  ;;  %v1032_v10 = vrot.slane %v904_v24, 1  ;;  %v1033_v14 = vrot.slane %v802_v30, 1  ;;  %v1348_v8 = vrot.slane %v904_v24, 2 }
 0x1f2   : > { %v1349_v61 = vrot.slane %v802_v30, 2  ;;  %v12724_v24 = vpack.c.bf16 %v9217_v55, %v9214_v54 }
 0x1f3   : > { %12721 = vst [vmem:[#allocation26_spill] sm:$0xff] %v9394_v28  ;;  %v1034_v39 = vsel %vm971_vm6, %v1032_v10, %v1033_v14  ;;  %v1036_v35 = vsel %vm971_vm6, %v1033_v14, %v1035_v58 }
 0x1f4   : > { %v9398_v15 = vpack.c.bf16 %v1036_v35, %v1034_v39  ;;  %v1350_v9 = vsel %vm1287_vm7, %v1348_v8, %v1349_v61  ;;  %v1352_v42 = vsel %vm1287_vm7, %v1349_v61, %v1351_v48  ;;  %v7991_v59 = vpop.f32.mrb[26].mxu0  ;;  %v9408_v30 = vsel %vm373_vm4, %v12724_v24, 0 }
 0x1f5   : > { %v9402_v20 = vpack.c.bf16 %v1352_v42, %v1350_v9  ;;  %v804_v40 = vrot.slane %v7991_v59, 7  ;;  %v873_v19 = vrot.slane %v7991_v59, 5  ;;  %v670_v18 = vpop.f32.mrb[27].mxu0  ;;  %12725 = vst [vmem:[#allocation29_spill] sm:$0xff] %v9408_v30 }
 0x1f6   : > { %12722 = vst [vmem:[#allocation27_spill] sm:$0xff] %v9398_v15  ;;  %v728_v10 = vrot.slane %v670_v18, 1  ;;  %v803_v58 = vrot.slane %v670_v18, 7  ;;  %8319 = vmatprep.subr.msk.bf16.mxu0 %vm373_vm4, %v9398_v15 }
 0x1f7   : > { %12723 = vst [vmem:[#allocation28_spill] sm:$0xff] %v9402_v20  ;;  %v921_v14 = vsel %vm763_vm5, %v804_v40, %v873_v19  ;;  %6919 = vmatpush3.bf16.xpose.msra.mxu0 %v9408_v30 }
 0x1f8   : > { %v1040_v48 = vrot.slane %v921_v14, 1  ;;  %v1356_v8 = vrot.slane %v921_v14, 2  ;;  %v805_v59 = vsel %vm763_vm5, %v803_v58, %v804_v40  ;;  %v905_v61 = vsel %vm763_vm5, %v728_v10, %v803_v58 }
 0x1f9   : > { %v9416_v39 = vpack.c.bf16 %v805_v59, %v905_v61  ;;  %v1037_v54 = vrot.slane %v905_v61, 1  ;;  %v1038_v55 = vrot.slane %v805_v59, 1  ;;  %v1353_v35 = vrot.slane %v905_v61, 2 }
 0x1fa   : > { %v1354_v9 = vrot.slane %v805_v59, 2  ;;  %v12729_v61 = vpack.c.bf16 %v9246_v6, %v9243_v4 }
 0x1fb   : > { %12726 = vst [vmem:[#allocation30_spill] sm:$0xff] %v9416_v39  ;;  %v1039_v18 = vsel %vm971_vm6, %v1037_v54, %v1038_v55  ;;  %v1041_v42 = vsel %vm971_vm6, %v1038_v55, %v1040_v48 }
 0x1fc   : > { %v9420_v24 = vpack.c.bf16 %v1041_v42, %v1039_v18  ;;  %v1355_v19 = vsel %vm1287_vm7, %v1353_v35, %v1354_v9  ;;  %v1357_v14 = vsel %vm1287_vm7, %v1354_v9, %v1356_v8  ;;  %v7994_v30 = vpop.f32.mrb[28].mxu0  ;;  %v9430_v59 = vsel %vm373_vm4, %v12729_v61, 0 }
 0x1fd   : > { %v9424_v40 = vpack.c.bf16 %v1357_v14, %v1355_v19  ;;  %v807_v10 = vrot.slane %v7994_v30, 7  ;;  %v874_v58 = vrot.slane %v7994_v30, 5  ;;  %v680_v15 = vpop.f32.mrb[29].mxu0  ;;  %12730 = vst [vmem:[#allocation33_spill] sm:$0xff] %v9430_v59 }
 0x1fe   : > { %12727 = vst [vmem:[#allocation31_spill] sm:$0xff] %v9420_v24  ;;  %v729_v54 = vrot.slane %v680_v15, 1  ;;  %v806_v48 = vrot.slane %v680_v15, 7  ;;  %8320 = vmatprep.subr.msk.bf16.mxu0 %vm373_vm4, %v9420_v24 }
 0x1ff   : > { %12728 = vst [vmem:[#allocation32_spill] sm:$0xff] %v9424_v40  ;;  %v922_v55 = vsel %vm763_vm5, %v807_v10, %v874_v58  ;;  %6921 = vmatpush3.bf16.xpose.msra.mxu0 %v9430_v59 }
 0x200   : > { %v1045_v8 = vrot.slane %v922_v55, 1  ;;  %v1361_v35 = vrot.slane %v922_v55, 2  ;;  %v808_v30 = vsel %vm763_vm5, %v806_v48, %v807_v10  ;;  %v906_v9 = vsel %vm763_vm5, %v729_v54, %v806_v48  ;;  %v8795_v48 = vld [vmem:[%s12318_s1] sm:$0xff]  }
 0x201   : > { %v9438_v18 = vpack.c.bf16 %v808_v30, %v906_v9  ;;  %v1042_v4 = vrot.slane %v906_v9, 1  ;;  %v1043_v6 = vrot.slane %v808_v30, 1  ;;  %v1358_v42 = vrot.slane %v906_v9, 2 }
 0x202   : > { %v1359_v19 = vrot.slane %v808_v30, 2  ;;  %v12734_v10 = vpack.c.bf16 %v9275_v5, %v9272_v25  ;;  %v12738_v5 = vpack.c.bf16 %v9086_v51, %v9089_v52  ;;  %v12742_v51 = vpack.c.bf16 %v9173_v0, %v9176_v1 }
 0x203   : > { %12731 = vst [vmem:[#allocation34_spill] sm:$0xff] %v9438_v18  ;;  %v1044_v15 = vsel %vm971_vm6, %v1042_v4, %v1043_v6  ;;  %v1046_v14 = vsel %vm971_vm6, %v1043_v6, %v1045_v8  ;;  %v12736_v8 = vpack.c.bf16 %v9115_v11, %v9118_v12  ;;  %v12744_v12 = vpack.c.bf16 %v9202_v37, %v9205_v38 }
 0x204   : > { %v9442_v61 = vpack.c.bf16 %v1046_v14, %v1044_v15  ;;  %v1360_v58 = vsel %vm1287_vm7, %v1358_v42, %v1359_v19  ;;  %v1362_v55 = vsel %vm1287_vm7, %v1359_v19, %v1361_v35  ;;  %v9452_v54 = vsel %vm373_vm4, %v12734_v10, 0  ;;  %v7997_v1 = vpop.f32.mrb[30].mxu0 }
 0x205   : > { %v9446_v59 = vpack.c.bf16 %v1362_v55, %v1360_v58  ;;  %12735 = vst [vmem:[#allocation37_spill] sm:$0xff] %v9452_v54  ;;  %v9466_v25 = vsel %vm373_vm4, %v12736_v8, 0  ;;  %v9478_v35 = vsel %vm373_vm4, %v12738_v5, 0  ;;  %v9499_v52 = vsel %vm373_vm4, %v12742_v51, 0  ;;  %v690_v30 = vpop.f32.mrb[31].mxu0 }
 0x206   : > { %12732 = vst [vmem:[#allocation35_spill] sm:$0xff] %v9442_v61  ;;  %8321 = vmatprep.subr.msk.bf16.mxu0 %vm373_vm4, %v9442_v61  ;;  %12737 = vst [vmem:[#allocation38_spill] sm:$0xff] %v9466_v25  ;;  %v810_v37 = vrot.slane %v7997_v1, 7  ;;  %v875_v38 = vrot.slane %v7997_v1, 5  ;;  %v730_v9 = vrot.slane %v690_v30, 1  ;;  %v809_v4 = vrot.slane %v690_v30, 7 }
 0x207   : > { %12733 = vst [vmem:[#allocation36_spill] sm:$0xff] %v9446_v59  ;;  %6923 = vmatpush3.bf16.xpose.msra.mxu0 %v9452_v54  ;;  %12739 = vst [vmem:[#allocation39_spill] sm:$0xff] %v9478_v35  ;;  %v12749_v8 = vpack.c.bf16 %v9260_v36, %v9263_v49  ;;  %v8796_v36 = vld [vmem:[%s12318_s1 + $0x10] sm:$0xff]   ;;  %v12753_v49 = vpack.c.bf16 %v9138_v22, %v9135_v21  ;;  %v12755_v30 = vpack.c.bf16 %v9109_v63, %v9106_v62 }
 0x208   : > { %8322 = vmatprep.subr.msk.bf16.mxu0 %vm373_vm4, %v9290_v43  ;;  %12743 = vst [vmem:[#allocation41_spill] sm:$0xff] %v9499_v52  ;;  %v923_v6 = vsel %vm763_vm5, %v810_v37, %v875_v38  ;;  %v12757_v21 = vpack.c.bf16 %v9167_v45, %v9164_v44  ;;  %v12759_v62 = vpack.c.bf16 %v9196_v17, %v9193_v16 }
 0x209   : > { %v1578_v42 = vrot.slane %v923_v6, 1  ;;  %v1647_v19 = vrot.slane %v923_v6, 2  ;;  %v9531_v5 = vsel %vm373_vm4, %v12749_v8, 0  ;;  %v9551_v38 = vsel %vm373_vm4, %v12753_v49, 0  ;;  %v12770_v6 = vld [vmem:[#allocation15_spill] sm:$0xff]  ;;  %v12779_v8 = vld [vmem:[#allocation9_spill] sm:$0xff] }
 0x20a   : > { %12750 = vst [vmem:[#allocation45_spill] sm:$0xff] %v9531_v5  ;;  %12754 = vst [vmem:[#allocation48_spill] sm:$0xff] %v9551_v38  ;;  %v9574_v22 = vsel %vm373_vm4, %v12757_v21, 0  ;;  %v9583_v63 = vsel %vm373_vm4, %v12759_v62, 0  ;;  %v12761_v44 = vpack.c.bf16 %v9225_v60, %v9222_v57  ;;  %v12763_v16 = vpack.c.bf16 %v9254_v26, %v9251_v23  ;;  %v12765_v57 = vld [vmem:[#allocation7_spill] sm:$0xff]  ;;  %v8797_v23 = vld [vmem:[%s12318_s1 + $0x18] sm:$0xff]  }
 0x20b   : > { %12758 = vst [vmem:[#allocation50_spill] sm:$0xff] %v9574_v22  ;;  %12760 = vst [vmem:[#allocation51_spill] sm:$0xff] %v9583_v63  ;;  %v12766_v60 = vpack.c.bf16 %v9283_v29, %v12765_v57  ;;  %v9643_v26 = vsel %vm373_vm4, %v9290_v43, 0  ;;  %v12769_v29 = vld [vmem:[#allocation13_spill] sm:$0xff]  ;;  %v8801_v49 = vld [vmem:[%s12318_s1 + $0x38] sm:$0xff]   ;;  %v8898_v21 = vmov 0  }
 0x20c   : > { %v9592_v45 = vsel %vm373_vm4, %v12761_v44, 0  ;;  %v9601_v17 = vsel %vm373_vm4, %v12763_v16, 0  ;;  %12768 = vst [vmem:[#allocation54_spill] sm:$0xff] %v9643_v26  ;;  %8791 = vset.pattern.permute.xlu1 %v8898_v21  ;;  %8792 = vset.pattern.permute.xlu0 %v8898_v21  ;;  %v1888_v62 = vld [vmem:[%s12319_s2 + $0x8] sm:$0xff]  ;;  %v9781_v44 = vsel %vm373_vm4, %v12769_v29, 0  ;;  %v8802_v16 = vld [vmem:[%s12318_s1 + $0x40] sm:$0xff]  }
 0x20d   : > { %12762 = vst [vmem:[#allocation52_spill] sm:$0xff] %v9592_v45  ;;  %12764 = vst [vmem:[#allocation53_spill] sm:$0xff] %v9601_v17  ;;  %v9814_v57 = vsel %vm373_vm4, %v9320_v53, 0 }
 0x20e   : > { %6925 = vmatmul.mubr.msk.bf16.vlgmr.msra.gmra.mrb[32].mxu0 %vm373_vm4, %v9080_v41  ;;  %v12740_v41 = vpack.c.bf16 %v9144_v33, %v9147_v34  ;;  %v9508_v33 = vsel %vm373_vm4, %v12744_v12, 0  ;;  %v12746_v34 = vpack.c.bf16 %v9231_v31, %v9234_v32  ;;  %v811_v31 = vsel %vm763_vm5, %v809_v4, %v810_v37  ;;  %12783 = vst [vmem:[#allocation55_spill] sm:$0xff] %v9781_v44 }
 0x20f   : > { %6927 = vmatpush3.bf16.xpose.msra.mxu0 %v9466_v25  ;;  %6942 = vmatprep.mubr.msk.bf16.mxu0 %vm373_vm4, %v8795_v48  ;;  %12745 = vst [vmem:[#allocation42_spill] sm:$0xff] %v9508_v33  ;;  %v907_v32 = vsel %vm763_vm5, %v730_v9, %v809_v4  ;;  %v1576_v58 = vrot.slane %v811_v31, 1  ;;  %v1645_v10 = vrot.slane %v811_v31, 2  ;;  %v9562_v9 = vsel %vm373_vm4, %v12755_v30, 0  ;;  %v8798_v4 = vld [vmem:[%s12318_s1 + $0x20] sm:$0xff]   ;;  %12784 = vst [vmem:[#allocation56_spill] sm:$0xff] %v9814_v57 }
 0x210   : > { %8323 = vmatprep.subr.msk.bf16.mxu0 %vm373_vm4, %v9312_v46  ;;  %v9490_v11 = vsel %vm373_vm4, %v12740_v41, 0  ;;  %v9517_v0 = vsel %vm373_vm4, %v12746_v34, 0  ;;  %v9525_v15 = vpack.c.bf16 %v811_v31, %v907_v32  ;;  %v1575_v14 = vrot.slane %v907_v32, 1  ;;  %12756 = vst [vmem:[#allocation49_spill] sm:$0xff] %v9562_v9  ;;  %v12773_v31 = vld [vmem:[#allocation21_spill] sm:$0xff]  ;;  %v1887_v30 = vld [vmem:[%s12319_s2] sm:$0xff] }
 0x211   : > { %12741 = vst [vmem:[#allocation40_spill] sm:$0xff] %v9490_v11  ;;  %12747 = vst [vmem:[#allocation43_spill] sm:$0xff] %v9517_v0  ;;  %v1644_v55 = vrot.slane %v907_v32, 2  ;;  %v1579_v51 = vsel %vm971_vm6, %v1576_v58, %v1578_v42  ;;  %v1648_v1 = vsel %vm1287_vm7, %v1645_v10, %v1647_v19  ;;  %v12771_v42 = vld [vmem:[#allocation11_spill] sm:$0xff]  ;;  %1891 = vperm.xlu1 %8791, %v1887_v30  }
 0x212   : > { %12748 = vst [vmem:[#allocation44_spill] sm:$0xff] %v9525_v15  ;;  %v1577_v41 = vsel %vm971_vm6, %v1575_v14, %v1576_v58  ;;  %v12772_v19 = vld [vmem:[#allocation19_spill] sm:$0xff]  ;;  %v12775_v14 = vld [vmem:[#allocation25_spill] sm:$0xff] }
 0x213   : > { %v9536_v12 = vpack.c.bf16 %v1579_v51, %v1577_v41  ;;  %v1646_v34 = vsel %vm1287_vm7, %v1644_v55, %v1645_v10  ;;  %v12774_v32 = vld [vmem:[#allocation23_spill] sm:$0xff]  ;;  %v12777_v55 = vld [vmem:[#allocation29_spill] sm:$0xff]  ;;  %v9676_v41 = vsel %vm373_vm4, %v12779_v8, 0  ;;  %v8799_v51 = vld [vmem:[%s12318_s1 + $0x28] sm:$0xff]  }
 0x214   : > { %v9542_v37 = vpack.c.bf16 %v1648_v1, %v1646_v34  ;;  %v12776_v58 = vld [vmem:[#allocation27_spill] sm:$0xff]  ;;  %v12778_v10 = vld [vmem:[#allocation33_spill] sm:$0xff]  ;;  %12780 = vst [vmem:[#allocation11_spill] sm:$0xff] %v9676_v41  ;;  %v9709_v34 = vsel %vm373_vm4, %v9298_v2, 0 }
 0x215   : > { %12751 = vst [vmem:[#allocation46_spill] sm:$0xff] %v9536_v12  ;;  %12781 = vst [vmem:[#allocation19_spill] sm:$0xff] %v9709_v34  ;;  %v8800_v1 = vld [vmem:[%s12318_s1 + $0x30] sm:$0xff]   ;;  %1896 = vperm.xlu1 %8791, %v1888_v62  }
 0x216   : > { %12752 = vst [vmem:[#allocation47_spill] sm:$0xff] %v9542_v37 }
 0x217   : > { %6929 = vmatpush3.bf16.xpose.msra.mxu0 %v9478_v35 }
 0x218   : > { %8324 = vmatprep.subr.msk.bf16.mxu0 %vm373_vm4, %v9334_v7 }
 0x21f   : > { %6931 = vmatpush3.bf16.xpose.msra.mxu0 %v9466_v25 }
 0x220   : > { %8325 = vmatprep.subr.msk.bf16.mxu0 %vm373_vm4, %v9350_v50 }
 0x227   : > { %6933 = vmatpush3.bf16.xpose.msra.mxu0 %v9490_v11 }
 0x228   : > { %8326 = vmatprep.subr.msk.bf16.mxu0 %vm373_vm4, %v9372_v27 }
 0x22f   : > { %6935 = vmatpush3.bf16.xpose.msra.mxu0 %v9499_v52 }
 0x230   : > { %8327 = vmatprep.subr.msk.bf16.mxu0 %vm373_vm4, %v9394_v28 }
 0x237   : > { %6937 = vmatpush3.bf16.xpose.msra.mxu0 %v9508_v33 }
 0x238   : > { %8328 = vmatprep.subr.msk.bf16.mxu0 %vm373_vm4, %v9416_v39 }
 0x23f   : > { %6939 = vmatpush3.bf16.xpose.msra.mxu0 %v9517_v0 }
 0x240   : > { %8329 = vmatprep.subr.msk.bf16.mxu0 %vm373_vm4, %v9438_v18 }
 0x247   : > { %6941 = vmatpush3.bf16.xpose.msra.mxu0 %v9531_v5 }
 0x248   : > { %8330 = vmatprep.subr.msk.bf16.mxu0 %vm373_vm4, %v9298_v2 }
 0x24e   : > { %6943 = vmatmul.mubr.msk.bf16.vlgmr.msra.gmra.mrb[32].mxu0 %vm373_vm4, %v8795_v48  ;;  %v9610_v48 = vsel %vm373_vm4, %v12766_v60, 0 }
 0x24f   : > { %6945 = vmatpush3.bf16.xpose.msra.mxu0 %v9551_v38  ;;  %6960 = vmatprep.mubr.msk.bf16.mxu0 %vm373_vm4, %v8796_v36  ;;  %12767 = vst [vmem:[#allocation7_spill] sm:$0xff] %v9610_v48 }
 0x250   : > { %8331 = vmatprep.subr.msk.bf16.mxu0 %vm373_vm4, %v9320_v53 }
 0x257   : > { %6947 = vmatpush3.bf16.xpose.msra.mxu0 %v9562_v9 }
 0x258   : > { %8332 = vmatprep.subr.msk.bf16.mxu0 %vm373_vm4, %v9342_v56 }
 0x25f   : > { %6949 = vmatpush3.bf16.xpose.msra.mxu0 %v9551_v38 }
 0x260   : > { %8333 = vmatprep.subr.msk.bf16.mxu0 %vm373_vm4, %v9358_v47 }
 0x267   : > { %6951 = vmatpush3.bf16.xpose.msra.mxu0 %v9574_v22 }
 0x268   : > { %8334 = vmatprep.subr.msk.bf16.mxu0 %vm373_vm4, %v9380_v3 }
 0x26f   : > { %6953 = vmatpush3.bf16.xpose.msra.mxu0 %v9583_v63 }
 0x270   : > { %8335 = vmatprep.subr.msk.bf16.mxu0 %vm373_vm4, %v9402_v20 }
 0x277   : > { %6955 = vmatpush3.bf16.xpose.msra.mxu0 %v9592_v45 }
 0x278   : > { %8336 = vmatprep.subr.msk.bf16.mxu0 %vm373_vm4, %v9424_v40 }
 0x27f   : > { %6957 = vmatpush3.bf16.xpose.msra.mxu0 %v9601_v17 }
 0x280   : > { %8337 = vmatprep.subr.msk.bf16.mxu0 %vm373_vm4, %v9446_v59 }
 0x287   : > { %6959 = vmatpush3.bf16.xpose.msra.mxu0 %v9610_v48 }
 0x288   : > { %8338 = vmatprep.subr.msk.bf16.mxu0 %vm373_vm4, %v9312_v46 }
 0x28e   : > { %6961 = vmatmul.mubr.msk.bf16.vlgmr.msra.gmra.mrb[32].mxu0 %vm373_vm4, %v8796_v36  ;;  %v9742_v36 = vsel %vm373_vm4, %v9312_v46, 0 }
 0x28f   : > { %6963 = vmatpush3.bf16.xpose.msra.mxu0 %v9478_v35  ;;  %6978 = vmatprep.mubr.msk.bf16.mxu0 %vm373_vm4, %v8797_v23  ;;  %12782 = vst [vmem:[#allocation21_spill] sm:$0xff] %v9742_v36 }
 0x290   : > { %8339 = vmatprep.subr.msk.bf16.mxu0 %vm373_vm4, %v9334_v7  ;;  %v1892_v60 = vpop.permute.xlu1 %1891 }
 0x297   : > { %6965 = vmatpush3.bf16.xpose.msra.mxu0 %v9466_v25 }
 0x298   : > { %8340 = vmatprep.subr.msk.bf16.mxu0 %vm373_vm4, %v9350_v50 }
 0x29f   : > { %6967 = vmatpush3.bf16.xpose.msra.mxu0 %v9490_v11 }
 0x2a0   : > { %8341 = vmatprep.subr.msk.bf16.mxu0 %vm373_vm4, %v9372_v27 }
 0x2a7   : > { %6969 = vmatpush3.bf16.xpose.msra.mxu0 %v9499_v52 }
 0x2a8   : > { %8342 = vmatprep.subr.msk.bf16.mxu0 %vm373_vm4, %v9394_v28 }
 0x2af   : > { %6971 = vmatpush3.bf16.xpose.msra.mxu0 %v9508_v33 }
 0x2b0   : > { %8343 = vmatprep.subr.msk.bf16.mxu0 %vm373_vm4, %v9416_v39 }
 0x2b7   : > { %6973 = vmatpush3.bf16.xpose.msra.mxu0 %v9517_v0 }
 0x2b8   : > { %8344 = vmatprep.subr.msk.bf16.mxu0 %vm373_vm4, %v9438_v18 }
 0x2bf   : > { %6975 = vmatpush3.bf16.xpose.msra.mxu0 %v9531_v5 }
 0x2c0   : > { %8345 = vmatprep.subr.msk.bf16.mxu0 %vm373_vm4, %v9525_v15 }
 0x2c7   : > { %6977 = vmatpush3.bf16.xpose.msra.mxu0 %v9643_v26 }
 0x2c8   : > { %8346 = vmatprep.subr.msk.bf16.mxu0 %vm373_vm4, %v12769_v29 }
 0x2ce   : > { %6979 = vmatmul.mubr.msk.bf16.vlgmr.msra.gmra.mrb[32].mxu0 %vm373_vm4, %v8797_v23 }
 0x2cf   : > { %6981 = vmatpush3.bf16.xpose.msra.mxu0 %v12770_v6  ;;  %6996 = vmatprep.mubr.msk.bf16.mxu0 %vm373_vm4, %v8798_v4 }
 0x2d0   : > { %8347 = vmatprep.subr.msk.bf16.mxu0 %vm373_vm4, %v9338_v13 }
 0x2d7   : > { %6983 = vmatpush3.bf16.xpose.msra.mxu0 %v12771_v42 }
 0x2d8   : > { %8348 = vmatprep.subr.msk.bf16.mxu0 %vm373_vm4, %v12772_v19 }
 0x2df   : > { %6985 = vmatpush3.bf16.xpose.msra.mxu0 %v12773_v31 }
 0x2e0   : > { %8349 = vmatprep.subr.msk.bf16.mxu0 %vm373_vm4, %v12774_v32 }
 0x2e7   : > { %6987 = vmatpush3.bf16.xpose.msra.mxu0 %v12775_v14 }
 0x2e8   : > { %8350 = vmatprep.subr.msk.bf16.mxu0 %vm373_vm4, %v12776_v58 }
 0x2ef   : > { %6989 = vmatpush3.bf16.xpose.msra.mxu0 %v12777_v55 }
 0x2f0   : > { %8351 = vmatprep.subr.msk.bf16.mxu0 %vm373_vm4, %v9420_v24 }
 0x2f7   : > { %6991 = vmatpush3.bf16.xpose.msra.mxu0 %v12778_v10 }
 0x2f8   : > { %8352 = vmatprep.subr.msk.bf16.mxu0 %vm373_vm4, %v9442_v61 }
 0x2ff   : > { %6993 = vmatpush3.bf16.xpose.msra.mxu0 %v9452_v54 }
 0x300   : > { %8353 = vmatprep.subr.msk.bf16.mxu0 %vm373_vm4, %v9536_v12 }
 0x307   : > { %6995 = vmatpush3.bf16.xpose.msra.mxu0 %v9676_v41 }
 0x308   : > { %8354 = vmatprep.subr.msk.bf16.mxu0 %vm373_vm4, %v9320_v53 }
 0x30e   : > { %6997 = vmatmul.mubr.msk.bf16.vlgmr.msra.gmra.mrb[32].mxu0 %vm373_vm4, %v8798_v4 }
 0x30f   : > { %6999 = vmatpush3.bf16.xpose.msra.mxu0 %v9562_v9  ;;  %7014 = vmatprep.mubr.msk.bf16.mxu0 %vm373_vm4, %v8799_v51 }
 0x310   : > { %8355 = vmatprep.subr.msk.bf16.mxu0 %vm373_vm4, %v9342_v56 }
 0x317   : > { %7001 = vmatpush3.bf16.xpose.msra.mxu0 %v9551_v38 }
 0x318   : > { %8356 = vmatprep.subr.msk.bf16.mxu0 %vm373_vm4, %v9358_v47 }
 0x31f   : > { %7003 = vmatpush3.bf16.xpose.msra.mxu0 %v9574_v22 }
 0x320   : > { %8357 = vmatprep.subr.msk.bf16.mxu0 %vm373_vm4, %v9380_v3 }
 0x327   : > { %7005 = vmatpush3.bf16.xpose.msra.mxu0 %v9583_v63 }
 0x328   : > { %8358 = vmatprep.subr.msk.bf16.mxu0 %vm373_vm4, %v9402_v20 }
 0x32f   : > { %7007 = vmatpush3.bf16.xpose.msra.mxu0 %v9592_v45 }
 0x330   : > { %8359 = vmatprep.subr.msk.bf16.mxu0 %vm373_vm4, %v9424_v40 }
 0x337   : > { %7009 = vmatpush3.bf16.xpose.msra.mxu0 %v9601_v17 }
 0x338   : > { %8360 = vmatprep.subr.msk.bf16.mxu0 %vm373_vm4, %v9446_v59 }
 0x33f   : > { %7011 = vmatpush3.bf16.xpose.msra.mxu0 %v9610_v48 }
 0x340   : > { %8361 = vmatprep.subr.msk.bf16.mxu0 %vm373_vm4, %v9542_v37 }
 0x347   : > { %7013 = vmatpush3.bf16.xpose.msra.mxu0 %v9709_v34 }
 0x348   : > { %8362 = vmatprep.subr.msk.bf16.mxu0 %vm373_vm4, %v9334_v7 }
 0x34e   : > { %7015 = vmatmul.mubr.msk.bf16.vlgmr.msra.gmra.mrb[32].mxu0 %vm373_vm4, %v8799_v51 }
 0x34f   : > { %7017 = vmatpush3.bf16.xpose.msra.mxu0 %v9466_v25  ;;  %7032 = vmatprep.mubr.msk.bf16.mxu0 %vm373_vm4, %v8800_v1 }
 0x350   : > { %8363 = vmatprep.subr.msk.bf16.mxu0 %vm373_vm4, %v9350_v50 }
 0x357   : > { %7019 = vmatpush3.bf16.xpose.msra.mxu0 %v9490_v11 }
 0x358   : > { %8364 = vmatprep.subr.msk.bf16.mxu0 %vm373_vm4, %v9372_v27 }
 0x35f   : > { %7021 = vmatpush3.bf16.xpose.msra.mxu0 %v9499_v52 }
 0x360   : > { %8365 = vmatprep.subr.msk.bf16.mxu0 %vm373_vm4, %v9394_v28 }
 0x367   : > { %7023 = vmatpush3.bf16.xpose.msra.mxu0 %v9508_v33 }
 0x368   : > { %8366 = vmatprep.subr.msk.bf16.mxu0 %vm373_vm4, %v9416_v39 }
 0x36f   : > { %7025 = vmatpush3.bf16.xpose.msra.mxu0 %v9517_v0 }
 0x370   : > { %8367 = vmatprep.subr.msk.bf16.mxu0 %vm373_vm4, %v9438_v18 }
 0x377   : > { %7027 = vmatpush3.bf16.xpose.msra.mxu0 %v9531_v5 }
 0x378   : > { %8368 = vmatprep.subr.msk.bf16.mxu0 %vm373_vm4, %v9525_v15 }
 0x37f   : > { %7029 = vmatpush3.bf16.xpose.msra.mxu0 %v9643_v26 }
 0x380   : > { %8369 = vmatprep.subr.msk.bf16.mxu0 %vm373_vm4, %v9438_v18 }
 0x387   : > { %7031 = vmatpush3.bf16.xpose.msra.mxu0 %v9742_v36 }
 0x388   : > { %8370 = vmatprep.subr.msk.bf16.mxu0 %vm373_vm4, %v9338_v13 }
 0x38e   : > { %7033 = vmatmul.mubr.msk.bf16.vlgmr.msra.gmra.mrb[32].mxu0 %vm373_vm4, %v8800_v1  ;;  %v1897_v1 = vpop.permute.xlu1 %1896 }
 0x38f   : > { %7035 = vmatpush3.bf16.xpose.msra.mxu0 %v12771_v42  ;;  %7050 = vmatprep.mubr.msk.bf16.mxu0 %vm373_vm4, %v8801_v49 }
 0x390   : > { %8371 = vmatprep.subr.msk.bf16.mxu0 %vm373_vm4, %v12772_v19 }
 0x397   : > { %7037 = vmatpush3.bf16.xpose.msra.mxu0 %v12773_v31 }
 0x398   : > { %8372 = vmatprep.subr.msk.bf16.mxu0 %vm373_vm4, %v12774_v32 }
 0x39f   : > { %7039 = vmatpush3.bf16.xpose.msra.mxu0 %v12775_v14 }
 0x3a0   : > { %8373 = vmatprep.subr.msk.bf16.mxu0 %vm373_vm4, %v12776_v58 }
 0x3a7   : > { %7041 = vmatpush3.bf16.xpose.msra.mxu0 %v12777_v55 }
 0x3a8   : > { %8374 = vmatprep.subr.msk.bf16.mxu0 %vm373_vm4, %v9420_v24 }
 0x3af   : > { %7043 = vmatpush3.bf16.xpose.msra.mxu0 %v12778_v10 }
 0x3b0   : > { %8375 = vmatprep.subr.msk.bf16.mxu0 %vm373_vm4, %v9442_v61 }
 0x3b7   : > { %7045 = vmatpush3.bf16.xpose.msra.mxu0 %v9452_v54 }
 0x3b8   : > { %8376 = vmatprep.subr.msk.bf16.mxu0 %vm373_vm4, %v9536_v12 }
 0x3bf   : > { %7047 = vmatpush3.bf16.xpose.msra.mxu0 %v9676_v41 }
 0x3c0   : > { %8377 = vmatprep.subr.msk.bf16.mxu0 %vm373_vm4, %v9442_v61 }
 0x3c7   : > { %7049 = vmatpush3.bf16.xpose.msra.mxu0 %v9781_v44 }
 0x3c8   : > { %8378 = vmatprep.subr.msk.bf16.mxu0 %vm373_vm4, %v9342_v56 }
 0x3ce   : > { %7051 = vmatmul.mubr.msk.bf16.vlgmr.msra.gmra.mrb[32].mxu0 %vm373_vm4, %v8801_v49 }
 0x3cf   : > { %7053 = vmatpush3.bf16.xpose.msra.mxu0 %v9551_v38  ;;  %7068 = vmatprep.mubr.msk.bf16.mxu0 %vm373_vm4, %v8802_v16 }
 0x3d0   : > { %8379 = vmatprep.subr.msk.bf16.mxu0 %vm373_vm4, %v9358_v47 }
 0x3d7   : > { %7055 = vmatpush3.bf16.xpose.msra.mxu0 %v9574_v22 }
 0x3d8   : > { %8380 = vmatprep.subr.msk.bf16.mxu0 %vm373_vm4, %v9380_v3 }
 0x3df   : > { %7057 = vmatpush3.bf16.xpose.msra.mxu0 %v9583_v63 }
 0x3e0   : > { %8381 = vmatprep.subr.msk.bf16.mxu0 %vm373_vm4, %v9402_v20 }
 0x3e7   : > { %7059 = vmatpush3.bf16.xpose.msra.mxu0 %v9592_v45 }
 0x3e8   : > { %8382 = vmatprep.subr.msk.bf16.mxu0 %vm373_vm4, %v9424_v40 }
 0x3ef   : > { %7061 = vmatpush3.bf16.xpose.msra.mxu0 %v9601_v17 }
 0x3f0   : > { %8383 = vmatprep.subr.msk.bf16.mxu0 %vm373_vm4, %v9446_v59 }
 0x3f7   : > { %7063 = vmatpush3.bf16.xpose.msra.mxu0 %v9610_v48 }
 0x3f8   : > { %8384 = vmatprep.subr.msk.bf16.mxu0 %vm373_vm4, %v9542_v37 }
 0x3ff   : > { %7065 = vmatpush3.bf16.xpose.msra.mxu0 %v9709_v34 }
 0x400   : > { %8385 = vmatprep.subr.msk.bf16.mxu0 %vm373_vm4, %v9446_v59 }
 0x407   : > { %7067 = vmatpush3.bf16.xpose.msra.mxu0 %v9814_v57 }
 0x40e   : > { %7069 = vmatmul.mubr.msk.bf16.vlgmr.msra.gmra.mrb[32].mxu0 %vm373_vm4, %v8802_v16 }
 0x4e1   : > { %v1874_v23 = vpop.f32.mrb[32].mxu0 }
 0x4e2   : > { %v1899_v4 = vadd.f32 %v1892_v60, %v1874_v23  ;;  %v1876_v51 = vpop.f32.mrb[33].mxu0 }
 0x4e3   : > { %v1900_v49 = vadd.f32 %v1892_v60, %v1876_v51  ;;  %v1878_v30 = vpop.f32.mrb[34].mxu0  ;;  %v8899_v51 = vmov 1.0|1.0  }
 0x4e4   : > { %v1903_v21 = vmax.f32 %v1899_v4, 0.0  ;;  %v1901_v62 = vadd.f32 %v1897_v1, %v1878_v30  ;;  %v1880_v44 = vpop.f32.mrb[35].mxu0  ;;  %8103 = vmatprep.subr.msk.bf16.mxu0 %vm9037_vm3, %v8899_v51  ;;  %8107 = vmatprep.subr.msk.bf16.mxu1 %vm9037_vm3, %v8899_v51 }
 0x4e5   : > { %v1904_v36 = vmax.f32 %v1900_v49, 0.0  ;;  %v1902_v34 = vadd.f32 %v1897_v1, %v1880_v44  ;;  %v8821_v44 = vld [vmem:[%s261_s22] sm:$0xff]  ;;  %8105 = vmatpush3.bf16.msk.msra.mxu0 %vm9037_vm3, %v8899_v51  ;;  %8109 = vmatpush3.bf16.msk.msra.mxu1 %vm9037_vm3, %v8899_v51  ;;  %s8900_s22 = smov 124  }
 0x4e6   : > { %v6500_v16 = vrot.slane %v1903_v21, 4  ;;  %v1905_v57 = vmax.f32 %v1901_v62, 0.0  ;;  %1911 = vxpose.xlu1.b32.start [1/2] (short) %v1903_v21, 128 }
 0x4e7   : > { %v6501_v23 = vrot.slane %v1904_v36, 4  ;;  %v1906_v60 = vmax.f32 %v1902_v34, 0.0  ;;  %v12787_v34 = vld [vmem:[#allocation6_spill] sm:$0xff] }
 0x4e8   : > { %v6544_v4 = vsel %vm470_vm1, %v8821_v44, %v6500_v16  ;;  %v9832_v1 = vrot.slane %v1905_v57, 4 }
 0x4e9   : > { %6550 = vst [vmem:[%s9823_s8] sm:$0xff] %v6544_v4  ;;  %v6545_v49 = vsel %vm470_vm1, %v12787_v34, %v6501_v23  ;;  %v9841_v30 = vrot.slane %v1906_v60, 4 }
 0x4ea   : > { %12786 = vst [vmem:[#allocation5_spill] sm:$0xff] %v9832_v1  ;;  %6551 = vst [vmem:[%s9823_s8 + $0x8] sm:$0xff] %v6545_v49  ;;  %v6503_v21 = vsel %vm470_vm1, %v6500_v16, %v9832_v1  ;;  %1912 = vxpose.xlu1.b32.end [2/2] (short) %v1905_v57, 128 }
 0x4eb   : > { %12788 = vst [vmem:[#allocation6_spill] sm:$0xff] %v9841_v30  ;;  %6552 = vst [vmem:[%s9823_s8 + $0x10] sm:$0xff] %v6503_v21  ;;  %v6505_v62 = vsel %vm470_vm1, %v6501_v23, %v9841_v30 }
 0x4ec   : > { %6553 = vst [vmem:[%s9823_s8 + $0x18] sm:$0xff] %v6505_v62 }
 0x523   : > { %1943 = vxpose.xlu1.b32.start [1/2] (short) %v1904_v36, 128  ;;  %v9858_v36 = vld [vmem:[%s12320_s3 + $0x8] sm:$0xff]  }
 0x527   : > { %1944 = vxpose.xlu1.b32.end [2/2] (short) %v1906_v60, 128  ;;  %v3951_v60 = vld [vmem:[%s12321_s4 + $0x8] sm:$0xff] }
 0x566   : > { %v1927_v37 = vpop.trf.xlu1 }
 0x567   : > { %8002 = vmatprep.mubr.msk.f32.mxu0 %vm1975_vm8, %v1927_v37 }
 0x56a   : > { %v1928_v51 = vpop.trf.xlu1 }
 0x56b   : > { %8003 = vmatmul.mubr.msk.f32.vlgmr.msra.gmra.mrb[36].mxu0 %vm1975_vm8, %v1928_v51 }
 0x56e   : > { %v1929_v44 = vpop.trf.xlu1 }
 0x56f   : > { %8005 = vmatprep.mubr.msk.f32.mxu0 %vm1975_vm8, %v1929_v44 }
 0x572   : > { %v1930_v4 = vpop.trf.xlu1 }
 0x573   : > { %8006 = vmatmul.mubr.msk.f32.gmra.mrb[38].mxu0 %vm1975_vm8, %v1930_v4 }
 0x576   : > { %v1931_v57 = vpop.trf.xlu1 }
 0x577   : > { %8008 = vmatprep.mubr.msk.f32.mxu0 %vm1975_vm8, %v1931_v57 }
 0x57a   : > { %v1932_v16 = vpop.trf.xlu1 }
 0x57b   : > { %8009 = vmatmul.mubr.msk.f32.gmra.mrb[40].mxu0 %vm1975_vm8, %v1932_v16 }
 0x57d   : > { %2890 = vrot.lane.b32.xlu1 %v9858_v36, %s8900_s22 }
 0x57e   : > { %v1933_v23 = vpop.trf.xlu1 }
 0x57f   : > { %8011 = vmatprep.mubr.msk.f32.mxu0 %vm1975_vm8, %v1933_v23 }
 0x581   : > { %3959 = vperm.xlu1 %8791, %v3951_v60  }
 0x582   : > { %v1934_v34 = vpop.trf.xlu1 }
 0x583   : > { %8012 = vmatmul.mubr.msk.f32.gmra.mrb[42].mxu0 %vm1975_vm8, %v1934_v34 }
 0x586   : > { %v1935_v49 = vpop.trf.xlu1 }
 0x587   : > { %8014 = vmatprep.mubr.msk.f32.mxu0 %vm1975_vm8, %v1935_v49 }
 0x58a   : > { %v1936_v21 = vpop.trf.xlu1 }
 0x58b   : > { %8015 = vmatmul.mubr.msk.f32.gmra.mrb[44].mxu0 %vm1975_vm8, %v1936_v21 }
 0x58e   : > { %v1937_v62 = vpop.trf.xlu1 }
 0x58f   : > { %8017 = vmatprep.mubr.msk.f32.mxu0 %vm1975_vm8, %v1937_v62 }
 0x592   : > { %v1938_v37 = vpop.trf.xlu1 }
 0x593   : > { %8018 = vmatmul.mubr.msk.f32.gmra.mrb[46].mxu0 %vm1975_vm8, %v1938_v37 }
 0x596   : > { %v1939_v51 = vpop.trf.xlu1 }
 0x597   : > { %8020 = vmatprep.mubr.msk.f32.mxu0 %vm1975_vm8, %v1939_v51 }
 0x59a   : > { %v1940_v44 = vpop.trf.xlu1 }
 0x59b   : > { %8021 = vmatmul.mubr.msk.f32.gmra.mrb[48].mxu0 %vm1975_vm8, %v1940_v44  ;;  %v9888_v44 = vld [vmem:[%s12320_s3] sm:$0xff]  }
 0x59c   : > { %2543 = vrot.lane.b32.xlu0 %v9888_v44, %s8900_s22 }
 0x59e   : > { %v1941_v4 = vpop.trf.xlu1 }
 0x59f   : > { %8023 = vmatprep.mubr.msk.f32.mxu0 %vm1975_vm8, %v1941_v4 }
 0x5a2   : > { %v1942_v57 = vpop.trf.xlu1 }
 0x5a3   : > { %8024 = vmatmul.mubr.msk.f32.gmra.mrb[50].mxu0 %vm1975_vm8, %v1942_v57 }
 0x5a6   : > { %v1959_v16 = vpop.trf.xlu1 }
 0x5a7   : > { %8026 = vmatprep.mubr.msk.f32.mxu0 %vm1975_vm8, %v1959_v16 }
 0x5aa   : > { %v1960_v23 = vpop.trf.xlu1 }
 0x5ab   : > { %8027 = vmatmul.mubr.msk.f32.gmra.mrb[52].mxu0 %vm1975_vm8, %v1960_v23 }
 0x5ae   : > { %v1961_v60 = vpop.trf.xlu1 }
 0x5af   : > { %8029 = vmatprep.mubr.msk.f32.mxu0 %vm1975_vm8, %v1961_v60 }
 0x5b2   : > { %v1962_v34 = vpop.trf.xlu1 }
 0x5b3   : > { %8030 = vmatmul.mubr.msk.f32.gmra.mrb[54].mxu0 %vm1975_vm8, %v1962_v34 }
 0x5b6   : > { %v1963_v49 = vpop.trf.xlu1 }
 0x5b7   : > { %8032 = vmatprep.mubr.msk.f32.mxu0 %vm1975_vm8, %v1963_v49 }
 0x5ba   : > { %v1964_v21 = vpop.trf.xlu1 }
 0x5bb   : > { %8033 = vmatmul.mubr.msk.f32.gmra.mrb[56].mxu0 %vm1975_vm8, %v1964_v21 }
 0x5be   : > { %v1965_v62 = vpop.trf.xlu1 }
 0x5bf   : > { %8035 = vmatprep.mubr.msk.f32.mxu0 %vm1975_vm8, %v1965_v62 }
 0x5c2   : > { %v1966_v37 = vpop.trf.xlu1 }
 0x5c3   : > { %8036 = vmatmul.mubr.msk.f32.gmra.mrb[58].mxu0 %vm1975_vm8, %v1966_v37 }
 0x5c6   : > { %v1967_v51 = vpop.trf.xlu1 }
 0x5c7   : > { %8038 = vmatprep.mubr.msk.f32.mxu0 %vm1975_vm8, %v1967_v51 }
 0x5ca   : > { %v1968_v4 = vpop.trf.xlu1 }
 0x5cb   : > { %8039 = vmatmul.mubr.msk.f32.gmra.mrb[60].mxu0 %vm1975_vm8, %v1968_v4 }
 0x5ce   : > { %v1969_v57 = vpop.trf.xlu1 }
 0x5cf   : > { %8041 = vmatprep.mubr.msk.f32.mxu0 %vm1975_vm8, %v1969_v57 }
 0x5d2   : > { %v1970_v16 = vpop.trf.xlu1 }
 0x5d3   : > { %8042 = vmatmul.mubr.msk.f32.gmra.mrb[62].mxu0 %vm1975_vm8, %v1970_v16 }
 0x5d6   : > { %v1971_v23 = vpop.trf.xlu1 }
 0x5d7   : > { %8044 = vmatprep.mubr.msk.f32.mxu0 %vm1975_vm8, %v1971_v23 }
 0x5da   : > { %v1972_v60 = vpop.trf.xlu1 }
 0x5db   : > { %8045 = vmatmul.mubr.msk.f32.gmra.mrb[64].mxu0 %vm1975_vm8, %v1972_v60 }
 0x5de   : > { %v1973_v34 = vpop.trf.xlu1 }
 0x5df   : > { %8047 = vmatprep.mubr.msk.f32.mxu0 %vm1975_vm8, %v1973_v34 }
 0x5e2   : > { %v1974_v49 = vpop.trf.xlu1 }
 0x5e3   : > { %8048 = vmatmul.mubr.msk.f32.gmra.mrb[66].mxu0 %vm1975_vm8, %v1974_v49 }
 0x60e   : > { %v9899_v21 = vpop.permute.xlu0 %2543 }
 0x60f   : > { %7120 = vmatprep.mubr.msk.bf16.mxu0 %vm1975_vm8, %v9899_v21 }
 0x63e   : > { %v8004_v62 = vpop.f32.mrb[36].mxu0 }
 0x63f   : > { %v2365_v37 = vrot.slane %v8004_v62, 7  ;;  %v2458_v51 = vrot.slane %v8004_v62, 5  ;;  %v2138_v4 = vpop.f32.mrb[37].mxu0 }
 0x640   : > { %v2314_v57 = vrot.slane %v2138_v4, 1  ;;  %v2364_v16 = vrot.slane %v2138_v4, 7 }
 0x641   : > { %v2506_v23 = vsel %vm763_vm5, %v2365_v37, %v2458_v51 }
 0x642   : > { %v2778_v60 = vrot.slane %v2506_v23, 1  ;;  %v3053_v30 = vrot.slane %v2506_v23, 2  ;;  %v9905_v34 = vsel %vm763_vm5, %v2364_v16, %v2365_v37  ;;  %v9908_v49 = vsel %vm763_vm5, %v2314_v57, %v2364_v16 }
 0x643   : > { %v2775_v1 = vrot.slane %v9908_v49, 1  ;;  %v2776_v41 = vrot.slane %v9905_v34, 1  ;;  %v3050_v12 = vrot.slane %v9908_v49, 2  ;;  %v3051_v62 = vrot.slane %v9905_v34, 2 }
 0x645   : > { %v9917_v51 = vsel %vm971_vm6, %v2775_v1, %v2776_v41  ;;  %v9920_v37 = vsel %vm971_vm6, %v2776_v41, %v2778_v60  ;;  %v9923_v57 = vsel %vm1287_vm7, %v3050_v12, %v3051_v62  ;;  %v9926_v16 = vsel %vm1287_vm7, %v3051_v62, %v3053_v30 }
 0x646   : > { %12789 = vst [vmem:[#allocation57_spill] sm:$0xff] %v9917_v51  ;;  %12790 = vst [vmem:[#allocation58_spill] sm:$0xff] %v9920_v37  ;;  %v8007_v23 = vpop.f32.mrb[38].mxu0 }
 0x647   : > { %12791 = vst [vmem:[#allocation59_spill] sm:$0xff] %v9923_v57  ;;  %12792 = vst [vmem:[#allocation60_spill] sm:$0xff] %v9926_v16  ;;  %v2362_v4 = vrot.slane %v8007_v23, 7  ;;  %v2457_v48 = vrot.slane %v8007_v23, 5  ;;  %v2148_v1 = vpop.f32.mrb[39].mxu0 }
 0x648   : > { %v2313_v59 = vrot.slane %v2148_v1, 1  ;;  %v2361_v17 = vrot.slane %v2148_v1, 7 }
 0x649   : > { %v2505_v41 = vsel %vm763_vm5, %v2362_v4, %v2457_v48 }
 0x64a   : > { %v2773_v60 = vrot.slane %v2505_v41, 1  ;;  %v3048_v12 = vrot.slane %v2505_v41, 2  ;;  %v9934_v40 = vsel %vm763_vm5, %v2361_v17, %v2362_v4  ;;  %v9937_v30 = vsel %vm763_vm5, %v2313_v59, %v2361_v17 }
 0x64b   : > { %v2770_v15 = vrot.slane %v9937_v30, 1  ;;  %v2771_v23 = vrot.slane %v9934_v40, 1  ;;  %v3045_v26 = vrot.slane %v9937_v30, 2  ;;  %v3046_v1 = vrot.slane %v9934_v40, 2 }
 0x64d   : > { %v9946_v48 = vsel %vm971_vm6, %v2770_v15, %v2771_v23  ;;  %v9949_v4 = vsel %vm971_vm6, %v2771_v23, %v2773_v60  ;;  %v9954_v17 = vsel %vm1287_vm7, %v3045_v26, %v3046_v1  ;;  %v9957_v41 = vsel %vm1287_vm7, %v3046_v1, %v3048_v12 }
 0x64e   : > { %12793 = vst [vmem:[#allocation61_spill] sm:$0xff] %v9946_v48  ;;  %12794 = vst [vmem:[#allocation62_spill] sm:$0xff] %v9949_v4  ;;  %v8010_v62 = vpop.f32.mrb[40].mxu0 }
 0x64f   : > { %12795 = vst [vmem:[#allocation63_spill] sm:$0xff] %v9954_v17  ;;  %12796 = vst [vmem:[#allocation64_spill] sm:$0xff] %v9957_v41  ;;  %v2368_v16 = vrot.slane %v8010_v62, 7  ;;  %v2459_v45 = vrot.slane %v8010_v62, 5  ;;  %v2158_v15 = vpop.f32.mrb[41].mxu0 }
 0x650   : > { %v2315_v20 = vrot.slane %v2158_v15, 1  ;;  %v2367_v63 = vrot.slane %v2158_v15, 7 }
 0x651   : > { %v2507_v60 = vsel %vm763_vm5, %v2368_v16, %v2459_v45 }
 0x652   : > { %v2783_v23 = vrot.slane %v2507_v60, 1  ;;  %v3058_v3 = vrot.slane %v2507_v60, 2  ;;  %v9963_v59 = vsel %vm763_vm5, %v2367_v63, %v2368_v16  ;;  %v9966_v26 = vsel %vm763_vm5, %v2315_v20, %v2367_v63 }
 0x653   : > { %v2780_v1 = vrot.slane %v9966_v26, 1  ;;  %v2781_v62 = vrot.slane %v9963_v59, 1  ;;  %v3055_v57 = vrot.slane %v9966_v26, 2  ;;  %v3056_v15 = vrot.slane %v9963_v59, 2 }
 0x655   : > { %v9975_v45 = vsel %vm971_vm6, %v2780_v1, %v2781_v62  ;;  %v9978_v16 = vsel %vm971_vm6, %v2781_v62, %v2783_v23  ;;  %v9983_v63 = vsel %vm1287_vm7, %v3055_v57, %v3056_v15  ;;  %v9986_v12 = vsel %vm1287_vm7, %v3056_v15, %v3058_v3 }
 0x656   : > { %12797 = vst [vmem:[#allocation65_spill] sm:$0xff] %v9975_v45  ;;  %12798 = vst [vmem:[#allocation66_spill] sm:$0xff] %v9978_v16  ;;  %v8013_v60 = vpop.f32.mrb[42].mxu0 }
 0x657   : > { %12799 = vst [vmem:[#allocation67_spill] sm:$0xff] %v9983_v63  ;;  %12800 = vst [vmem:[#allocation68_spill] sm:$0xff] %v9986_v12  ;;  %v2371_v17 = vrot.slane %v8013_v60, 7  ;;  %v2460_v41 = vrot.slane %v8013_v60, 5  ;;  %v2168_v22 = vpop.f32.mrb[43].mxu0 }
 0x658   : > { %v2316_v47 = vrot.slane %v2168_v22, 1  ;;  %v2370_v56 = vrot.slane %v2168_v22, 7 }
 0x659   : > { %v2508_v23 = vsel %vm763_vm5, %v2371_v17, %v2460_v41 }
 0x65a   : > { %v2788_v62 = vrot.slane %v2508_v23, 1  ;;  %v3063_v9 = vrot.slane %v2508_v23, 2  ;;  %v9992_v20 = vsel %vm763_vm5, %v2370_v56, %v2371_v17  ;;  %v9995_v57 = vsel %vm763_vm5, %v2316_v47, %v2370_v56 }
 0x65b   : > { %v2785_v15 = vrot.slane %v9995_v57, 1  ;;  %v2786_v60 = vrot.slane %v9992_v20, 1  ;;  %v3060_v1 = vrot.slane %v9995_v57, 2  ;;  %v3061_v22 = vrot.slane %v9992_v20, 2 }
 0x65d   : > { %v10004_v41 = vsel %vm971_vm6, %v2785_v15, %v2786_v60  ;;  %v10007_v17 = vsel %vm971_vm6, %v2786_v60, %v2788_v62  ;;  %v10012_v47 = vsel %vm1287_vm7, %v3060_v1, %v3061_v22  ;;  %v10015_v3 = vsel %vm1287_vm7, %v3061_v22, %v3063_v9 }
 0x65e   : > { %12801 = vst [vmem:[#allocation69_spill] sm:$0xff] %v10004_v41  ;;  %12802 = vst [vmem:[#allocation70_spill] sm:$0xff] %v10007_v17  ;;  %v8016_v23 = vpop.f32.mrb[44].mxu0 }
 0x65f   : > { %12803 = vst [vmem:[#allocation71_spill] sm:$0xff] %v10012_v47  ;;  %12804 = vst [vmem:[#allocation72_spill] sm:$0xff] %v10015_v3  ;;  %v2374_v63 = vrot.slane %v8016_v23, 7  ;;  %v2461_v12 = vrot.slane %v8016_v23, 5  ;;  %v2178_v53 = vpop.f32.mrb[45].mxu0 }
 0x660   : > { %v2317_v38 = vrot.slane %v2178_v53, 1  ;;  %v2373_v2 = vrot.slane %v2178_v53, 7 }
 0x661   : > { %v2509_v62 = vsel %vm763_vm5, %v2374_v63, %v2461_v12 }
 0x662   : > { %v2793_v60 = vrot.slane %v2509_v62, 1  ;;  %v3068_v45 = vrot.slane %v2509_v62, 2  ;;  %v10021_v56 = vsel %vm763_vm5, %v2373_v2, %v2374_v63  ;;  %v10024_v1 = vsel %vm763_vm5, %v2317_v38, %v2373_v2 }
 0x663   : > { %v2790_v22 = vrot.slane %v10024_v1, 1  ;;  %v2791_v23 = vrot.slane %v10021_v56, 1  ;;  %v3065_v15 = vrot.slane %v10024_v1, 2  ;;  %v3066_v53 = vrot.slane %v10021_v56, 2 }
 0x665   : > { %v10033_v12 = vsel %vm971_vm6, %v2790_v22, %v2791_v23  ;;  %v10036_v63 = vsel %vm971_vm6, %v2791_v23, %v2793_v60  ;;  %v10041_v38 = vsel %vm1287_vm7, %v3065_v15, %v3066_v53  ;;  %v10044_v9 = vsel %vm1287_vm7, %v3066_v53, %v3068_v45 }
 0x666   : > { %12805 = vst [vmem:[#allocation73_spill] sm:$0xff] %v10033_v12  ;;  %12806 = vst [vmem:[#allocation74_spill] sm:$0xff] %v10036_v63  ;;  %v8019_v62 = vpop.f32.mrb[46].mxu0 }
 0x667   : > { %12807 = vst [vmem:[#allocation75_spill] sm:$0xff] %v10041_v38  ;;  %12808 = vst [vmem:[#allocation76_spill] sm:$0xff] %v10044_v9  ;;  %v2377_v47 = vrot.slane %v8019_v62, 7  ;;  %v2462_v3 = vrot.slane %v8019_v62, 5  ;;  %v2188_v41 = vpop.f32.mrb[47].mxu0 }
 0x668   : > { %v2318_v17 = vrot.slane %v2188_v41, 1  ;;  %v2376_v16 = vrot.slane %v2188_v41, 7 }
 0x669   : > { %v2510_v60 = vsel %vm763_vm5, %v2377_v47, %v2462_v3 }
 0x66a   : > { %v2798_v23 = vrot.slane %v2510_v60, 1  ;;  %v3073_v51 = vrot.slane %v2510_v60, 2  ;;  %v10050_v2 = vsel %vm763_vm5, %v2376_v16, %v2377_v47  ;;  %v10053_v15 = vsel %vm763_vm5, %v2318_v17, %v2376_v16 }
 0x66b   : > { %v2795_v53 = vrot.slane %v10053_v15, 1  ;;  %v2796_v62 = vrot.slane %v10050_v2, 1  ;;  %v3070_v22 = vrot.slane %v10053_v15, 2  ;;  %v3071_v41 = vrot.slane %v10050_v2, 2 }
 0x66d   : > { %v10062_v3 = vsel %vm971_vm6, %v2795_v53, %v2796_v62  ;;  %v10065_v47 = vsel %vm971_vm6, %v2796_v62, %v2798_v23  ;;  %v10070_v17 = vsel %vm1287_vm7, %v3070_v22, %v3071_v41  ;;  %v10073_v45 = vsel %vm1287_vm7, %v3071_v41, %v3073_v51 }
 0x66e   : > { %12809 = vst [vmem:[#allocation77_spill] sm:$0xff] %v10062_v3  ;;  %12810 = vst [vmem:[#allocation78_spill] sm:$0xff] %v10065_v47  ;;  %v8022_v60 = vpop.f32.mrb[48].mxu0 }
 0x66f   : > { %12811 = vst [vmem:[#allocation79_spill] sm:$0xff] %v10070_v17  ;;  %12812 = vst [vmem:[#allocation80_spill] sm:$0xff] %v10073_v45  ;;  %v2380_v38 = vrot.slane %v8022_v60, 7  ;;  %v2463_v9 = vrot.slane %v8022_v60, 5  ;;  %v2198_v12 = vpop.f32.mrb[49].mxu0 }
 0x670   : > { %v2319_v63 = vrot.slane %v2198_v12, 1  ;;  %v2379_v37 = vrot.slane %v2198_v12, 7 }
 0x671   : > { %v2511_v23 = vsel %vm763_vm5, %v2380_v38, %v2463_v9 }
 0x672   : > { %v2803_v62 = vrot.slane %v2511_v23, 1  ;;  %v3078_v48 = vrot.slane %v2511_v23, 2  ;;  %v10079_v16 = vsel %vm763_vm5, %v2379_v37, %v2380_v38  ;;  %v10082_v22 = vsel %vm763_vm5, %v2319_v63, %v2379_v37 }
 0x673   : > { %v2800_v41 = vrot.slane %v10082_v22, 1  ;;  %v2801_v60 = vrot.slane %v10079_v16, 1  ;;  %v3075_v53 = vrot.slane %v10082_v22, 2  ;;  %v3076_v12 = vrot.slane %v10079_v16, 2 }
 0x675   : > { %v10091_v9 = vsel %vm971_vm6, %v2800_v41, %v2801_v60  ;;  %v10094_v38 = vsel %vm971_vm6, %v2801_v60, %v2803_v62  ;;  %v10099_v63 = vsel %vm1287_vm7, %v3075_v53, %v3076_v12  ;;  %v10102_v51 = vsel %vm1287_vm7, %v3076_v12, %v3078_v48 }
 0x676   : > { %12813 = vst [vmem:[#allocation81_spill] sm:$0xff] %v10091_v9  ;;  %12814 = vst [vmem:[#allocation82_spill] sm:$0xff] %v10094_v38  ;;  %v8025_v23 = vpop.f32.mrb[50].mxu0 }
 0x677   : > { %12815 = vst [vmem:[#allocation83_spill] sm:$0xff] %v10099_v63  ;;  %12816 = vst [vmem:[#allocation84_spill] sm:$0xff] %v10102_v51  ;;  %v2383_v17 = vrot.slane %v8025_v23, 7  ;;  %v2464_v45 = vrot.slane %v8025_v23, 5  ;;  %v2208_v3 = vpop.f32.mrb[51].mxu0 }
 0x678   : > { %v2320_v47 = vrot.slane %v2208_v3, 1  ;;  %v2382_v4 = vrot.slane %v2208_v3, 7 }
 0x679   : > { %v2512_v62 = vsel %vm763_vm5, %v2383_v17, %v2464_v45 }
 0x67a   : > { %v2808_v60 = vrot.slane %v2512_v62, 1  ;;  %v3083_v54 = vrot.slane %v2512_v62, 2  ;;  %v2384_v37 = vsel %vm763_vm5, %v2382_v4, %v2383_v17  ;;  %v2496_v53 = vsel %vm763_vm5, %v2320_v47, %v2382_v4 }
 0x67b   : > { %v2805_v9 = vrot.slane %v2496_v53, 1  ;;  %v2806_v38 = vrot.slane %v2384_v37, 1  ;;  %v3080_v48 = vrot.slane %v2496_v53, 2  ;;  %v3081_v12 = vrot.slane %v2384_v37, 2 }
 0x67c   : > { %v10109_v61 = vpack.c.bf16 %v2384_v37, %v2496_v53  ;;  %v12818_v62 = vpack.c.bf16 %v9934_v40, %v9937_v30 }
 0x67d   : > { %v2807_v23 = vsel %vm971_vm6, %v2805_v9, %v2806_v38  ;;  %v2809_v41 = vsel %vm971_vm6, %v2806_v38, %v2808_v60  ;;  %v3082_v3 = vsel %vm1287_vm7, %v3080_v48, %v3081_v12  ;;  %v3084_v45 = vsel %vm1287_vm7, %v3081_v12, %v3083_v54 }
 0x67e   : > { %12817 = vst [vmem:[#allocation85_spill] sm:$0xff] %v10109_v61  ;;  %v10119_v17 = vsel %vm1975_vm8, %v12818_v62, 0  ;;  %8386 = vmatprep.subr.msk.bf16.mxu0 %vm1975_vm8, %v10109_v61  ;;  %8530 = vmatprep.subr.msk.bf16.mxu1 %vm1975_vm8, %v10109_v61  ;;  %v8028_v4 = vpop.f32.mrb[52].mxu0  ;;  %v10125_v47 = vpack.c.bf16 %v2809_v41, %v2807_v23  ;;  %v10127_v9 = vpack.c.bf16 %v3084_v45, %v3082_v3 }
 0x67f   : > { %12819 = vst [vmem:[#allocation86_spill] sm:$0xff] %v10119_v17  ;;  %v2386_v38 = vrot.slane %v8028_v4, 7  ;;  %v2465_v37 = vrot.slane %v8028_v4, 5  ;;  %7105 = vmatpush3.bf16.xpose.msra.mxu0 %v10119_v17  ;;  %v2218_v54 = vpop.f32.mrb[53].mxu0 }
 0x680   : > { %12820 = vst [vmem:[#allocation87_spill] sm:$0xff] %v10125_v47  ;;  %12821 = vst [vmem:[#allocation88_spill] sm:$0xff] %v10127_v9  ;;  %v2321_v40 = vrot.slane %v2218_v54, 1  ;;  %v2385_v30 = vrot.slane %v2218_v54, 7 }
 0x681   : > { %v2513_v60 = vsel %vm763_vm5, %v2386_v38, %v2465_v37 }
 0x682   : > { %v2813_v53 = vrot.slane %v2513_v60, 1  ;;  %v3088_v48 = vrot.slane %v2513_v60, 2  ;;  %v2387_v12 = vsel %vm763_vm5, %v2385_v30, %v2386_v38  ;;  %v2497_v62 = vsel %vm763_vm5, %v2321_v40, %v2385_v30 }
 0x683   : > { %v10133_v61 = vpack.c.bf16 %v2387_v12, %v2497_v62  ;;  %v2810_v41 = vrot.slane %v2497_v62, 1  ;;  %v2811_v23 = vrot.slane %v2387_v12, 1  ;;  %v3085_v3 = vrot.slane %v2497_v62, 2 }
 0x684   : > { %v3086_v45 = vrot.slane %v2387_v12, 2  ;;  %v12823_v60 = vpack.c.bf16 %v9905_v34, %v9908_v49 }
 0x685   : > { %12822 = vst [vmem:[#allocation89_spill] sm:$0xff] %v10133_v61  ;;  %8387 = vmatprep.subr.msk.bf16.mxu0 %vm1975_vm8, %v10133_v61  ;;  %v2812_v4 = vsel %vm971_vm6, %v2810_v41, %v2811_v23  ;;  %v2814_v54 = vsel %vm971_vm6, %v2811_v23, %v2813_v53 }
 0x686   : > { %v8031_v37 = vpop.f32.mrb[54].mxu0  ;;  %v10143_v38 = vsel %vm1975_vm8, %v12823_v60, 0  ;;  %v10145_v40 = vpack.c.bf16 %v2814_v54, %v2812_v4  ;;  %v3087_v30 = vsel %vm1287_vm7, %v3085_v3, %v3086_v45  ;;  %v3089_v12 = vsel %vm1287_vm7, %v3086_v45, %v3088_v48 }
 0x687   : > { %12824 = vst [vmem:[#allocation90_spill] sm:$0xff] %v10143_v38  ;;  %v2389_v62 = vrot.slane %v8031_v37, 7  ;;  %v2466_v63 = vrot.slane %v8031_v37, 5  ;;  %7107 = vmatpush3.bf16.xpose.msra.mxu0 %v10143_v38  ;;  %v2228_v41 = vpop.f32.mrb[55].mxu0  ;;  %v10150_v61 = vpack.c.bf16 %v3089_v12, %v3087_v30 }
 0x688   : > { %12825 = vst [vmem:[#allocation91_spill] sm:$0xff] %v10145_v40  ;;  %v2322_v53 = vrot.slane %v2228_v41, 1  ;;  %v2388_v23 = vrot.slane %v2228_v41, 7 }
 0x689   : > { %12826 = vst [vmem:[#allocation92_spill] sm:$0xff] %v10150_v61  ;;  %v2514_v34 = vsel %vm763_vm5, %v2389_v62, %v2466_v63 }
 0x68a   : > { %v2818_v49 = vrot.slane %v2514_v34, 1  ;;  %v3093_v60 = vrot.slane %v2514_v34, 2  ;;  %v2390_v4 = vsel %vm763_vm5, %v2388_v23, %v2389_v62  ;;  %v2498_v54 = vsel %vm763_vm5, %v2322_v53, %v2388_v23 }
 0x68b   : > { %v10155_v3 = vpack.c.bf16 %v2390_v4, %v2498_v54  ;;  %v2815_v48 = vrot.slane %v2498_v54, 1  ;;  %v2816_v45 = vrot.slane %v2390_v4, 1  ;;  %v3090_v37 = vrot.slane %v2498_v54, 2 }
 0x68c   : > { %v3091_v51 = vrot.slane %v2390_v4, 2 }
 0x68d   : > { %12827 = vst [vmem:[#allocation93_spill] sm:$0xff] %v10155_v3  ;;  %v2817_v38 = vsel %vm971_vm6, %v2815_v48, %v2816_v45  ;;  %v2819_v30 = vsel %vm971_vm6, %v2816_v45, %v2818_v49  ;;  %8388 = vmatprep.subr.msk.bf16.mxu0 %vm1975_vm8, %v10155_v3 }
 0x68e   : > { %v10161_v63 = vpack.c.bf16 %v2819_v30, %v2817_v38  ;;  %v3092_v12 = vsel %vm1287_vm7, %v3090_v37, %v3091_v51  ;;  %v3094_v62 = vsel %vm1287_vm7, %v3091_v51, %v3093_v60  ;;  %v8034_v41 = vpop.f32.mrb[56].mxu0 }
 0x68f   : > { %v10165_v53 = vpack.c.bf16 %v3094_v62, %v3092_v12  ;;  %v2392_v23 = vrot.slane %v8034_v41, 7  ;;  %v2467_v34 = vrot.slane %v8034_v41, 5  ;;  %7109 = vmatpush3.bf16.xpose.msra.mxu0 %v10119_v17  ;;  %v2238_v4 = vpop.f32.mrb[57].mxu0 }
 0x690   : > { %12828 = vst [vmem:[#allocation94_spill] sm:$0xff] %v10161_v63  ;;  %v2323_v54 = vrot.slane %v2238_v4, 1  ;;  %v2391_v48 = vrot.slane %v2238_v4, 7 }
 0x691   : > { %12829 = vst [vmem:[#allocation95_spill] sm:$0xff] %v10165_v53  ;;  %v2515_v49 = vsel %vm763_vm5, %v2392_v23, %v2467_v34 }
 0x692   : > { %v2823_v45 = vrot.slane %v2515_v49, 1  ;;  %v3098_v3 = vrot.slane %v2515_v49, 2  ;;  %v2393_v38 = vsel %vm763_vm5, %v2391_v48, %v2392_v23  ;;  %v2499_v37 = vsel %vm763_vm5, %v2323_v54, %v2391_v48 }
 0x693   : > { %v10171_v30 = vpack.c.bf16 %v2393_v38, %v2499_v37  ;;  %v2820_v51 = vrot.slane %v2499_v37, 1  ;;  %v2821_v60 = vrot.slane %v2393_v38, 1  ;;  %v3095_v12 = vrot.slane %v2499_v37, 2 }
 0x694   : > { %v3096_v62 = vrot.slane %v2393_v38, 2  ;;  %v12832_v48 = vpack.c.bf16 %v9963_v59, %v9966_v26 }
 0x695   : > { %12830 = vst [vmem:[#allocation96_spill] sm:$0xff] %v10171_v30  ;;  %v2822_v41 = vsel %vm971_vm6, %v2820_v51, %v2821_v60  ;;  %v2824_v17 = vsel %vm971_vm6, %v2821_v60, %v2823_v45  ;;  %8389 = vmatprep.subr.msk.bf16.mxu0 %vm1975_vm8, %v10171_v30 }
 0x696   : > { %v10177_v34 = vpack.c.bf16 %v2824_v17, %v2822_v41  ;;  %v3097_v4 = vsel %vm1287_vm7, %v3095_v12, %v3096_v62  ;;  %v3099_v23 = vsel %vm1287_vm7, %v3096_v62, %v3098_v3  ;;  %v8037_v54 = vpop.f32.mrb[58].mxu0  ;;  %v10185_v49 = vsel %vm1975_vm8, %v12832_v48, 0 }
 0x697   : > { %12833 = vst [vmem:[#allocation98_spill] sm:$0xff] %v10185_v49  ;;  %v10187_v38 = vpack.c.bf16 %v3099_v23, %v3097_v4  ;;  %v2395_v37 = vrot.slane %v8037_v54, 7  ;;  %v2468_v45 = vrot.slane %v8037_v54, 5  ;;  %7111 = vmatpush3.bf16.xpose.msra.mxu0 %v10185_v49  ;;  %v2248_v51 = vpop.f32.mrb[59].mxu0 }
 0x698   : > { %12831 = vst [vmem:[#allocation97_spill] sm:$0xff] %v10177_v34  ;;  %v2324_v17 = vrot.slane %v2248_v51, 1  ;;  %v2394_v60 = vrot.slane %v2248_v51, 7 }
 0x699   : > { %12834 = vst [vmem:[#allocation99_spill] sm:$0xff] %v10187_v38  ;;  %v2516_v12 = vsel %vm763_vm5, %v2395_v37, %v2468_v45 }
 0x69a   : > { %v2828_v41 = vrot.slane %v2516_v12, 1  ;;  %v3103_v3 = vrot.slane %v2516_v12, 2  ;;  %v2396_v62 = vsel %vm763_vm5, %v2394_v60, %v2395_v37  ;;  %v2500_v59 = vsel %vm763_vm5, %v2324_v17, %v2394_v60 }
 0x69b   : > { %v10193_v26 = vpack.c.bf16 %v2396_v62, %v2500_v59  ;;  %v2825_v48 = vrot.slane %v2500_v59, 1  ;;  %v2826_v4 = vrot.slane %v2396_v62, 1  ;;  %v3100_v23 = vrot.slane %v2500_v59, 2 }
 0x69c   : > { %v3101_v30 = vrot.slane %v2396_v62, 2  ;;  %v12837_v60 = vpack.c.bf16 %v9992_v20, %v9995_v57 }
 0x69d   : > { %12835 = vst [vmem:[#allocation100_spill] sm:$0xff] %v10193_v26  ;;  %v2827_v54 = vsel %vm971_vm6, %v2825_v48, %v2826_v4  ;;  %v2829_v49 = vsel %vm971_vm6, %v2826_v4, %v2828_v41  ;;  %8390 = vmatprep.subr.msk.bf16.mxu0 %vm1975_vm8, %v10193_v26 }
 0x69e   : > { %v10199_v45 = vpack.c.bf16 %v2829_v49, %v2827_v54  ;;  %v3102_v51 = vsel %vm1287_vm7, %v3100_v23, %v3101_v30  ;;  %v3104_v37 = vsel %vm1287_vm7, %v3101_v30, %v3103_v3  ;;  %v8040_v17 = vpop.f32.mrb[60].mxu0  ;;  %v10207_v12 = vsel %vm1975_vm8, %v12837_v60, 0 }
 0x69f   : > { %12838 = vst [vmem:[#allocation102_spill] sm:$0xff] %v10207_v12  ;;  %v10209_v62 = vpack.c.bf16 %v3104_v37, %v3102_v51  ;;  %v2398_v59 = vrot.slane %v8040_v17, 7  ;;  %v2469_v41 = vrot.slane %v8040_v17, 5  ;;  %7113 = vmatpush3.bf16.xpose.msra.mxu0 %v10207_v12  ;;  %v2258_v48 = vpop.f32.mrb[61].mxu0 }
 0x6a0   : > { %12836 = vst [vmem:[#allocation101_spill] sm:$0xff] %v10199_v45  ;;  %v2325_v49 = vrot.slane %v2258_v48, 1  ;;  %v2397_v4 = vrot.slane %v2258_v48, 7 }
 0x6a1   : > { %12839 = vst [vmem:[#allocation103_spill] sm:$0xff] %v10209_v62  ;;  %v2517_v23 = vsel %vm763_vm5, %v2398_v59, %v2469_v41 }
 0x6a2   : > { %v2833_v54 = vrot.slane %v2517_v23, 1  ;;  %v3108_v30 = vrot.slane %v2517_v23, 2  ;;  %v2399_v3 = vsel %vm763_vm5, %v2397_v4, %v2398_v59  ;;  %v2501_v20 = vsel %vm763_vm5, %v2325_v49, %v2397_v4 }
 0x6a3   : > { %v10215_v57 = vpack.c.bf16 %v2399_v3, %v2501_v20  ;;  %v2830_v60 = vrot.slane %v2501_v20, 1  ;;  %v2831_v51 = vrot.slane %v2399_v3, 1  ;;  %v3105_v37 = vrot.slane %v2501_v20, 2 }
 0x6a4   : > { %v3106_v26 = vrot.slane %v2399_v3, 2  ;;  %v12842_v4 = vpack.c.bf16 %v10021_v56, %v10024_v1 }
 0x6a5   : > { %12840 = vst [vmem:[#allocation104_spill] sm:$0xff] %v10215_v57  ;;  %v2832_v17 = vsel %vm971_vm6, %v2830_v60, %v2831_v51  ;;  %v2834_v12 = vsel %vm971_vm6, %v2831_v51, %v2833_v54  ;;  %8391 = vmatprep.subr.msk.bf16.mxu0 %vm1975_vm8, %v10215_v57 }
 0x6a6   : > { %v10221_v41 = vpack.c.bf16 %v2834_v12, %v2832_v17  ;;  %v3107_v48 = vsel %vm1287_vm7, %v3105_v37, %v3106_v26  ;;  %v3109_v59 = vsel %vm1287_vm7, %v3106_v26, %v3108_v30  ;;  %v8043_v49 = vpop.f32.mrb[62].mxu0  ;;  %v10229_v23 = vsel %vm1975_vm8, %v12842_v4, 0 }
 0x6a7   : > { %12843 = vst [vmem:[#allocation106_spill] sm:$0xff] %v10229_v23  ;;  %v10231_v3 = vpack.c.bf16 %v3109_v59, %v3107_v48  ;;  %v2401_v20 = vrot.slane %v8043_v49, 7  ;;  %v2470_v54 = vrot.slane %v8043_v49, 5  ;;  %7115 = vmatpush3.bf16.xpose.msra.mxu0 %v10229_v23  ;;  %v2268_v60 = vpop.f32.mrb[63].mxu0 }
 0x6a8   : > { %12841 = vst [vmem:[#allocation105_spill] sm:$0xff] %v10221_v41  ;;  %v2326_v12 = vrot.slane %v2268_v60, 1  ;;  %v2400_v51 = vrot.slane %v2268_v60, 7 }
 0x6a9   : > { %12844 = vst [vmem:[#allocation107_spill] sm:$0xff] %v10231_v3  ;;  %v2518_v37 = vsel %vm763_vm5, %v2401_v20, %v2470_v54 }
 0x6aa   : > { %v2838_v17 = vrot.slane %v2518_v37, 1  ;;  %v3113_v26 = vrot.slane %v2518_v37, 2  ;;  %v2402_v30 = vsel %vm763_vm5, %v2400_v51, %v2401_v20  ;;  %v2502_v56 = vsel %vm763_vm5, %v2326_v12, %v2400_v51 }
 0x6ab   : > { %v10237_v1 = vpack.c.bf16 %v2402_v30, %v2502_v56  ;;  %v2835_v4 = vrot.slane %v2502_v56, 1  ;;  %v2836_v48 = vrot.slane %v2402_v30, 1  ;;  %v3110_v59 = vrot.slane %v2502_v56, 2 }
 0x6ac   : > { %v3111_v57 = vrot.slane %v2402_v30, 2  ;;  %v12847_v51 = vpack.c.bf16 %v10050_v2, %v10053_v15 }
 0x6ad   : > { %12845 = vst [vmem:[#allocation108_spill] sm:$0xff] %v10237_v1  ;;  %v2837_v49 = vsel %vm971_vm6, %v2835_v4, %v2836_v48  ;;  %v2839_v23 = vsel %vm971_vm6, %v2836_v48, %v2838_v17  ;;  %8392 = vmatprep.subr.msk.bf16.mxu0 %vm1975_vm8, %v10237_v1 }
 0x6ae   : > { %v10243_v54 = vpack.c.bf16 %v2839_v23, %v2837_v49  ;;  %v3112_v60 = vsel %vm1287_vm7, %v3110_v59, %v3111_v57  ;;  %v3114_v20 = vsel %vm1287_vm7, %v3111_v57, %v3113_v26  ;;  %v8046_v12 = vpop.f32.mrb[64].mxu0  ;;  %v10251_v37 = vsel %vm1975_vm8, %v12847_v51, 0 }
 0x6af   : > { %12848 = vst [vmem:[#allocation110_spill] sm:$0xff] %v10251_v37  ;;  %v10253_v30 = vpack.c.bf16 %v3114_v20, %v3112_v60  ;;  %v2404_v56 = vrot.slane %v8046_v12, 7  ;;  %v2471_v17 = vrot.slane %v8046_v12, 5  ;;  %7117 = vmatpush3.bf16.xpose.msra.mxu0 %v10251_v37  ;;  %v2278_v4 = vpop.f32.mrb[65].mxu0 }
 0x6b0   : > { %12846 = vst [vmem:[#allocation109_spill] sm:$0xff] %v10243_v54  ;;  %v2327_v23 = vrot.slane %v2278_v4, 1  ;;  %v2403_v48 = vrot.slane %v2278_v4, 7 }
 0x6b1   : > { %12849 = vst [vmem:[#allocation111_spill] sm:$0xff] %v10253_v30  ;;  %v2519_v59 = vsel %vm763_vm5, %v2404_v56, %v2471_v17 }
 0x6b2   : > { %v2843_v49 = vrot.slane %v2519_v59, 1  ;;  %v3118_v57 = vrot.slane %v2519_v59, 2  ;;  %v2405_v26 = vsel %vm763_vm5, %v2403_v48, %v2404_v56  ;;  %v2503_v2 = vsel %vm763_vm5, %v2327_v23, %v2403_v48 }
 0x6b3   : > { %v10259_v15 = vpack.c.bf16 %v2405_v26, %v2503_v2  ;;  %v2840_v51 = vrot.slane %v2503_v2, 1  ;;  %v2841_v60 = vrot.slane %v2405_v26, 1  ;;  %v3115_v20 = vrot.slane %v2503_v2, 2 }
 0x6b4   : > { %v3116_v1 = vrot.slane %v2405_v26, 2  ;;  %v12852_v23 = vpack.c.bf16 %v10079_v16, %v10082_v22 }
 0x6b5   : > { %12850 = vst [vmem:[#allocation112_spill] sm:$0xff] %v10259_v15  ;;  %v2842_v12 = vsel %vm971_vm6, %v2840_v51, %v2841_v60  ;;  %v2844_v37 = vsel %vm971_vm6, %v2841_v60, %v2843_v49  ;;  %8393 = vmatprep.subr.msk.bf16.mxu0 %vm1975_vm8, %v10259_v15 }
 0x6b6   : > { %v10265_v17 = vpack.c.bf16 %v2844_v37, %v2842_v12  ;;  %v3117_v4 = vsel %vm1287_vm7, %v3115_v20, %v3116_v1  ;;  %v3119_v56 = vsel %vm1287_vm7, %v3116_v1, %v3118_v57  ;;  %v10273_v48 = vsel %vm1975_vm8, %v12852_v23, 0  ;;  %v8049_v16 = vpop.f32.mrb[66].mxu0 }
 0x6b7   : > { %12853 = vst [vmem:[#allocation114_spill] sm:$0xff] %v10273_v48  ;;  %v10275_v59 = vpack.c.bf16 %v3119_v56, %v3117_v4  ;;  %7119 = vmatpush3.bf16.xpose.msra.mxu0 %v10273_v48  ;;  %v2472_v22 = vrot.slane %v8049_v16, 5  ;;  %v2288_v1 = vpop.f32.mrb[67].mxu0 }
 0x6b8   : > { %12851 = vst [vmem:[#allocation113_spill] sm:$0xff] %v10265_v17  ;;  %8394 = vmatprep.subr.msk.bf16.mxu0 %vm373_vm4, %v9290_v43  ;;  %v2328_v37 = vrot.slane %v2288_v1, 1  ;;  %v2406_v49 = vrot.slane %v2288_v1, 7 }
 0x6b9   : > { %12854 = vst [vmem:[#allocation115_spill] sm:$0xff] %v10275_v59 }
 0x6ba   : > { %v2504_v2 = vsel %vm763_vm5, %v2328_v37, %v2406_v49 }
 0x6bb   : > { %v3436_v20 = vrot.slane %v2504_v2, 1  ;;  %v3557_v4 = vrot.slane %v2504_v2, 2 }
 0x6be   : > { %7121 = vmatmul.mubr.msk.bf16.vlgmr.msra.gmra.mrb[68].mxu0 %vm1975_vm8, %v9899_v21  ;;  %v10321_v21 = vld [vmem:[%s12320_s3 + $0x10] sm:$0xff]  }
 0x6bf   : > { %7123 = vmatpush3.bf16.xpose.msra.mxu0 %v9466_v25  ;;  %7138 = vmatprep.mubr.msk.bf16.mxu0 %vm373_vm4, %v9888_v44 }
 0x6c0   : > { %8395 = vmatprep.subr.msk.bf16.mxu0 %vm373_vm4, %v9312_v46  ;;  %3165 = vrot.lane.b32.xlu0 %v10321_v21, %s8900_s22 }
 0x6c7   : > { %7125 = vmatpush3.bf16.xpose.msra.mxu0 %v9478_v35 }
 0x6c8   : > { %8396 = vmatprep.subr.msk.bf16.mxu0 %vm373_vm4, %v9334_v7 }
 0x6cf   : > { %7127 = vmatpush3.bf16.xpose.msra.mxu0 %v9466_v25 }
 0x6d0   : > { %8397 = vmatprep.subr.msk.bf16.mxu0 %vm373_vm4, %v9350_v50 }
 0x6d7   : > { %7129 = vmatpush3.bf16.xpose.msra.mxu0 %v9490_v11 }
 0x6d8   : > { %8398 = vmatprep.subr.msk.bf16.mxu0 %vm373_vm4, %v9372_v27 }
 0x6df   : > { %7131 = vmatpush3.bf16.xpose.msra.mxu0 %v9499_v52 }
 0x6e0   : > { %8399 = vmatprep.subr.msk.bf16.mxu0 %vm373_vm4, %v9394_v28 }
 0x6e7   : > { %7133 = vmatpush3.bf16.xpose.msra.mxu0 %v9508_v33 }
 0x6e8   : > { %8400 = vmatprep.subr.msk.bf16.mxu0 %vm373_vm4, %v9416_v39 }
 0x6ef   : > { %7135 = vmatpush3.bf16.xpose.msra.mxu0 %v9517_v0 }
 0x6f0   : > { %8401 = vmatprep.subr.msk.bf16.mxu0 %vm373_vm4, %v9438_v18 }
 0x6f7   : > { %7137 = vmatpush3.bf16.xpose.msra.mxu0 %v9531_v5 }
 0x6f8   : > { %8402 = vmatprep.subr.msk.bf16.mxu0 %vm373_vm4, %v12779_v8 }
 0x6fe   : > { %7139 = vmatmul.mubr.msk.bf16.vlgmr.msra.gmra.mrb[68].mxu0 %vm373_vm4, %v9888_v44  ;;  %v2407_v44 = vrot.slane %v8049_v16, 7 }
 0x6ff   : > { %7141 = vmatpush3.bf16.xpose.msra.mxu0 %v12771_v42  ;;  %7156 = vmatprep.mubr.msk.bf16.mxu0 %vm373_vm4, %v9858_v36 }
 0x700   : > { %8403 = vmatprep.subr.msk.bf16.mxu0 %vm373_vm4, %v12769_v29  ;;  %v2520_v57 = vsel %vm763_vm5, %v2407_v44, %v2472_v22  ;;  %v2408_v26 = vsel %vm763_vm5, %v2406_v49, %v2407_v44 }
 0x701   : > { %v3439_v51 = vrot.slane %v2520_v57, 1  ;;  %v3560_v60 = vrot.slane %v2520_v57, 2  ;;  %v3437_v12 = vrot.slane %v2408_v26, 1  ;;  %v3558_v56 = vrot.slane %v2408_v26, 2  ;;  %v12858_v57 = vld [vmem:[#allocation35_spill] sm:$0xff] }
 0x702   : > { %v10331_v23 = vpack.c.bf16 %v2408_v26, %v2504_v2  ;;  %v12859_v26 = vld [vmem:[#allocation37_spill] sm:$0xff]  ;;  %v2891_v2 = vpop.permute.xlu1 %2890 }
 0x703   : > { %v3438_v16 = vsel %vm971_vm6, %v3436_v20, %v3437_v12  ;;  %v3440_v22 = vsel %vm971_vm6, %v3437_v12, %v3439_v51  ;;  %v3559_v44 = vsel %vm1287_vm7, %v3557_v4, %v3558_v56  ;;  %v3561_v1 = vsel %vm1287_vm7, %v3558_v56, %v3560_v60  ;;  %v12860_v51 = vld [vmem:[#allocation62_spill] sm:$0xff]  ;;  %v12861_v60 = vld [vmem:[#allocation61_spill] sm:$0xff] }
 0x704   : > { %12855 = vst [vmem:[#allocation116_spill] sm:$0xff] %v10331_v23  ;;  %v10337_v37 = vpack.c.bf16 %v3440_v22, %v3438_v16  ;;  %v10339_v49 = vpack.c.bf16 %v3561_v1, %v3559_v44  ;;  %v12862_v20 = vpack.c.bf16 %v12860_v51, %v12861_v60  ;;  %v12864_v4 = vld [vmem:[#allocation58_spill] sm:$0xff]  ;;  %v12865_v56 = vld [vmem:[#allocation57_spill] sm:$0xff] }
 0x705   : > { %v12866_v16 = vpack.c.bf16 %v12864_v4, %v12865_v56  ;;  %v12869_v44 = vld [vmem:[#allocation65_spill] sm:$0xff]  ;;  %v12872_v60 = vld [vmem:[#allocation70_spill] sm:$0xff] }
 0x706   : > { %12856 = vst [vmem:[#allocation117_spill] sm:$0xff] %v10337_v37  ;;  %12857 = vst [vmem:[#allocation118_spill] sm:$0xff] %v10339_v49  ;;  %v10362_v12 = vsel %vm1975_vm8, %v12862_v20, 0  ;;  %v12873_v20 = vld [vmem:[#allocation69_spill] sm:$0xff]  ;;  %v12888_v49 = vld [vmem:[#allocation10_spill] sm:$0xff] }
 0x707   : > { %7143 = vmatpush3.bf16.xpose.msra.mxu0 %v12770_v6  ;;  %12863 = vst [vmem:[#allocation62_spill] sm:$0xff] %v10362_v12  ;;  %v10372_v22 = vsel %vm1975_vm8, %v12866_v16, 0  ;;  %v12874_v4 = vpack.c.bf16 %v12872_v60, %v12873_v20  ;;  %v12876_v16 = vld [vmem:[#allocation74_spill] sm:$0xff]  ;;  %v12881_v20 = vld [vmem:[#allocation77_spill] sm:$0xff] }
 0x708   : > { %8404 = vmatprep.subr.msk.bf16.mxu0 %vm373_vm4, %v9338_v13  ;;  %12867 = vst [vmem:[#allocation61_spill] sm:$0xff] %v10372_v22  ;;  %v12880_v60 = vld [vmem:[#allocation78_spill] sm:$0xff]  ;;  %v12900_v37 = vld [vmem:[#allocation53_spill] sm:$0xff] }
 0x709   : > { %v10393_v56 = vsel %vm1975_vm8, %v12874_v4, 0  ;;  %v12882_v4 = vpack.c.bf16 %v12880_v60, %v12881_v20  ;;  %v12889_v60 = vld [vmem:[#allocation48_spill] sm:$0xff]  ;;  %v12890_v20 = vld [vmem:[#allocation14_spill] sm:$0xff] }
 0x70a   : > { %12875 = vst [vmem:[#allocation57_spill] sm:$0xff] %v10393_v56 }
 0x70b   : > { %v10411_v8 = vsel %vm1975_vm8, %v12882_v4, 0  ;;  %v12891_v4 = vld [vmem:[#allocation49_spill] sm:$0xff] }
 0x70c   : > { %12883 = vst [vmem:[#allocation65_spill] sm:$0xff] %v10411_v8 }
 0x70f   : > { %7145 = vmatpush3.bf16.xpose.msra.mxu0 %v12771_v42 }
 0x710   : > { %8405 = vmatprep.subr.msk.bf16.mxu0 %vm373_vm4, %v12772_v19 }
 0x717   : > { %7147 = vmatpush3.bf16.xpose.msra.mxu0 %v12773_v31 }
 0x718   : > { %8406 = vmatprep.subr.msk.bf16.mxu0 %vm373_vm4, %v12774_v32 }
 0x71f   : > { %7149 = vmatpush3.bf16.xpose.msra.mxu0 %v12775_v14 }
 0x720   : > { %8407 = vmatprep.subr.msk.bf16.mxu0 %vm373_vm4, %v12776_v58 }
 0x727   : > { %7151 = vmatpush3.bf16.xpose.msra.mxu0 %v12777_v55 }
 0x728   : > { %8408 = vmatprep.subr.msk.bf16.mxu0 %vm373_vm4, %v9420_v24 }
 0x72f   : > { %7153 = vmatpush3.bf16.xpose.msra.mxu0 %v12778_v10 }
 0x730   : > { %8409 = vmatprep.subr.msk.bf16.mxu0 %vm373_vm4, %v12858_v57 }
 0x737   : > { %7155 = vmatpush3.bf16.xpose.msra.mxu0 %v12859_v26 }
 0x738   : > { %8410 = vmatprep.subr.msk.bf16.mxu0 %vm1975_vm8, %v10125_v47  ;;  %v12899_v47 = vld [vmem:[#allocation32_spill] sm:$0xff] }
 0x73e   : > { %7157 = vmatmul.mubr.msk.bf16.vlgmr.msra.gmra.mrb[68].mxu0 %vm373_vm4, %v9858_v36  ;;  %v12868_v36 = vld [vmem:[#allocation66_spill] sm:$0xff] }
 0x73f   : > { %7159 = vmatpush3.bf16.xpose.msra.mxu0 %v10362_v12  ;;  %7174 = vmatprep.mubr.msk.bf16.mxu0 %vm1975_vm8, %v2891_v2  ;;  %v12870_v1 = vpack.c.bf16 %v12868_v36, %v12869_v44  ;;  %v12877_v36 = vld [vmem:[#allocation73_spill] sm:$0xff] }
 0x740   : > { %8411 = vmatprep.subr.msk.bf16.mxu0 %vm1975_vm8, %v10145_v40  ;;  %v12878_v44 = vpack.c.bf16 %v12876_v16, %v12877_v36  ;;  %v12884_v16 = vld [vmem:[#allocation82_spill] sm:$0xff]  ;;  %v12885_v36 = vld [vmem:[#allocation81_spill] sm:$0xff] }
 0x741   : > { %v10384_v51 = vsel %vm1975_vm8, %v12870_v1, 0 }
 0x742   : > { %12871 = vst [vmem:[#allocation58_spill] sm:$0xff] %v10384_v51  ;;  %v10402_v1 = vsel %vm1975_vm8, %v12878_v44, 0  ;;  %v12886_v44 = vpack.c.bf16 %v12884_v16, %v12885_v36  ;;  %v12892_v16 = vld [vmem:[#allocation17_spill] sm:$0xff]  ;;  %v8806_v36 = vld [vmem:[%s12320_s3 + $0x18] sm:$0xff]  }
 0x743   : > { %12879 = vst [vmem:[#allocation66_spill] sm:$0xff] %v10402_v1  ;;  %3321 = vrot.lane.b32.xlu0 %v8806_v36, %s8900_s22 }
 0x744   : > { %v10420_v43 = vsel %vm1975_vm8, %v12886_v44, 0  ;;  %v12894_v44 = vld [vmem:[#allocation50_spill] sm:$0xff] }
 0x745   : > { %12887 = vst [vmem:[#allocation70_spill] sm:$0xff] %v10420_v43 }
 0x747   : > { %7161 = vmatpush3.bf16.xpose.msra.mxu0 %v10372_v22 }
 0x748   : > { %8412 = vmatprep.subr.msk.bf16.mxu0 %vm1975_vm8, %v10161_v63 }
 0x74f   : > { %7163 = vmatpush3.bf16.xpose.msra.mxu0 %v10362_v12 }
 0x750   : > { %8413 = vmatprep.subr.msk.bf16.mxu0 %vm1975_vm8, %v10177_v34 }
 0x757   : > { %7165 = vmatpush3.bf16.xpose.msra.mxu0 %v10384_v51 }
 0x758   : > { %8414 = vmatprep.subr.msk.bf16.mxu0 %vm1975_vm8, %v10199_v45 }
 0x75f   : > { %7167 = vmatpush3.bf16.xpose.msra.mxu0 %v10393_v56 }
 0x760   : > { %8415 = vmatprep.subr.msk.bf16.mxu0 %vm1975_vm8, %v10221_v41 }
 0x767   : > { %7169 = vmatpush3.bf16.xpose.msra.mxu0 %v10402_v1 }
 0x768   : > { %8416 = vmatprep.subr.msk.bf16.mxu0 %vm1975_vm8, %v10243_v54 }
 0x76f   : > { %7171 = vmatpush3.bf16.xpose.msra.mxu0 %v10411_v8 }
 0x770   : > { %8417 = vmatprep.subr.msk.bf16.mxu0 %vm1975_vm8, %v10265_v17 }
 0x777   : > { %7173 = vmatpush3.bf16.xpose.msra.mxu0 %v10420_v43 }
 0x778   : > { %8418 = vmatprep.subr.msk.bf16.mxu0 %vm373_vm4, %v12888_v49  ;;  %v12895_v49 = vld [vmem:[#allocation24_spill] sm:$0xff] }
 0x77e   : > { %7175 = vmatmul.mubr.msk.bf16.vlgmr.msra.gmra.mrb[68].mxu0 %vm1975_vm8, %v2891_v2  ;;  %v12893_v2 = vld [vmem:[#allocation20_spill] sm:$0xff] }
 0x77f   : > { %7177 = vmatpush3.bf16.xpose.msra.mxu0 %v12889_v60  ;;  %7192 = vmatprep.mubr.msk.bf16.mxu0 %vm373_vm4, %v10321_v21 }
 0x780   : > { %8419 = vmatprep.subr.msk.bf16.mxu0 %vm373_vm4, %v12890_v20  ;;  %v12897_v20 = vld [vmem:[#allocation28_spill] sm:$0xff] }
 0x787   : > { %7179 = vmatpush3.bf16.xpose.msra.mxu0 %v12891_v4  ;;  %v12896_v4 = vld [vmem:[#allocation51_spill] sm:$0xff] }
 0x788   : > { %8420 = vmatprep.subr.msk.bf16.mxu0 %vm373_vm4, %v12892_v16  ;;  %v12898_v16 = vld [vmem:[#allocation52_spill] sm:$0xff] }
 0x78f   : > { %7181 = vmatpush3.bf16.xpose.msra.mxu0 %v12889_v60  ;;  %v12901_v60 = vld [vmem:[#allocation36_spill] sm:$0xff] }
 0x790   : > { %8421 = vmatprep.subr.msk.bf16.mxu0 %vm373_vm4, %v12893_v2  ;;  %v12902_v2 = vld [vmem:[#allocation7_spill] sm:$0xff] }
 0x797   : > { %7183 = vmatpush3.bf16.xpose.msra.mxu0 %v12894_v44 }
 0x798   : > { %8422 = vmatprep.subr.msk.bf16.mxu0 %vm373_vm4, %v12895_v49  ;;  %v3166_v49 = vpop.permute.xlu0 %3165 }
 0x79f   : > { %7185 = vmatpush3.bf16.xpose.msra.mxu0 %v12896_v4  ;;  %v12904_v4 = vld [vmem:[#allocation63_spill] sm:$0xff] }
 0x7a0   : > { %8423 = vmatprep.subr.msk.bf16.mxu0 %vm373_vm4, %v12897_v20  ;;  %v12903_v20 = vld [vmem:[#allocation64_spill] sm:$0xff] }
 0x7a7   : > { %7187 = vmatpush3.bf16.xpose.msra.mxu0 %v12898_v16  ;;  %v12905_v16 = vpack.c.bf16 %v12903_v20, %v12904_v4  ;;  %v12912_v20 = vld [vmem:[#allocation67_spill] sm:$0xff] }
 0x7a8   : > { %8424 = vmatprep.subr.msk.bf16.mxu0 %vm373_vm4, %v12899_v47 }
 0x7a9   : > { %v10462_v44 = vsel %vm1975_vm8, %v12905_v16, 0 }
 0x7aa   : > { %12906 = vst [vmem:[#allocation69_spill] sm:$0xff] %v10462_v44 }
 0x7af   : > { %7189 = vmatpush3.bf16.xpose.msra.mxu0 %v12900_v37 }
 0x7b0   : > { %8425 = vmatprep.subr.msk.bf16.mxu0 %vm373_vm4, %v12901_v60  ;;  %v12908_v60 = vld [vmem:[#allocation59_spill] sm:$0xff] }
 0x7b7   : > { %7191 = vmatpush3.bf16.xpose.msra.mxu0 %v12902_v2  ;;  %v12907_v2 = vld [vmem:[#allocation60_spill] sm:$0xff] }
 0x7b8   : > { %8426 = vmatprep.subr.msk.bf16.mxu0 %vm1975_vm8, %v10127_v9  ;;  %v12909_v9 = vpack.c.bf16 %v12907_v2, %v12908_v60  ;;  %v12916_v60 = vld [vmem:[#allocation71_spill] sm:$0xff] }
 0x7ba   : > { %v10472_v37 = vsel %vm1975_vm8, %v12909_v9, 0  ;;  %v12915_v9 = vld [vmem:[#allocation72_spill] sm:$0xff] }
 0x7bb   : > { %12910 = vst [vmem:[#allocation74_spill] sm:$0xff] %v10472_v37  ;;  %v12917_v2 = vpack.c.bf16 %v12915_v9, %v12916_v60  ;;  %v12923_v9 = vld [vmem:[#allocation80_spill] sm:$0xff]  ;;  %v12924_v60 = vld [vmem:[#allocation79_spill] sm:$0xff] }
 0x7be   : > { %7193 = vmatmul.mubr.msk.bf16.vlgmr.msra.gmra.mrb[68].mxu0 %vm373_vm4, %v10321_v21  ;;  %v12911_v21 = vld [vmem:[#allocation68_spill] sm:$0xff] }
 0x7bf   : > { %7195 = vmatpush3.bf16.xpose.msra.mxu0 %v10462_v44  ;;  %7210 = vmatprep.mubr.msk.bf16.mxu0 %vm1975_vm8, %v3166_v49  ;;  %v12913_v4 = vpack.c.bf16 %v12911_v21, %v12912_v20  ;;  %v12919_v21 = vld [vmem:[#allocation76_spill] sm:$0xff]  ;;  %v12920_v20 = vld [vmem:[#allocation75_spill] sm:$0xff] }
 0x7c0   : > { %8427 = vmatprep.subr.msk.bf16.mxu0 %vm1975_vm8, %v10150_v61 }
 0x7c1   : > { %v10484_v16 = vsel %vm1975_vm8, %v12913_v4, 0  ;;  %v12921_v4 = vpack.c.bf16 %v12919_v21, %v12920_v20  ;;  %v12927_v21 = vld [vmem:[#allocation84_spill] sm:$0xff]  ;;  %v12928_v20 = vld [vmem:[#allocation83_spill] sm:$0xff] }
 0x7c2   : > { %12914 = vst [vmem:[#allocation73_spill] sm:$0xff] %v10484_v16 }
 0x7c7   : > { %7197 = vmatpush3.bf16.xpose.msra.mxu0 %v10472_v37 }
 0x7c8   : > { %8428 = vmatprep.subr.msk.bf16.mxu0 %vm1975_vm8, %v10165_v53  ;;  %v10493_v53 = vsel %vm1975_vm8, %v12917_v2, 0  ;;  %v12925_v2 = vpack.c.bf16 %v12923_v9, %v12924_v60  ;;  %v8807_v9 = vld [vmem:[%s12320_s3 + $0x20] sm:$0xff]   ;;  %v12932_v60 = vld [vmem:[#allocation54_spill] sm:$0xff] }
 0x7c9   : > { %12918 = vst [vmem:[#allocation78_spill] sm:$0xff] %v10493_v53  ;;  %3444 = vrot.lane.b32.xlu0 %v8807_v9, %s8900_s22 }
 0x7cf   : > { %7199 = vmatpush3.bf16.xpose.msra.mxu0 %v10462_v44 }
 0x7d0   : > { %8429 = vmatprep.subr.msk.bf16.mxu0 %vm1975_vm8, %v10187_v38  ;;  %v10502_v38 = vsel %vm1975_vm8, %v12921_v4, 0  ;;  %v12929_v4 = vpack.c.bf16 %v12927_v21, %v12928_v20  ;;  %v3322_v21 = vpop.permute.xlu0 %3321  ;;  %v12934_v20 = vld [vmem:[#allocation90_spill] sm:$0xff] }
 0x7d1   : > { %12922 = vst [vmem:[#allocation77_spill] sm:$0xff] %v10502_v38 }
 0x7d7   : > { %7201 = vmatpush3.bf16.xpose.msra.mxu0 %v10484_v16 }
 0x7d8   : > { %8430 = vmatprep.subr.msk.bf16.mxu0 %vm1975_vm8, %v10209_v62  ;;  %v10511_v62 = vsel %vm1975_vm8, %v12925_v2, 0  ;;  %v12933_v2 = vld [vmem:[#allocation89_spill] sm:$0xff] }
 0x7d9   : > { %12926 = vst [vmem:[#allocation82_spill] sm:$0xff] %v10511_v62 }
 0x7df   : > { %7203 = vmatpush3.bf16.xpose.msra.mxu0 %v10493_v53 }
 0x7e0   : > { %8431 = vmatprep.subr.msk.bf16.mxu0 %vm1975_vm8, %v10231_v3  ;;  %v10520_v3 = vsel %vm1975_vm8, %v12929_v4, 0  ;;  %v12935_v4 = vld [vmem:[#allocation93_spill] sm:$0xff] }
 0x7e1   : > { %12930 = vst [vmem:[#allocation81_spill] sm:$0xff] %v10520_v3 }
 0x7e7   : > { %7205 = vmatpush3.bf16.xpose.msra.mxu0 %v10502_v38 }
 0x7e8   : > { %8432 = vmatprep.subr.msk.bf16.mxu0 %vm1975_vm8, %v10253_v30 }
 0x7ef   : > { %7207 = vmatpush3.bf16.xpose.msra.mxu0 %v10511_v62 }
 0x7f0   : > { %8433 = vmatprep.subr.msk.bf16.mxu0 %vm1975_vm8, %v10275_v59 }
 0x7f7   : > { %7209 = vmatpush3.bf16.xpose.msra.mxu0 %v10520_v3 }
 0x7f8   : > { %8434 = vmatprep.subr.msk.bf16.mxu0 %vm373_vm4, %v9312_v46  ;;  %v12937_v46 = vld [vmem:[#allocation96_spill] sm:$0xff] }
 0x7fe   : > { %7211 = vmatmul.mubr.msk.bf16.vlgmr.msra.gmra.mrb[68].mxu0 %vm1975_vm8, %v3166_v49  ;;  %v12931_v49 = vld [vmem:[#allocation44_spill] sm:$0xff] }
 0x7ff   : > { %7213 = vmatpush3.bf16.xpose.msra.mxu0 %v9478_v35  ;;  %7228 = vmatprep.mubr.msk.bf16.mxu0 %vm373_vm4, %v8806_v36  ;;  %v12936_v35 = vld [vmem:[#allocation86_spill] sm:$0xff] }
 0x800   : > { %8435 = vmatprep.subr.msk.bf16.mxu0 %vm373_vm4, %v9334_v7 }
 0x807   : > { %7215 = vmatpush3.bf16.xpose.msra.mxu0 %v9466_v25 }
 0x808   : > { %8436 = vmatprep.subr.msk.bf16.mxu0 %vm373_vm4, %v9350_v50 }
 0x80f   : > { %7217 = vmatpush3.bf16.xpose.msra.mxu0 %v9490_v11 }
 0x810   : > { %8437 = vmatprep.subr.msk.bf16.mxu0 %vm373_vm4, %v9372_v27 }
 0x817   : > { %7219 = vmatpush3.bf16.xpose.msra.mxu0 %v9499_v52 }
 0x818   : > { %8438 = vmatprep.subr.msk.bf16.mxu0 %vm373_vm4, %v9394_v28 }
 0x81f   : > { %7221 = vmatpush3.bf16.xpose.msra.mxu0 %v9508_v33 }
 0x820   : > { %8439 = vmatprep.subr.msk.bf16.mxu0 %vm373_vm4, %v9416_v39 }
 0x827   : > { %7223 = vmatpush3.bf16.xpose.msra.mxu0 %v9517_v0 }
 0x828   : > { %8440 = vmatprep.subr.msk.bf16.mxu0 %vm373_vm4, %v9438_v18 }
 0x82f   : > { %7225 = vmatpush3.bf16.xpose.msra.mxu0 %v9531_v5  ;;  %v12943_v5 = vld [vmem:[#allocation108_spill] sm:$0xff] }
 0x830   : > { %8441 = vmatprep.subr.msk.bf16.mxu0 %vm373_vm4, %v12931_v49  ;;  %v12938_v49 = vld [vmem:[#allocation98_spill] sm:$0xff] }
 0x837   : > { %7227 = vmatpush3.bf16.xpose.msra.mxu0 %v12932_v60  ;;  %v12939_v60 = vld [vmem:[#allocation100_spill] sm:$0xff] }
 0x838   : > { %8442 = vmatprep.subr.msk.bf16.mxu0 %vm1975_vm8, %v12933_v2  ;;  %v12940_v2 = vld [vmem:[#allocation102_spill] sm:$0xff] }
 0x83e   : > { %7229 = vmatmul.mubr.msk.bf16.vlgmr.msra.gmra.mrb[68].mxu0 %vm373_vm4, %v8806_v36  ;;  %v12941_v36 = vld [vmem:[#allocation104_spill] sm:$0xff] }
 0x83f   : > { %7231 = vmatpush3.bf16.xpose.msra.mxu0 %v12934_v20  ;;  %7246 = vmatprep.mubr.msk.bf16.mxu0 %vm1975_vm8, %v3322_v21  ;;  %v12942_v20 = vld [vmem:[#allocation106_spill] sm:$0xff] }
 0x840   : > { %8443 = vmatprep.subr.msk.bf16.mxu0 %vm1975_vm8, %v12935_v4  ;;  %v12944_v4 = vld [vmem:[#allocation110_spill] sm:$0xff] }
 0x847   : > { %7233 = vmatpush3.bf16.xpose.msra.mxu0 %v12936_v35 }
 0x848   : > { %8444 = vmatprep.subr.msk.bf16.mxu0 %vm1975_vm8, %v12937_v46 }
 0x84f   : > { %7235 = vmatpush3.bf16.xpose.msra.mxu0 %v12938_v49 }
 0x850   : > { %8445 = vmatprep.subr.msk.bf16.mxu0 %vm1975_vm8, %v12939_v60  ;;  %v12945_v60 = vld [vmem:[#allocation85_spill] sm:$0xff] }
 0x857   : > { %7237 = vmatpush3.bf16.xpose.msra.mxu0 %v12940_v2  ;;  %v10580_v2 = vsel %vm1975_vm8, %v12945_v60, 0  ;;  %v8808_v60 = vld [vmem:[%s12320_s3 + $0x28] sm:$0xff]  }
 0x858   : > { %8446 = vmatprep.subr.msk.bf16.mxu0 %vm1975_vm8, %v12941_v36  ;;  %12946 = vst [vmem:[#allocation64_spill] sm:$0xff] %v10580_v2  ;;  %3565 = vrot.lane.b32.xlu0 %v8808_v60, %s8900_s22 }
 0x85f   : > { %7239 = vmatpush3.bf16.xpose.msra.mxu0 %v12942_v20 }
 0x860   : > { %8447 = vmatprep.subr.msk.bf16.mxu0 %vm1975_vm8, %v12943_v5 }
 0x867   : > { %7241 = vmatpush3.bf16.xpose.msra.mxu0 %v12944_v4 }
 0x868   : > { %8448 = vmatprep.subr.msk.bf16.mxu0 %vm1975_vm8, %v10259_v15 }
 0x86f   : > { %7243 = vmatpush3.bf16.xpose.msra.mxu0 %v10273_v48 }
 0x870   : > { %8449 = vmatprep.subr.msk.bf16.mxu0 %vm1975_vm8, %v10331_v23 }
 0x877   : > { %7245 = vmatpush3.bf16.xpose.msra.mxu0 %v10580_v2 }
 0x878   : > { %8450 = vmatprep.subr.msk.bf16.mxu0 %vm373_vm4, %v12769_v29  ;;  %v3445_v29 = vpop.permute.xlu0 %3444 }
 0x87e   : > { %7247 = vmatmul.mubr.msk.bf16.vlgmr.msra.gmra.mrb[68].mxu0 %vm1975_vm8, %v3322_v21  ;;  %v12947_v21 = vld [vmem:[#allocation46_spill] sm:$0xff] }
 0x87f   : > { %7249 = vmatpush3.bf16.xpose.msra.mxu0 %v12770_v6  ;;  %7264 = vmatprep.mubr.msk.bf16.mxu0 %vm373_vm4, %v8807_v9  ;;  %v12948_v6 = vld [vmem:[#allocation11_spill] sm:$0xff] }
 0x880   : > { %8451 = vmatprep.subr.msk.bf16.mxu0 %vm373_vm4, %v9338_v13 }
 0x887   : > { %7251 = vmatpush3.bf16.xpose.msra.mxu0 %v12771_v42 }
 0x888   : > { %8452 = vmatprep.subr.msk.bf16.mxu0 %vm373_vm4, %v12772_v19 }
 0x88f   : > { %7253 = vmatpush3.bf16.xpose.msra.mxu0 %v12773_v31 }
 0x890   : > { %8453 = vmatprep.subr.msk.bf16.mxu0 %vm373_vm4, %v12774_v32 }
 0x897   : > { %7255 = vmatpush3.bf16.xpose.msra.mxu0 %v12775_v14 }
 0x898   : > { %8454 = vmatprep.subr.msk.bf16.mxu0 %vm373_vm4, %v12776_v58 }
 0x89f   : > { %7257 = vmatpush3.bf16.xpose.msra.mxu0 %v12777_v55 }
 0x8a0   : > { %8455 = vmatprep.subr.msk.bf16.mxu0 %vm373_vm4, %v9420_v24 }
 0x8a7   : > { %7259 = vmatpush3.bf16.xpose.msra.mxu0 %v12778_v10 }
 0x8a8   : > { %8456 = vmatprep.subr.msk.bf16.mxu0 %vm373_vm4, %v12858_v57 }
 0x8af   : > { %7261 = vmatpush3.bf16.xpose.msra.mxu0 %v12859_v26 }
 0x8b0   : > { %8457 = vmatprep.subr.msk.bf16.mxu0 %vm373_vm4, %v12947_v21 }
 0x8b7   : > { %7263 = vmatpush3.bf16.xpose.msra.mxu0 %v12948_v6 }
 0x8b8   : > { %8458 = vmatprep.subr.msk.bf16.mxu0 %vm1975_vm8, %v10145_v40 }
 0x8be   : > { %7265 = vmatmul.mubr.msk.bf16.vlgmr.msra.gmra.mrb[68].mxu0 %vm373_vm4, %v8807_v9  ;;  %v12949_v9 = vld [vmem:[#allocation117_spill] sm:$0xff] }
 0x8bf   : > { %7267 = vmatpush3.bf16.xpose.msra.mxu0 %v10372_v22  ;;  %7282 = vmatprep.mubr.msk.bf16.mxu0 %vm1975_vm8, %v3445_v29  ;;  %v12950_v22 = vld [vmem:[#allocation87_spill] sm:$0xff] }
 0x8c0   : > { %8459 = vmatprep.subr.msk.bf16.mxu0 %vm1975_vm8, %v10161_v63  ;;  %v10640_v40 = vsel %vm1975_vm8, %v12950_v22, 0  ;;  %v8809_v22 = vld [vmem:[%s12320_s3 + $0x30] sm:$0xff]  }
 0x8c1   : > { %12951 = vst [vmem:[#allocation63_spill] sm:$0xff] %v10640_v40  ;;  %3678 = vrot.lane.b32.xlu0 %v8809_v22, %s8900_s22 }
 0x8c7   : > { %7269 = vmatpush3.bf16.xpose.msra.mxu0 %v10362_v12 }
 0x8c8   : > { %8460 = vmatprep.subr.msk.bf16.mxu0 %vm1975_vm8, %v10177_v34 }
 0x8cf   : > { %7271 = vmatpush3.bf16.xpose.msra.mxu0 %v10384_v51 }
 0x8d0   : > { %8461 = vmatprep.subr.msk.bf16.mxu0 %vm1975_vm8, %v10199_v45 }
 0x8d7   : > { %7273 = vmatpush3.bf16.xpose.msra.mxu0 %v10393_v56 }
 0x8d8   : > { %8462 = vmatprep.subr.msk.bf16.mxu0 %vm1975_vm8, %v10221_v41 }
 0x8df   : > { %7275 = vmatpush3.bf16.xpose.msra.mxu0 %v10402_v1  ;;  %v12952_v1 = vld [vmem:[#allocation14_spill] sm:$0xff] }
 0x8e0   : > { %8463 = vmatprep.subr.msk.bf16.mxu0 %vm1975_vm8, %v10243_v54  ;;  %v12964_v54 = vld [vmem:[#allocation7_spill] sm:$0xff] }
 0x8e7   : > { %7277 = vmatpush3.bf16.xpose.msra.mxu0 %v10411_v8  ;;  %v12953_v8 = vld [vmem:[#allocation49_spill] sm:$0xff] }
 0x8e8   : > { %8464 = vmatprep.subr.msk.bf16.mxu0 %vm1975_vm8, %v10265_v17  ;;  %v12954_v17 = vld [vmem:[#allocation17_spill] sm:$0xff] }
 0x8ef   : > { %7279 = vmatpush3.bf16.xpose.msra.mxu0 %v10420_v43  ;;  %v12955_v43 = vld [vmem:[#allocation48_spill] sm:$0xff] }
 0x8f0   : > { %8465 = vmatprep.subr.msk.bf16.mxu0 %vm1975_vm8, %v12949_v9  ;;  %v12956_v9 = vld [vmem:[#allocation20_spill] sm:$0xff] }
 0x8f7   : > { %7281 = vmatpush3.bf16.xpose.msra.mxu0 %v10640_v40  ;;  %v12960_v40 = vld [vmem:[#allocation28_spill] sm:$0xff] }
 0x8f8   : > { %8466 = vmatprep.subr.msk.bf16.mxu0 %vm373_vm4, %v12952_v1  ;;  %v12957_v1 = vld [vmem:[#allocation50_spill] sm:$0xff] }
 0x8fe   : > { %7283 = vmatmul.mubr.msk.bf16.vlgmr.msra.gmra.mrb[68].mxu0 %vm1975_vm8, %v3445_v29  ;;  %v12958_v29 = vld [vmem:[#allocation24_spill] sm:$0xff] }
 0x8ff   : > { %7285 = vmatpush3.bf16.xpose.msra.mxu0 %v12953_v8  ;;  %7300 = vmatprep.mubr.msk.bf16.mxu0 %vm373_vm4, %v8808_v60  ;;  %v12959_v8 = vld [vmem:[#allocation51_spill] sm:$0xff] }
 0x900   : > { %8467 = vmatprep.subr.msk.bf16.mxu0 %vm373_vm4, %v12954_v17  ;;  %v12963_v17 = vld [vmem:[#allocation36_spill] sm:$0xff] }
 0x907   : > { %7287 = vmatpush3.bf16.xpose.msra.mxu0 %v12955_v43  ;;  %v12961_v43 = vld [vmem:[#allocation52_spill] sm:$0xff] }
 0x908   : > { %8468 = vmatprep.subr.msk.bf16.mxu0 %vm373_vm4, %v12956_v9  ;;  %v12962_v9 = vld [vmem:[#allocation53_spill] sm:$0xff] }
 0x90f   : > { %7289 = vmatpush3.bf16.xpose.msra.mxu0 %v12957_v1  ;;  %v12965_v1 = vld [vmem:[#allocation47_spill] sm:$0xff] }
 0x910   : > { %8469 = vmatprep.subr.msk.bf16.mxu0 %vm373_vm4, %v12958_v29  ;;  %v12966_v29 = vld [vmem:[#allocation19_spill] sm:$0xff] }
 0x917   : > { %7291 = vmatpush3.bf16.xpose.msra.mxu0 %v12959_v8 }
 0x918   : > { %8470 = vmatprep.subr.msk.bf16.mxu0 %vm373_vm4, %v12960_v40  ;;  %v3566_v40 = vpop.permute.xlu0 %3565 }
 0x91f   : > { %7293 = vmatpush3.bf16.xpose.msra.mxu0 %v12961_v43 }
 0x920   : > { %8471 = vmatprep.subr.msk.bf16.mxu0 %vm373_vm4, %v12899_v47 }
 0x927   : > { %7295 = vmatpush3.bf16.xpose.msra.mxu0 %v12962_v9  ;;  %v12967_v9 = vld [vmem:[#allocation95_spill] sm:$0xff] }
 0x928   : > { %8472 = vmatprep.subr.msk.bf16.mxu0 %vm373_vm4, %v12963_v17 }
 0x92f   : > { %7297 = vmatpush3.bf16.xpose.msra.mxu0 %v12964_v54  ;;  %v12968_v54 = vld [vmem:[#allocation99_spill] sm:$0xff] }
 0x930   : > { %8473 = vmatprep.subr.msk.bf16.mxu0 %vm373_vm4, %v12965_v1 }
 0x937   : > { %7299 = vmatpush3.bf16.xpose.msra.mxu0 %v12966_v29  ;;  %v12969_v29 = vld [vmem:[#allocation103_spill] sm:$0xff] }
 0x938   : > { %8474 = vmatprep.subr.msk.bf16.mxu0 %vm1975_vm8, %v10150_v61  ;;  %v12972_v61 = vld [vmem:[#allocation88_spill] sm:$0xff] }
 0x93e   : > { %7301 = vmatmul.mubr.msk.bf16.vlgmr.msra.gmra.mrb[68].mxu0 %vm373_vm4, %v8808_v60  ;;  %v12970_v60 = vld [vmem:[#allocation107_spill] sm:$0xff] }
 0x93f   : > { %7303 = vmatpush3.bf16.xpose.msra.mxu0 %v10472_v37  ;;  %7318 = vmatprep.mubr.msk.bf16.mxu0 %vm1975_vm8, %v3566_v40  ;;  %v12971_v37 = vld [vmem:[#allocation118_spill] sm:$0xff] }
 0x940   : > { %8475 = vmatprep.subr.msk.bf16.mxu0 %vm1975_vm8, %v12967_v9 }
 0x947   : > { %7305 = vmatpush3.bf16.xpose.msra.mxu0 %v10462_v44 }
 0x948   : > { %8476 = vmatprep.subr.msk.bf16.mxu0 %vm1975_vm8, %v12968_v54 }
 0x94f   : > { %7307 = vmatpush3.bf16.xpose.msra.mxu0 %v10484_v16 }
 0x950   : > { %8477 = vmatprep.subr.msk.bf16.mxu0 %vm1975_vm8, %v12969_v29 }
 0x957   : > { %7309 = vmatpush3.bf16.xpose.msra.mxu0 %v10493_v53  ;;  %v10700_v53 = vsel %vm1975_vm8, %v12972_v61, 0  ;;  %v8810_v61 = vld [vmem:[%s12320_s3 + $0x38] sm:$0xff]  }
 0x958   : > { %8478 = vmatprep.subr.msk.bf16.mxu0 %vm1975_vm8, %v12970_v60  ;;  %12973 = vst [vmem:[#allocation60_spill] sm:$0xff] %v10700_v53  ;;  %3788 = vrot.lane.b32.xlu0 %v8810_v61, %s8900_s22 }
 0x95f   : > { %7311 = vmatpush3.bf16.xpose.msra.mxu0 %v10502_v38 }
 0x960   : > { %8479 = vmatprep.subr.msk.bf16.mxu0 %vm1975_vm8, %v10253_v30 }
 0x967   : > { %7313 = vmatpush3.bf16.xpose.msra.mxu0 %v10511_v62 }
 0x968   : > { %8480 = vmatprep.subr.msk.bf16.mxu0 %vm1975_vm8, %v10275_v59 }
 0x96f   : > { %7315 = vmatpush3.bf16.xpose.msra.mxu0 %v10520_v3 }
 0x970   : > { %8481 = vmatprep.subr.msk.bf16.mxu0 %vm1975_vm8, %v12971_v37 }
 0x977   : > { %7317 = vmatpush3.bf16.xpose.msra.mxu0 %v10700_v53 }
 0x978   : > { %8482 = vmatprep.subr.msk.bf16.mxu0 %vm373_vm4, %v9334_v7 }
 0x97e   : > { %7319 = vmatmul.mubr.msk.bf16.vlgmr.msra.gmra.mrb[68].mxu0 %vm1975_vm8, %v3566_v40  ;;  %v12974_v40 = vld [vmem:[#allocation45_spill] sm:$0xff] }
 0x97f   : > { %7321 = vmatpush3.bf16.xpose.msra.mxu0 %v9466_v25  ;;  %7336 = vmatprep.mubr.msk.bf16.mxu0 %vm373_vm4, %v8809_v22 }
 0x980   : > { %8483 = vmatprep.subr.msk.bf16.mxu0 %vm373_vm4, %v9350_v50 }
 0x987   : > { %7323 = vmatpush3.bf16.xpose.msra.mxu0 %v9490_v11  ;;  %v12976_v11 = vld [vmem:[#allocation54_spill] sm:$0xff] }
 0x988   : > { %8484 = vmatprep.subr.msk.bf16.mxu0 %vm373_vm4, %v9372_v27  ;;  %v12975_v27 = vld [vmem:[#allocation44_spill] sm:$0xff] }
 0x98f   : > { %7325 = vmatpush3.bf16.xpose.msra.mxu0 %v9499_v52 }
 0x990   : > { %8485 = vmatprep.subr.msk.bf16.mxu0 %vm373_vm4, %v9394_v28  ;;  %v12977_v28 = vld [vmem:[#allocation21_spill] sm:$0xff] }
 0x997   : > { %7327 = vmatpush3.bf16.xpose.msra.mxu0 %v9508_v33  ;;  %v12978_v33 = vld [vmem:[#allocation93_spill] sm:$0xff] }
 0x998   : > { %8486 = vmatprep.subr.msk.bf16.mxu0 %vm373_vm4, %v9416_v39  ;;  %v3679_v39 = vpop.permute.xlu0 %3678 }
 0x99f   : > { %7329 = vmatpush3.bf16.xpose.msra.mxu0 %v9517_v0 }
 0x9a0   : > { %8487 = vmatprep.subr.msk.bf16.mxu0 %vm373_vm4, %v9438_v18 }
 0x9a7   : > { %7331 = vmatpush3.bf16.xpose.msra.mxu0 %v12974_v40 }
 0x9a8   : > { %8488 = vmatprep.subr.msk.bf16.mxu0 %vm373_vm4, %v12975_v27  ;;  %v12980_v27 = vld [vmem:[#allocation102_spill] sm:$0xff] }
 0x9af   : > { %7333 = vmatpush3.bf16.xpose.msra.mxu0 %v12976_v11  ;;  %v12979_v11 = vld [vmem:[#allocation100_spill] sm:$0xff] }
 0x9b0   : > { %8489 = vmatprep.subr.msk.bf16.mxu0 %vm373_vm4, %v9438_v18 }
 0x9b7   : > { %7335 = vmatpush3.bf16.xpose.msra.mxu0 %v12977_v28 }
 0x9b8   : > { %8490 = vmatprep.subr.msk.bf16.mxu0 %vm1975_vm8, %v12978_v33 }
 0x9be   : > { %7337 = vmatmul.mubr.msk.bf16.vlgmr.msra.gmra.mrb[68].mxu0 %vm373_vm4, %v8809_v22  ;;  %v12981_v22 = vld [vmem:[#allocation89_spill] sm:$0xff] }
 0x9bf   : > { %7339 = vmatpush3.bf16.xpose.msra.mxu0 %v12936_v35  ;;  %7354 = vmatprep.mubr.msk.bf16.mxu0 %vm1975_vm8, %v3679_v39  ;;  %v10760_v28 = vsel %vm1975_vm8, %v12981_v22, 0 }
 0x9c0   : > { %8491 = vmatprep.subr.msk.bf16.mxu0 %vm1975_vm8, %v12937_v46  ;;  %12982 = vst [vmem:[#allocation59_spill] sm:$0xff] %v10760_v28 }
 0x9c7   : > { %7341 = vmatpush3.bf16.xpose.msra.mxu0 %v12938_v49 }
 0x9c8   : > { %8492 = vmatprep.subr.msk.bf16.mxu0 %vm1975_vm8, %v12979_v11 }
 0x9cf   : > { %7343 = vmatpush3.bf16.xpose.msra.mxu0 %v12980_v27 }
 0x9d0   : > { %8493 = vmatprep.subr.msk.bf16.mxu0 %vm1975_vm8, %v12941_v36 }
 0x9d7   : > { %7345 = vmatpush3.bf16.xpose.msra.mxu0 %v12942_v20 }
 0x9d8   : > { %8494 = vmatprep.subr.msk.bf16.mxu0 %vm1975_vm8, %v12943_v5 }
 0x9df   : > { %7347 = vmatpush3.bf16.xpose.msra.mxu0 %v12944_v4 }
 0x9e0   : > { %8495 = vmatprep.subr.msk.bf16.mxu0 %vm1975_vm8, %v10259_v15 }
 0x9e7   : > { %7349 = vmatpush3.bf16.xpose.msra.mxu0 %v10273_v48 }
 0x9e8   : > { %8496 = vmatprep.subr.msk.bf16.mxu0 %vm1975_vm8, %v10331_v23  ;;  %v12988_v23 = vld [vmem:[#allocation70_spill] sm:$0xff] }
 0x9ef   : > { %7351 = vmatpush3.bf16.xpose.msra.mxu0 %v10580_v2  ;;  %v3789_v2 = vpop.permute.xlu0 %3788 }
 0x9f0   : > { %8497 = vmatprep.subr.msk.bf16.mxu0 %vm1975_vm8, %v10259_v15 }
 0x9f7   : > { %7353 = vmatpush3.bf16.xpose.msra.mxu0 %v10760_v28  ;;  %v8811_v28 = vld [vmem:[%s12320_s3 + $0x40] sm:$0xff]  }
 0x9f8   : > { %8498 = vmatprep.subr.msk.bf16.mxu0 %vm373_vm4, %v9338_v13  ;;  %3898 = vrot.lane.b32.xlu0 %v8811_v28, %s8900_s22 }
 0x9fe   : > { %7355 = vmatmul.mubr.msk.bf16.vlgmr.msra.gmra.mrb[68].mxu0 %vm1975_vm8, %v3679_v39  ;;  %v12983_v39 = vld [vmem:[#allocation55_spill] sm:$0xff] }
 0x9ff   : > { %7357 = vmatpush3.bf16.xpose.msra.mxu0 %v12771_v42  ;;  %7372 = vmatprep.mubr.msk.bf16.mxu0 %vm373_vm4, %v8810_v61 }
 0xa00   : > { %8499 = vmatprep.subr.msk.bf16.mxu0 %vm373_vm4, %v12772_v19 }
 0xa07   : > { %7359 = vmatpush3.bf16.xpose.msra.mxu0 %v12773_v31 }
 0xa08   : > { %8500 = vmatprep.subr.msk.bf16.mxu0 %vm373_vm4, %v12774_v32 }
 0xa0f   : > { %7361 = vmatpush3.bf16.xpose.msra.mxu0 %v12775_v14 }
 0xa10   : > { %8501 = vmatprep.subr.msk.bf16.mxu0 %vm373_vm4, %v12776_v58 }
 0xa17   : > { %7363 = vmatpush3.bf16.xpose.msra.mxu0 %v12777_v55 }
 0xa18   : > { %8502 = vmatprep.subr.msk.bf16.mxu0 %vm373_vm4, %v9420_v24 }
 0xa1f   : > { %7365 = vmatpush3.bf16.xpose.msra.mxu0 %v12778_v10 }
 0xa20   : > { %8503 = vmatprep.subr.msk.bf16.mxu0 %vm373_vm4, %v12858_v57 }
 0xa27   : > { %7367 = vmatpush3.bf16.xpose.msra.mxu0 %v12859_v26 }
 0xa28   : > { %8504 = vmatprep.subr.msk.bf16.mxu0 %vm373_vm4, %v12947_v21  ;;  %v12987_v21 = vld [vmem:[#allocation113_spill] sm:$0xff] }
 0xa2f   : > { %7369 = vmatpush3.bf16.xpose.msra.mxu0 %v12948_v6  ;;  %v12986_v6 = vld [vmem:[#allocation65_spill] sm:$0xff] }
 0xa30   : > { %8505 = vmatprep.subr.msk.bf16.mxu0 %vm373_vm4, %v12858_v57 }
 0xa37   : > { %7371 = vmatpush3.bf16.xpose.msra.mxu0 %v12983_v39  ;;  %v12984_v39 = vld [vmem:[#allocation66_spill] sm:$0xff] }
 0xa38   : > { %8506 = vmatprep.subr.msk.bf16.mxu0 %vm1975_vm8, %v10161_v63 }
 0xa3e   : > { %7373 = vmatmul.mubr.msk.bf16.vlgmr.msra.gmra.mrb[68].mxu0 %vm373_vm4, %v8810_v61  ;;  %v12985_v61 = vld [vmem:[#allocation109_spill] sm:$0xff] }
 0xa3f   : > { %7375 = vmatpush3.bf16.xpose.msra.mxu0 %v10362_v12  ;;  %7390 = vmatprep.mubr.msk.bf16.mxu0 %vm1975_vm8, %v3789_v2 }
 0xa40   : > { %8507 = vmatprep.subr.msk.bf16.mxu0 %vm1975_vm8, %v10177_v34 }
 0xa47   : > { %7377 = vmatpush3.bf16.xpose.msra.mxu0 %v10384_v51  ;;  %v12989_v51 = vld [vmem:[#allocation117_spill] sm:$0xff] }
 0xa48   : > { %8508 = vmatprep.subr.msk.bf16.mxu0 %vm1975_vm8, %v10199_v45  ;;  %v12990_v45 = vld [vmem:[#allocation63_spill] sm:$0xff] }
 0xa4f   : > { %7379 = vmatpush3.bf16.xpose.msra.mxu0 %v10393_v56 }
 0xa50   : > { %8509 = vmatprep.subr.msk.bf16.mxu0 %vm1975_vm8, %v10221_v41  ;;  %v12991_v41 = vld [vmem:[#allocation91_spill] sm:$0xff] }
 0xa57   : > { %7381 = vmatpush3.bf16.xpose.msra.mxu0 %v12984_v39  ;;  %v10820_v39 = vsel %vm1975_vm8, %v12991_v41, 0 }
 0xa58   : > { %8510 = vmatprep.subr.msk.bf16.mxu0 %vm1975_vm8, %v12985_v61  ;;  %12992 = vst [vmem:[#allocation68_spill] sm:$0xff] %v10820_v39 }
 0xa5f   : > { %7383 = vmatpush3.bf16.xpose.msra.mxu0 %v12986_v6  ;;  %v12993_v6 = vld [vmem:[#allocation17_spill] sm:$0xff] }
 0xa60   : > { %8511 = vmatprep.subr.msk.bf16.mxu0 %vm1975_vm8, %v12987_v21 }
 0xa67   : > { %7385 = vmatpush3.bf16.xpose.msra.mxu0 %v12988_v23  ;;  %v12994_v23 = vld [vmem:[#allocation48_spill] sm:$0xff] }
 0xa68   : > { %8512 = vmatprep.subr.msk.bf16.mxu0 %vm1975_vm8, %v12989_v51  ;;  %v3950_v51 = vld [vmem:[%s12321_s4] sm:$0xff] }
 0xa69   : > { %3954 = vperm.xlu0 %8792, %v3950_v51   ;;  %v13000_v51 = vld [vmem:[#allocation7_spill] sm:$0xff] }
 0xa6f   : > { %7387 = vmatpush3.bf16.xpose.msra.mxu0 %v12990_v45  ;;  %v12995_v45 = vld [vmem:[#allocation20_spill] sm:$0xff] }
 0xa70   : > { %8513 = vmatprep.subr.msk.bf16.mxu0 %vm1975_vm8, %v12987_v21  ;;  %v12996_v21 = vld [vmem:[#allocation50_spill] sm:$0xff] }
 0xa77   : > { %7389 = vmatpush3.bf16.xpose.msra.mxu0 %v10820_v39  ;;  %v12997_v39 = vld [vmem:[#allocation24_spill] sm:$0xff] }
 0xa78   : > { %8514 = vmatprep.subr.msk.bf16.mxu0 %vm373_vm4, %v12993_v6  ;;  %v12999_v6 = vld [vmem:[#allocation53_spill] sm:$0xff] }
 0xa7e   : > { %7391 = vmatmul.mubr.msk.bf16.vlgmr.msra.gmra.mrb[68].mxu0 %vm1975_vm8, %v3789_v2  ;;  %v12998_v2 = vld [vmem:[#allocation28_spill] sm:$0xff] }
 0xa7f   : > { %7393 = vmatpush3.bf16.xpose.msra.mxu0 %v12994_v23  ;;  %7408 = vmatprep.mubr.msk.bf16.mxu0 %vm373_vm4, %v8811_v28 }
 0xa80   : > { %8515 = vmatprep.subr.msk.bf16.mxu0 %vm373_vm4, %v12995_v45 }
 0xa87   : > { %7395 = vmatpush3.bf16.xpose.msra.mxu0 %v12996_v21 }
 0xa88   : > { %8516 = vmatprep.subr.msk.bf16.mxu0 %vm373_vm4, %v12997_v39  ;;  %v13001_v39 = vld [vmem:[#allocation19_spill] sm:$0xff] }
 0xa8f   : > { %7397 = vmatpush3.bf16.xpose.msra.mxu0 %v12959_v8 }
 0xa90   : > { %8517 = vmatprep.subr.msk.bf16.mxu0 %vm373_vm4, %v12998_v2  ;;  %v13002_v2 = vld [vmem:[#allocation56_spill] sm:$0xff] }
 0xa97   : > { %7399 = vmatpush3.bf16.xpose.msra.mxu0 %v12961_v43 }
 0xa98   : > { %8518 = vmatprep.subr.msk.bf16.mxu0 %vm373_vm4, %v12899_v47  ;;  %v3899_v47 = vpop.permute.xlu0 %3898 }
 0xa9f   : > { %7401 = vmatpush3.bf16.xpose.msra.mxu0 %v12999_v6 }
 0xaa0   : > { %8519 = vmatprep.subr.msk.bf16.mxu0 %vm373_vm4, %v12963_v17 }
 0xaa7   : > { %7403 = vmatpush3.bf16.xpose.msra.mxu0 %v13000_v51 }
 0xaa8   : > { %8520 = vmatprep.subr.msk.bf16.mxu0 %vm373_vm4, %v12965_v1 }
 0xaaf   : > { %7405 = vmatpush3.bf16.xpose.msra.mxu0 %v13001_v39  ;;  %v13003_v39 = vld [vmem:[#allocation78_spill] sm:$0xff] }
 0xab0   : > { %8521 = vmatprep.subr.msk.bf16.mxu0 %vm373_vm4, %v12963_v17 }
 0xab7   : > { %7407 = vmatpush3.bf16.xpose.msra.mxu0 %v13002_v2 }
 0xab8   : > { %8522 = vmatprep.subr.msk.bf16.mxu0 %vm1975_vm8, %v12967_v9 }
 0xabe   : > { %7409 = vmatmul.mubr.msk.bf16.vlgmr.msra.gmra.mrb[68].mxu0 %vm373_vm4, %v8811_v28  ;;  %v13004_v28 = vld [vmem:[#allocation92_spill] sm:$0xff] }
 0xabf   : > { %7411 = vmatpush3.bf16.xpose.msra.mxu0 %v10462_v44  ;;  %7426 = vmatprep.mubr.msk.bf16.mxu0 %vm1975_vm8, %v3899_v47  ;;  %v10879_v2 = vsel %vm1975_vm8, %v13004_v28, 0 }
 0xac0   : > { %8523 = vmatprep.subr.msk.bf16.mxu0 %vm1975_vm8, %v12968_v54  ;;  %13005 = vst [vmem:[#allocation67_spill] sm:$0xff] %v10879_v2 }
 0xac7   : > { %7413 = vmatpush3.bf16.xpose.msra.mxu0 %v10484_v16 }
 0xac8   : > { %8524 = vmatprep.subr.msk.bf16.mxu0 %vm1975_vm8, %v12969_v29 }
 0xacf   : > { %7415 = vmatpush3.bf16.xpose.msra.mxu0 %v13003_v39 }
 0xad0   : > { %8525 = vmatprep.subr.msk.bf16.mxu0 %vm1975_vm8, %v12970_v60 }
 0xad7   : > { %7417 = vmatpush3.bf16.xpose.msra.mxu0 %v10502_v38  ;;  %v3960_v38 = vpop.permute.xlu1 %3959 }
 0xad8   : > { %8526 = vmatprep.subr.msk.bf16.mxu0 %vm1975_vm8, %v10253_v30 }
 0xadf   : > { %7419 = vmatpush3.bf16.xpose.msra.mxu0 %v10511_v62 }
 0xae0   : > { %8527 = vmatprep.subr.msk.bf16.mxu0 %vm1975_vm8, %v10275_v59 }
 0xae7   : > { %7421 = vmatpush3.bf16.xpose.msra.mxu0 %v10520_v3 }
 0xae8   : > { %8528 = vmatprep.subr.msk.bf16.mxu0 %vm1975_vm8, %v12971_v37  ;;  %v3955_v1 = vpop.permute.xlu0 %3954 }
 0xaef   : > { %7423 = vmatpush3.bf16.xpose.msra.mxu0 %v10700_v53 }
 0xaf0   : > { %8529 = vmatprep.subr.msk.bf16.mxu0 %vm1975_vm8, %v10275_v59 }
 0xaf7   : > { %7425 = vmatpush3.bf16.xpose.msra.mxu0 %v10879_v2 }
 0xafe   : > { %7427 = vmatmul.mubr.msk.bf16.vlgmr.msra.gmra.mrb[68].mxu0 %vm1975_vm8, %v3899_v47 }
 0xbd1   : > { %v3937_v62 = vpop.f32.mrb[68].mxu0 }
 0xbd2   : > { %v3962_v30 = vadd.f32 %v3955_v1, %v3937_v62  ;;  %v3939_v3 = vpop.f32.mrb[69].mxu0  ;;  %v13006_v62 = vld [vmem:[#allocation5_spill] sm:$0xff] }
 0xbd3   : > { %v3963_v37 = vadd.f32 %v3955_v1, %v3939_v3  ;;  %v3941_v60 = vpop.f32.mrb[70].mxu0  ;;  %v13008_v3 = vld [vmem:[#allocation6_spill] sm:$0xff] }
 0xbd4   : > { %v3966_v53 = vmax.f32 %v3962_v30, 0.0  ;;  %v3964_v39 = vadd.f32 %v3960_v38, %v3941_v60  ;;  %v3943_v59 = vpop.f32.mrb[71].mxu0  ;;  %v8818_v60 = vld [vmem:[%s12322_s5 + $0x30] sm:$0xff]  }
 0xbd5   : > { %v3967_v29 = vmax.f32 %v3963_v37, 0.0  ;;  %v3965_v16 = vadd.f32 %v3960_v38, %v3943_v59  ;;  %v10902_v59 = vld [vmem:[%s12322_s5] sm:$0xff]   ;;  %v10908_v37 = vld [vmem:[%s12322_s5 + $0x8] sm:$0xff]  }
 0xbd6   : > { %v6516_v54 = vrot.slane %v3966_v53, 4  ;;  %v3968_v9 = vmax.f32 %v3964_v39, 0.0  ;;  %3970 = vxpose.xlu0.b32.start [1/2] (short) %v3966_v53, 128  ;;  %v8819_v39 = vld [vmem:[%s12322_s5 + $0x38] sm:$0xff]  }
 0xbd7   : > { %v6517_v47 = vrot.slane %v3967_v29, 4  ;;  %v3969_v2 = vmax.f32 %v3965_v16, 0.0  ;;  %4002 = vxpose.xlu1.b32.start [1/2] (short) %v3967_v29, 128  ;;  %v8815_v16 = vld [vmem:[%s12322_s5 + $0x18] sm:$0xff]   ;;  %v8817_v29 = vld [vmem:[%s12322_s5 + $0x28] sm:$0xff]  }
 0xbd8   : > { %v6546_v28 = vsel %vm470_vm1, %v13006_v62, %v6516_v54  ;;  %v10885_v44 = vrot.slane %v3968_v9, 4 }
 0xbd9   : > { %6554 = vst [vmem:[%s9823_s8 + $0x20] sm:$0xff] %v6546_v28  ;;  %v6547_v30 = vsel %vm470_vm1, %v13008_v3, %v6517_v47  ;;  %v10890_v1 = vrot.slane %v3969_v2, 4  ;;  %v6477_v28 = vld [vmem:[%s12323_s6 + $0x8] sm:$0xff] }
 0xbda   : > { %13007 = vst [vmem:[#allocation72_spill] sm:$0xff] %v10885_v44  ;;  %6555 = vst [vmem:[%s9823_s8 + $0x28] sm:$0xff] %v6547_v30  ;;  %v6519_v38 = vsel %vm470_vm1, %v6516_v54, %v10885_v44  ;;  %3971 = vxpose.xlu0.b32.end [2/2] (short) %v3968_v9, 128  ;;  %v8814_v54 = vld [vmem:[%s12322_s5 + $0x10] sm:$0xff]   ;;  %v8816_v9 = vld [vmem:[%s12322_s5 + $0x20] sm:$0xff]  }
 0xbdb   : > { %13009 = vst [vmem:[#allocation71_spill] sm:$0xff] %v10890_v1  ;;  %6556 = vst [vmem:[%s9823_s8 + $0x30] sm:$0xff] %v6519_v38  ;;  %v6521_v53 = vsel %vm470_vm1, %v6517_v47, %v10890_v1  ;;  %4003 = vxpose.xlu1.b32.end [2/2] (short) %v3969_v2, 128  ;;  %v8820_v2 = vld [vmem:[%s12322_s5 + $0x40] sm:$0xff]   ;;  %v13011_v44 = vld [vmem:[#allocation8_spill] sm:$0xff] }
 0xbdc   : > { %6557 = vst [vmem:[%s9823_s8 + $0x38] sm:$0xff] %v6521_v53  ;;  %v6476_v30 = vld [vmem:[%s12323_s6] sm:$0xff] }
 0xc31   : > { %4695 = vrot.lane.b32.xlu1 %v10902_v59, %s8901_s21 }
 0xc35   : > { %5052 = vrot.lane.b32.xlu1 %v10908_v37, %s8901_s21 }
 0xc39   : > { %5379 = vrot.lane.b32.xlu1 %v8814_v54, %s8901_s21 }
 0xc3b   : > { %4586 = vrot.lane.b32.xlu0 %v10902_v59, %s8900_s22 }
 0xc3d   : > { %5587 = vrot.lane.b32.xlu1 %v8815_v16, %s8901_s21 }
 0xc3f   : > { %4850 = vrot.lane.b32.xlu0 %v10908_v37, %s8900_s22 }
 0xc41   : > { %5762 = vrot.lane.b32.xlu1 %v8816_v9, %s8901_s21 }
 0xc43   : > { %5207 = vrot.lane.b32.xlu0 %v8814_v54, %s8900_s22 }
 0xc45   : > { %5935 = vrot.lane.b32.xlu1 %v8817_v29, %s8901_s21 }
 0xc47   : > { %5534 = vrot.lane.b32.xlu0 %v8815_v16, %s8900_s22  ;;  %v13010_v16 = vld [vmem:[#allocation90_spill] sm:$0xff] }
 0xc49   : > { %6100 = vrot.lane.b32.xlu1 %v8818_v60, %s8901_s21 }
 0xc4b   : > { %5700 = vrot.lane.b32.xlu0 %v8816_v9, %s8900_s22 }
 0xc4d   : > { %6262 = vrot.lane.b32.xlu1 %v8819_v39, %s8901_s21 }
 0xc4f   : > { %5875 = vrot.lane.b32.xlu0 %v8817_v29, %s8900_s22 }
 0xc51   : > { %6424 = vrot.lane.b32.xlu1 %v8820_v2, %s8901_s21 }
 0xc53   : > { %6048 = vrot.lane.b32.xlu0 %v8818_v60, %s8900_s22 }
 0xc55   : > { %6485 = vperm.xlu1 %8791, %v6477_v28  }
 0xc56   : > { %v3986_v47 = vpop.trf.xlu0 }
 0xc57   : > { %6210 = vrot.lane.b32.xlu0 %v8819_v39, %s8900_s22  ;;  %8054 = vmatprep.mubr.msk.f32.mxu1 %vm1975_vm8, %v3986_v47  ;;  %v4018_v62 = vpop.trf.xlu1 }
 0xc5a   : > { %v3987_v3 = vpop.trf.xlu0 }
 0xc5b   : > { %6372 = vrot.lane.b32.xlu0 %v8820_v2, %s8900_s22  ;;  %8055 = vmatmul.mubr.msk.f32.vlgmr.msra.gmra.mrb[0].mxu1 %vm1975_vm8, %v3987_v3  ;;  %v4019_v53 = vpop.trf.xlu1 }
 0xc5c   : > { %7463 = vmatpush3.bf16.xpose.msra.mxu1 %v12936_v35 }
 0xc5d   : > { %8531 = vmatprep.subr.msk.bf16.mxu1 %vm1975_vm8, %v12981_v22 }
 0xc5e   : > { %v3988_v38 = vpop.trf.xlu0 }
 0xc5f   : > { %6480 = vperm.xlu0 %8792, %v6476_v30   ;;  %8057 = vmatprep.mubr.msk.f32.mxu1 %vm1975_vm8, %v3988_v38  ;;  %v4020_v9 = vpop.trf.xlu1 }
 0xc62   : > { %v3989_v54 = vpop.trf.xlu0 }
 0xc63   : > { %8058 = vmatmul.mubr.msk.f32.gmra.mrb[2].mxu1 %vm1975_vm8, %v3989_v54  ;;  %v4021_v39 = vpop.trf.xlu1 }
 0xc64   : > { %7465 = vmatpush3.bf16.xpose.msra.mxu1 %v13010_v16 }
 0xc65   : > { %8532 = vmatprep.subr.msk.bf16.mxu1 %vm1975_vm8, %v12978_v33 }
 0xc66   : > { %v3990_v29 = vpop.trf.xlu0 }
 0xc67   : > { %8060 = vmatprep.mubr.msk.f32.mxu1 %vm1975_vm8, %v3990_v29  ;;  %v4022_v28 = vpop.trf.xlu1 }
 0xc6a   : > { %v3991_v60 = vpop.trf.xlu0 }
 0xc6b   : > { %8061 = vmatmul.mubr.msk.f32.gmra.mrb[4].mxu1 %vm1975_vm8, %v3991_v60  ;;  %v4023_v30 = vpop.trf.xlu1 }
 0xc6c   : > { %7467 = vmatpush3.bf16.xpose.msra.mxu1 %v12936_v35 }
 0xc6d   : > { %8533 = vmatprep.subr.msk.bf16.mxu1 %vm1975_vm8, %v12937_v46 }
 0xc6e   : > { %v3992_v2 = vpop.trf.xlu0 }
 0xc6f   : > { %8063 = vmatprep.mubr.msk.f32.mxu1 %vm1975_vm8, %v3992_v2  ;;  %v4024_v54 = vpop.trf.xlu1 }
 0xc72   : > { %v3993_v47 = vpop.trf.xlu0 }
 0xc73   : > { %8064 = vmatmul.mubr.msk.f32.gmra.mrb[6].mxu1 %vm1975_vm8, %v3993_v47  ;;  %v4025_v2 = vpop.trf.xlu1 }
 0xc74   : > { %7469 = vmatpush3.bf16.xpose.msra.mxu1 %v12938_v49 }
 0xc75   : > { %8534 = vmatprep.subr.msk.bf16.mxu1 %vm1975_vm8, %v12979_v11 }
 0xc76   : > { %v3994_v3 = vpop.trf.xlu0 }
 0xc77   : > { %8066 = vmatprep.mubr.msk.f32.mxu1 %vm1975_vm8, %v3994_v3  ;;  %v4026_v3 = vpop.trf.xlu1 }
 0xc7a   : > { %v3995_v38 = vpop.trf.xlu0 }
 0xc7b   : > { %8067 = vmatmul.mubr.msk.f32.gmra.mrb[8].mxu1 %vm1975_vm8, %v3995_v38  ;;  %v4027_v1 = vpop.trf.xlu1 }
 0xc7c   : > { %7471 = vmatpush3.bf16.xpose.msra.mxu1 %v12980_v27 }
 0xc7d   : > { %8535 = vmatprep.subr.msk.bf16.mxu1 %vm1975_vm8, %v12941_v36 }
 0xc7e   : > { %v3996_v29 = vpop.trf.xlu0 }
 0xc7f   : > { %8069 = vmatprep.mubr.msk.f32.mxu1 %vm1975_vm8, %v3996_v29 }
 0xc82   : > { %v3997_v60 = vpop.trf.xlu0 }
 0xc83   : > { %8070 = vmatmul.mubr.msk.f32.gmra.mrb[10].mxu1 %vm1975_vm8, %v3997_v60 }
 0xc84   : > { %7473 = vmatpush3.bf16.xpose.msra.mxu1 %v12942_v20 }
 0xc85   : > { %8536 = vmatprep.subr.msk.bf16.mxu1 %vm1975_vm8, %v12943_v5 }
 0xc86   : > { %v3998_v47 = vpop.trf.xlu0 }
 0xc87   : > { %8072 = vmatprep.mubr.msk.f32.mxu1 %vm1975_vm8, %v3998_v47  ;;  %v4028_v47 = vpop.trf.xlu1 }
 0xc8a   : > { %v3999_v38 = vpop.trf.xlu0 }
 0xc8b   : > { %8073 = vmatmul.mubr.msk.f32.gmra.mrb[12].mxu1 %vm1975_vm8, %v3999_v38  ;;  %v4029_v38 = vpop.trf.xlu1 }
 0xc8c   : > { %7475 = vmatpush3.bf16.xpose.msra.mxu1 %v12944_v4 }
 0xc8d   : > { %8537 = vmatprep.subr.msk.bf16.mxu1 %vm1975_vm8, %v10259_v15 }
 0xc8e   : > { %v4000_v29 = vpop.trf.xlu0 }
 0xc8f   : > { %8075 = vmatprep.mubr.msk.f32.mxu1 %vm1975_vm8, %v4000_v29  ;;  %v4030_v29 = vpop.trf.xlu1 }
 0xc92   : > { %v4001_v60 = vpop.trf.xlu0 }
 0xc93   : > { %8076 = vmatmul.mubr.msk.f32.gmra.mrb[14].mxu1 %vm1975_vm8, %v4001_v60 }
 0xc94   : > { %7477 = vmatpush3.bf16.xpose.msra.mxu1 %v10273_v48  ;;  %8078 = vmatprep.mubr.msk.f32.mxu1 %vm1975_vm8, %v4018_v62  ;;  %v4031_v62 = vpop.trf.xlu1 }
 0xc95   : > { %8538 = vmatprep.subr.msk.bf16.mxu1 %vm373_vm4, %v13011_v44 }
 0xc97   : > { %8079 = vmatmul.mubr.msk.f32.gmra.mrb[16].mxu1 %vm1975_vm8, %v4019_v53 }
 0xc98   : > { %8081 = vmatprep.mubr.msk.f32.mxu1 %vm1975_vm8, %v4020_v9  ;;  %v4032_v44 = vpop.trf.xlu1 }
 0xc9b   : > { %8082 = vmatmul.mubr.msk.f32.gmra.mrb[18].mxu1 %vm1975_vm8, %v4021_v39  ;;  %v13013_v39 = vld [vmem:[#allocation39_spill] sm:$0xff] }
 0xc9c   : > { %8084 = vmatprep.mubr.msk.f32.mxu1 %vm1975_vm8, %v4022_v28  ;;  %v4033_v9 = vpop.trf.xlu1  ;;  %v13014_v28 = vld [vmem:[#allocation40_spill] sm:$0xff] }
 0xc9f   : > { %8085 = vmatmul.mubr.msk.f32.gmra.mrb[20].mxu1 %vm1975_vm8, %v4023_v30  ;;  %v13015_v30 = vld [vmem:[#allocation22_spill] sm:$0xff] }
 0xca0   : > { %8087 = vmatprep.mubr.msk.f32.mxu1 %vm1975_vm8, %v4024_v54  ;;  %v13016_v54 = vld [vmem:[#allocation26_spill] sm:$0xff] }
 0xca3   : > { %8088 = vmatmul.mubr.msk.f32.gmra.mrb[22].mxu1 %vm1975_vm8, %v4025_v2  ;;  %v13017_v2 = vld [vmem:[#allocation42_spill] sm:$0xff]  ;;  %v11031_v60 = vpop.permute.xlu1 %4695 }
 0xca4   : > { %8090 = vmatprep.mubr.msk.f32.mxu1 %vm1975_vm8, %v4026_v3  ;;  %v13018_v3 = vld [vmem:[#allocation30_spill] sm:$0xff] }
 0xca7   : > { %8091 = vmatmul.mubr.msk.f32.gmra.mrb[24].mxu1 %vm1975_vm8, %v4027_v1  ;;  %v13012_v1 = vld [vmem:[#allocation12_spill] sm:$0xff] }
 0xca8   : > { %8093 = vmatprep.mubr.msk.f32.mxu1 %vm1975_vm8, %v4028_v47 }
 0xcab   : > { %8094 = vmatmul.mubr.msk.f32.gmra.mrb[26].mxu1 %vm1975_vm8, %v4029_v38 }
 0xcac   : > { %8096 = vmatprep.mubr.msk.f32.mxu1 %vm1975_vm8, %v4030_v29 }
 0xcad   : > { %v4587_v53 = vpop.permute.xlu0 %4586 }
 0xcaf   : > { %8097 = vmatmul.mubr.msk.f32.gmra.mrb[28].mxu1 %vm1975_vm8, %v4031_v62 }
 0xcb0   : > { %8099 = vmatprep.mubr.msk.f32.mxu1 %vm1975_vm8, %v4032_v44 }
 0xcb3   : > { %8100 = vmatmul.mubr.msk.f32.gmra.mrb[30].mxu1 %vm1975_vm8, %v4033_v9 }
 0xcb4   : > { %7478 = vmatprep.mubr.msk.bf16.mxu1 %vm1975_vm8, %v4587_v53 }
 0xcb7   : > { %7479 = vmatmul.mubr.msk.bf16.vlgmr.msra.gmra.mrb[32].mxu1 %vm1975_vm8, %v4587_v53 }
 0xcb8   : > { %7481 = vmatpush3.bf16.xpose.msra.mxu1 %v9466_v25  ;;  %7496 = vmatprep.mubr.msk.bf16.mxu1 %vm373_vm4, %v10902_v59 }
 0xcb9   : > { %8539 = vmatprep.subr.msk.bf16.mxu1 %vm373_vm4, %v13012_v1 }
 0xcc0   : > { %7483 = vmatpush3.bf16.xpose.msra.mxu1 %v13013_v39 }
 0xcc1   : > { %8540 = vmatprep.subr.msk.bf16.mxu1 %vm373_vm4, %v9334_v7 }
 0xcc8   : > { %7485 = vmatpush3.bf16.xpose.msra.mxu1 %v9466_v25 }
 0xcc9   : > { %8541 = vmatprep.subr.msk.bf16.mxu1 %vm373_vm4, %v9350_v50 }
 0xcd0   : > { %7487 = vmatpush3.bf16.xpose.msra.mxu1 %v13014_v28 }
 0xcd1   : > { %8542 = vmatprep.subr.msk.bf16.mxu1 %vm373_vm4, %v13015_v30 }
 0xcd8   : > { %7489 = vmatpush3.bf16.xpose.msra.mxu1 %v9499_v52 }
 0xcd9   : > { %8543 = vmatprep.subr.msk.bf16.mxu1 %vm373_vm4, %v13016_v54 }
 0xce0   : > { %7491 = vmatpush3.bf16.xpose.msra.mxu1 %v13017_v2 }
 0xce1   : > { %8544 = vmatprep.subr.msk.bf16.mxu1 %vm373_vm4, %v13018_v3 }
 0xce8   : > { %7493 = vmatpush3.bf16.xpose.msra.mxu1 %v9517_v0 }
 0xce9   : > { %8545 = vmatprep.subr.msk.bf16.mxu1 %vm373_vm4, %v9438_v18 }
 0xcf0   : > { %7495 = vmatpush3.bf16.xpose.msra.mxu1 %v12974_v40 }
 0xcf7   : > { %7497 = vmatmul.mubr.msk.bf16.vlgmr.msra.gmra.mrb[32].mxu1 %vm373_vm4, %v10902_v59 }
 0xcf8   : > { %7514 = vmatprep.mubr.msk.bf16.mxu1 %vm1975_vm8, %v11031_v60 }
 0xd2e   : > { %v8056_v47 = vpop.f32.mrb[0].mxu1 }
 0xd2f   : > { %v4423_v38 = vrot.slane %v8056_v47, 7  ;;  %v4516_v29 = vrot.slane %v8056_v47, 5  ;;  %v4196_v62 = vpop.f32.mrb[1].mxu1 }
 0xd30   : > { %v4372_v44 = vrot.slane %v4196_v62, 1  ;;  %v4422_v53 = vrot.slane %v4196_v62, 7 }
 0xd31   : > { %v4564_v9 = vsel %vm763_vm5, %v4423_v38, %v4516_v29 }
 0xd32   : > { %v4940_v48 = vrot.slane %v4564_v9, 1  ;;  %v5267_v15 = vrot.slane %v4564_v9, 2  ;;  %v11039_v4 = vsel %vm763_vm5, %v4422_v53, %v4423_v38  ;;  %v11042_v5 = vsel %vm763_vm5, %v4372_v44, %v4422_v53 }
 0xd33   : > { %v4937_v59 = vrot.slane %v11042_v5, 1  ;;  %v4938_v20 = vrot.slane %v11039_v4, 1  ;;  %v5264_v36 = vrot.slane %v11042_v5, 2  ;;  %v5265_v47 = vrot.slane %v11039_v4, 2 }
 0xd35   : > { %v11051_v29 = vsel %vm971_vm6, %v4937_v59, %v4938_v20  ;;  %v11054_v38 = vsel %vm971_vm6, %v4938_v20, %v4940_v48  ;;  %v11057_v44 = vsel %vm1287_vm7, %v5264_v36, %v5265_v47  ;;  %v11060_v53 = vsel %vm1287_vm7, %v5265_v47, %v5267_v15 }
 0xd36   : > { %13019 = vst [vmem:[#allocation76_spill] sm:$0xff] %v11051_v29  ;;  %13020 = vst [vmem:[#allocation75_spill] sm:$0xff] %v11054_v38  ;;  %v8059_v9 = vpop.f32.mrb[2].mxu1 }
 0xd37   : > { %13021 = vst [vmem:[#allocation80_spill] sm:$0xff] %v11057_v44  ;;  %13022 = vst [vmem:[#allocation79_spill] sm:$0xff] %v11060_v53  ;;  %v4420_v62 = vrot.slane %v8059_v9, 7  ;;  %v4515_v49 = vrot.slane %v8059_v9, 5  ;;  %v4206_v59 = vpop.f32.mrb[3].mxu1 }
 0xd38   : > { %v4371_v46 = vrot.slane %v4206_v59, 1  ;;  %v4419_v35 = vrot.slane %v4206_v59, 7 }
 0xd39   : > { %v4563_v48 = vsel %vm763_vm5, %v4420_v62, %v4515_v49 }
 0xd3a   : > { %v4935_v20 = vrot.slane %v4563_v48, 1  ;;  %v5262_v36 = vrot.slane %v4563_v48, 2  ;;  %v11068_v33 = vsel %vm763_vm5, %v4419_v35, %v4420_v62  ;;  %v11071_v15 = vsel %vm763_vm5, %v4371_v46, %v4419_v35 }
 0xd3b   : > { %v4932_v47 = vrot.slane %v11071_v15, 1  ;;  %v4933_v27 = vrot.slane %v11068_v33, 1  ;;  %v5259_v11 = vrot.slane %v11071_v15, 2  ;;  %v5260_v9 = vrot.slane %v11068_v33, 2 }
 0xd3d   : > { %v11080_v49 = vsel %vm971_vm6, %v4932_v47, %v4933_v27  ;;  %v11083_v62 = vsel %vm971_vm6, %v4933_v27, %v4935_v20  ;;  %v11086_v46 = vsel %vm1287_vm7, %v5259_v11, %v5260_v9  ;;  %v11089_v35 = vsel %vm1287_vm7, %v5260_v9, %v5262_v36 }
 0xd3e   : > { %13023 = vst [vmem:[#allocation84_spill] sm:$0xff] %v11080_v49  ;;  %13024 = vst [vmem:[#allocation83_spill] sm:$0xff] %v11083_v62  ;;  %v8062_v48 = vpop.f32.mrb[4].mxu1 }
 0xd3f   : > { %13025 = vst [vmem:[#allocation85_spill] sm:$0xff] %v11086_v46  ;;  %13026 = vst [vmem:[#allocation5_spill] sm:$0xff] %v11089_v35  ;;  %v4426_v59 = vrot.slane %v8062_v48, 7  ;;  %v4517_v40 = vrot.slane %v8062_v48, 5  ;;  %v4216_v47 = vpop.f32.mrb[5].mxu1 }
 0xd40   : > { %v4373_v18 = vrot.slane %v4216_v47, 1  ;;  %v4425_v0 = vrot.slane %v4216_v47, 7 }
 0xd41   : > { %v4565_v27 = vsel %vm763_vm5, %v4426_v59, %v4517_v40 }
 0xd42   : > { %v4945_v20 = vrot.slane %v4565_v27, 1  ;;  %v5272_v11 = vrot.slane %v4565_v27, 2  ;;  %v11097_v3 = vsel %vm763_vm5, %v4425_v0, %v4426_v59  ;;  %v11100_v36 = vsel %vm763_vm5, %v4373_v18, %v4425_v0 }
 0xd43   : > { %v4942_v9 = vrot.slane %v11100_v36, 1  ;;  %v4943_v16 = vrot.slane %v11097_v3, 1  ;;  %v5269_v22 = vrot.slane %v11100_v36, 2  ;;  %v5270_v48 = vrot.slane %v11097_v3, 2 }
 0xd45   : > { %v11109_v40 = vsel %vm971_vm6, %v4942_v9, %v4943_v16  ;;  %v11112_v59 = vsel %vm971_vm6, %v4943_v16, %v4945_v20  ;;  %v11115_v18 = vsel %vm1287_vm7, %v5269_v22, %v5270_v48  ;;  %v11118_v0 = vsel %vm1287_vm7, %v5270_v48, %v5272_v11 }
 0xd46   : > { %13027 = vst [vmem:[#allocation6_spill] sm:$0xff] %v11109_v40  ;;  %13028 = vst [vmem:[#allocation8_spill] sm:$0xff] %v11112_v59  ;;  %v8065_v27 = vpop.f32.mrb[6].mxu1 }
 0xd47   : > { %13029 = vst [vmem:[#allocation119_spill] sm:$0xff] %v11115_v18  ;;  %13030 = vst [vmem:[#allocation120_spill] sm:$0xff] %v11118_v0  ;;  %v4429_v47 = vrot.slane %v8065_v27, 7  ;;  %v4518_v52 = vrot.slane %v8065_v27, 5  ;;  %v4226_v9 = vpop.f32.mrb[7].mxu1 }
 0xd48   : > { %v4374_v30 = vrot.slane %v4226_v9, 1  ;;  %v4428_v28 = vrot.slane %v4226_v9, 7 }
 0xd49   : > { %v4566_v16 = vsel %vm763_vm5, %v4429_v47, %v4518_v52 }
 0xd4a   : > { %v4950_v20 = vrot.slane %v4566_v16, 1  ;;  %v5277_v22 = vrot.slane %v4566_v16, 2  ;;  %v11126_v50 = vsel %vm763_vm5, %v4428_v28, %v4429_v47  ;;  %v11129_v11 = vsel %vm763_vm5, %v4374_v30, %v4428_v28 }
 0xd4b   : > { %v4947_v48 = vrot.slane %v11129_v11, 1  ;;  %v4948_v2 = vrot.slane %v11126_v50, 1  ;;  %v5274_v54 = vrot.slane %v11129_v11, 2  ;;  %v5275_v27 = vrot.slane %v11126_v50, 2 }
 0xd4d   : > { %v11138_v52 = vsel %vm971_vm6, %v4947_v48, %v4948_v2  ;;  %v11141_v47 = vsel %vm971_vm6, %v4948_v2, %v4950_v20  ;;  %v11144_v28 = vsel %vm1287_vm7, %v5274_v54, %v5275_v27  ;;  %v11147_v30 = vsel %vm1287_vm7, %v5275_v27, %v5277_v22 }
 0xd4e   : > { %13031 = vst [vmem:[#allocation121_spill] sm:$0xff] %v11138_v52  ;;  %13032 = vst [vmem:[#allocation122_spill] sm:$0xff] %v11141_v47  ;;  %v8068_v16 = vpop.f32.mrb[8].mxu1 }
 0xd4f   : > { %13033 = vst [vmem:[#allocation123_spill] sm:$0xff] %v11144_v28  ;;  %13034 = vst [vmem:[#allocation124_spill] sm:$0xff] %v11147_v30  ;;  %v4432_v9 = vrot.slane %v8068_v16, 7  ;;  %v4519_v39 = vrot.slane %v8068_v16, 5  ;;  %v4236_v48 = vpop.f32.mrb[9].mxu1 }
 0xd50   : > { %v4375_v1 = vrot.slane %v4236_v48, 1  ;;  %v4431_v18 = vrot.slane %v4236_v48, 7 }
 0xd51   : > { %v4567_v2 = vsel %vm763_vm5, %v4432_v9, %v4519_v39 }
 0xd52   : > { %v4955_v20 = vrot.slane %v4567_v2, 1  ;;  %v5282_v54 = vrot.slane %v4567_v2, 2  ;;  %v11155_v0 = vsel %vm763_vm5, %v4431_v18, %v4432_v9  ;;  %v11158_v22 = vsel %vm763_vm5, %v4375_v1, %v4431_v18 }
 0xd53   : > { %v4952_v27 = vrot.slane %v11158_v22, 1  ;;  %v4953_v25 = vrot.slane %v11155_v0, 1  ;;  %v5279_v7 = vrot.slane %v11158_v22, 2  ;;  %v5280_v16 = vrot.slane %v11155_v0, 2 }
 0xd55   : > { %v11167_v39 = vsel %vm971_vm6, %v4952_v27, %v4953_v25  ;;  %v11170_v9 = vsel %vm971_vm6, %v4953_v25, %v4955_v20  ;;  %v11173_v1 = vsel %vm1287_vm7, %v5279_v7, %v5280_v16  ;;  %v11176_v18 = vsel %vm1287_vm7, %v5280_v16, %v5282_v54 }
 0xd56   : > { %13035 = vst [vmem:[#allocation125_spill] sm:$0xff] %v11167_v39  ;;  %13036 = vst [vmem:[#allocation126_spill] sm:$0xff] %v11170_v9  ;;  %v8071_v2 = vpop.f32.mrb[10].mxu1 }
 0xd57   : > { %13037 = vst [vmem:[#allocation127_spill] sm:$0xff] %v11173_v1  ;;  %13038 = vst [vmem:[#allocation128_spill] sm:$0xff] %v11176_v18  ;;  %v4435_v48 = vrot.slane %v8071_v2, 7  ;;  %v4520_v44 = vrot.slane %v8071_v2, 5  ;;  %v4246_v27 = vpop.f32.mrb[11].mxu1 }
 0xd58   : > { %v4376_v53 = vrot.slane %v4246_v27, 1  ;;  %v4434_v46 = vrot.slane %v4246_v27, 7 }
 0xd59   : > { %v4568_v25 = vsel %vm763_vm5, %v4435_v48, %v4520_v44 }
 0xd5a   : > { %v4960_v20 = vrot.slane %v4568_v25, 1  ;;  %v5287_v7 = vrot.slane %v4568_v25, 2  ;;  %v11184_v35 = vsel %vm763_vm5, %v4434_v46, %v4435_v48  ;;  %v11187_v54 = vsel %vm763_vm5, %v4376_v53, %v4434_v46 }
 0xd5b   : > { %v4957_v16 = vrot.slane %v11187_v54, 1  ;;  %v4958_v28 = vrot.slane %v11184_v35, 1  ;;  %v5284_v30 = vrot.slane %v11187_v54, 2  ;;  %v5285_v2 = vrot.slane %v11184_v35, 2 }
 0xd5d   : > { %v11196_v44 = vsel %vm971_vm6, %v4957_v16, %v4958_v28  ;;  %v11199_v48 = vsel %vm971_vm6, %v4958_v28, %v4960_v20  ;;  %v11202_v53 = vsel %vm1287_vm7, %v5284_v30, %v5285_v2  ;;  %v11205_v46 = vsel %vm1287_vm7, %v5285_v2, %v5287_v7 }
 0xd5e   : > { %13039 = vst [vmem:[#allocation129_spill] sm:$0xff] %v11196_v44  ;;  %13040 = vst [vmem:[#allocation130_spill] sm:$0xff] %v11199_v48  ;;  %v8074_v25 = vpop.f32.mrb[12].mxu1 }
 0xd5f   : > { %13041 = vst [vmem:[#allocation131_spill] sm:$0xff] %v11202_v53  ;;  %13042 = vst [vmem:[#allocation132_spill] sm:$0xff] %v11205_v46  ;;  %v4438_v27 = vrot.slane %v8074_v25, 7  ;;  %v4521_v51 = vrot.slane %v8074_v25, 5  ;;  %v4256_v16 = vpop.f32.mrb[13].mxu1 }
 0xd60   : > { %v4377_v17 = vrot.slane %v4256_v16, 1  ;;  %v4437_v6 = vrot.slane %v4256_v16, 7 }
 0xd61   : > { %v4569_v28 = vsel %vm763_vm5, %v4438_v27, %v4521_v51 }
 0xd62   : > { %v4965_v20 = vrot.slane %v4569_v28, 1  ;;  %v5292_v30 = vrot.slane %v4569_v28, 2  ;;  %v11213_v43 = vsel %vm763_vm5, %v4437_v6, %v4438_v27  ;;  %v11216_v7 = vsel %vm763_vm5, %v4377_v17, %v4437_v6 }
 0xd63   : > { %v4962_v2 = vrot.slane %v11216_v7, 1  ;;  %v4963_v1 = vrot.slane %v11213_v43, 1  ;;  %v5289_v18 = vrot.slane %v11216_v7, 2  ;;  %v5290_v25 = vrot.slane %v11213_v43, 2 }
 0xd65   : > { %v11225_v51 = vsel %vm971_vm6, %v4962_v2, %v4963_v1  ;;  %v11228_v27 = vsel %vm971_vm6, %v4963_v1, %v4965_v20  ;;  %v11231_v6 = vsel %vm1287_vm7, %v5289_v18, %v5290_v25  ;;  %v11234_v17 = vsel %vm1287_vm7, %v5290_v25, %v5292_v30 }
 0xd66   : > { %13043 = vst [vmem:[#allocation133_spill] sm:$0xff] %v11225_v51  ;;  %13044 = vst [vmem:[#allocation134_spill] sm:$0xff] %v11228_v27  ;;  %v8077_v28 = vpop.f32.mrb[14].mxu1 }
 0xd67   : > { %13045 = vst [vmem:[#allocation135_spill] sm:$0xff] %v11231_v6  ;;  %13046 = vst [vmem:[#allocation136_spill] sm:$0xff] %v11234_v17  ;;  %v4441_v16 = vrot.slane %v8077_v28, 7  ;;  %v4522_v8 = vrot.slane %v8077_v28, 5  ;;  %v4266_v2 = vpop.f32.mrb[15].mxu1 }
 0xd68   : > { %v4378_v21 = vrot.slane %v4266_v2, 1  ;;  %v4440_v45 = vrot.slane %v4266_v2, 7 }
 0xd69   : > { %v4570_v1 = vsel %vm763_vm5, %v4441_v16, %v4522_v8 }
 0xd6a   : > { %v4970_v20 = vrot.slane %v4570_v1, 1  ;;  %v5297_v18 = vrot.slane %v4570_v1, 2  ;;  %v4442_v23 = vsel %vm763_vm5, %v4440_v45, %v4441_v16  ;;  %v4554_v30 = vsel %vm763_vm5, %v4378_v21, %v4440_v45  ;;  %v8080_v25 = vpop.f32.mrb[16].mxu1 }
 0xd6b   : > { %v4967_v44 = vrot.slane %v4554_v30, 1  ;;  %v4968_v48 = vrot.slane %v4442_v23, 1  ;;  %v5294_v53 = vrot.slane %v4554_v30, 2  ;;  %v5295_v51 = vrot.slane %v4442_v23, 2  ;;  %v4276_v27 = vpop.f32.mrb[17].mxu1 }
 0xd6c   : > { %v4444_v46 = vrot.slane %v8080_v25, 7  ;;  %v4523_v6 = vrot.slane %v8080_v25, 5  ;;  %v11243_v28 = vpack.c.bf16 %v4442_v23, %v4554_v30  ;;  %v4379_v17 = vrot.slane %v4276_v27, 1 }
 0xd6d   : > { %v4443_v2 = vrot.slane %v4276_v27, 7  ;;  %v4969_v8 = vsel %vm971_vm6, %v4967_v44, %v4968_v48  ;;  %v4971_v1 = vsel %vm971_vm6, %v4968_v48, %v4970_v20  ;;  %v5296_v16 = vsel %vm1287_vm7, %v5294_v53, %v5295_v51 }
 0xd6e   : > { %13047 = vst [vmem:[#allocation137_spill] sm:$0xff] %v11243_v28  ;;  %v11249_v45 = vsel %vm763_vm5, %v4444_v46, %v4523_v6  ;;  %8546 = vmatprep.subr.msk.bf16.mxu1 %vm1975_vm8, %v11243_v28  ;;  %v13048_v21 = vpack.c.bf16 %v11068_v33, %v11071_v15  ;;  %v8083_v30 = vpop.f32.mrb[18].mxu1  ;;  %v11259_v27 = vpack.c.bf16 %v4971_v1, %v4969_v8 }
 0xd6f   : > { %v5298_v44 = vsel %vm1287_vm7, %v5295_v51, %v5297_v18  ;;  %v4975_v48 = vrot.slane %v11249_v45, 1  ;;  %v11264_v53 = vsel %vm763_vm5, %v4443_v2, %v4444_v46  ;;  %v11267_v6 = vsel %vm763_vm5, %v4379_v17, %v4443_v2  ;;  %v4286_v20 = vpop.f32.mrb[19].mxu1 }
 0xd70   : > { %v11257_v23 = vsel %vm1975_vm8, %v13048_v21, 0  ;;  %13050 = vst [vmem:[#allocation139_spill] sm:$0xff] %v11259_v27  ;;  %v4972_v33 = vrot.slane %v11267_v6, 1  ;;  %v4973_v15 = vrot.slane %v11264_v53, 1  ;;  %v11274_v25 = vpack.c.bf16 %v11264_v53, %v11267_v6 }
 0xd71   : > { %13049 = vst [vmem:[#allocation138_spill] sm:$0xff] %v11257_v23  ;;  %7499 = vmatpush3.bf16.xpose.msra.mxu1 %v11257_v23  ;;  %v4447_v51 = vrot.slane %v8083_v30, 7  ;;  %v4524_v18 = vrot.slane %v8083_v30, 5  ;;  %v4380_v8 = vrot.slane %v4286_v20, 1  ;;  %v4446_v1 = vrot.slane %v4286_v20, 7 }
 0xd72   : > { %13051 = vst [vmem:[#allocation140_spill] sm:$0xff] %v11274_v25  ;;  %v8086_v46 = vpop.f32.mrb[20].mxu1  ;;  %v4974_v21 = vsel %vm971_vm6, %v4972_v33, %v4973_v15  ;;  %v4976_v17 = vsel %vm971_vm6, %v4973_v15, %v4975_v48  ;;  %v11278_v2 = vpack.c.bf16 %v5298_v44, %v5296_v16  ;;  %8547 = vmatprep.subr.msk.bf16.mxu1 %vm1975_vm8, %v11274_v25 }
 0xd73   : > { %v11283_v28 = vsel %vm763_vm5, %v4447_v51, %v4524_v18  ;;  %v4450_v39 = vrot.slane %v8086_v46, 7  ;;  %v4525_v9 = vrot.slane %v8086_v46, 5  ;;  %v4296_v52 = vpop.f32.mrb[21].mxu1  ;;  %v11285_v47 = vpack.c.bf16 %v4976_v17, %v4974_v21 }
 0xd74   : > { %13052 = vst [vmem:[#allocation141_spill] sm:$0xff] %v11278_v2  ;;  %v11288_v30 = vsel %vm763_vm5, %v4446_v1, %v4447_v51  ;;  %v11291_v20 = vsel %vm763_vm5, %v4380_v8, %v4446_v1  ;;  %v13054_v16 = vpack.c.bf16 %v11039_v4, %v11042_v5  ;;  %v13056_v15 = vpack.c.bf16 %v11097_v3, %v11100_v36 }
 0xd75   : > { %13053 = vst [vmem:[#allocation142_spill] sm:$0xff] %v11285_v47  ;;  %v13058_v51 = vpack.c.bf16 %v11126_v50, %v11129_v11  ;;  %v11315_v5 = vpack.c.bf16 %v11288_v30, %v11291_v20  ;;  %v11318_v4 = vsel %vm763_vm5, %v4450_v39, %v4525_v9  ;;  %v4381_v1 = vrot.slane %v4296_v52, 1 }
 0xd76   : > { %v11297_v44 = vsel %vm1975_vm8, %v13054_v16, 0  ;;  %v11305_v18 = vsel %vm1975_vm8, %v13056_v15, 0  ;;  %v4449_v46 = vrot.slane %v4296_v52, 7  ;;  %v8089_v21 = vpop.f32.mrb[22].mxu1  ;;  %v4980_v3 = vrot.slane %v11283_v28, 1 }
 0xd77   : > { %13055 = vst [vmem:[#allocation143_spill] sm:$0xff] %v11297_v44  ;;  %13057 = vst [vmem:[#allocation144_spill] sm:$0xff] %v11305_v18  ;;  %v11311_v8 = vsel %vm1975_vm8, %v13058_v51, 0  ;;  %v4977_v36 = vrot.slane %v11291_v20, 1  ;;  %v4453_v50 = vrot.slane %v8089_v21, 7  ;;  %v4526_v11 = vrot.slane %v8089_v21, 5 }
 0xd78   : > { %13059 = vst [vmem:[#allocation145_spill] sm:$0xff] %v11315_v5  ;;  %v4306_v17 = vpop.f32.mrb[23].mxu1  ;;  %v11326_v16 = vsel %vm763_vm5, %v4449_v46, %v4450_v39  ;;  %v11329_v9 = vsel %vm763_vm5, %v4381_v1, %v4449_v46  ;;  %v4978_v51 = vrot.slane %v11288_v30, 1  ;;  %v4985_v48 = vrot.slane %v11318_v4, 1 }
 0xd79   : > { %7501 = vmatpush3.bf16.xpose.msra.mxu1 %v11297_v44  ;;  %v4382_v52 = vrot.slane %v4306_v17, 1  ;;  %v4452_v15 = vrot.slane %v4306_v17, 7  ;;  %v4982_v33 = vrot.slane %v11329_v9, 1  ;;  %v4983_v21 = vrot.slane %v11326_v16, 1 }
 0xd7a   : > { %8548 = vmatprep.subr.msk.bf16.mxu1 %vm1975_vm8, %v11315_v5  ;;  %v11337_v44 = vpack.c.bf16 %v11326_v16, %v11329_v9  ;;  %v11340_v39 = vsel %vm763_vm5, %v4453_v50, %v4526_v11  ;;  %v8092_v17 = vpop.f32.mrb[24].mxu1  ;;  %v4979_v5 = vsel %vm971_vm6, %v4977_v36, %v4978_v51  ;;  %v4981_v49 = vsel %vm971_vm6, %v4978_v51, %v4980_v3 }
 0xd7b   : > { %v11343_v1 = vsel %vm763_vm5, %v4452_v15, %v4453_v50  ;;  %v11346_v46 = vsel %vm763_vm5, %v4382_v52, %v4452_v15  ;;  %v4316_v59 = vpop.f32.mrb[25].mxu1  ;;  %v4990_v11 = vrot.slane %v11340_v39, 1  ;;  %v4456_v52 = vrot.slane %v8092_v17, 7 }
 0xd7c   : > { %13060 = vst [vmem:[#allocation146_spill] sm:$0xff] %v11337_v44  ;;  %v4987_v2 = vrot.slane %v11346_v46, 1  ;;  %v4988_v40 = vrot.slane %v11343_v1, 1  ;;  %v11356_v50 = vpack.c.bf16 %v11343_v1, %v11346_v46  ;;  %v4527_v15 = vrot.slane %v8092_v17, 5 }
 0xd7d   : > { %v4383_v38 = vrot.slane %v4316_v59, 1  ;;  %v4455_v47 = vrot.slane %v4316_v59, 7  ;;  %v4984_v62 = vsel %vm971_vm6, %v4982_v33, %v4983_v21  ;;  %v4986_v27 = vsel %vm971_vm6, %v4983_v21, %v4985_v48 }
 0xd7e   : > { %13061 = vst [vmem:[#allocation147_spill] sm:$0xff] %v11356_v50  ;;  %v8095_v25 = vpop.f32.mrb[26].mxu1  ;;  %v11363_v29 = vsel %vm971_vm6, %v4987_v2, %v4988_v40  ;;  %v11367_v61 = vsel %vm763_vm5, %v4456_v52, %v4527_v15  ;;  %v11387_v48 = vpack.c.bf16 %v4981_v49, %v4979_v5  ;;  %v11389_v2 = vpack.c.bf16 %v4986_v27, %v4984_v62 }
 0xd7f   : > { %v11370_v17 = vsel %vm763_vm5, %v4455_v47, %v4456_v52  ;;  %v11373_v59 = vsel %vm763_vm5, %v4383_v38, %v4455_v47  ;;  %v4459_v36 = vrot.slane %v8095_v25, 7  ;;  %v4326_v3 = vpop.f32.mrb[27].mxu1  ;;  %v4528_v47 = vrot.slane %v8095_v25, 5 }
 0xd80   : > { %v11385_v38 = vpack.c.bf16 %v11370_v17, %v11373_v59  ;;  %v4384_v15 = vrot.slane %v4326_v3, 1  ;;  %v4458_v33 = vrot.slane %v4326_v3, 7  ;;  %13062 = vst [vmem:[#allocation148_spill] sm:$0xff] %v11387_v48  ;;  %13063 = vst [vmem:[#allocation149_spill] sm:$0xff] %v11389_v2  ;;  %v4991_v52 = vsel %vm971_vm6, %v4988_v40, %v4990_v11 }
 0xd81   : > { %7503 = vmatpush3.bf16.xpose.msra.mxu1 %v11257_v23  ;;  %v11392_v51 = vsel %vm763_vm5, %v4459_v36, %v4528_v47  ;;  %v5315_v34 = vrot.slane %v11343_v1, 2  ;;  %v4995_v63 = vrot.slane %v11367_v61, 1  ;;  %v5322_v62 = vrot.slane %v11367_v61, 2 }
 0xd82   : > { %8549 = vmatprep.subr.msk.bf16.mxu1 %vm1975_vm8, %v11337_v44  ;;  %v8098_v23 = vpop.f32.mrb[28].mxu1  ;;  %v11398_v25 = vsel %vm763_vm5, %v4458_v33, %v4459_v36  ;;  %v11401_v49 = vsel %vm763_vm5, %v4384_v15, %v4458_v33  ;;  %v4992_v27 = vrot.slane %v11373_v59, 1  ;;  %v4993_v5 = vrot.slane %v11370_v17, 1 }
 0xd83   : > { %v4462_v44 = vrot.slane %v8098_v23, 7  ;;  %v4529_v56 = vrot.slane %v8098_v23, 5  ;;  %v4336_v21 = vpop.f32.mrb[29].mxu1  ;;  %v5319_v23 = vrot.slane %v11373_v59, 2  ;;  %v11409_v40 = vpack.c.bf16 %v11398_v25, %v11401_v49 }
 0xd84   : > { %v4385_v11 = vrot.slane %v4336_v21, 1  ;;  %v4461_v36 = vrot.slane %v4336_v21, 7  ;;  %v5320_v33 = vrot.slane %v11370_v17, 2  ;;  %v5000_v61 = vrot.slane %v11392_v51, 1 }
 0xd85   : > { %v4577_v1 = vsel %vm763_vm5, %v4462_v44, %v4529_v56  ;;  %v5327_v59 = vrot.slane %v11392_v51, 2  ;;  %v4997_v41 = vrot.slane %v11401_v49, 1  ;;  %v5324_v51 = vrot.slane %v11401_v49, 2 }
 0xd86   : > { %v8101_v3 = vpop.f32.mrb[30].mxu1  ;;  %v4463_v48 = vsel %vm763_vm5, %v4461_v36, %v4462_v44  ;;  %v4561_v56 = vsel %vm763_vm5, %v4385_v11, %v4461_v36  ;;  %v5005_v26 = vrot.slane %v4577_v1, 1  ;;  %v5325_v44 = vrot.slane %v11398_v25, 2 }
 0xd87   : > { %v4465_v47 = vrot.slane %v8101_v3, 7  ;;  %v4530_v15 = vrot.slane %v8101_v3, 5  ;;  %v4346_v2 = vpop.f32.mrb[31].mxu1  ;;  %v5002_v17 = vrot.slane %v4561_v56, 1  ;;  %v5003_v12 = vrot.slane %v4463_v48, 1 }
 0xd88   : > { %v4464_v21 = vrot.slane %v4346_v2, 7  ;;  %v11422_v57 = vpack.c.bf16 %v4463_v48, %v4561_v56  ;;  %v5332_v11 = vrot.slane %v4577_v1, 2  ;;  %v4386_v36 = vrot.slane %v4346_v2, 1 }
 0xd89   : > { %7505 = vmatpush3.bf16.xpose.msra.mxu1 %v11305_v18  ;;  %v4998_v18 = vrot.slane %v11398_v25, 1  ;;  %v11425_v3 = vsel %vm763_vm5, %v4465_v47, %v4530_v15  ;;  %v5329_v10 = vrot.slane %v4561_v56, 2  ;;  %v5330_v24 = vrot.slane %v4463_v48, 2 }
 0xd8a   : > { %8550 = vmatprep.subr.msk.bf16.mxu1 %vm1975_vm8, %v11356_v50  ;;  %v4466_v50 = vsel %vm763_vm5, %v4464_v21, %v4465_v47  ;;  %v11431_v55 = vpack.c.bf16 %v4991_v52, %v11363_v29  ;;  %v4994_v58 = vsel %vm971_vm6, %v4992_v27, %v4993_v5  ;;  %v4996_v14 = vsel %vm971_vm6, %v4993_v5, %v4995_v63 }
 0xd8b   : > { %v4999_v15 = vsel %vm971_vm6, %v4997_v41, %v4998_v18  ;;  %v5001_v32 = vsel %vm971_vm6, %v4998_v18, %v5000_v61  ;;  %v5004_v47 = vsel %vm971_vm6, %v5002_v17, %v5003_v12  ;;  %v11438_v49 = vpack.c.bf16 %v4996_v14, %v4994_v58 }
 0xd8c   : > { %13064 = vst [vmem:[#allocation150_spill] sm:$0xff] %v11431_v55  ;;  %v11440_v25 = vpack.c.bf16 %v5001_v32, %v4999_v15  ;;  %v5006_v2 = vsel %vm971_vm6, %v5003_v12, %v5005_v26  ;;  %v13067_v48 = vrot.slane %v11264_v53, 2  ;;  %v13068_v29 = vrot.slane %v11267_v6, 2 }
 0xd8d   : > { %13065 = vst [vmem:[#allocation151_spill] sm:$0xff] %v11438_v49  ;;  %v11449_v63 = vpack.c.bf16 %v5006_v2, %v5004_v47  ;;  %v13070_v41 = vrot.slane %v11249_v45, 2  ;;  %v13072_v32 = vrot.slane %v11288_v30, 2  ;;  %v13073_v58 = vrot.slane %v11291_v20, 2 }
 0xd8e   : > { %13066 = vst [vmem:[#allocation152_spill] sm:$0xff] %v11440_v25  ;;  %v5301_v52 = vsel %vm1287_vm7, %v13068_v29, %v13067_v48  ;;  %v13071_v18 = vmov %v13067_v48  ;;  %v13074_v12 = vrot.slane %v11283_v28, 2  ;;  %v13078_v5 = vrot.slane %v11326_v16, 2 }
 0xd8f   : > { %13069 = vst [vmem:[#allocation153_spill] sm:$0xff] %v11449_v63  ;;  %v5303_v14 = vsel %vm1287_vm7, %v13071_v18, %v13070_v41  ;;  %v5306_v26 = vsel %vm1287_vm7, %v13073_v58, %v13072_v32  ;;  %v13075_v6 = vmov %v13072_v32  ;;  %v13079_v1 = vrot.slane %v11329_v9, 2 }
 0xd90   : > { %v5308_v27 = vsel %vm1287_vm7, %v13075_v6, %v13074_v12  ;;  %v11468_v45 = vpack.c.bf16 %v5303_v14, %v5301_v52  ;;  %v13080_v61 = vrot.slane %v11318_v4, 2  ;;  %v13081_v28 = vmov %v13078_v5  ;;  %v13101_v6 = vld [vmem:[#allocation31_spill] sm:$0xff] }
 0xd91   : > { %7507 = vmatpush3.bf16.xpose.msra.mxu1 %v11311_v8  ;;  %v11470_v53 = vpack.c.bf16 %v5308_v27, %v5306_v26  ;;  %v5311_v20 = vsel %vm1287_vm7, %v13079_v1, %v13078_v5  ;;  %v13083_v17 = vrot.slane %v11346_v46, 2  ;;  %v13084_v47 = vrot.slane %v11340_v39, 2  ;;  %v13093_v26 = vld [vmem:[#allocation9_spill] sm:$0xff]  ;;  %v13103_v5 = vld [vmem:[#allocation35_spill] sm:$0xff] }
 0xd92   : > { %8551 = vmatprep.subr.msk.bf16.mxu1 %vm1975_vm8, %v11385_v38  ;;  %13076 = vst [vmem:[#allocation154_spill] sm:$0xff] %v11468_v45  ;;  %v5313_v30 = vsel %vm1287_vm7, %v13081_v28, %v13080_v61  ;;  %v5321_v9 = vsel %vm1287_vm7, %v5319_v23, %v5320_v33  ;;  %v5323_v4 = vsel %vm1287_vm7, %v5320_v33, %v5322_v62  ;;  %v5757_v33 = vrot.slane %v11425_v3, 1  ;;  %v13102_v27 = vld [vmem:[#allocation33_spill] sm:$0xff]  ;;  %v4851_v61 = vpop.permute.xlu0 %4850  ;;  %v8822_v28 = vld [vmem:[%s12322_s5 + $0x8] sm:$0xff]  }
 0xd93   : > { %13077 = vst [vmem:[#allocation155_spill] sm:$0xff] %v11470_v53  ;;  %v11482_v56 = vpack.c.bf16 %v5313_v30, %v5311_v20  ;;  %v5316_v15 = vsel %vm1287_vm7, %v13083_v17, %v5315_v34  ;;  %v5318_v2 = vsel %vm1287_vm7, %v5315_v34, %v13084_v47  ;;  %v5326_v16 = vsel %vm1287_vm7, %v5324_v51, %v5325_v44  ;;  %v13104_v1 = vld [vmem:[#allocation37_spill] sm:$0xff]  ;;  %v13105_v20 = vld [vmem:[#allocation87_spill] sm:$0xff]  ;;  %v13106_v30 = vld [vmem:[#allocation62_spill] sm:$0xff] }
 0xd94   : > { %v11491_v48 = vpack.c.bf16 %v5318_v2, %v5316_v15  ;;  %v5328_v29 = vsel %vm1287_vm7, %v5325_v44, %v5327_v59  ;;  %v11496_v52 = vpack.c.bf16 %v5323_v4, %v5321_v9  ;;  %v5331_v46 = vsel %vm1287_vm7, %v5329_v10, %v5330_v24  ;;  %v13107_v17 = vld [vmem:[#allocation91_spill] sm:$0xff]  ;;  %v13108_v15 = vld [vmem:[#allocation61_spill] sm:$0xff]  ;;  %v13109_v47 = vld [vmem:[#allocation94_spill] sm:$0xff] }
 0xd95   : > { %13082 = vst [vmem:[#allocation156_spill] sm:$0xff] %v11482_v56  ;;  %v11498_v41 = vpack.c.bf16 %v5328_v29, %v5326_v16  ;;  %v5333_v39 = vsel %vm1287_vm7, %v5330_v24, %v5332_v11  ;;  %v13089_v34 = vpack.c.bf16 %v11155_v0, %v11158_v22  ;;  %v4562_v62 = vsel %vm763_vm5, %v4386_v36, %v4464_v21  ;;  %v13110_v2 = vld [vmem:[#allocation97_spill] sm:$0xff]  ;;  %v13111_v9 = vld [vmem:[#allocation58_spill] sm:$0xff] }
 0xd96   : > { %13085 = vst [vmem:[#allocation157_spill] sm:$0xff] %v11491_v48  ;;  %13086 = vst [vmem:[#allocation158_spill] sm:$0xff] %v11496_v52  ;;  %v11502_v18 = vpack.c.bf16 %v5333_v39, %v5331_v46  ;;  %v5754_v10 = vrot.slane %v4562_v62, 1  ;;  %v5755_v59 = vrot.slane %v4466_v50, 1  ;;  %v11515_v24 = vpack.c.bf16 %v4466_v50, %v4562_v62  ;;  %v13112_v4 = vld [vmem:[#allocation101_spill] sm:$0xff]  ;;  %v13115_v46 = vld [vmem:[#allocation66_spill] sm:$0xff] }
 0xd97   : > { %13087 = vst [vmem:[#allocation159_spill] sm:$0xff] %v11498_v41  ;;  %v11508_v23 = vsel %vm1975_vm8, %v13089_v34, 0  ;;  %v13090_v51 = vpack.c.bf16 %v11184_v35, %v11187_v54  ;;  %v5930_v11 = vrot.slane %v11425_v3, 2  ;;  %v5927_v36 = vrot.slane %v4562_v62, 2  ;;  %v13100_v3 = vld [vmem:[#allocation29_spill] sm:$0xff] }
 0xd98   : > { %13088 = vst [vmem:[#allocation160_spill] sm:$0xff] %v11502_v18  ;;  %v5756_v22 = vsel %vm971_vm6, %v5754_v10, %v5755_v59  ;;  %v5758_v44 = vsel %vm971_vm6, %v5755_v59, %v5757_v33  ;;  %v5928_v14 = vrot.slane %v4466_v50, 2  ;;  %v13092_v35 = vpack.c.bf16 %v11213_v43, %v11216_v7  ;;  %v13095_v43 = vld [vmem:[#allocation13_spill] sm:$0xff]  ;;  %v13096_v7 = vld [vmem:[#allocation15_spill] sm:$0xff]  ;;  %v13119_v33 = vld [vmem:[#allocation70_spill] sm:$0xff]  ;;  %v5053_v59 = vpop.permute.xlu1 %5052 }
 0xd99   : > { %7509 = vmatpush3.bf16.xpose.msra.mxu1 %v11508_v23  ;;  %v11521_v0 = vsel %vm1975_vm8, %v13090_v51, 0  ;;  %v11526_v21 = vpack.c.bf16 %v5758_v44, %v5756_v22  ;;  %v13098_v50 = vld [vmem:[#allocation25_spill] sm:$0xff]  ;;  %v13120_v10 = vld [vmem:[#allocation139_spill] sm:$0xff]  ;;  %v13122_v22 = vld [vmem:[#allocation84_spill] sm:$0xff] }
 0xd9a   : > { %8552 = vmatprep.subr.msk.bf16.mxu1 %vm1975_vm8, %v11409_v40  ;;  %v11535_v54 = vsel %vm1975_vm8, %v13092_v35, 0  ;;  %v5929_v32 = vsel %vm1287_vm7, %v5927_v36, %v5928_v14  ;;  %v5931_v58 = vsel %vm1287_vm7, %v5928_v14, %v5930_v11  ;;  %v13113_v16 = vld [vmem:[#allocation57_spill] sm:$0xff]  ;;  %v13121_v51 = vld [vmem:[#allocation83_spill] sm:$0xff]  ;;  %v13124_v36 = vld [vmem:[#allocation142_spill] sm:$0xff] }
 0xd9b   : > { %13091 = vst [vmem:[#allocation161_spill] sm:$0xff] %v11526_v21  ;;  %v11542_v12 = vpack.c.bf16 %v5931_v58, %v5929_v32  ;;  %v13114_v29 = vld [vmem:[#allocation105_spill] sm:$0xff]  ;;  %v13123_v44 = vpack.c.bf16 %v13121_v51, %v13122_v22  ;;  %v13125_v14 = vld [vmem:[#allocation75_spill] sm:$0xff]  ;;  %v13126_v35 = vld [vmem:[#allocation76_spill] sm:$0xff] }
 0xd9c   : > { %v13116_v39 = vld [vmem:[#allocation109_spill] sm:$0xff]  ;;  %v13127_v32 = vpack.c.bf16 %v13125_v14, %v13126_v35 }
 0xd9d   : > { %13094 = vst [vmem:[#allocation9_spill] sm:$0xff] %v11542_v12  ;;  %v13117_v34 = vld [vmem:[#allocation65_spill] sm:$0xff]  ;;  %v11606_v11 = vsel %vm1975_vm8, %v13123_v44, 0  ;;  %v13134_v44 = vld [vmem:[#allocation122_spill] sm:$0xff] }
 0xd9e   : > { %v13118_v62 = vld [vmem:[#allocation113_spill] sm:$0xff]  ;;  %v11616_v58 = vsel %vm1975_vm8, %v13127_v32, 0 }
 0xd9f   : > { %v13135_v14 = vld [vmem:[#allocation121_spill] sm:$0xff] }
 0xda0   : > { %v13136_v35 = vpack.c.bf16 %v13134_v44, %v13135_v14  ;;  %v13142_v44 = vld [vmem:[#allocation130_spill] sm:$0xff]  ;;  %v13143_v14 = vld [vmem:[#allocation129_spill] sm:$0xff] }
 0xda1   : > { %7511 = vmatpush3.bf16.xpose.msra.mxu1 %v11521_v0 }
 0xda2   : > { %8553 = vmatprep.subr.msk.bf16.mxu1 %vm1975_vm8, %v11422_v57  ;;  %v11637_v32 = vsel %vm1975_vm8, %v13136_v35, 0  ;;  %v13144_v35 = vpack.c.bf16 %v13142_v44, %v13143_v14  ;;  %v13151_v44 = vld [vmem:[#allocation48_spill] sm:$0xff]  ;;  %v8823_v14 = vld [vmem:[%s12322_s5 + $0x10] sm:$0xff]  }
 0xda3   : > { %13137 = vst [vmem:[#allocation15_spill] sm:$0xff] %v11637_v32 }
 0xda9   : > { %7513 = vmatpush3.bf16.xpose.msra.mxu1 %v11535_v54 }
 0xdaa   : > { %8554 = vmatprep.subr.msk.bf16.mxu1 %vm373_vm4, %v13093_v26  ;;  %v13128_v26 = vld [vmem:[#allocation148_spill] sm:$0xff] }
 0xdb0   : > { %7515 = vmatmul.mubr.msk.bf16.vlgmr.msra.gmra.mrb[32].mxu1 %vm1975_vm8, %v11031_v60  ;;  %v13097_v60 = vld [vmem:[#allocation23_spill] sm:$0xff] }
 0xdb1   : > { %7517 = vmatpush3.bf16.xpose.msra.mxu1 %v12771_v42  ;;  %7532 = vmatprep.mubr.msk.bf16.mxu1 %vm373_vm4, %v10908_v37  ;;  %v13099_v37 = vld [vmem:[#allocation27_spill] sm:$0xff] }
 0xdb2   : > { %8555 = vmatprep.subr.msk.bf16.mxu1 %vm373_vm4, %v13095_v43 }
 0xdb9   : > { %7519 = vmatpush3.bf16.xpose.msra.mxu1 %v13096_v7 }
 0xdba   : > { %8556 = vmatprep.subr.msk.bf16.mxu1 %vm373_vm4, %v9338_v13 }
 0xdc1   : > { %7521 = vmatpush3.bf16.xpose.msra.mxu1 %v12771_v42 }
 0xdc2   : > { %8557 = vmatprep.subr.msk.bf16.mxu1 %vm373_vm4, %v12772_v19 }
 0xdc9   : > { %7523 = vmatpush3.bf16.xpose.msra.mxu1 %v12773_v31 }
 0xdca   : > { %8558 = vmatprep.subr.msk.bf16.mxu1 %vm373_vm4, %v13097_v60 }
 0xdd1   : > { %7525 = vmatpush3.bf16.xpose.msra.mxu1 %v13098_v50 }
 0xdd2   : > { %8559 = vmatprep.subr.msk.bf16.mxu1 %vm373_vm4, %v13099_v37 }
 0xdd9   : > { %7527 = vmatpush3.bf16.xpose.msra.mxu1 %v13100_v3 }
 0xdda   : > { %8560 = vmatprep.subr.msk.bf16.mxu1 %vm373_vm4, %v13101_v6 }
 0xde1   : > { %7529 = vmatpush3.bf16.xpose.msra.mxu1 %v13102_v27 }
 0xde2   : > { %8561 = vmatprep.subr.msk.bf16.mxu1 %vm373_vm4, %v13103_v5 }
 0xde9   : > { %7531 = vmatpush3.bf16.xpose.msra.mxu1 %v13104_v1 }
 0xdea   : > { %8562 = vmatprep.subr.msk.bf16.mxu1 %vm1975_vm8, %v13105_v20  ;;  %v13129_v20 = vld [vmem:[#allocation149_spill] sm:$0xff] }
 0xdf0   : > { %7533 = vmatmul.mubr.msk.bf16.vlgmr.msra.gmra.mrb[32].mxu1 %vm373_vm4, %v8822_v28  ;;  %v13131_v28 = vld [vmem:[#allocation6_spill] sm:$0xff] }
 0xdf1   : > { %7535 = vmatpush3.bf16.xpose.msra.mxu1 %v13106_v30  ;;  %7550 = vmatprep.mubr.msk.bf16.mxu1 %vm1975_vm8, %v4851_v61 }
 0xdf2   : > { %8563 = vmatprep.subr.msk.bf16.mxu1 %vm1975_vm8, %v13107_v17 }
 0xdf9   : > { %7537 = vmatpush3.bf16.xpose.msra.mxu1 %v13108_v15 }
 0xdfa   : > { %8564 = vmatprep.subr.msk.bf16.mxu1 %vm1975_vm8, %v13109_v47 }
 0xe01   : > { %7539 = vmatpush3.bf16.xpose.msra.mxu1 %v13106_v30 }
 0xe02   : > { %8565 = vmatprep.subr.msk.bf16.mxu1 %vm1975_vm8, %v13110_v2 }
 0xe09   : > { %7541 = vmatpush3.bf16.xpose.msra.mxu1 %v13111_v9 }
 0xe0a   : > { %8566 = vmatprep.subr.msk.bf16.mxu1 %vm1975_vm8, %v13112_v4 }
 0xe11   : > { %7543 = vmatpush3.bf16.xpose.msra.mxu1 %v13113_v16 }
 0xe12   : > { %8567 = vmatprep.subr.msk.bf16.mxu1 %vm1975_vm8, %v13114_v29 }
 0xe19   : > { %7545 = vmatpush3.bf16.xpose.msra.mxu1 %v13115_v46 }
 0xe1a   : > { %8568 = vmatprep.subr.msk.bf16.mxu1 %vm1975_vm8, %v13116_v39 }
 0xe21   : > { %7547 = vmatpush3.bf16.xpose.msra.mxu1 %v13117_v34 }
 0xe22   : > { %8569 = vmatprep.subr.msk.bf16.mxu1 %vm1975_vm8, %v13118_v62 }
 0xe29   : > { %7549 = vmatpush3.bf16.xpose.msra.mxu1 %v13119_v33 }
 0xe2a   : > { %8570 = vmatprep.subr.msk.bf16.mxu1 %vm1975_vm8, %v13120_v10  ;;  %v11655_v10 = vsel %vm1975_vm8, %v13144_v35, 0  ;;  %v13152_v35 = vld [vmem:[#allocation14_spill] sm:$0xff] }
 0xe2b   : > { %13145 = vst [vmem:[#allocation25_spill] sm:$0xff] %v11655_v10 }
 0xe30   : > { %7551 = vmatmul.mubr.msk.bf16.vlgmr.msra.gmra.mrb[32].mxu1 %vm1975_vm8, %v4851_v61  ;;  %v13130_v61 = vld [vmem:[#allocation8_spill] sm:$0xff] }
 0xe31   : > { %7553 = vmatpush3.bf16.xpose.msra.mxu1 %v11606_v11  ;;  %7568 = vmatprep.mubr.msk.bf16.mxu1 %vm1975_vm8, %v5053_v59  ;;  %v13132_v51 = vpack.c.bf16 %v13130_v61, %v13131_v28  ;;  %v13138_v61 = vld [vmem:[#allocation126_spill] sm:$0xff]  ;;  %v13139_v28 = vld [vmem:[#allocation125_spill] sm:$0xff] }
 0xe32   : > { %8571 = vmatprep.subr.msk.bf16.mxu1 %vm1975_vm8, %v13124_v36 }
 0xe33   : > { %v11628_v22 = vsel %vm1975_vm8, %v13132_v51, 0  ;;  %v13140_v51 = vpack.c.bf16 %v13138_v61, %v13139_v28  ;;  %v13146_v61 = vld [vmem:[#allocation134_spill] sm:$0xff]  ;;  %v13147_v28 = vld [vmem:[#allocation133_spill] sm:$0xff] }
 0xe34   : > { %13133 = vst [vmem:[#allocation13_spill] sm:$0xff] %v11628_v22 }
 0xe35   : > { %v11646_v12 = vsel %vm1975_vm8, %v13140_v51, 0  ;;  %v13148_v51 = vpack.c.bf16 %v13146_v61, %v13147_v28  ;;  %v13153_v61 = vld [vmem:[#allocation49_spill] sm:$0xff] }
 0xe36   : > { %13141 = vst [vmem:[#allocation23_spill] sm:$0xff] %v11646_v12  ;;  %v13154_v28 = vld [vmem:[#allocation17_spill] sm:$0xff] }
 0xe37   : > { %v11664_v21 = vsel %vm1975_vm8, %v13148_v51, 0  ;;  %v13157_v51 = vld [vmem:[#allocation24_spill] sm:$0xff] }
 0xe38   : > { %13149 = vst [vmem:[#allocation27_spill] sm:$0xff] %v11664_v21 }
 0xe39   : > { %7555 = vmatpush3.bf16.xpose.msra.mxu1 %v11616_v58 }
 0xe3a   : > { %8572 = vmatprep.subr.msk.bf16.mxu1 %vm1975_vm8, %v13128_v26 }
 0xe41   : > { %7557 = vmatpush3.bf16.xpose.msra.mxu1 %v11606_v11 }
 0xe42   : > { %8573 = vmatprep.subr.msk.bf16.mxu1 %vm1975_vm8, %v13129_v20 }
 0xe49   : > { %7559 = vmatpush3.bf16.xpose.msra.mxu1 %v11628_v22 }
 0xe4a   : > { %8574 = vmatprep.subr.msk.bf16.mxu1 %vm1975_vm8, %v11431_v55 }
 0xe51   : > { %7561 = vmatpush3.bf16.xpose.msra.mxu1 %v11637_v32 }
 0xe52   : > { %8575 = vmatprep.subr.msk.bf16.mxu1 %vm1975_vm8, %v11438_v49 }
 0xe59   : > { %7563 = vmatpush3.bf16.xpose.msra.mxu1 %v11646_v12 }
 0xe5a   : > { %8576 = vmatprep.subr.msk.bf16.mxu1 %vm1975_vm8, %v11440_v25  ;;  %v13150_v25 = vld [vmem:[#allocation10_spill] sm:$0xff] }
 0xe61   : > { %7565 = vmatpush3.bf16.xpose.msra.mxu1 %v11655_v10 }
 0xe62   : > { %8577 = vmatprep.subr.msk.bf16.mxu1 %vm1975_vm8, %v11449_v63  ;;  %v13159_v63 = vld [vmem:[#allocation28_spill] sm:$0xff] }
 0xe69   : > { %7567 = vmatpush3.bf16.xpose.msra.mxu1 %v11664_v21  ;;  %v13158_v21 = vld [vmem:[#allocation51_spill] sm:$0xff] }
 0xe6a   : > { %8578 = vmatprep.subr.msk.bf16.mxu1 %vm373_vm4, %v13150_v25  ;;  %v13155_v25 = vld [vmem:[#allocation20_spill] sm:$0xff] }
 0xe70   : > { %7569 = vmatmul.mubr.msk.bf16.vlgmr.msra.gmra.mrb[32].mxu1 %vm1975_vm8, %v5053_v59  ;;  %v13156_v59 = vld [vmem:[#allocation50_spill] sm:$0xff] }
 0xe71   : > { %7571 = vmatpush3.bf16.xpose.msra.mxu1 %v13151_v44  ;;  %7586 = vmatprep.mubr.msk.bf16.mxu1 %vm373_vm4, %v8823_v14 }
 0xe72   : > { %8579 = vmatprep.subr.msk.bf16.mxu1 %vm373_vm4, %v13152_v35  ;;  %v13160_v35 = vld [vmem:[#allocation52_spill] sm:$0xff] }
 0xe79   : > { %7573 = vmatpush3.bf16.xpose.msra.mxu1 %v13153_v61  ;;  %v13161_v61 = vld [vmem:[#allocation32_spill] sm:$0xff] }
 0xe7a   : > { %8580 = vmatprep.subr.msk.bf16.mxu1 %vm373_vm4, %v13154_v28  ;;  %v13162_v28 = vld [vmem:[#allocation53_spill] sm:$0xff] }
 0xe81   : > { %7575 = vmatpush3.bf16.xpose.msra.mxu1 %v13151_v44  ;;  %v13163_v44 = vld [vmem:[#allocation36_spill] sm:$0xff] }
 0xe82   : > { %8581 = vmatprep.subr.msk.bf16.mxu1 %vm373_vm4, %v13155_v25  ;;  %v13164_v25 = vld [vmem:[#allocation7_spill] sm:$0xff] }
 0xe89   : > { %7577 = vmatpush3.bf16.xpose.msra.mxu1 %v13156_v59  ;;  %v13165_v59 = vld [vmem:[#allocation88_spill] sm:$0xff] }
 0xe8a   : > { %8582 = vmatprep.subr.msk.bf16.mxu1 %vm373_vm4, %v13157_v51  ;;  %v5208_v51 = vpop.permute.xlu0 %5207 }
 0xe91   : > { %7579 = vmatpush3.bf16.xpose.msra.mxu1 %v13158_v21  ;;  %v13166_v21 = vld [vmem:[#allocation69_spill] sm:$0xff] }
 0xe92   : > { %8583 = vmatprep.subr.msk.bf16.mxu1 %vm373_vm4, %v13159_v63  ;;  %v13174_v63 = vld [vmem:[#allocation107_spill] sm:$0xff] }
 0xe99   : > { %7581 = vmatpush3.bf16.xpose.msra.mxu1 %v13160_v35  ;;  %v13167_v35 = vld [vmem:[#allocation92_spill] sm:$0xff] }
 0xe9a   : > { %8584 = vmatprep.subr.msk.bf16.mxu1 %vm373_vm4, %v13161_v61  ;;  %v13168_v61 = vld [vmem:[#allocation74_spill] sm:$0xff] }
 0xea1   : > { %7583 = vmatpush3.bf16.xpose.msra.mxu1 %v13162_v28  ;;  %v13169_v28 = vld [vmem:[#allocation95_spill] sm:$0xff] }
 0xea2   : > { %8585 = vmatprep.subr.msk.bf16.mxu1 %vm373_vm4, %v13163_v44  ;;  %v13173_v44 = vld [vmem:[#allocation78_spill] sm:$0xff] }
 0xea9   : > { %7585 = vmatpush3.bf16.xpose.msra.mxu1 %v13164_v25  ;;  %v13170_v25 = vld [vmem:[#allocation99_spill] sm:$0xff] }
 0xeaa   : > { %8586 = vmatprep.subr.msk.bf16.mxu1 %vm1975_vm8, %v13165_v59  ;;  %v13171_v59 = vld [vmem:[#allocation73_spill] sm:$0xff] }
 0xeb0   : > { %7587 = vmatmul.mubr.msk.bf16.vlgmr.msra.gmra.mrb[32].mxu1 %vm373_vm4, %v8823_v14  ;;  %v13172_v14 = vld [vmem:[#allocation103_spill] sm:$0xff] }
 0xeb1   : > { %7589 = vmatpush3.bf16.xpose.msra.mxu1 %v13166_v21  ;;  %7604 = vmatprep.mubr.msk.bf16.mxu1 %vm1975_vm8, %v5208_v51 }
 0xeb2   : > { %8587 = vmatprep.subr.msk.bf16.mxu1 %vm1975_vm8, %v13167_v35  ;;  %v13175_v35 = vld [vmem:[#allocation77_spill] sm:$0xff] }
 0xeb9   : > { %7591 = vmatpush3.bf16.xpose.msra.mxu1 %v13168_v61  ;;  %v13176_v61 = vld [vmem:[#allocation111_spill] sm:$0xff] }
 0xeba   : > { %8588 = vmatprep.subr.msk.bf16.mxu1 %vm1975_vm8, %v13169_v28  ;;  %v13177_v28 = vld [vmem:[#allocation82_spill] sm:$0xff] }
 0xec1   : > { %7593 = vmatpush3.bf16.xpose.msra.mxu1 %v13166_v21  ;;  %v13178_v21 = vld [vmem:[#allocation115_spill] sm:$0xff] }
 0xec2   : > { %8589 = vmatprep.subr.msk.bf16.mxu1 %vm1975_vm8, %v13170_v25  ;;  %v13179_v25 = vld [vmem:[#allocation81_spill] sm:$0xff] }
 0xec9   : > { %7595 = vmatpush3.bf16.xpose.msra.mxu1 %v13171_v59  ;;  %v13180_v59 = vld [vmem:[#allocation141_spill] sm:$0xff] }
 0xeca   : > { %8590 = vmatprep.subr.msk.bf16.mxu1 %vm1975_vm8, %v13172_v14  ;;  %v5380_v14 = vpop.permute.xlu1 %5379 }
 0xed1   : > { %7597 = vmatpush3.bf16.xpose.msra.mxu1 %v13173_v44  ;;  %v13181_v44 = vld [vmem:[#allocation5_spill] sm:$0xff] }
 0xed2   : > { %8591 = vmatprep.subr.msk.bf16.mxu1 %vm1975_vm8, %v13174_v63  ;;  %v13182_v63 = vld [vmem:[#allocation85_spill] sm:$0xff] }
 0xed3   : > { %v13183_v10 = vpack.c.bf16 %v13181_v44, %v13182_v63  ;;  %v13187_v63 = vld [vmem:[#allocation120_spill] sm:$0xff] }
 0xed9   : > { %7599 = vmatpush3.bf16.xpose.msra.mxu1 %v13175_v35  ;;  %v11729_v35 = vsel %vm1975_vm8, %v13183_v10, 0  ;;  %v13188_v10 = vld [vmem:[#allocation119_spill] sm:$0xff] }
 0xeda   : > { %8592 = vmatprep.subr.msk.bf16.mxu1 %vm1975_vm8, %v13176_v61  ;;  %v13189_v44 = vpack.c.bf16 %v13187_v63, %v13188_v10  ;;  %v13195_v63 = vld [vmem:[#allocation128_spill] sm:$0xff]  ;;  %v13196_v10 = vld [vmem:[#allocation127_spill] sm:$0xff] }
 0xee1   : > { %7601 = vmatpush3.bf16.xpose.msra.mxu1 %v13177_v28 }
 0xee2   : > { %8593 = vmatprep.subr.msk.bf16.mxu1 %vm1975_vm8, %v13178_v21  ;;  %v13185_v21 = vld [vmem:[#allocation80_spill] sm:$0xff] }
 0xee9   : > { %7603 = vmatpush3.bf16.xpose.msra.mxu1 %v13179_v25  ;;  %v13184_v25 = vld [vmem:[#allocation79_spill] sm:$0xff] }
 0xeea   : > { %8594 = vmatprep.subr.msk.bf16.mxu1 %vm1975_vm8, %v13180_v59  ;;  %v13186_v28 = vpack.c.bf16 %v13184_v25, %v13185_v21  ;;  %v13191_v21 = vld [vmem:[#allocation124_spill] sm:$0xff] }
 0xeec   : > { %v11739_v59 = vsel %vm1975_vm8, %v13186_v28, 0  ;;  %v13192_v28 = vld [vmem:[#allocation123_spill] sm:$0xff] }
 0xeed   : > { %v13193_v25 = vpack.c.bf16 %v13191_v21, %v13192_v28  ;;  %v13199_v21 = vld [vmem:[#allocation132_spill] sm:$0xff]  ;;  %v13200_v28 = vld [vmem:[#allocation131_spill] sm:$0xff] }
 0xef0   : > { %7605 = vmatmul.mubr.msk.bf16.vlgmr.msra.gmra.mrb[32].mxu1 %vm1975_vm8, %v5208_v51  ;;  %v11751_v51 = vsel %vm1975_vm8, %v13189_v44, 0  ;;  %v13197_v44 = vpack.c.bf16 %v13195_v63, %v13196_v10  ;;  %v13203_v63 = vld [vmem:[#allocation136_spill] sm:$0xff]  ;;  %v13204_v10 = vld [vmem:[#allocation135_spill] sm:$0xff] }
 0xef1   : > { %7607 = vmatpush3.bf16.xpose.msra.mxu1 %v11729_v35  ;;  %7622 = vmatprep.mubr.msk.bf16.mxu1 %vm1975_vm8, %v5380_v14  ;;  %13190 = vst [vmem:[#allocation29_spill] sm:$0xff] %v11751_v51 }
 0xef2   : > { %8595 = vmatprep.subr.msk.bf16.mxu1 %vm1975_vm8, %v11468_v45 }
 0xef9   : > { %7609 = vmatpush3.bf16.xpose.msra.mxu1 %v11739_v59 }
 0xefa   : > { %8596 = vmatprep.subr.msk.bf16.mxu1 %vm1975_vm8, %v11470_v53  ;;  %v11760_v53 = vsel %vm1975_vm8, %v13193_v25, 0  ;;  %v13201_v25 = vpack.c.bf16 %v13199_v21, %v13200_v28  ;;  %v13208_v21 = vld [vmem:[#allocation39_spill] sm:$0xff]  ;;  %v8824_v28 = vld [vmem:[%s12322_s5 + $0x18] sm:$0xff]  }
 0xefb   : > { %13194 = vst [vmem:[#allocation31_spill] sm:$0xff] %v11760_v53 }
 0xf01   : > { %7611 = vmatpush3.bf16.xpose.msra.mxu1 %v11729_v35 }
 0xf02   : > { %8597 = vmatprep.subr.msk.bf16.mxu1 %vm1975_vm8, %v11482_v56  ;;  %v11769_v56 = vsel %vm1975_vm8, %v13197_v44, 0  ;;  %v13205_v44 = vpack.c.bf16 %v13203_v63, %v13204_v10  ;;  %v13210_v63 = vld [vmem:[#allocation38_spill] sm:$0xff] }
 0xf03   : > { %13198 = vst [vmem:[#allocation33_spill] sm:$0xff] %v11769_v56  ;;  %v13211_v10 = vld [vmem:[#allocation18_spill] sm:$0xff] }
 0xf09   : > { %7613 = vmatpush3.bf16.xpose.msra.mxu1 %v11751_v51 }
 0xf0a   : > { %8598 = vmatprep.subr.msk.bf16.mxu1 %vm1975_vm8, %v11491_v48  ;;  %v11778_v48 = vsel %vm1975_vm8, %v13201_v25, 0  ;;  %v13209_v25 = vld [vmem:[#allocation16_spill] sm:$0xff] }
 0xf0b   : > { %13202 = vst [vmem:[#allocation35_spill] sm:$0xff] %v11778_v48 }
 0xf11   : > { %7615 = vmatpush3.bf16.xpose.msra.mxu1 %v11760_v53 }
 0xf12   : > { %8599 = vmatprep.subr.msk.bf16.mxu1 %vm1975_vm8, %v11496_v52  ;;  %v11787_v52 = vsel %vm1975_vm8, %v13205_v44, 0  ;;  %v13212_v44 = vld [vmem:[#allocation40_spill] sm:$0xff] }
 0xf13   : > { %13206 = vst [vmem:[#allocation37_spill] sm:$0xff] %v11787_v52 }
 0xf19   : > { %7617 = vmatpush3.bf16.xpose.msra.mxu1 %v11769_v56 }
 0xf1a   : > { %8600 = vmatprep.subr.msk.bf16.mxu1 %vm1975_vm8, %v11498_v41  ;;  %v13207_v41 = vld [vmem:[#allocation12_spill] sm:$0xff] }
 0xf21   : > { %7619 = vmatpush3.bf16.xpose.msra.mxu1 %v11778_v48 }
 0xf22   : > { %8601 = vmatprep.subr.msk.bf16.mxu1 %vm1975_vm8, %v11502_v18  ;;  %v13217_v18 = vld [vmem:[#allocation30_spill] sm:$0xff] }
 0xf29   : > { %7621 = vmatpush3.bf16.xpose.msra.mxu1 %v11787_v52  ;;  %v13216_v52 = vld [vmem:[#allocation42_spill] sm:$0xff] }
 0xf2a   : > { %8602 = vmatprep.subr.msk.bf16.mxu1 %vm373_vm4, %v13207_v41  ;;  %v13213_v41 = vld [vmem:[#allocation22_spill] sm:$0xff] }
 0xf30   : > { %7623 = vmatmul.mubr.msk.bf16.vlgmr.msra.gmra.mrb[32].mxu1 %vm1975_vm8, %v5380_v14  ;;  %v13214_v14 = vld [vmem:[#allocation41_spill] sm:$0xff] }
 0xf31   : > { %7625 = vmatpush3.bf16.xpose.msra.mxu1 %v13208_v21  ;;  %7640 = vmatprep.mubr.msk.bf16.mxu1 %vm373_vm4, %v8824_v28  ;;  %v13215_v21 = vld [vmem:[#allocation26_spill] sm:$0xff] }
 0xf32   : > { %8603 = vmatprep.subr.msk.bf16.mxu1 %vm373_vm4, %v13209_v25  ;;  %v13218_v25 = vld [vmem:[#allocation43_spill] sm:$0xff] }
 0xf39   : > { %7627 = vmatpush3.bf16.xpose.msra.mxu1 %v13210_v63  ;;  %v13219_v63 = vld [vmem:[#allocation34_spill] sm:$0xff] }
 0xf3a   : > { %8604 = vmatprep.subr.msk.bf16.mxu1 %vm373_vm4, %v13211_v10  ;;  %v13220_v10 = vld [vmem:[#allocation45_spill] sm:$0xff] }
 0xf41   : > { %7629 = vmatpush3.bf16.xpose.msra.mxu1 %v13212_v44  ;;  %v13221_v44 = vld [vmem:[#allocation44_spill] sm:$0xff] }
 0xf42   : > { %8605 = vmatprep.subr.msk.bf16.mxu1 %vm373_vm4, %v13213_v41  ;;  %v13222_v41 = vld [vmem:[#allocation54_spill] sm:$0xff] }
 0xf49   : > { %7631 = vmatpush3.bf16.xpose.msra.mxu1 %v13214_v14  ;;  %v13223_v14 = vld [vmem:[#allocation89_spill] sm:$0xff] }
 0xf4a   : > { %8606 = vmatprep.subr.msk.bf16.mxu1 %vm373_vm4, %v13215_v21  ;;  %v5535_v21 = vpop.permute.xlu0 %5534 }
 0xf51   : > { %7633 = vmatpush3.bf16.xpose.msra.mxu1 %v13216_v52  ;;  %v13224_v52 = vld [vmem:[#allocation90_spill] sm:$0xff] }
 0xf52   : > { %8607 = vmatprep.subr.msk.bf16.mxu1 %vm373_vm4, %v13217_v18  ;;  %v13233_v18 = vld [vmem:[#allocation108_spill] sm:$0xff] }
 0xf59   : > { %7635 = vmatpush3.bf16.xpose.msra.mxu1 %v13218_v25  ;;  %v13225_v25 = vld [vmem:[#allocation93_spill] sm:$0xff] }
 0xf5a   : > { %8608 = vmatprep.subr.msk.bf16.mxu1 %vm373_vm4, %v13219_v63  ;;  %v13226_v63 = vld [vmem:[#allocation86_spill] sm:$0xff] }
 0xf61   : > { %7637 = vmatpush3.bf16.xpose.msra.mxu1 %v13220_v10  ;;  %v13227_v10 = vld [vmem:[#allocation96_spill] sm:$0xff] }
 0xf62   : > { %8609 = vmatprep.subr.msk.bf16.mxu1 %vm373_vm4, %v13221_v44  ;;  %v13228_v44 = vld [vmem:[#allocation98_spill] sm:$0xff] }
 0xf69   : > { %7639 = vmatpush3.bf16.xpose.msra.mxu1 %v13222_v41  ;;  %v13229_v41 = vld [vmem:[#allocation100_spill] sm:$0xff] }
 0xf6a   : > { %8610 = vmatprep.subr.msk.bf16.mxu1 %vm1975_vm8, %v13223_v14  ;;  %v13230_v14 = vld [vmem:[#allocation102_spill] sm:$0xff] }
 0xf70   : > { %7641 = vmatmul.mubr.msk.bf16.vlgmr.msra.gmra.mrb[32].mxu1 %vm373_vm4, %v8824_v28  ;;  %v13231_v28 = vld [vmem:[#allocation104_spill] sm:$0xff] }
 0xf71   : > { %7643 = vmatpush3.bf16.xpose.msra.mxu1 %v13224_v52  ;;  %7658 = vmatprep.mubr.msk.bf16.mxu1 %vm1975_vm8, %v5535_v21  ;;  %v13232_v52 = vld [vmem:[#allocation106_spill] sm:$0xff] }
 0xf72   : > { %8611 = vmatprep.subr.msk.bf16.mxu1 %vm1975_vm8, %v13225_v25  ;;  %v13234_v25 = vld [vmem:[#allocation110_spill] sm:$0xff] }
 0xf79   : > { %7645 = vmatpush3.bf16.xpose.msra.mxu1 %v13226_v63  ;;  %v13235_v63 = vld [vmem:[#allocation112_spill] sm:$0xff] }
 0xf7a   : > { %8612 = vmatprep.subr.msk.bf16.mxu1 %vm1975_vm8, %v13227_v10  ;;  %v13236_v10 = vld [vmem:[#allocation114_spill] sm:$0xff] }
 0xf81   : > { %7647 = vmatpush3.bf16.xpose.msra.mxu1 %v13228_v44  ;;  %v13237_v44 = vld [vmem:[#allocation116_spill] sm:$0xff] }
 0xf82   : > { %8613 = vmatprep.subr.msk.bf16.mxu1 %vm1975_vm8, %v13229_v41  ;;  %v13238_v41 = vld [vmem:[#allocation64_spill] sm:$0xff] }
 0xf89   : > { %7649 = vmatpush3.bf16.xpose.msra.mxu1 %v13230_v14  ;;  %v13239_v14 = vld [vmem:[#allocation140_spill] sm:$0xff] }
 0xf8a   : > { %8614 = vmatprep.subr.msk.bf16.mxu1 %vm1975_vm8, %v13231_v28  ;;  %v5588_v28 = vpop.permute.xlu1 %5587 }
 0xf91   : > { %7651 = vmatpush3.bf16.xpose.msra.mxu1 %v13232_v52  ;;  %v13240_v52 = vld [vmem:[#allocation143_spill] sm:$0xff] }
 0xf92   : > { %8615 = vmatprep.subr.msk.bf16.mxu1 %vm1975_vm8, %v13233_v18 }
 0xf99   : > { %7653 = vmatpush3.bf16.xpose.msra.mxu1 %v13234_v25  ;;  %v13241_v25 = vld [vmem:[#allocation145_spill] sm:$0xff] }
 0xf9a   : > { %8616 = vmatprep.subr.msk.bf16.mxu1 %vm1975_vm8, %v13235_v63  ;;  %v13242_v63 = vld [vmem:[#allocation138_spill] sm:$0xff] }
 0xfa1   : > { %7655 = vmatpush3.bf16.xpose.msra.mxu1 %v13236_v10  ;;  %v13243_v10 = vld [vmem:[#allocation146_spill] sm:$0xff] }
 0xfa2   : > { %8617 = vmatprep.subr.msk.bf16.mxu1 %vm1975_vm8, %v13237_v44  ;;  %v13244_v44 = vld [vmem:[#allocation144_spill] sm:$0xff] }
 0xfa9   : > { %7657 = vmatpush3.bf16.xpose.msra.mxu1 %v13238_v41  ;;  %v13245_v41 = vld [vmem:[#allocation147_spill] sm:$0xff] }
 0xfaa   : > { %8618 = vmatprep.subr.msk.bf16.mxu1 %vm1975_vm8, %v13239_v14  ;;  %v8825_v14 = vld [vmem:[%s12322_s5 + $0x20] sm:$0xff]  }
 0xfb0   : > { %7659 = vmatmul.mubr.msk.bf16.vlgmr.msra.gmra.mrb[32].mxu1 %vm1975_vm8, %v5535_v21  ;;  %v13246_v21 = vld [vmem:[#allocation137_spill] sm:$0xff] }
 0xfb1   : > { %7661 = vmatpush3.bf16.xpose.msra.mxu1 %v13240_v52  ;;  %7676 = vmatprep.mubr.msk.bf16.mxu1 %vm1975_vm8, %v5588_v28  ;;  %v11872_v52 = vsel %vm1975_vm8, %v13246_v21, 0  ;;  %v13252_v21 = vld [vmem:[#allocation25_spill] sm:$0xff] }
 0xfb2   : > { %8619 = vmatprep.subr.msk.bf16.mxu1 %vm1975_vm8, %v13241_v25 }
 0xfb9   : > { %7663 = vmatpush3.bf16.xpose.msra.mxu1 %v13242_v63 }
 0xfba   : > { %8620 = vmatprep.subr.msk.bf16.mxu1 %vm1975_vm8, %v13243_v10 }
 0xfc1   : > { %7665 = vmatpush3.bf16.xpose.msra.mxu1 %v13244_v44 }
 0xfc2   : > { %8621 = vmatprep.subr.msk.bf16.mxu1 %vm1975_vm8, %v13245_v41 }
 0xfc9   : > { %7667 = vmatpush3.bf16.xpose.msra.mxu1 %v11311_v8 }
 0xfca   : > { %8622 = vmatprep.subr.msk.bf16.mxu1 %vm1975_vm8, %v11385_v38 }
 0xfd1   : > { %7669 = vmatpush3.bf16.xpose.msra.mxu1 %v11508_v23 }
 0xfd2   : > { %8623 = vmatprep.subr.msk.bf16.mxu1 %vm1975_vm8, %v11409_v40 }
 0xfd9   : > { %7671 = vmatpush3.bf16.xpose.msra.mxu1 %v11521_v0 }
 0xfda   : > { %8624 = vmatprep.subr.msk.bf16.mxu1 %vm1975_vm8, %v11422_v57 }
 0xfe1   : > { %7673 = vmatpush3.bf16.xpose.msra.mxu1 %v11535_v54 }
 0xfe2   : > { %8625 = vmatprep.subr.msk.bf16.mxu1 %vm1975_vm8, %v11515_v24 }
 0xfe9   : > { %7675 = vmatpush3.bf16.xpose.msra.mxu1 %v11872_v52 }
 0xfea   : > { %8626 = vmatprep.subr.msk.bf16.mxu1 %vm373_vm4, %v13095_v43  ;;  %v13247_v43 = vld [vmem:[#allocation46_spill] sm:$0xff] }
 0xff0   : > { %7677 = vmatmul.mubr.msk.bf16.vlgmr.msra.gmra.mrb[32].mxu1 %vm1975_vm8, %v5588_v28  ;;  %v5701_v28 = vpop.permute.xlu0 %5700 }
 0xff1   : > { %7679 = vmatpush3.bf16.xpose.msra.mxu1 %v13096_v7  ;;  %7694 = vmatprep.mubr.msk.bf16.mxu1 %vm373_vm4, %v8825_v14  ;;  %v13248_v7 = vld [vmem:[#allocation11_spill] sm:$0xff] }
 0xff2   : > { %8627 = vmatprep.subr.msk.bf16.mxu1 %vm373_vm4, %v9338_v13 }
 0xff9   : > { %7681 = vmatpush3.bf16.xpose.msra.mxu1 %v12771_v42 }
 0xffa   : > { %8628 = vmatprep.subr.msk.bf16.mxu1 %vm373_vm4, %v12772_v19 }
0x1001   : > { %7683 = vmatpush3.bf16.xpose.msra.mxu1 %v12773_v31 }
0x1002   : > { %8629 = vmatprep.subr.msk.bf16.mxu1 %vm373_vm4, %v13097_v60 }
0x1009   : > { %7685 = vmatpush3.bf16.xpose.msra.mxu1 %v13098_v50 }
0x100a   : > { %8630 = vmatprep.subr.msk.bf16.mxu1 %vm373_vm4, %v13099_v37 }
0x1011   : > { %7687 = vmatpush3.bf16.xpose.msra.mxu1 %v13100_v3 }
0x1012   : > { %8631 = vmatprep.subr.msk.bf16.mxu1 %vm373_vm4, %v13101_v6 }
0x1019   : > { %7689 = vmatpush3.bf16.xpose.msra.mxu1 %v13102_v27 }
0x101a   : > { %8632 = vmatprep.subr.msk.bf16.mxu1 %vm373_vm4, %v13103_v5 }
0x1021   : > { %7691 = vmatpush3.bf16.xpose.msra.mxu1 %v13104_v1 }
0x1022   : > { %8633 = vmatprep.subr.msk.bf16.mxu1 %vm373_vm4, %v13247_v43 }
0x1029   : > { %7693 = vmatpush3.bf16.xpose.msra.mxu1 %v13248_v7 }
0x102a   : > { %8634 = vmatprep.subr.msk.bf16.mxu1 %vm1975_vm8, %v13107_v17  ;;  %v13249_v17 = vld [vmem:[#allocation117_spill] sm:$0xff] }
0x1030   : > { %7695 = vmatmul.mubr.msk.bf16.vlgmr.msra.gmra.mrb[32].mxu1 %vm373_vm4, %v8825_v14  ;;  %v5763_v14 = vpop.permute.xlu1 %5762 }
0x1031   : > { %7697 = vmatpush3.bf16.xpose.msra.mxu1 %v13108_v15  ;;  %7712 = vmatprep.mubr.msk.bf16.mxu1 %vm1975_vm8, %v5701_v28  ;;  %v13250_v15 = vld [vmem:[#allocation63_spill] sm:$0xff] }
0x1032   : > { %8635 = vmatprep.subr.msk.bf16.mxu1 %vm1975_vm8, %v13109_v47 }
0x1039   : > { %7699 = vmatpush3.bf16.xpose.msra.mxu1 %v13106_v30 }
0x103a   : > { %8636 = vmatprep.subr.msk.bf16.mxu1 %vm1975_vm8, %v13110_v2 }
0x1041   : > { %7701 = vmatpush3.bf16.xpose.msra.mxu1 %v13111_v9 }
0x1042   : > { %8637 = vmatprep.subr.msk.bf16.mxu1 %vm1975_vm8, %v13112_v4 }
0x1049   : > { %7703 = vmatpush3.bf16.xpose.msra.mxu1 %v13113_v16 }
0x104a   : > { %8638 = vmatprep.subr.msk.bf16.mxu1 %vm1975_vm8, %v13114_v29 }
0x1051   : > { %7705 = vmatpush3.bf16.xpose.msra.mxu1 %v13115_v46 }
0x1052   : > { %8639 = vmatprep.subr.msk.bf16.mxu1 %vm1975_vm8, %v13116_v39 }
0x1059   : > { %7707 = vmatpush3.bf16.xpose.msra.mxu1 %v13117_v34 }
0x105a   : > { %8640 = vmatprep.subr.msk.bf16.mxu1 %vm1975_vm8, %v13118_v62 }
0x1061   : > { %7709 = vmatpush3.bf16.xpose.msra.mxu1 %v13119_v33 }
0x1062   : > { %8641 = vmatprep.subr.msk.bf16.mxu1 %vm1975_vm8, %v13249_v17 }
0x1069   : > { %7711 = vmatpush3.bf16.xpose.msra.mxu1 %v13250_v15 }
0x106a   : > { %8642 = vmatprep.subr.msk.bf16.mxu1 %vm1975_vm8, %v13124_v36  ;;  %v13254_v36 = vld [vmem:[#allocation27_spill] sm:$0xff] }
0x1070   : > { %7713 = vmatmul.mubr.msk.bf16.vlgmr.msra.gmra.mrb[32].mxu1 %vm1975_vm8, %v5701_v28  ;;  %v13253_v28 = vld [vmem:[#allocation153_spill] sm:$0xff] }
0x1071   : > { %7715 = vmatpush3.bf16.xpose.msra.mxu1 %v11616_v58  ;;  %7730 = vmatprep.mubr.msk.bf16.mxu1 %vm1975_vm8, %v5763_v14  ;;  %v13251_v58 = vld [vmem:[#allocation152_spill] sm:$0xff] }
0x1072   : > { %8643 = vmatprep.subr.msk.bf16.mxu1 %vm1975_vm8, %v13128_v26 }
0x1079   : > { %7717 = vmatpush3.bf16.xpose.msra.mxu1 %v11606_v11 }
0x107a   : > { %8644 = vmatprep.subr.msk.bf16.mxu1 %vm1975_vm8, %v13129_v20 }
0x1081   : > { %7719 = vmatpush3.bf16.xpose.msra.mxu1 %v11628_v22  ;;  %v13255_v22 = vld [vmem:[#allocation161_spill] sm:$0xff] }
0x1082   : > { %8645 = vmatprep.subr.msk.bf16.mxu1 %vm1975_vm8, %v11431_v55  ;;  %v13256_v55 = vld [vmem:[#allocation139_spill] sm:$0xff] }
0x1089   : > { %7721 = vmatpush3.bf16.xpose.msra.mxu1 %v11637_v32  ;;  %v11957_v32 = vsel %vm1975_vm8, %v13256_v55, 0  ;;  %v13261_v55 = vld [vmem:[#allocation48_spill] sm:$0xff] }
0x108a   : > { %8646 = vmatprep.subr.msk.bf16.mxu1 %vm1975_vm8, %v11438_v49  ;;  %13257 = vst [vmem:[#allocation87_spill] sm:$0xff] %v11957_v32  ;;  %v13268_v49 = vld [vmem:[#allocation32_spill] sm:$0xff] }
0x1091   : > { %7723 = vmatpush3.bf16.xpose.msra.mxu1 %v11646_v12  ;;  %v13258_v12 = vld [vmem:[#allocation14_spill] sm:$0xff] }
0x1092   : > { %8647 = vmatprep.subr.msk.bf16.mxu1 %vm1975_vm8, %v13251_v58  ;;  %v13267_v58 = vld [vmem:[#allocation52_spill] sm:$0xff] }
0x1099   : > { %7725 = vmatpush3.bf16.xpose.msra.mxu1 %v13252_v21  ;;  %v13259_v21 = vld [vmem:[#allocation49_spill] sm:$0xff] }
0x109a   : > { %8648 = vmatprep.subr.msk.bf16.mxu1 %vm1975_vm8, %v13253_v28  ;;  %v13262_v28 = vld [vmem:[#allocation20_spill] sm:$0xff] }
0x10a1   : > { %7727 = vmatpush3.bf16.xpose.msra.mxu1 %v13254_v36  ;;  %v8826_v36 = vld [vmem:[%s12322_s5 + $0x28] sm:$0xff]  }
0x10a2   : > { %8649 = vmatprep.subr.msk.bf16.mxu1 %vm1975_vm8, %v13255_v22  ;;  %v13260_v22 = vld [vmem:[#allocation17_spill] sm:$0xff] }
0x10a9   : > { %7729 = vmatpush3.bf16.xpose.msra.mxu1 %v11957_v32  ;;  %v13263_v32 = vld [vmem:[#allocation50_spill] sm:$0xff] }
0x10aa   : > { %8650 = vmatprep.subr.msk.bf16.mxu1 %vm373_vm4, %v13258_v12  ;;  %v13264_v12 = vld [vmem:[#allocation24_spill] sm:$0xff] }
0x10b0   : > { %7731 = vmatmul.mubr.msk.bf16.vlgmr.msra.gmra.mrb[32].mxu1 %vm1975_vm8, %v5763_v14  ;;  %v13265_v14 = vld [vmem:[#allocation51_spill] sm:$0xff] }
0x10b1   : > { %7733 = vmatpush3.bf16.xpose.msra.mxu1 %v13259_v21  ;;  %7748 = vmatprep.mubr.msk.bf16.mxu1 %vm373_vm4, %v8826_v36  ;;  %v13266_v21 = vld [vmem:[#allocation28_spill] sm:$0xff] }
0x10b2   : > { %8651 = vmatprep.subr.msk.bf16.mxu1 %vm373_vm4, %v13260_v22  ;;  %v13269_v22 = vld [vmem:[#allocation53_spill] sm:$0xff] }
0x10b9   : > { %7735 = vmatpush3.bf16.xpose.msra.mxu1 %v13261_v55  ;;  %v13270_v55 = vld [vmem:[#allocation36_spill] sm:$0xff] }
0x10ba   : > { %8652 = vmatprep.subr.msk.bf16.mxu1 %vm373_vm4, %v13262_v28  ;;  %v13271_v28 = vld [vmem:[#allocation7_spill] sm:$0xff] }
0x10c1   : > { %7737 = vmatpush3.bf16.xpose.msra.mxu1 %v13263_v32  ;;  %v13272_v32 = vld [vmem:[#allocation47_spill] sm:$0xff] }
0x10c2   : > { %8653 = vmatprep.subr.msk.bf16.mxu1 %vm373_vm4, %v13264_v12  ;;  %v13273_v12 = vld [vmem:[#allocation19_spill] sm:$0xff] }
0x10c9   : > { %7739 = vmatpush3.bf16.xpose.msra.mxu1 %v13265_v14  ;;  %v13274_v14 = vld [vmem:[#allocation92_spill] sm:$0xff] }
0x10ca   : > { %8654 = vmatprep.subr.msk.bf16.mxu1 %vm373_vm4, %v13266_v21  ;;  %v5876_v21 = vpop.permute.xlu0 %5875 }
0x10d1   : > { %7741 = vmatpush3.bf16.xpose.msra.mxu1 %v13267_v58  ;;  %v13275_v58 = vld [vmem:[#allocation74_spill] sm:$0xff] }
0x10d2   : > { %8655 = vmatprep.subr.msk.bf16.mxu1 %vm373_vm4, %v13268_v49 }
0x10d9   : > { %7743 = vmatpush3.bf16.xpose.msra.mxu1 %v13269_v22  ;;  %v13276_v22 = vld [vmem:[#allocation95_spill] sm:$0xff] }
0x10da   : > { %8656 = vmatprep.subr.msk.bf16.mxu1 %vm373_vm4, %v13270_v55  ;;  %v13277_v55 = vld [vmem:[#allocation69_spill] sm:$0xff] }
0x10e1   : > { %7745 = vmatpush3.bf16.xpose.msra.mxu1 %v13271_v28  ;;  %v13278_v28 = vld [vmem:[#allocation99_spill] sm:$0xff] }
0x10e2   : > { %8657 = vmatprep.subr.msk.bf16.mxu1 %vm373_vm4, %v13272_v32  ;;  %v13279_v32 = vld [vmem:[#allocation73_spill] sm:$0xff] }
0x10e9   : > { %7747 = vmatpush3.bf16.xpose.msra.mxu1 %v13273_v12  ;;  %v13280_v12 = vld [vmem:[#allocation103_spill] sm:$0xff] }
0x10ea   : > { %8658 = vmatprep.subr.msk.bf16.mxu1 %vm1975_vm8, %v13274_v14  ;;  %v13281_v14 = vld [vmem:[#allocation78_spill] sm:$0xff] }
0x10f0   : > { %7749 = vmatmul.mubr.msk.bf16.vlgmr.msra.gmra.mrb[32].mxu1 %vm373_vm4, %v8826_v36  ;;  %v13282_v36 = vld [vmem:[#allocation107_spill] sm:$0xff] }
0x10f1   : > { %7751 = vmatpush3.bf16.xpose.msra.mxu1 %v13275_v58  ;;  %7766 = vmatprep.mubr.msk.bf16.mxu1 %vm1975_vm8, %v5876_v21  ;;  %v13283_v58 = vld [vmem:[#allocation77_spill] sm:$0xff] }
0x10f2   : > { %8659 = vmatprep.subr.msk.bf16.mxu1 %vm1975_vm8, %v13276_v22  ;;  %v13284_v22 = vld [vmem:[#allocation82_spill] sm:$0xff] }
0x10f9   : > { %7753 = vmatpush3.bf16.xpose.msra.mxu1 %v13277_v55  ;;  %v13285_v55 = vld [vmem:[#allocation115_spill] sm:$0xff] }
0x10fa   : > { %8660 = vmatprep.subr.msk.bf16.mxu1 %vm1975_vm8, %v13278_v28  ;;  %v13286_v28 = vld [vmem:[#allocation81_spill] sm:$0xff] }
0x1101   : > { %7755 = vmatpush3.bf16.xpose.msra.mxu1 %v13279_v32  ;;  %v13287_v32 = vld [vmem:[#allocation118_spill] sm:$0xff] }
0x1102   : > { %8661 = vmatprep.subr.msk.bf16.mxu1 %vm1975_vm8, %v13280_v12  ;;  %v13288_v12 = vld [vmem:[#allocation60_spill] sm:$0xff] }
0x1109   : > { %7757 = vmatpush3.bf16.xpose.msra.mxu1 %v13281_v14 }
0x110a   : > { %8662 = vmatprep.subr.msk.bf16.mxu1 %vm1975_vm8, %v13282_v36  ;;  %v5936_v36 = vpop.permute.xlu1 %5935 }
0x1111   : > { %7759 = vmatpush3.bf16.xpose.msra.mxu1 %v13283_v58 }
0x1112   : > { %8663 = vmatprep.subr.msk.bf16.mxu1 %vm1975_vm8, %v13176_v61 }
0x1119   : > { %7761 = vmatpush3.bf16.xpose.msra.mxu1 %v13284_v22  ;;  %v13289_v22 = vld [vmem:[#allocation155_spill] sm:$0xff] }
0x111a   : > { %8664 = vmatprep.subr.msk.bf16.mxu1 %vm1975_vm8, %v13285_v55 }
0x1121   : > { %7763 = vmatpush3.bf16.xpose.msra.mxu1 %v13286_v28  ;;  %v13290_v28 = vld [vmem:[#allocation156_spill] sm:$0xff] }
0x1122   : > { %8665 = vmatprep.subr.msk.bf16.mxu1 %vm1975_vm8, %v13287_v32 }
0x1129   : > { %7765 = vmatpush3.bf16.xpose.msra.mxu1 %v13288_v12  ;;  %v13291_v12 = vld [vmem:[#allocation157_spill] sm:$0xff] }
0x112a   : > { %8666 = vmatprep.subr.msk.bf16.mxu1 %vm1975_vm8, %v11468_v45  ;;  %v13294_v45 = vld [vmem:[#allocation160_spill] sm:$0xff] }
0x1130   : > { %7767 = vmatmul.mubr.msk.bf16.vlgmr.msra.gmra.mrb[32].mxu1 %vm1975_vm8, %v5876_v21  ;;  %v13292_v21 = vld [vmem:[#allocation158_spill] sm:$0xff] }
0x1131   : > { %7769 = vmatpush3.bf16.xpose.msra.mxu1 %v11739_v59  ;;  %7784 = vmatprep.mubr.msk.bf16.mxu1 %vm1975_vm8, %v5936_v36  ;;  %v13293_v59 = vld [vmem:[#allocation159_spill] sm:$0xff] }
0x1132   : > { %8667 = vmatprep.subr.msk.bf16.mxu1 %vm1975_vm8, %v13289_v22 }
0x1139   : > { %7771 = vmatpush3.bf16.xpose.msra.mxu1 %v11729_v35 }
0x113a   : > { %8668 = vmatprep.subr.msk.bf16.mxu1 %vm1975_vm8, %v13290_v28  ;;  %v13295_v28 = vld [vmem:[#allocation37_spill] sm:$0xff] }
0x1141   : > { %7773 = vmatpush3.bf16.xpose.msra.mxu1 %v11751_v51  ;;  %v13296_v51 = vld [vmem:[#allocation9_spill] sm:$0xff] }
0x1142   : > { %8669 = vmatprep.subr.msk.bf16.mxu1 %vm1975_vm8, %v13291_v12  ;;  %v13297_v12 = vld [vmem:[#allocation141_spill] sm:$0xff] }
0x1149   : > { %7775 = vmatpush3.bf16.xpose.msra.mxu1 %v11760_v53  ;;  %v12042_v53 = vsel %vm1975_vm8, %v13297_v12, 0  ;;  %v13302_v12 = vld [vmem:[#allocation40_spill] sm:$0xff] }
0x114a   : > { %8670 = vmatprep.subr.msk.bf16.mxu1 %vm1975_vm8, %v13292_v21  ;;  %13298 = vst [vmem:[#allocation62_spill] sm:$0xff] %v12042_v53  ;;  %v13309_v21 = vld [vmem:[#allocation34_spill] sm:$0xff] }
0x1151   : > { %7777 = vmatpush3.bf16.xpose.msra.mxu1 %v11769_v56  ;;  %v13299_v56 = vld [vmem:[#allocation16_spill] sm:$0xff] }
0x1152   : > { %8671 = vmatprep.subr.msk.bf16.mxu1 %vm1975_vm8, %v13293_v59  ;;  %v13308_v59 = vld [vmem:[#allocation43_spill] sm:$0xff] }
0x1159   : > { %7779 = vmatpush3.bf16.xpose.msra.mxu1 %v11778_v48  ;;  %v13300_v48 = vld [vmem:[#allocation38_spill] sm:$0xff] }
0x115a   : > { %8672 = vmatprep.subr.msk.bf16.mxu1 %vm1975_vm8, %v13294_v45  ;;  %v13303_v45 = vld [vmem:[#allocation22_spill] sm:$0xff] }
0x1161   : > { %7781 = vmatpush3.bf16.xpose.msra.mxu1 %v13295_v28  ;;  %v8827_v28 = vld [vmem:[%s12322_s5 + $0x30] sm:$0xff]  }
0x1162   : > { %8673 = vmatprep.subr.msk.bf16.mxu1 %vm1975_vm8, %v13296_v51  ;;  %v13301_v51 = vld [vmem:[#allocation18_spill] sm:$0xff] }
0x1169   : > { %7783 = vmatpush3.bf16.xpose.msra.mxu1 %v12042_v53  ;;  %v13304_v53 = vld [vmem:[#allocation41_spill] sm:$0xff] }
0x116a   : > { %8674 = vmatprep.subr.msk.bf16.mxu1 %vm373_vm4, %v13299_v56  ;;  %v13305_v56 = vld [vmem:[#allocation26_spill] sm:$0xff] }
0x1170   : > { %7785 = vmatmul.mubr.msk.bf16.vlgmr.msra.gmra.mrb[32].mxu1 %vm1975_vm8, %v5936_v36  ;;  %v13307_v36 = vld [vmem:[#allocation30_spill] sm:$0xff] }
0x1171   : > { %7787 = vmatpush3.bf16.xpose.msra.mxu1 %v13300_v48  ;;  %7802 = vmatprep.mubr.msk.bf16.mxu1 %vm373_vm4, %v8827_v28  ;;  %v13306_v48 = vld [vmem:[#allocation42_spill] sm:$0xff] }
0x1172   : > { %8675 = vmatprep.subr.msk.bf16.mxu1 %vm373_vm4, %v13301_v51  ;;  %v13310_v51 = vld [vmem:[#allocation45_spill] sm:$0xff] }
0x1179   : > { %7789 = vmatpush3.bf16.xpose.msra.mxu1 %v13302_v12  ;;  %v13311_v12 = vld [vmem:[#allocation44_spill] sm:$0xff] }
0x117a   : > { %8676 = vmatprep.subr.msk.bf16.mxu1 %vm373_vm4, %v13303_v45  ;;  %v13312_v45 = vld [vmem:[#allocation54_spill] sm:$0xff] }
0x1181   : > { %7791 = vmatpush3.bf16.xpose.msra.mxu1 %v13304_v53  ;;  %v13313_v53 = vld [vmem:[#allocation21_spill] sm:$0xff] }
0x1182   : > { %8677 = vmatprep.subr.msk.bf16.mxu1 %vm373_vm4, %v13305_v56  ;;  %v13314_v56 = vld [vmem:[#allocation93_spill] sm:$0xff] }
0x1189   : > { %7793 = vmatpush3.bf16.xpose.msra.mxu1 %v13306_v48  ;;  %v6049_v48 = vpop.permute.xlu0 %6048 }
0x118a   : > { %8678 = vmatprep.subr.msk.bf16.mxu1 %vm373_vm4, %v13307_v36  ;;  %v13316_v36 = vld [vmem:[#allocation96_spill] sm:$0xff] }
0x1191   : > { %7795 = vmatpush3.bf16.xpose.msra.mxu1 %v13308_v59  ;;  %v13315_v59 = vld [vmem:[#allocation86_spill] sm:$0xff] }
0x1192   : > { %8679 = vmatprep.subr.msk.bf16.mxu1 %vm373_vm4, %v13309_v21 }
0x1199   : > { %7797 = vmatpush3.bf16.xpose.msra.mxu1 %v13310_v51  ;;  %v13317_v51 = vld [vmem:[#allocation98_spill] sm:$0xff] }
0x119a   : > { %8680 = vmatprep.subr.msk.bf16.mxu1 %vm373_vm4, %v13311_v12  ;;  %v13318_v12 = vld [vmem:[#allocation100_spill] sm:$0xff] }
0x11a1   : > { %7799 = vmatpush3.bf16.xpose.msra.mxu1 %v13312_v45  ;;  %v13320_v45 = vld [vmem:[#allocation104_spill] sm:$0xff] }
0x11a2   : > { %8681 = vmatprep.subr.msk.bf16.mxu1 %vm373_vm4, %v13309_v21  ;;  %v13319_v21 = vld [vmem:[#allocation102_spill] sm:$0xff] }
0x11a9   : > { %7801 = vmatpush3.bf16.xpose.msra.mxu1 %v13313_v53  ;;  %v13321_v53 = vld [vmem:[#allocation106_spill] sm:$0xff] }
0x11aa   : > { %8682 = vmatprep.subr.msk.bf16.mxu1 %vm1975_vm8, %v13314_v56  ;;  %v13323_v56 = vld [vmem:[#allocation112_spill] sm:$0xff] }
0x11b0   : > { %7803 = vmatmul.mubr.msk.bf16.vlgmr.msra.gmra.mrb[32].mxu1 %vm373_vm4, %v8827_v28  ;;  %v13322_v28 = vld [vmem:[#allocation110_spill] sm:$0xff] }
0x11b1   : > { %7805 = vmatpush3.bf16.xpose.msra.mxu1 %v13315_v59  ;;  %7820 = vmatprep.mubr.msk.bf16.mxu1 %vm1975_vm8, %v6049_v48  ;;  %v13324_v59 = vld [vmem:[#allocation114_spill] sm:$0xff] }
0x11b2   : > { %8683 = vmatprep.subr.msk.bf16.mxu1 %vm1975_vm8, %v13316_v36  ;;  %v13325_v36 = vld [vmem:[#allocation116_spill] sm:$0xff] }
0x11b9   : > { %7807 = vmatpush3.bf16.xpose.msra.mxu1 %v13317_v51  ;;  %v13326_v51 = vld [vmem:[#allocation64_spill] sm:$0xff] }
0x11ba   : > { %8684 = vmatprep.subr.msk.bf16.mxu1 %vm1975_vm8, %v13318_v12  ;;  %v13327_v12 = vld [vmem:[#allocation59_spill] sm:$0xff] }
0x11c1   : > { %7809 = vmatpush3.bf16.xpose.msra.mxu1 %v13319_v21  ;;  %v13373_v21 = vld [vmem:[#allocation159_spill] sm:$0xff] }
0x11c2   : > { %8685 = vmatprep.subr.msk.bf16.mxu1 %vm1975_vm8, %v13320_v45  ;;  %v13375_v45 = vld [vmem:[#allocation160_spill] sm:$0xff] }
0x11c9   : > { %7811 = vmatpush3.bf16.xpose.msra.mxu1 %v13321_v53  ;;  %v13376_v53 = vld [vmem:[#allocation37_spill] sm:$0xff] }
0x11ca   : > { %8686 = vmatprep.subr.msk.bf16.mxu1 %vm1975_vm8, %v13233_v18  ;;  %v6101_v18 = vpop.permute.xlu1 %6100 }
0x11d1   : > { %7813 = vmatpush3.bf16.xpose.msra.mxu1 %v13322_v28  ;;  %v13377_v28 = vld [vmem:[#allocation9_spill] sm:$0xff] }
0x11d2   : > { %8687 = vmatprep.subr.msk.bf16.mxu1 %vm1975_vm8, %v13323_v56 }
0x11d9   : > { %7815 = vmatpush3.bf16.xpose.msra.mxu1 %v13324_v59  ;;  %v13379_v59 = vld [vmem:[#allocation154_spill] sm:$0xff] }
0x11da   : > { %8688 = vmatprep.subr.msk.bf16.mxu1 %vm1975_vm8, %v13325_v36  ;;  %v5409_v36 = vsel %vm1975_vm8, %v13379_v59, 0 }
0x11e1   : > { %7817 = vmatpush3.bf16.xpose.msra.mxu1 %v13326_v51 }
0x11e2   : > { %8689 = vmatprep.subr.msk.bf16.mxu1 %vm1975_vm8, %v13323_v56  ;;  %v13378_v56 = vld [vmem:[#allocation62_spill] sm:$0xff] }
0x11e9   : > { %7819 = vmatpush3.bf16.xpose.msra.mxu1 %v13327_v12 }
0x11ea   : > { %8690 = vmatprep.subr.msk.bf16.mxu1 %vm1975_vm8, %v13241_v25  ;;  %v13357_v25 = vld [vmem:[#allocation95_spill] sm:$0xff] }
0x11f0   : > { %7821 = vmatmul.mubr.msk.bf16.vlgmr.msra.gmra.mrb[32].mxu1 %vm1975_vm8, %v6049_v48  ;;  %v13371_v48 = vld [vmem:[#allocation158_spill] sm:$0xff] }
0x11f1   : > { %7823 = vmatpush3.bf16.xpose.msra.mxu1 %v13242_v63  ;;  %7838 = vmatprep.mubr.msk.bf16.mxu1 %vm1975_vm8, %v6101_v18  ;;  %v13358_v63 = vld [vmem:[#allocation69_spill] sm:$0xff] }
0x11f2   : > { %8691 = vmatprep.subr.msk.bf16.mxu1 %vm1975_vm8, %v13243_v10  ;;  %v13359_v10 = vld [vmem:[#allocation99_spill] sm:$0xff] }
0x11f9   : > { %7825 = vmatpush3.bf16.xpose.msra.mxu1 %v13244_v44  ;;  %v13360_v44 = vld [vmem:[#allocation73_spill] sm:$0xff] }
0x11fa   : > { %8692 = vmatprep.subr.msk.bf16.mxu1 %vm1975_vm8, %v13245_v41  ;;  %v13361_v41 = vld [vmem:[#allocation103_spill] sm:$0xff] }
0x1201   : > { %7827 = vmatpush3.bf16.xpose.msra.mxu1 %v11311_v8  ;;  %v13328_v8 = vld [vmem:[#allocation140_spill] sm:$0xff] }
0x1202   : > { %8693 = vmatprep.subr.msk.bf16.mxu1 %vm1975_vm8, %v11385_v38  ;;  %v4725_v38 = vsel %vm1975_vm8, %v13328_v8, 0 }
0x1209   : > { %7829 = vmatpush3.bf16.xpose.msra.mxu1 %v11508_v23  ;;  %v13332_v23 = vld [vmem:[#allocation150_spill] sm:$0xff] }
0x120a   : > { %8694 = vmatprep.subr.msk.bf16.mxu1 %vm1975_vm8, %v11409_v40  ;;  %v8828_v40 = vld [vmem:[%s12322_s5 + $0x38] sm:$0xff]  }
0x1211   : > { %7831 = vmatpush3.bf16.xpose.msra.mxu1 %v11521_v0  ;;  %v13334_v0 = vld [vmem:[#allocation151_spill] sm:$0xff] }
0x1212   : > { %8695 = vmatprep.subr.msk.bf16.mxu1 %vm1975_vm8, %v11422_v57 }
0x1219   : > { %7833 = vmatpush3.bf16.xpose.msra.mxu1 %v11535_v54  ;;  %v13335_v54 = vld [vmem:[#allocation23_spill] sm:$0xff] }
0x121a   : > { %8696 = vmatprep.subr.msk.bf16.mxu1 %vm1975_vm8, %v11515_v24  ;;  %v13333_v24 = vld [vmem:[#allocation15_spill] sm:$0xff] }
0x1221   : > { %7835 = vmatpush3.bf16.xpose.msra.mxu1 %v11872_v52  ;;  %v13362_v52 = vld [vmem:[#allocation107_spill] sm:$0xff] }
0x1222   : > { %8697 = vmatprep.subr.msk.bf16.mxu1 %vm1975_vm8, %v11422_v57  ;;  %v13331_v57 = vld [vmem:[#allocation13_spill] sm:$0xff] }
0x1229   : > { %7837 = vmatpush3.bf16.xpose.msra.mxu1 %v4725_v38 }
0x122a   : > { %8698 = vmatprep.subr.msk.bf16.mxu1 %vm373_vm4, %v9338_v13  ;;  %v13329_v13 = vld [vmem:[#allocation55_spill] sm:$0xff] }
0x1230   : > { %7839 = vmatmul.mubr.msk.bf16.vlgmr.msra.gmra.mrb[32].mxu1 %vm1975_vm8, %v6101_v18 }
0x1231   : > { %7841 = vmatpush3.bf16.xpose.msra.mxu1 %v12771_v42  ;;  %7856 = vmatprep.mubr.msk.bf16.mxu1 %vm373_vm4, %v8828_v40  ;;  %v6211_v42 = vpop.permute.xlu0 %6210 }
0x1232   : > { %8699 = vmatprep.subr.msk.bf16.mxu1 %vm373_vm4, %v12772_v19  ;;  %v13330_v19 = vld [vmem:[#allocation68_spill] sm:$0xff] }
0x1239   : > { %7843 = vmatpush3.bf16.xpose.msra.mxu1 %v12773_v31  ;;  %v6263_v31 = vpop.permute.xlu1 %6262 }
0x123a   : > { %8700 = vmatprep.subr.msk.bf16.mxu1 %vm373_vm4, %v13097_v60  ;;  %v13336_v60 = vld [vmem:[#allocation152_spill] sm:$0xff] }
0x1241   : > { %7845 = vmatpush3.bf16.xpose.msra.mxu1 %v13098_v50  ;;  %v13337_v50 = vld [vmem:[#allocation25_spill] sm:$0xff] }
0x1242   : > { %8701 = vmatprep.subr.msk.bf16.mxu1 %vm373_vm4, %v13099_v37  ;;  %v13338_v37 = vld [vmem:[#allocation153_spill] sm:$0xff] }
0x1249   : > { %7847 = vmatpush3.bf16.xpose.msra.mxu1 %v13100_v3  ;;  %v13339_v3 = vld [vmem:[#allocation27_spill] sm:$0xff] }
0x124a   : > { %8702 = vmatprep.subr.msk.bf16.mxu1 %vm373_vm4, %v13101_v6  ;;  %v13340_v6 = vld [vmem:[#allocation161_spill] sm:$0xff] }
0x1251   : > { %7849 = vmatpush3.bf16.xpose.msra.mxu1 %v13102_v27  ;;  %v13341_v27 = vld [vmem:[#allocation87_spill] sm:$0xff] }
0x1252   : > { %8703 = vmatprep.subr.msk.bf16.mxu1 %vm373_vm4, %v13103_v5 }
0x1259   : > { %7851 = vmatpush3.bf16.xpose.msra.mxu1 %v13104_v1 }
0x125a   : > { %8704 = vmatprep.subr.msk.bf16.mxu1 %vm373_vm4, %v13247_v43  ;;  %v13363_v43 = vld [vmem:[#allocation82_spill] sm:$0xff] }
0x1261   : > { %7853 = vmatpush3.bf16.xpose.msra.mxu1 %v13248_v7  ;;  %v13364_v7 = vld [vmem:[#allocation81_spill] sm:$0xff] }
0x1262   : > { %8705 = vmatprep.subr.msk.bf16.mxu1 %vm373_vm4, %v13103_v5  ;;  %v13342_v5 = vld [vmem:[#allocation142_spill] sm:$0xff] }
0x1263   : > { %v5082_v1 = vsel %vm1975_vm8, %v13342_v5, 0 }
0x1269   : > { %7855 = vmatpush3.bf16.xpose.msra.mxu1 %v13329_v13 }
0x126a   : > { %8706 = vmatprep.subr.msk.bf16.mxu1 %vm1975_vm8, %v13109_v47  ;;  %v13344_v47 = vld [vmem:[#allocation48_spill] sm:$0xff] }
0x1270   : > { %7857 = vmatmul.mubr.msk.bf16.vlgmr.msra.gmra.mrb[32].mxu1 %vm373_vm4, %v8828_v40 }
0x1271   : > { %7859 = vmatpush3.bf16.xpose.msra.mxu1 %v13106_v30  ;;  %7874 = vmatprep.mubr.msk.bf16.mxu1 %vm1975_vm8, %v6211_v42  ;;  %v13343_v30 = vld [vmem:[#allocation17_spill] sm:$0xff] }
0x1272   : > { %8707 = vmatprep.subr.msk.bf16.mxu1 %vm1975_vm8, %v13110_v2  ;;  %v8829_v2 = vld [vmem:[%s12322_s5 + $0x40] sm:$0xff]  }
0x1279   : > { %7861 = vmatpush3.bf16.xpose.msra.mxu1 %v13111_v9  ;;  %v13345_v9 = vld [vmem:[#allocation20_spill] sm:$0xff] }
0x127a   : > { %8708 = vmatprep.subr.msk.bf16.mxu1 %vm1975_vm8, %v13112_v4  ;;  %v13346_v4 = vld [vmem:[#allocation50_spill] sm:$0xff] }
0x1281   : > { %7863 = vmatpush3.bf16.xpose.msra.mxu1 %v13113_v16  ;;  %v13347_v16 = vld [vmem:[#allocation24_spill] sm:$0xff] }
0x1282   : > { %8709 = vmatprep.subr.msk.bf16.mxu1 %vm1975_vm8, %v13114_v29  ;;  %v13348_v29 = vld [vmem:[#allocation51_spill] sm:$0xff] }
0x1289   : > { %7865 = vmatpush3.bf16.xpose.msra.mxu1 %v13115_v46  ;;  %v13349_v46 = vld [vmem:[#allocation28_spill] sm:$0xff] }
0x128a   : > { %8710 = vmatprep.subr.msk.bf16.mxu1 %vm1975_vm8, %v13116_v39  ;;  %v13350_v39 = vld [vmem:[#allocation52_spill] sm:$0xff] }
0x1291   : > { %7867 = vmatpush3.bf16.xpose.msra.mxu1 %v13117_v34  ;;  %v13351_v34 = vld [vmem:[#allocation53_spill] sm:$0xff] }
0x1292   : > { %8711 = vmatprep.subr.msk.bf16.mxu1 %vm1975_vm8, %v13118_v62 }
0x1299   : > { %7869 = vmatpush3.bf16.xpose.msra.mxu1 %v13119_v33  ;;  %v13353_v33 = vld [vmem:[#allocation7_spill] sm:$0xff] }
0x129a   : > { %8712 = vmatprep.subr.msk.bf16.mxu1 %vm1975_vm8, %v13249_v17  ;;  %v13365_v17 = vld [vmem:[#allocation60_spill] sm:$0xff] }
0x12a1   : > { %7871 = vmatpush3.bf16.xpose.msra.mxu1 %v13250_v15  ;;  %v13366_v15 = vld [vmem:[#allocation67_spill] sm:$0xff] }
0x12a2   : > { %8713 = vmatprep.subr.msk.bf16.mxu1 %vm1975_vm8, %v13118_v62  ;;  %v13352_v62 = vld [vmem:[#allocation36_spill] sm:$0xff] }
0x12a9   : > { %7873 = vmatpush3.bf16.xpose.msra.mxu1 %v13330_v19 }
0x12aa   : > { %8714 = vmatprep.subr.msk.bf16.mxu1 %vm1975_vm8, %v13128_v26  ;;  %v13355_v26 = vld [vmem:[#allocation19_spill] sm:$0xff] }
0x12b0   : > { %7875 = vmatmul.mubr.msk.bf16.vlgmr.msra.gmra.mrb[32].mxu1 %vm1975_vm8, %v6211_v42 }
0x12b1   : > { %7877 = vmatpush3.bf16.xpose.msra.mxu1 %v11606_v11  ;;  %7892 = vmatprep.mubr.msk.bf16.mxu1 %vm1975_vm8, %v6263_v31  ;;  %v13354_v11 = vld [vmem:[#allocation47_spill] sm:$0xff] }
0x12b2   : > { %8715 = vmatprep.subr.msk.bf16.mxu1 %vm1975_vm8, %v13129_v20  ;;  %v13356_v20 = vld [vmem:[#allocation56_spill] sm:$0xff] }
0x12b9   : > { %7879 = vmatpush3.bf16.xpose.msra.mxu1 %v13331_v57 }
0x12ba   : > { %8716 = vmatprep.subr.msk.bf16.mxu1 %vm1975_vm8, %v13332_v23 }
0x12c1   : > { %7881 = vmatpush3.bf16.xpose.msra.mxu1 %v13333_v24 }
0x12c2   : > { %8717 = vmatprep.subr.msk.bf16.mxu1 %vm1975_vm8, %v13334_v0 }
0x12c9   : > { %7883 = vmatpush3.bf16.xpose.msra.mxu1 %v13335_v54 }
0x12ca   : > { %8718 = vmatprep.subr.msk.bf16.mxu1 %vm1975_vm8, %v13336_v60 }
0x12d1   : > { %7885 = vmatpush3.bf16.xpose.msra.mxu1 %v13337_v50  ;;  %v13380_v50 = vld [vmem:[#allocation72_spill] sm:$0xff] }
0x12d2   : > { %8719 = vmatprep.subr.msk.bf16.mxu1 %vm1975_vm8, %v13338_v37 }
0x12d9   : > { %7887 = vmatpush3.bf16.xpose.msra.mxu1 %v13339_v3 }
0x12da   : > { %8720 = vmatprep.subr.msk.bf16.mxu1 %vm1975_vm8, %v13340_v6  ;;  %v13381_v6 = vld [vmem:[#allocation71_spill] sm:$0xff] }
0x12e1   : > { %7889 = vmatpush3.bf16.xpose.msra.mxu1 %v13341_v27 }
0x12e2   : > { %8721 = vmatprep.subr.msk.bf16.mxu1 %vm1975_vm8, %v13338_v37 }
0x12e9   : > { %7891 = vmatpush3.bf16.xpose.msra.mxu1 %v5082_v1 }
0x12ea   : > { %8722 = vmatprep.subr.msk.bf16.mxu1 %vm373_vm4, %v13343_v30 }
0x12f0   : > { %7893 = vmatmul.mubr.msk.bf16.vlgmr.msra.gmra.mrb[32].mxu1 %vm1975_vm8, %v6263_v31 }
0x12f1   : > { %7895 = vmatpush3.bf16.xpose.msra.mxu1 %v13344_v47  ;;  %7910 = vmatprep.mubr.msk.bf16.mxu1 %vm373_vm4, %v8829_v2 }
0x12f2   : > { %8723 = vmatprep.subr.msk.bf16.mxu1 %vm373_vm4, %v13345_v9 }
0x12f9   : > { %7897 = vmatpush3.bf16.xpose.msra.mxu1 %v13346_v4 }
0x12fa   : > { %8724 = vmatprep.subr.msk.bf16.mxu1 %vm373_vm4, %v13347_v16 }
0x1301   : > { %7899 = vmatpush3.bf16.xpose.msra.mxu1 %v13348_v29 }
0x1302   : > { %8725 = vmatprep.subr.msk.bf16.mxu1 %vm373_vm4, %v13349_v46 }
0x1309   : > { %7901 = vmatpush3.bf16.xpose.msra.mxu1 %v13350_v39 }
0x130a   : > { %8726 = vmatprep.subr.msk.bf16.mxu1 %vm373_vm4, %v13268_v49  ;;  %v6373_v49 = vpop.permute.xlu0 %6372 }
0x130e   : > { %v6481_v51 = vpop.permute.xlu0 %6480 }
0x1311   : > { %7903 = vmatpush3.bf16.xpose.msra.mxu1 %v13351_v34 }
0x1312   : > { %8727 = vmatprep.subr.msk.bf16.mxu1 %vm373_vm4, %v13352_v62 }
0x1319   : > { %7905 = vmatpush3.bf16.xpose.msra.mxu1 %v13353_v33 }
0x131a   : > { %8728 = vmatprep.subr.msk.bf16.mxu1 %vm373_vm4, %v13354_v11 }
0x1321   : > { %7907 = vmatpush3.bf16.xpose.msra.mxu1 %v13355_v26 }
0x1322   : > { %8729 = vmatprep.subr.msk.bf16.mxu1 %vm373_vm4, %v13352_v62 }
0x1329   : > { %7909 = vmatpush3.bf16.xpose.msra.mxu1 %v13356_v20 }
0x132a   : > { %8730 = vmatprep.subr.msk.bf16.mxu1 %vm1975_vm8, %v13357_v25 }
0x1330   : > { %7911 = vmatmul.mubr.msk.bf16.vlgmr.msra.gmra.mrb[32].mxu1 %vm373_vm4, %v8829_v2 }
0x1331   : > { %7913 = vmatpush3.bf16.xpose.msra.mxu1 %v13358_v63  ;;  %7928 = vmatprep.mubr.msk.bf16.mxu1 %vm1975_vm8, %v6373_v49 }
0x1332   : > { %8731 = vmatprep.subr.msk.bf16.mxu1 %vm1975_vm8, %v13359_v10 }
0x1339   : > { %7915 = vmatpush3.bf16.xpose.msra.mxu1 %v13360_v44 }
0x133a   : > { %8732 = vmatprep.subr.msk.bf16.mxu1 %vm1975_vm8, %v13361_v41 }
0x1341   : > { %7917 = vmatpush3.bf16.xpose.msra.mxu1 %v13281_v14  ;;  %v13367_v14 = vld [vmem:[#allocation156_spill] sm:$0xff] }
0x1342   : > { %8733 = vmatprep.subr.msk.bf16.mxu1 %vm1975_vm8, %v13362_v52 }
0x1349   : > { %7919 = vmatpush3.bf16.xpose.msra.mxu1 %v13283_v58  ;;  %v13369_v58 = vld [vmem:[#allocation157_spill] sm:$0xff] }
0x134a   : > { %8734 = vmatprep.subr.msk.bf16.mxu1 %vm1975_vm8, %v13176_v61  ;;  %v6425_v61 = vpop.permute.xlu1 %6424 }
0x134e   : > { %v6486_v38 = vpop.permute.xlu1 %6485 }
0x1351   : > { %7921 = vmatpush3.bf16.xpose.msra.mxu1 %v13363_v43 }
0x1352   : > { %8735 = vmatprep.subr.msk.bf16.mxu1 %vm1975_vm8, %v13285_v55 }
0x1359   : > { %7923 = vmatpush3.bf16.xpose.msra.mxu1 %v13364_v7 }
0x135a   : > { %8736 = vmatprep.subr.msk.bf16.mxu1 %vm1975_vm8, %v13287_v32  ;;  %v13368_v32 = vld [vmem:[#allocation29_spill] sm:$0xff] }
0x1361   : > { %7925 = vmatpush3.bf16.xpose.msra.mxu1 %v13365_v17 }
0x1362   : > { %8737 = vmatprep.subr.msk.bf16.mxu1 %vm1975_vm8, %v13285_v55  ;;  %v13370_v55 = vld [vmem:[#allocation31_spill] sm:$0xff] }
0x1369   : > { %7927 = vmatpush3.bf16.xpose.msra.mxu1 %v13366_v15 }
0x136a   : > { %8738 = vmatprep.subr.msk.bf16.mxu1 %vm1975_vm8, %v13289_v22  ;;  %v13372_v22 = vld [vmem:[#allocation33_spill] sm:$0xff] }
0x1370   : > { %7929 = vmatmul.mubr.msk.bf16.vlgmr.msra.gmra.mrb[32].mxu1 %vm1975_vm8, %v6373_v49 }
0x1371   : > { %7931 = vmatpush3.bf16.xpose.msra.mxu1 %v11729_v35  ;;  %7946 = vmatprep.mubr.msk.bf16.mxu1 %vm1975_vm8, %v6425_v61  ;;  %v13374_v35 = vld [vmem:[#allocation35_spill] sm:$0xff] }
0x1372   : > { %8739 = vmatprep.subr.msk.bf16.mxu1 %vm1975_vm8, %v13367_v14 }
0x1379   : > { %7933 = vmatpush3.bf16.xpose.msra.mxu1 %v13368_v32 }
0x137a   : > { %8740 = vmatprep.subr.msk.bf16.mxu1 %vm1975_vm8, %v13369_v58 }
0x1381   : > { %7935 = vmatpush3.bf16.xpose.msra.mxu1 %v13370_v55 }
0x1382   : > { %8741 = vmatprep.subr.msk.bf16.mxu1 %vm1975_vm8, %v13371_v48 }
0x1389   : > { %7937 = vmatpush3.bf16.xpose.msra.mxu1 %v13372_v22 }
0x138a   : > { %8742 = vmatprep.subr.msk.bf16.mxu1 %vm1975_vm8, %v13373_v21 }
0x1391   : > { %7939 = vmatpush3.bf16.xpose.msra.mxu1 %v13374_v35 }
0x1392   : > { %8743 = vmatprep.subr.msk.bf16.mxu1 %vm1975_vm8, %v13375_v45 }
0x1399   : > { %7941 = vmatpush3.bf16.xpose.msra.mxu1 %v13376_v53 }
0x139a   : > { %8744 = vmatprep.subr.msk.bf16.mxu1 %vm1975_vm8, %v13377_v28 }
0x13a1   : > { %7943 = vmatpush3.bf16.xpose.msra.mxu1 %v13378_v56 }
0x13a2   : > { %8745 = vmatprep.subr.msk.bf16.mxu1 %vm1975_vm8, %v13375_v45 }
0x13a9   : > { %7945 = vmatpush3.bf16.xpose.msra.mxu1 %v5409_v36 }
0x13b0   : > { %7947 = vmatmul.mubr.msk.bf16.vlgmr.msra.gmra.mrb[32].mxu1 %vm1975_vm8, %v6425_v61 }
0x1483   : > { %v6463_v12 = vpop.f32.mrb[32].mxu1 }
0x1484   : > { %v6488_v18 = vadd.f32 %v6481_v51, %v6463_v12  ;;  %v6465_v8 = vpop.f32.mrb[33].mxu1 }
0x1485   : > { %v6489_v40 = vadd.f32 %v6481_v51, %v6465_v8  ;;  %v6467_v13 = vpop.f32.mrb[34].mxu1 }
0x1486   : > { %v6492_v42 = vmax.f32 %v6488_v18, 0.0  ;;  %v6490_v19 = vadd.f32 %v6486_v38, %v6467_v13  ;;  %v6469_v31 = vpop.f32.mrb[35].mxu1 }
0x1487   : > { %v6493_v57 = vmax.f32 %v6489_v40, 0.0  ;;  %v6491_v23 = vadd.f32 %v6486_v38, %v6469_v31 }
0x1488   : > { %v6532_v24 = vrot.slane %v6492_v42, 4  ;;  %v6494_v0 = vmax.f32 %v6490_v19, 0.0 }
0x1489   : > { %v6533_v54 = vrot.slane %v6493_v57, 4  ;;  %v6495_v60 = vmax.f32 %v6491_v23, 0.0 }
0x148a   : > { %v6548_v37 = vsel %vm470_vm1, %v13380_v50, %v6532_v24  ;;  %v6534_v3 = vrot.slane %v6494_v0, 4 }
0x148b   : > { %6558 = vst [vmem:[%s9823_s8 + $0x40] sm:$0xff] %v6548_v37  ;;  %v6549_v27 = vsel %vm470_vm1, %v13381_v6, %v6533_v54  ;;  %v6536_v5 = vrot.slane %v6495_v60, 4 }
0x148c   : > { %6559 = vst [vmem:[%s9823_s8 + $0x48] sm:$0xff] %v6549_v27  ;;  %v6535_v1 = vsel %vm470_vm1, %v6532_v24, %v6534_v3  ;;  %6562 = vst [vmem:[%s9823_s8 + $0x60] sm:$0xf] %v6534_v3 }
0x148d   : > { %6560 = vst [vmem:[%s9823_s8 + $0x50] sm:$0xff] %v6535_v1  ;;  %v6537_v30 = vsel %vm470_vm1, %v6533_v54, %v6536_v5  ;;  %6563 = vst [vmem:[%s9823_s8 + $0x68] sm:$0xf] %v6536_v5 }
0x148e   : > { %6561 = vst [vmem:[%s9823_s8 + $0x58] sm:$0xff] %v6537_v30 }
0x148f PF: > { %p17_p8 = scmp.ge.s32.totalorder %s8964_s29, 4   ;;  %s13382_s24 = smov %s8886_s25 }
0x1490   : > { %s13383_s25 = smov %s8890_s26  ;;  %s13384_s26 = smov %s8974_s9 }
0x1491   : > { %s13385_s27 = smov %s8964_s29  ;;  %19 = sbr.rel (!%p17_p8) target bundleno = 3 (0x3), region = 112 }
0x1498   :  { %6585 = vsyncpa [#allocation3], 1 }
0x1499   :  { %6587 = vsyncpa [#allocation3 + $0x1], 1 }

</bundles_post_ra>
